<compile_context>
chip_gen: v7x
topology: tpu7x:2x2x1
jax: 0.10.0
libtpu: 0.0.40
codegen_flags: <defaults>
</compile_context>

<pallas_src>
import functools

import jax
import jax.numpy as jnp
from jax import lax
from jax.experimental import pallas as pl
from jax.experimental.pallas import tpu as pltpu


# ----------------------------------------------------------------------------
# Tiling helpers
# ----------------------------------------------------------------------------
def _largest_divisor_at_most(n, cap):
    cap = max(1, min(n, cap))
    for d in range(cap, 0, -1):
        if n % d == 0:
            return d
    return n


def _pick_strip_rows(H, W, cin, cout, budget_bytes=3 * 1024 * 1024):
    """Image rows per strip so in+out blocks stay around `budget_bytes`."""
    if W % 8 != 0:
        return H  # fall back to a single whole-image strip
    cap = budget_bytes // max(1, W * (cin + cout) * 4)
    return _largest_divisor_at_most(H, max(8, cap))


# ----------------------------------------------------------------------------
# 3x3 "same" convolution (+ optional fused ReLU), row-strip tiled.
# One grid step = one (batch, row-strip).  The strip (+1-row halo) is assembled
# once into a flat VMEM scratch; each tap is a pl.ds window of TH*W rows and
# the 9 taps are accumulated as (TH*W, Cin) x (Cin, Cout) MXU matmuls.
# ----------------------------------------------------------------------------
def _conv3x3_kernel(x_ref, halo_ref, w_ref, b_ref, o_ref, xa_ref, *, TH, W, relu):
    """
    x_ref    : (1, TH*W, Cin)       strip rows, flattened row-major
    halo_ref : (1, 1, 2*W, Cin)     [row above strip | row below strip] (zeros at edges)
    w_ref    : (9, Cin, Cout)       taps, index dy*3+dx
    b_ref    : (1, Cout)
    o_ref    : (1, TH*W, Cout)
    xa_ref   : ((TH+2)*W + 16, Cin) scratch: 8 pad rows | top halo | strip | bottom halo | 8 pad rows
    """
    Cout = w_ref.shape[-1]
    M = TH * W

    # Assemble the haloed strip once (one aligned copy, not 9 relayouts).
    xa_ref[pl.ds(8, W), :] = halo_ref[0, 0, :W, :]
    xa_ref[pl.ds(8 + W, M), :] = x_ref[0]
    xa_ref[pl.ds(8 + (TH + 1) * W, W), :] = halo_ref[0, 0, W:, :]

    col = lax.broadcasted_iota(jnp.int32, (M, 1), 0) % W
    not_left = col != 0            # valid rows for the dx == -1 taps
    not_right = col != (W - 1)     # valid rows for the dx == +1 taps

    acc = jnp.zeros((M, Cout), jnp.float32)
    for dy in range(3):
        for dx in range(3):
            start = 8 + dy * W + dx - 1          # static offset into xa_ref
            t = xa_ref[pl.ds(start, M), :]
            if dx == 0:
                t = jnp.where(not_left, t, 0.0)   # select: also kills pad garbage
            elif dx == 2:
                t = jnp.where(not_right, t, 0.0)
            acc = acc + jnp.dot(t, w_ref[dy * 3 + dx],
                                preferred_element_type=jnp.float32)
    acc = acc + b_ref[...]
    if relu:
        acc = jnp.maximum(acc, 0.0)
    o_ref[0] = acc


def conv3x3(x, w, b, relu=False):
    """x: (N,H,W,Cin) f32, w: (3,3,Cin,Cout), b: (Cout,) -> (N,H,W,Cout)."""
    N, H, W, Cin = x.shape
    Cout = w.shape[-1]
    TH = _pick_strip_rows(H, W, Cin, Cout)
    nS = H // TH

    xf = x.reshape(N, H * W, Cin)                      # free row-major flatten
    zeros = jnp.zeros((N, 1, W, Cin), x.dtype)
    top = jnp.concatenate([zeros, x[:, TH - 1:H - 1:TH]], axis=1)   # (N,nS,W,Cin)
    bot = jnp.concatenate([x[:, TH:H:TH], zeros], axis=1)           # (N,nS,W,Cin)
    halo = jnp.concatenate([top, bot], axis=2)                      # (N,nS,2W,Cin)

    w9 = w.reshape(9, Cin, Cout)
    b2 = b.reshape(1, Cout)
    kernel = functools.partial(_conv3x3_kernel, TH=TH, W=W, relu=relu)
    out = pl.pallas_call(
        kernel,
        out_shape=jax.ShapeDtypeStruct((N, H * W, Cout), jnp.float32),
        grid=(N, nS),
        in_specs=[
            pl.BlockSpec((1, TH * W, Cin), lambda n, i: (n, i, 0)),
            pl.BlockSpec((1, 1, 2 * W, Cin), lambda n, i: (n, i, 0, 0)),
            pl.BlockSpec((9, Cin, Cout), lambda n, i: (0, 0, 0)),
            pl.BlockSpec((1, Cout), lambda n, i: (0, 0)),
        ],
        out_specs=pl.BlockSpec((1, TH * W, Cout), lambda n, i: (n, i, 0)),
        scratch_shapes=[pltpu.VMEM(((TH + 2) * W + 16, Cin), jnp.float32)],
        compiler_params=pltpu.CompilerParams(
            dimension_semantics=("parallel", "parallel"),
            vmem_limit_bytes=48 * 1024 * 1024),
    )(xf, halo, w9, b2)
    return out.reshape(N, H, W, Cout)


# ----------------------------------------------------------------------------
# 2x2 / stride-2 max pooling, THo output rows per grid step.
# Vertical pooling is an elementwise max of adjacent rows; horizontal pooling
# uses two 0/1 selection matmuls (even / odd columns) + elementwise max, which
# avoids strided sublane accesses.
# ----------------------------------------------------------------------------
def _maxpool_kernel(x_ref, se_ref, so_ref, o_ref, *, THo):
    for j in range(THo):
        v = jnp.maximum(x_ref[0, 2 * j], x_ref[0, 2 * j + 1])        # (W, C)
        a = jnp.dot(se_ref[...], v, preferred_element_type=jnp.float32)
        c = jnp.dot(so_ref[...], v, preferred_element_type=jnp.float32)
        o_ref[0, j] = jnp.maximum(a, c)


def maxpool2x2(x):
    # NOTE: like the original, odd H/W would be truncated; shapes here are even.
    N, H, W, C = x.shape
    Ho, Wo = H // 2, W // 2
    cap = (2 * 1024 * 1024) // max(1, 2 * W * C * 4)
    THo = _largest_divisor_at_most(Ho, max(8, min(cap, 32)))
    idx = jnp.arange(Wo)
    sel_even = jnp.zeros((Wo, W), jnp.float32).at[idx, 2 * idx].set(1.0)
    sel_odd = jnp.zeros((Wo, W), jnp.float32).at[idx, 2 * idx + 1].set(1.0)
    kernel = functools.partial(_maxpool_kernel, THo=THo)
    return pl.pallas_call(
        kernel,
        out_shape=jax.ShapeDtypeStruct((N, Ho, Wo, C), jnp.float32),
        grid=(N, Ho // THo),
        in_specs=[
            pl.BlockSpec((1, 2 * THo, W, C), lambda n, i: (n, i, 0, 0)),
            pl.BlockSpec((Wo, W), lambda n, i: (0, 0)),
            pl.BlockSpec((Wo, W), lambda n, i: (0, 0)),
        ],
        out_specs=pl.BlockSpec((1, THo, Wo, C), lambda n, i: (n, i, 0, 0)),
        compiler_params=pltpu.CompilerParams(
            dimension_semantics=("parallel", "parallel")),
    )(x, sel_even, sel_odd)


# ----------------------------------------------------------------------------
# Fused: L2-normalize over channels -> Linear(C, K, bias=False) -> /T -> softmax
# over K, row-strip tiled.
# ----------------------------------------------------------------------------
def _cls_softmax_kernel(x_ref, w_ref, o_ref, *, inv_temperature):
    x = x_ref[0]                                           # (TM, C)
    ss = jnp.sum(x * x, axis=-1, keepdims=True)
    xn = x * lax.rsqrt(jnp.maximum(ss, 1e-24))             # == x / max(||x||, 1e-12)
    logits = jnp.dot(xn, w_ref[...],
                     preferred_element_type=jnp.float32) * inv_temperature
    m = jnp.max(logits, axis=-1, keepdims=True)
    e = jnp.exp(logits - m)
    denom = jnp.sum(e, axis=-1, keepdims=True)
    o_ref[0] = e * pl.reciprocal(denom, approx=True)


def classify_softmax(x, w_t, temperature):
    """x: (N,H,W,C), w_t: (C,K) (transpose of nn.Linear weight) -> (N,H,W,K)."""
    N, H, W, C = x.shape
    K = w_t.shape[-1]
    TH = _pick_strip_rows(H, W, C, K, budget_bytes=4 * 1024 * 1024)
    TM = TH * W
    xf = x.reshape(N, H * W, C)
    kernel = functools.partial(_cls_softmax_kernel,
                               inv_temperature=1.0 / float(temperature))
    out = pl.pallas_call(
        kernel,
        out_shape=jax.ShapeDtypeStruct((N, H * W, K), jnp.float32),
        grid=(N, H // TH),
        in_specs=[
            pl.BlockSpec((1, TM, C), lambda n, i: (n, i, 0)),
            pl.BlockSpec((C, K), lambda n, i: (0, 0)),
        ],
        out_specs=pl.BlockSpec((1, TM, K), lambda n, i: (n, i, 0)),
        compiler_params=pltpu.CompilerParams(
            dimension_semantics=("parallel", "parallel"),
            vmem_limit_bytes=48 * 1024 * 1024),
    )(xf, w_t)
    return out.reshape(N, H, W, K)


# ----------------------------------------------------------------------------
# Parameter construction + SPE forward.
# ----------------------------------------------------------------------------
def _conv_param(key, cin, cout):
    kw, kb = jax.random.split(key)
    std = (2.0 / (9 * cin)) ** 0.5
    w = jax.random.normal(kw, (3, 3, cin, cout), jnp.float32) * std
    b = jax.random.normal(kb, (cout,), jnp.float32) * 0.01
    return w, b


class SPEPallas:
    def __init__(self, key, K=8, temperature=0.5, cnum=64):
        self.cnum = cnum
        self.K = K
        self.temperature = temperature
        keys = iter(jax.random.split(key, 32))
        c = cnum
        # VGG19 features[:4] / [4:9] / [9:18] conv stacks (pools handled separately).
        self.se256 = [_conv_param(next(keys), 3, c), _conv_param(next(keys), c, c)]
        self.se128 = [_conv_param(next(keys), c, 2 * c),
                      _conv_param(next(keys), 2 * c, 2 * c)]
        self.se64 = [_conv_param(next(keys), 2 * c, 4 * c)] + \
                    [_conv_param(next(keys), 4 * c, 4 * c) for _ in range(3)]
        # heads
        self.head1 = _conv_param(next(keys), c, 3)
        self.head2 = _conv_param(next(keys), 2 * c, 3)
        self.head3 = _conv_param(next(keys), 4 * c, 3)
        # nonlinear clusterers (Conv(2C->C), ReLU, Conv(C->C))
        self.clus256 = [_conv_param(next(keys), 2 * c, c), _conv_param(next(keys), c, c)]
        self.clus128 = [_conv_param(next(keys), 4 * c, 2 * c),
                        _conv_param(next(keys), 2 * c, 2 * c)]
        self.clus64 = [_conv_param(next(keys), 8 * c, 4 * c),
                       _conv_param(next(keys), 4 * c, 4 * c)]
        # classifiers: nn.Linear(C, K, bias=False) weight is (K, C); store W.T
        self.cls256 = jax.random.normal(next(keys), (c, K), jnp.float32) * 0.1
        self.cls128 = jax.random.normal(next(keys), (2 * c, K), jnp.float32) * 0.1
        self.cls64 = jax.random.normal(next(keys), (4 * c, K), jnp.float32) * 0.1

    def forward(self, image_nchw):
        x = jnp.transpose(image_nchw, (0, 2, 3, 1)).astype(jnp.float32)  # -> NHWC

        # SE encoders (frozen VGG-style stacks).  In the original forward the
        # same frozen encoder is applied twice to the same input, so tf_* == sf_*.
        sf256 = x
        for w, b in self.se256:
            sf256 = conv3x3(sf256, w, b, relu=True)
        sf128 = maxpool2x2(sf256)
        for w, b in self.se128:
            sf128 = conv3x3(sf128, w, b, relu=True)
        sf64 = maxpool2x2(sf128)
        for w, b in self.se64:
            sf64 = conv3x3(sf64, w, b, relu=True)
        tf256, tf128, tf64 = sf256, sf128, sf64

        out1 = conv3x3(tf256, *self.head1, relu=False)
        out2 = conv3x3(tf128, *self.head2, relu=False)
        out3 = conv3x3(tf64, *self.head3, relu=False)

        # Returned concat features (cheap wrapper concat; tf == sf).
        f256 = jnp.concatenate([sf256, tf256], axis=-1)
        f128 = jnp.concatenate([sf128, tf128], axis=-1)
        f64 = jnp.concatenate([sf64, tf64], axis=-1)

        # Clusterer first conv: fold the (sf | tf) channel concat by summing
        # the two weight halves -- conv(cat(sf, sf), w) == conv(sf, w_lo + w_hi).
        def clusterer(feat, params):
            (w0, b0), (w1, b1) = params
            C = feat.shape[-1]
            w0f = w0[:, :, :C, :] + w0[:, :, C:, :]
            h = conv3x3(feat, w0f, b0, relu=True)
            return conv3x3(h, w1, b1, relu=False)

        s256 = clusterer(sf256, self.clus256)
        s128 = clusterer(sf128, self.clus128)
        s64 = clusterer(sf64, self.clus64)

        label256 = classify_softmax(s256, self.cls256, self.temperature)
        label128 = classify_softmax(s128, self.cls128, self.temperature)
        label64 = classify_softmax(s64, self.cls64, self.temperature)

        to_nchw = lambda t: jnp.transpose(t, (0, 3, 1, 2))
        return ([to_nchw(f64), to_nchw(f128), to_nchw(f256)],
                [to_nchw(s64), to_nchw(s128), to_nchw(s256)],
                [to_nchw(label64), to_nchw(label128), to_nchw(label256)],
                [to_nchw(out1), to_nchw(out2), to_nchw(out3)])


if __name__ == "__main__":
    key = jax.random.PRNGKey(0)
    k_params, k_img = jax.random.split(key)
    model = SPEPallas(k_params, K=8, temperature=0.5, cnum=64)
    # small spatial size (32) instead of 256; batch=2, NCHW like PyTorch.
    image256 = jax.random.normal(k_img, (2, 3, 32, 32), jnp.float32)
    outs = model.forward(image256)
    jax.block_until_ready(outs)
    print("KERNEL_OK")
</pallas_src>

<mosaic_0001>
module attributes {stable_mosaic.version = 11 : i64} {
  func.func @_conv3x3_kernel(%arg0: i32, %arg1: i32, %arg2: memref<1x1024x3xf32, #tpu.memory_space<vmem>>, %arg3: memref<1x1x64x3xf32, #tpu.memory_space<vmem>>, %arg4: memref<9x3x64xf32, #tpu.memory_space<vmem>>, %arg5: memref<1x64xf32, #tpu.memory_space<vmem>>, %arg6: memref<1x1024x64xf32, #tpu.memory_space<vmem>>, %arg7: memref<1104x3xf32, #tpu.memory_space<vmem>>) attributes {dimension_semantics = [#tpu.dimension_semantics<parallel>, #tpu.dimension_semantics<parallel>], iteration_bounds = array<i64: 2, 1>, scalar_prefetch = 0 : i64, scratch_operands = 1 : i64, tpu.core_type = #tpu.core_type<tc>, window_params = [{transform_indices = @transform_0, window_bounds = array<i64: 1, 1024, 3>}, {transform_indices = @transform_1, window_bounds = array<i64: 1, 1, 64, 3>}, {pipeline_mode = #tpu.pipeline_mode<synchronous>, transform_indices = @transform_2, window_bounds = array<i64: 9, 3, 64>}, {pipeline_mode = #tpu.pipeline_mode<synchronous>, transform_indices = @transform_3, window_bounds = array<i64: 1, 64>}, {transform_indices = @transform_4, window_bounds = array<i64: 1, 1024, 64>}]} {
    %c0 = arith.constant 0 : index
    %c0_0 = arith.constant 0 : index
    %c0_1 = arith.constant 0 : index
    %c0_2 = arith.constant 0 : index
    %0 = vector.load %arg3[%c0, %c0_0, %c0_1, %c0_2] : memref<1x1x64x3xf32, #tpu.memory_space<vmem>>, vector<1x1x32x3xf32>
    %1 = vector.shape_cast %0 : vector<1x1x32x3xf32> to vector<32x3xf32>
    %c8 = arith.constant 8 : index
    %c0_3 = arith.constant 0 : index
    %2 = vector.load %arg7[%c8, %c0_3] : memref<1104x3xf32, #tpu.memory_space<vmem>>, vector<32x3xf32>
    tpu.vector_store %arg7[%c8, %c0_3], %1 {strides = array<i32>} : memref<1104x3xf32, #tpu.memory_space<vmem>>, vector<32x3xf32>,
    %c0_4 = arith.constant 0 : index
    %c0_5 = arith.constant 0 : index
    %c0_6 = arith.constant 0 : index
    %3 = vector.load %arg2[%c0_4, %c0_5, %c0_6] : memref<1x1024x3xf32, #tpu.memory_space<vmem>>, vector<1x1024x3xf32>
    %4 = vector.shape_cast %3 : vector<1x1024x3xf32> to vector<1024x3xf32>
    %c40 = arith.constant 40 : index
    %c0_7 = arith.constant 0 : index
    %5 = vector.load %arg7[%c40, %c0_7] : memref<1104x3xf32, #tpu.memory_space<vmem>>, vector<1024x3xf32>
    tpu.vector_store %arg7[%c40, %c0_7], %4 {strides = array<i32>} : memref<1104x3xf32, #tpu.memory_space<vmem>>, vector<1024x3xf32>,
    %c0_8 = arith.constant 0 : index
    %c0_9 = arith.constant 0 : index
    %c32 = arith.constant 32 : index
    %c0_10 = arith.constant 0 : index
    %6 = vector.load %arg3[%c0_8, %c0_9, %c32, %c0_10] : memref<1x1x64x3xf32, #tpu.memory_space<vmem>>, vector<1x1x32x3xf32>
    %7 = vector.shape_cast %6 : vector<1x1x32x3xf32> to vector<32x3xf32>
    %c1064 = arith.constant 1064 : index
    %c0_11 = arith.constant 0 : index
    %8 = vector.load %arg7[%c1064, %c0_11] : memref<1104x3xf32, #tpu.memory_space<vmem>>, vector<32x3xf32>
    tpu.vector_store %arg7[%c1064, %c0_11], %7 {strides = array<i32>} : memref<1104x3xf32, #tpu.memory_space<vmem>>, vector<32x3xf32>,
    %9 = tpu.iota {dimensions = array<i32: 0>} : vector<1024x1xi32>
    %c32_i32 = arith.constant 32 : i32
    %c0_i32 = arith.constant 0 : i32
    %10 = arith.cmpi eq, %c32_i32, %c0_i32 : i32
    %c1_i32 = arith.constant 1 : i32
    %11 = arith.select %10, %c1_i32, %c32_i32 : i32
    %12 = vector.broadcast %11 : i32 to vector<1024x1xi32>
    %13 = arith.remsi %9, %12 : vector<1024x1xi32>
    %c0_i32_12 = arith.constant 0 : i32
    %14 = vector.broadcast %c0_i32_12 : i32 to vector<1024x1xi32>
    %15 = arith.cmpi ne, %13, %14 : vector<1024x1xi32>
    %c0_i32_13 = arith.constant 0 : i32
    %16 = vector.broadcast %c0_i32_13 : i32 to vector<1024x1xi32>
    %17 = arith.cmpi slt, %13, %16 : vector<1024x1xi32>
    %c0_i32_14 = arith.constant 0 : i32
    %18 = arith.cmpi slt, %11, %c0_i32_14 : i32
    %19 = vector.broadcast %18 : i1 to vector<1024x1xi1>
    %20 = vector.broadcast %19 : vector<1024x1xi1> to vector<1024x1xi1>
    %21 = arith.xori %17, %20 : vector<1024x1xi1>
    %22 = arith.andi %21, %15 : vector<1024x1xi1>
    %23 = vector.broadcast %11 : i32 to vector<1024x1xi32>
    %24 = arith.addi %13, %23 : vector<1024x1xi32>
    %25 = arith.select %22, %24, %13 : vector<1024x1xi1>, vector<1024x1xi32>
    %c0_i32_15 = arith.constant 0 : i32
    %26 = vector.broadcast %c0_i32_15 : i32 to vector<1024x1xi32>
    %27 = arith.cmpi ne, %25, %26 : vector<1024x1xi32>
    %c31_i32 = arith.constant 31 : i32
    %28 = vector.broadcast %c31_i32 : i32 to vector<1024x1xi32>
    %29 = arith.cmpi ne, %25, %28 : vector<1024x1xi32>
    %cst = arith.constant 0.000000e+00 : f32
    %30 = vector.broadcast %cst : f32 to vector<1024x64xf32>
    %c7 = arith.constant 7 : index
    %c0_16 = arith.constant 0 : index
    %31 = vector.load %arg7[%c7, %c0_16] : memref<1104x3xf32, #tpu.memory_space<vmem>>, vector<1024x3xf32>
    %cst_17 = arith.constant 0.000000e+00 : f32
    %32 = vector.shape_cast %27 : vector<1024x1xi1> to vector<1024x1xi1>
    %33 = vector.broadcast %32 : vector<1024x1xi1> to vector<1024x3xi1>
    %34 = vector.broadcast %cst_17 : f32 to vector<1024x3xf32>
    %35 = arith.select %33, %31, %34 : vector<1024x3xi1>, vector<1024x3xf32>
    %c0_18 = arith.constant 0 : index
    %c0_19 = arith.constant 0 : index
    %c0_20 = arith.constant 0 : index
    %36 = vector.load %arg4[%c0_18, %c0_19, %c0_20] : memref<9x3x64xf32, #tpu.memory_space<vmem>>, vector<1x3x64xf32>
    %37 = vector.shape_cast %36 : vector<1x3x64xf32> to vector<3x64xf32>
    %cst_21 = arith.constant dense<0.000000e+00> : vector<1024x64xf32>
    %38 = tpu.matmul %35, %37, %cst_21 {dimension_numbers = #tpu.dot_dimension_numbers<[1], [0], [0], [1], [0, 0, 1, 1], [], []>} : vector<1024x3xf32>, vector<3x64xf32>, vector<1024x64xf32> -> vector<1024x64xf32>
    %39 = arith.addf %30, %38 : vector<1024x64xf32>
    %c8_22 = arith.constant 8 : index
    %c0_23 = arith.constant 0 : index
    %40 = vector.load %arg7[%c8_22, %c0_23] : memref<1104x3xf32, #tpu.memory_space<vmem>>, vector<1024x3xf32>
    %c1 = arith.constant 1 : index
    %c0_24 = arith.constant 0 : index
    %c0_25 = arith.constant 0 : index
    %41 = vector.load %arg4[%c1, %c0_24, %c0_25] : memref<9x3x64xf32, #tpu.memory_space<vmem>>, vector<1x3x64xf32>
    %42 = vector.shape_cast %41 : vector<1x3x64xf32> to vector<3x64xf32>
    %cst_26 = arith.constant dense<0.000000e+00> : vector<1024x64xf32>
    %43 = tpu.matmul %40, %42, %cst_26 {dimension_numbers = #tpu.dot_dimension_numbers<[1], [0], [0], [1], [0, 0, 1, 1], [], []>} : vector<1024x3xf32>, vector<3x64xf32>, vector<1024x64xf32> -> vector<1024x64xf32>
    %44 = arith.addf %39, %43 : vector<1024x64xf32>
    %c9 = arith.constant 9 : index
    %c0_27 = arith.constant 0 : index
    %45 = vector.load %arg7[%c9, %c0_27] : memref<1104x3xf32, #tpu.memory_space<vmem>>, vector<1024x3xf32>
    %cst_28 = arith.constant 0.000000e+00 : f32
    %46 = vector.shape_cast %29 : vector<1024x1xi1> to vector<1024x1xi1>
    %47 = vector.broadcast %46 : vector<1024x1xi1> to vector<1024x3xi1>
    %48 = vector.broadcast %cst_28 : f32 to vector<1024x3xf32>
    %49 = arith.select %47, %45, %48 : vector<1024x3xi1>, vector<1024x3xf32>
    %c2 = arith.constant 2 : index
    %c0_29 = arith.constant 0 : index
    %c0_30 = arith.constant 0 : index
    %50 = vector.load %arg4[%c2, %c0_29, %c0_30] : memref<9x3x64xf32, #tpu.memory_space<vmem>>, vector<1x3x64xf32>
    %51 = vector.shape_cast %50 : vector<1x3x64xf32> to vector<3x64xf32>
    %cst_31 = arith.constant dense<0.000000e+00> : vector<1024x64xf32>
    %52 = tpu.matmul %49, %51, %cst_31 {dimension_numbers = #tpu.dot_dimension_numbers<[1], [0], [0], [1], [0, 0, 1, 1], [], []>} : vector<1024x3xf32>, vector<3x64xf32>, vector<1024x64xf32> -> vector<1024x64xf32>
    %53 = arith.addf %44, %52 : vector<1024x64xf32>
    %c39 = arith.constant 39 : index
    %c0_32 = arith.constant 0 : index
    %54 = vector.load %arg7[%c39, %c0_32] : memref<1104x3xf32, #tpu.memory_space<vmem>>, vector<1024x3xf32>
    %cst_33 = arith.constant 0.000000e+00 : f32
    %55 = vector.shape_cast %27 : vector<1024x1xi1> to vector<1024x1xi1>
    %56 = vector.broadcast %55 : vector<1024x1xi1> to vector<1024x3xi1>
    %57 = vector.broadcast %cst_33 : f32 to vector<1024x3xf32>
    %58 = arith.select %56, %54, %57 : vector<1024x3xi1>, vector<1024x3xf32>
    %c3 = arith.constant 3 : index
    %c0_34 = arith.constant 0 : index
    %c0_35 = arith.constant 0 : index
    %59 = vector.load %arg4[%c3, %c0_34, %c0_35] : memref<9x3x64xf32, #tpu.memory_space<vmem>>, vector<1x3x64xf32>
    %60 = vector.shape_cast %59 : vector<1x3x64xf32> to vector<3x64xf32>
    %cst_36 = arith.constant dense<0.000000e+00> : vector<1024x64xf32>
    %61 = tpu.matmul %58, %60, %cst_36 {dimension_numbers = #tpu.dot_dimension_numbers<[1], [0], [0], [1], [0, 0, 1, 1], [], []>} : vector<1024x3xf32>, vector<3x64xf32>, vector<1024x64xf32> -> vector<1024x64xf32>
    %62 = arith.addf %53, %61 : vector<1024x64xf32>
    %c40_37 = arith.constant 40 : index
    %c0_38 = arith.constant 0 : index
    %63 = vector.load %arg7[%c40_37, %c0_38] : memref<1104x3xf32, #tpu.memory_space<vmem>>, vector<1024x3xf32>
    %c4 = arith.constant 4 : index
    %c0_39 = arith.constant 0 : index
    %c0_40 = arith.constant 0 : index
    %64 = vector.load %arg4[%c4, %c0_39, %c0_40] : memref<9x3x64xf32, #tpu.memory_space<vmem>>, vector<1x3x64xf32>
    %65 = vector.shape_cast %64 : vector<1x3x64xf32> to vector<3x64xf32>
    %cst_41 = arith.constant dense<0.000000e+00> : vector<1024x64xf32>
    %66 = tpu.matmul %63, %65, %cst_41 {dimension_numbers = #tpu.dot_dimension_numbers<[1], [0], [0], [1], [0, 0, 1, 1], [], []>} : vector<1024x3xf32>, vector<3x64xf32>, vector<1024x64xf32> -> vector<1024x64xf32>
    %67 = arith.addf %62, %66 : vector<1024x64xf32>
    %c41 = arith.constant 41 : index
    %c0_42 = arith.constant 0 : index
    %68 = vector.load %arg7[%c41, %c0_42] : memref<1104x3xf32, #tpu.memory_space<vmem>>, vector<1024x3xf32>
    %cst_43 = arith.constant 0.000000e+00 : f32
    %69 = vector.shape_cast %29 : vector<1024x1xi1> to vector<1024x1xi1>
    %70 = vector.broadcast %69 : vector<1024x1xi1> to vector<1024x3xi1>
    %71 = vector.broadcast %cst_43 : f32 to vector<1024x3xf32>
    %72 = arith.select %70, %68, %71 : vector<1024x3xi1>, vector<1024x3xf32>
    %c5 = arith.constant 5 : index
    %c0_44 = arith.constant 0 : index
    %c0_45 = arith.constant 0 : index
    %73 = vector.load %arg4[%c5, %c0_44, %c0_45] : memref<9x3x64xf32, #tpu.memory_space<vmem>>, vector<1x3x64xf32>
    %74 = vector.shape_cast %73 : vector<1x3x64xf32> to vector<3x64xf32>
    %cst_46 = arith.constant dense<0.000000e+00> : vector<1024x64xf32>
    %75 = tpu.matmul %72, %74, %cst_46 {dimension_numbers = #tpu.dot_dimension_numbers<[1], [0], [0], [1], [0, 0, 1, 1], [], []>} : vector<1024x3xf32>, vector<3x64xf32>, vector<1024x64xf32> -> vector<1024x64xf32>
    %76 = arith.addf %67, %75 : vector<1024x64xf32>
    %c71 = arith.constant 71 : index
    %c0_47 = arith.constant 0 : index
    %77 = vector.load %arg7[%c71, %c0_47] : memref<1104x3xf32, #tpu.memory_space<vmem>>, vector<1024x3xf32>
    %cst_48 = arith.constant 0.000000e+00 : f32
    %78 = vector.shape_cast %27 : vector<1024x1xi1> to vector<1024x1xi1>
    %79 = vector.broadcast %78 : vector<1024x1xi1> to vector<1024x3xi1>
    %80 = vector.broadcast %cst_48 : f32 to vector<1024x3xf32>
    %81 = arith.select %79, %77, %80 : vector<1024x3xi1>, vector<1024x3xf32>
    %c6 = arith.constant 6 : index
    %c0_49 = arith.constant 0 : index
    %c0_50 = arith.constant 0 : index
    %82 = vector.load %arg4[%c6, %c0_49, %c0_50] : memref<9x3x64xf32, #tpu.memory_space<vmem>>, vector<1x3x64xf32>
    %83 = vector.shape_cast %82 : vector<1x3x64xf32> to vector<3x64xf32>
    %cst_51 = arith.constant dense<0.000000e+00> : vector<1024x64xf32>
    %84 = tpu.matmul %81, %83, %cst_51 {dimension_numbers = #tpu.dot_dimension_numbers<[1], [0], [0], [1], [0, 0, 1, 1], [], []>} : vector<1024x3xf32>, vector<3x64xf32>, vector<1024x64xf32> -> vector<1024x64xf32>
    %85 = arith.addf %76, %84 : vector<1024x64xf32>
    %c72 = arith.constant 72 : index
    %c0_52 = arith.constant 0 : index
    %86 = vector.load %arg7[%c72, %c0_52] : memref<1104x3xf32, #tpu.memory_space<vmem>>, vector<1024x3xf32>
    %c7_53 = arith.constant 7 : index
    %c0_54 = arith.constant 0 : index
    %c0_55 = arith.constant 0 : index
    %87 = vector.load %arg4[%c7_53, %c0_54, %c0_55] : memref<9x3x64xf32, #tpu.memory_space<vmem>>, vector<1x3x64xf32>
    %88 = vector.shape_cast %87 : vector<1x3x64xf32> to vector<3x64xf32>
    %cst_56 = arith.constant dense<0.000000e+00> : vector<1024x64xf32>
    %89 = tpu.matmul %86, %88, %cst_56 {dimension_numbers = #tpu.dot_dimension_numbers<[1], [0], [0], [1], [0, 0, 1, 1], [], []>} : vector<1024x3xf32>, vector<3x64xf32>, vector<1024x64xf32> -> vector<1024x64xf32>
    %90 = arith.addf %85, %89 : vector<1024x64xf32>
    %c73 = arith.constant 73 : index
    %c0_57 = arith.constant 0 : index
    %91 = vector.load %arg7[%c73, %c0_57] : memref<1104x3xf32, #tpu.memory_space<vmem>>, vector<1024x3xf32>
    %cst_58 = arith.constant 0.000000e+00 : f32
    %92 = vector.shape_cast %29 : vector<1024x1xi1> to vector<1024x1xi1>
    %93 = vector.broadcast %92 : vector<1024x1xi1> to vector<1024x3xi1>
    %94 = vector.broadcast %cst_58 : f32 to vector<1024x3xf32>
    %95 = arith.select %93, %91, %94 : vector<1024x3xi1>, vector<1024x3xf32>
    %c8_59 = arith.constant 8 : index
    %c0_60 = arith.constant 0 : index
    %c0_61 = arith.constant 0 : index
    %96 = vector.load %arg4[%c8_59, %c0_60, %c0_61] : memref<9x3x64xf32, #tpu.memory_space<vmem>>, vector<1x3x64xf32>
    %97 = vector.shape_cast %96 : vector<1x3x64xf32> to vector<3x64xf32>
    %cst_62 = arith.constant dense<0.000000e+00> : vector<1024x64xf32>
    %98 = tpu.matmul %95, %97, %cst_62 {dimension_numbers = #tpu.dot_dimension_numbers<[1], [0], [0], [1], [0, 0, 1, 1], [], []>} : vector<1024x3xf32>, vector<3x64xf32>, vector<1024x64xf32> -> vector<1024x64xf32>
    %99 = arith.addf %90, %98 : vector<1024x64xf32>
    %c0_63 = arith.constant 0 : index
    %c0_64 = arith.constant 0 : index
    %100 = vector.load %arg5[%c0_63, %c0_64] : memref<1x64xf32, #tpu.memory_space<vmem>>, vector<1x64xf32>
    %101 = vector.broadcast %100 : vector<1x64xf32> to vector<1024x64xf32>
    %102 = arith.addf %99, %101 : vector<1024x64xf32>
    %cst_65 = arith.constant 0.000000e+00 : f32
    %103 = vector.broadcast %cst_65 : f32 to vector<1024x64xf32>
    %104 = arith.maximumf %102, %103 : vector<1024x64xf32>
    %c0_66 = arith.constant 0 : index
    %c0_67 = arith.constant 0 : index
    %c0_68 = arith.constant 0 : index
    %105 = vector.load %arg6[%c0_66, %c0_67, %c0_68] : memref<1x1024x64xf32, #tpu.memory_space<vmem>>, vector<1x1024x64xf32>
    %106 = vector.shape_cast %105 : vector<1x1024x64xf32> to vector<1024x64xf32>
    %107 = vector.shape_cast %104 : vector<1024x64xf32> to vector<1x1024x64xf32>
    tpu.vector_store %arg6[%c0_66, %c0_67, %c0_68], %107 {strides = array<i32>} : memref<1x1024x64xf32, #tpu.memory_space<vmem>>, vector<1x1024x64xf32>,
    return
  }
  func.func @transform_0(%arg0: i32, %arg1: i32) -> (i32, i32, i32) {
    %c0_i32 = arith.constant 0 : i32
    %c0_i32_0 = arith.constant 0 : i32
    return %arg0, %arg1, %c0_i32 : i32, i32, i32
  }
  func.func @transform_1(%arg0: i32, %arg1: i32) -> (i32, i32, i32, i32) {
    %c0_i32 = arith.constant 0 : i32
    %c0_i32_0 = arith.constant 0 : i32
    %c0_i32_1 = arith.constant 0 : i32
    return %arg0, %arg1, %c0_i32, %c0_i32_0 : i32, i32, i32, i32
  }
  func.func @transform_2(%arg0: i32, %arg1: i32) -> (i32, i32, i32) {
    %c0_i32 = arith.constant 0 : i32
    %c0_i32_0 = arith.constant 0 : i32
    %c0_i32_1 = arith.constant 0 : i32
    %c0_i32_2 = arith.constant 0 : i32
    return %c0_i32, %c0_i32_0, %c0_i32_1 : i32, i32, i32
  }
  func.func @transform_3(%arg0: i32, %arg1: i32) -> (i32, i32) {
    %c0_i32 = arith.constant 0 : i32
    %c0_i32_0 = arith.constant 0 : i32
    %c0_i32_1 = arith.constant 0 : i32
    return %c0_i32, %c0_i32_0 : i32, i32
  }
  func.func @transform_4(%arg0: i32, %arg1: i32) -> (i32, i32, i32) {
    %c0_i32 = arith.constant 0 : i32
    %c0_i32_0 = arith.constant 0 : i32
    return %arg0, %arg1, %c0_i32 : i32, i32, i32
  }
}

</mosaic_0001>

<bundles_post_ra>
// kernel: tpu_custom_call.1
= control target key start
LH: loop header
LB: loop body
LE: loop exit
PB: predicated region body
PF: predicated region fallthrough
CT: control target
= control target key end

     0   :  { %s21333_s15 = smov 0   ;;  %s21335_s16 = smov 0   ;;  %s24669_s0 = inlined_call_operand.vmem [shape: f32[2,1024,3], index: 0, kind: input, shape index: {}]   ;;  %s24670_s1 = inlined_call_operand.vmem [shape: f32[2,1,64,3], index: 1, kind: input, shape index: {}]   ;;  %s24671_s2 = inlined_call_operand.vmem [shape: f32[9,3,64], index: 2, kind: input, shape index: {}]   ;;  %s24672_s3 = inlined_call_operand.vmem [shape: f32[1,64], index: 3, kind: input, shape index: {}]   ;;  %s24673_s4 = inlined_call_operand.vmem [shape: f32[2,1024,64], index: 4, kind: output, shape index: {}]  }
   0x1   :  { %s21337_s17 = smov 0  }
   0x2 LB: > { %s26_s18 = sadd.s32 1, %s21302_s16  ;;  %p16143_p0 = scmp.ge.s32.totalorder %s21306_s17, 1  ;;  %s21306_s17 = sphi %s21337_s17, %s14_s17   ;;  %s21302_s16 = sphi %s21335_s16, %s26134_s16   ;;  %s21298_s15 = sphi %s21333_s15, %s26133_s15  }
   0x3   : > { %p28_p1 = scmp.ge.s32.totalorder %s26_s18, 2  ;;  %p199_p2 = scmp.lt.s32.totalorder %s21306_s17, 3 }
   0x5   : > { %s26136_s18 = smov (%p28_p1, %s26_s18), 0  ;;  %p200_p3 = pnand %p16143_p0, %p199_p2 }
   0x7   : > { %203 = sbr.rel (%p200_p3) target bundleno = 1401 (0x579), region = 36 }
   0xe   : > { %v16150_v0 = vld [vmem:[%s24671_s2 + $0x4] sm:$0x7]  ;;  %vm24674_vm0 = vcmask 1042432   ;;  %v16669_v1 = vld [vmem:[%s24671_s2 + $0x10] sm:$0x7]  ;;  %p243_p4 = scmp.lt.s32.totalorder %s21298_s15, 1 }
   0xf   : > { %18486 = vmatprep.subr.msk.mxu1 %vm24674_vm0, %v16150_v0  ;;  %19262 = vmatprep.subr.msk.mxu0 %vm24674_vm0, %v16669_v1  ;;  %v21362_v2 = vld [vmem:[%s24671_s2] sm:$0x7]  ;;  %v21367_v3 = vld [vmem:[%s24671_s2 + $0x14] sm:$0x7]  ;;  %vm24683_vm1 = vcmask 23552  }
  0x10   : > { %18487 = vmatpush3.msk.msra.mxu1 %vm24674_vm0, %v16150_v0  ;;  %19263 = vmatpush3.msk.msra.mxu0 %vm24674_vm0, %v16669_v1  ;;  %s26138_s15 = smov (!%p243_p4, %s21298_s15), 1 }
  0x11   : > { %18680 = vmatprep.subr.msk.mxu1 %vm24674_vm0, %v21362_v2  ;;  %19456 = vmatprep.subr.msk.mxu0 %vm24674_vm0, %v21367_v3  ;;  %s17322_s27 = sshll.u32 %s26138_s15, 10  ;;  %s17323_s28 = sshll.u32 %s26138_s15, 6 }
  0x12   : > { %s21384_s5 = scalar_lea.vmem %s24669_s0, %s17322_s27  ;;  %s21389_s8 = scalar_lea.vmem %s24670_s1, %s17323_s28 }
  0x13   : > { %v271_v4 = vld [vmem:[%s21389_s8] sm:$0xff]  ;;  %v272_v6 = vld [vmem:[%s21389_s8 + $0x8] sm:$0xff]  ;;  %v273_v8 = vld [vmem:[%s21389_s8 + $0x10] sm:$0xff]  ;;  %s24160_s30 = scalar_lea.vmem %s24673_s4, %s17322_s27 }
  0x14   : > { %v280_v5 = vld [vmem:[%s21384_s5] sm:$0xff]  ;;  %276 = vst.msk [vmem:[#allocation2 + $0x8] sm:$0xff] %vm24683_vm1, %v271_v4  ;;  %277 = vst.msk [vmem:[#allocation2 + $0x10] sm:$0xff] %vm24683_vm1, %v272_v6  ;;  %v281_v7 = vld [vmem:[%s21384_s5 + $0x8] sm:$0xff] }
  0x15   : > { %408 = vst.msk [vmem:[#allocation2 + $0x28] sm:$0xff] %vm24683_vm1, %v280_v5  ;;  %v282_v9 = vld [vmem:[%s21384_s5 + $0x10] sm:$0xff]  ;;  %409 = vst.msk [vmem:[#allocation2 + $0x30] sm:$0xff] %vm24683_vm1, %v281_v7  ;;  %v274_v10 = vld [vmem:[%s21389_s8 + $0x18] sm:$0xff] }
  0x16   : > { %278 = vst.msk [vmem:[#allocation2 + $0x18] sm:$0xff] %vm24683_vm1, %v273_v8  ;;  %410 = vst.msk [vmem:[#allocation2 + $0x38] sm:$0xff] %vm24683_vm1, %v282_v9  ;;  %v283_v11 = vld [vmem:[%s21384_s5 + $0x18] sm:$0xff]  ;;  %v284_v12 = vld [vmem:[%s21384_s5 + $0x20] sm:$0xff] }
  0x17   : > { %279 = vst.msk [vmem:[#allocation2 + $0x20] sm:$0xff] %vm24683_vm1, %v274_v10  ;;  %411 = vst.msk [vmem:[#allocation2 + $0x40] sm:$0xff] %vm24683_vm1, %v283_v11  ;;  %v285_v13 = vld [vmem:[%s21384_s5 + $0x28] sm:$0xff]  ;;  %v286_v14 = vld [vmem:[%s21384_s5 + $0x30] sm:$0xff] }
  0x18   : > { %412 = vst.msk [vmem:[#allocation2 + $0x48] sm:$0xff] %vm24683_vm1, %v284_v12  ;;  %v287_v15 = vld [vmem:[%s21384_s5 + $0x38] sm:$0xff]  ;;  %413 = vst.msk [vmem:[#allocation2 + $0x50] sm:$0xff] %vm24683_vm1, %v285_v13  ;;  %v288_v16 = vld [vmem:[%s21384_s5 + $0x40] sm:$0xff] }
  0x19   : > { %414 = vst.msk [vmem:[#allocation2 + $0x58] sm:$0xff] %vm24683_vm1, %v286_v14  ;;  %415 = vst.msk [vmem:[#allocation2 + $0x60] sm:$0xff] %vm24683_vm1, %v287_v15  ;;  %v289_v17 = vld [vmem:[%s21384_s5 + $0x48] sm:$0xff]  ;;  %v290_v18 = vld [vmem:[%s21384_s5 + $0x50] sm:$0xff] }
  0x1a   : > { %416 = vst.msk [vmem:[#allocation2 + $0x68] sm:$0xff] %vm24683_vm1, %v288_v16  ;;  %417 = vst.msk [vmem:[#allocation2 + $0x70] sm:$0xff] %vm24683_vm1, %v289_v17  ;;  %v291_v19 = vld [vmem:[%s21384_s5 + $0x58] sm:$0xff]  ;;  %v292_v20 = vld [vmem:[%s21384_s5 + $0x60] sm:$0xff] }
  0x1b   : > { %418 = vst.msk [vmem:[#allocation2 + $0x78] sm:$0xff] %vm24683_vm1, %v290_v18  ;;  %v293_v21 = vld [vmem:[%s21384_s5 + $0x68] sm:$0xff]  ;;  %419 = vst.msk [vmem:[#allocation2 + $0x80] sm:$0xff] %vm24683_vm1, %v291_v19  ;;  %v294_v22 = vld [vmem:[%s21384_s5 + $0x70] sm:$0xff] }
  0x1c   : > { %420 = vst.msk [vmem:[#allocation2 + $0x88] sm:$0xff] %vm24683_vm1, %v292_v20  ;;  %421 = vst.msk [vmem:[#allocation2 + $0x90] sm:$0xff] %vm24683_vm1, %v293_v21  ;;  %v295_v23 = vld [vmem:[%s21384_s5 + $0x78] sm:$0xff]  ;;  %v296_v24 = vld [vmem:[%s21384_s5 + $0x80] sm:$0xff] }
  0x1d   : > { %422 = vst.msk [vmem:[#allocation2 + $0x98] sm:$0xff] %vm24683_vm1, %v294_v22  ;;  %423 = vst.msk [vmem:[#allocation2 + $0xa0] sm:$0xff] %vm24683_vm1, %v295_v23  ;;  %v297_v25 = vld [vmem:[%s21384_s5 + $0x88] sm:$0xff]  ;;  %v298_v26 = vld [vmem:[%s21384_s5 + $0x90] sm:$0xff] }
  0x1e   : > { %424 = vst.msk [vmem:[#allocation2 + $0xa8] sm:$0xff] %vm24683_vm1, %v296_v24  ;;  %v299_v27 = vld [vmem:[%s21384_s5 + $0x98] sm:$0xff]  ;;  %v2978_v28 = vld [vmem:[#allocation2 + $0x8] sm:$0xff]  ;;  %v2979_v30 = vld [vmem:[#allocation2 + $0x10] sm:$0xff] }
  0x1f   : > { %v8505_v29 = vld [vmem:[#allocation2 + $0x28] sm:$0xff]  ;;  %425 = vst.msk [vmem:[#allocation2 + $0xb0] sm:$0xff] %vm24683_vm1, %v297_v25  ;;  %426 = vst.msk [vmem:[#allocation2 + $0xb8] sm:$0xff] %vm24683_vm1, %v298_v26  ;;  %18488 = vmatprep.mubr.msk.f32.mxu1 %vm24683_vm1, %v2978_v28  ;;  %v8506_v31 = vld [vmem:[#allocation2 + $0x30] sm:$0xff] }
  0x20   : > { %427 = vst.msk [vmem:[#allocation2 + $0xc0] sm:$0xff] %vm24683_vm1, %v299_v27  ;;  %19264 = vmatprep.mubr.msk.f32.mxu0 %vm24683_vm1, %v8505_v29  ;;  %v2980_v32 = vld [vmem:[#allocation2 + $0x18] sm:$0xff]  ;;  %18489 = vmatmul.mubr.msk.f32.vlgmr.msra.gmra.mrb[0].mxu1 %vm24683_vm1, %v2979_v30  ;;  %v2981_v34 = vld [vmem:[#allocation2 + $0x20] sm:$0xff]  ;;  %v8509_v36 = vld [vmem:[#allocation2 + $0x48] sm:$0xff] }
  0x21   : > { %v8507_v33 = vld [vmem:[#allocation2 + $0x38] sm:$0xff]  ;;  %19265 = vmatmul.mubr.msk.f32.vlgmr.msra.gmra.mrb[0].mxu0 %vm24683_vm1, %v8506_v31  ;;  %18681 = vmatpush3.msk.msra.mxu1 %vm24674_vm0, %v21362_v2  ;;  %v8508_v35 = vld [vmem:[#allocation2 + $0x40] sm:$0xff]  ;;  %v8510_v37 = vld [vmem:[#allocation2 + $0x50] sm:$0xff] }
  0x22   : > { %19457 = vmatpush3.msk.msra.mxu0 %vm24674_vm0, %v21367_v3  ;;  %18491 = vmatprep.mubr.msk.f32.mxu1 %vm24683_vm1, %v2980_v32  ;;  %v21453_v38 = vld [vmem:[#allocation2 + $0x58] sm:$0xff]  ;;  %v300_v39 = vld [vmem:[%s21384_s5 + $0xa0] sm:$0xff]  ;;  %v301_v40 = vld [vmem:[%s21384_s5 + $0xa8] sm:$0xff] }
  0x23   : > { %19267 = vmatprep.mubr.msk.f32.mxu0 %vm24683_vm1, %v8507_v33  ;;  %v302_v41 = vld [vmem:[%s21384_s5 + $0xb0] sm:$0xff]  ;;  %v21458_v42 = vld [vmem:[#allocation2 + $0x60] sm:$0xff]  ;;  %428 = vst.msk [vmem:[#allocation2 + $0xc8] sm:$0xff] %vm24683_vm1, %v300_v39  ;;  %429 = vst.msk [vmem:[#allocation2 + $0xd0] sm:$0xff] %vm24683_vm1, %v301_v40 }
  0x24   : > { %18492 = vmatmul.mubr.msk.f32.gmra.mrb[2].mxu1 %vm24683_vm1, %v2981_v34  ;;  %430 = vst.msk [vmem:[#allocation2 + $0xd8] sm:$0xff] %vm24683_vm1, %v302_v41  ;;  %v303_v43 = vld [vmem:[%s21384_s5 + $0xb8] sm:$0xff]  ;;  %v304_v44 = vld [vmem:[%s21384_s5 + $0xc0] sm:$0xff]  ;;  %v305_v45 = vld [vmem:[%s21384_s5 + $0xc8] sm:$0xff] }
  0x25   : > { %19268 = vmatmul.mubr.msk.f32.gmra.mrb[2].mxu0 %vm24683_vm1, %v8508_v35  ;;  %18494 = vmatprep.mubr.msk.f32.mxu1 %vm24683_vm1, %v8505_v29  ;;  %v8513_v46 = vld [vmem:[#allocation2 + $0x68] sm:$0xff]  ;;  %431 = vst.msk [vmem:[#allocation2 + $0xe0] sm:$0xff] %vm24683_vm1, %v303_v43  ;;  %432 = vst.msk [vmem:[#allocation2 + $0xe8] sm:$0xff] %vm24683_vm1, %v304_v44  ;;  %v306_v47 = vld [vmem:[%s21384_s5 + $0xd0] sm:$0xff] }
  0x26   : > { %19270 = vmatprep.mubr.msk.f32.mxu0 %vm24683_vm1, %v8509_v36  ;;  %433 = vst.msk [vmem:[#allocation2 + $0xf0] sm:$0xff] %vm24683_vm1, %v305_v45  ;;  %v307_v48 = vld [vmem:[%s21384_s5 + $0xd8] sm:$0xff]  ;;  %v308_v49 = vld [vmem:[%s21384_s5 + $0xe0] sm:$0xff]  ;;  %434 = vst.msk [vmem:[#allocation2 + $0xf8] sm:$0xff] %vm24683_vm1, %v306_v47 }
  0x27   : > { %435 = vst.msk [vmem:[#allocation2 + $0x100] sm:$0xff] %vm24683_vm1, %v307_v48  ;;  %436 = vst.msk [vmem:[#allocation2 + $0x108] sm:$0xff] %vm24683_vm1, %v308_v49  ;;  %v309_v50 = vld [vmem:[%s21384_s5 + $0xe8] sm:$0xff]  ;;  %v310_v51 = vld [vmem:[%s21384_s5 + $0xf0] sm:$0xff] }
  0x28   : > { %18495 = vmatmul.mubr.msk.f32.gmra.mrb[4].mxu1 %vm24683_vm1, %v8506_v31  ;;  %v311_v52 = vld [vmem:[%s21384_s5 + $0xf8] sm:$0xff]  ;;  %437 = vst.msk [vmem:[#allocation2 + $0x110] sm:$0xff] %vm24683_vm1, %v309_v50  ;;  %438 = vst.msk [vmem:[#allocation2 + $0x118] sm:$0xff] %vm24683_vm1, %v310_v51  ;;  %v312_v53 = vld [vmem:[%s21384_s5 + $0x100] sm:$0xff] }
  0x29   : > { %19271 = vmatmul.mubr.msk.f32.gmra.mrb[4].mxu0 %vm24683_vm1, %v8510_v37  ;;  %18497 = vmatprep.mubr.msk.f32.mxu1 %vm24683_vm1, %v8507_v33  ;;  %439 = vst.msk [vmem:[#allocation2 + $0x120] sm:$0xff] %vm24683_vm1, %v311_v52  ;;  %v313_v54 = vld [vmem:[%s21384_s5 + $0x108] sm:$0xff]  ;;  %v314_v55 = vld [vmem:[%s21384_s5 + $0x110] sm:$0xff]  ;;  %440 = vst.msk [vmem:[#allocation2 + $0x128] sm:$0xff] %vm24683_vm1, %v312_v53 }
  0x2a   : > { %19273 = vmatprep.mubr.msk.f32.mxu0 %vm24683_vm1, %v21453_v38  ;;  %v8514_v56 = vld [vmem:[#allocation2 + $0x70] sm:$0xff]  ;;  %441 = vst.msk [vmem:[#allocation2 + $0x130] sm:$0xff] %vm24683_vm1, %v313_v54  ;;  %442 = vst.msk [vmem:[#allocation2 + $0x138] sm:$0xff] %vm24683_vm1, %v314_v55  ;;  %v315_v57 = vld [vmem:[%s21384_s5 + $0x118] sm:$0xff] }
  0x2b   : > { %v316_v58 = vld [vmem:[%s21384_s5 + $0x120] sm:$0xff]  ;;  %v317_v59 = vld [vmem:[%s21384_s5 + $0x128] sm:$0xff]  ;;  %443 = vst.msk [vmem:[#allocation2 + $0x140] sm:$0xff] %vm24683_vm1, %v315_v57  ;;  %v318_v60 = vld [vmem:[%s21384_s5 + $0x130] sm:$0xff] }
  0x2c   : > { %18498 = vmatmul.mubr.msk.f32.gmra.mrb[6].mxu1 %vm24683_vm1, %v8508_v35  ;;  %444 = vst.msk [vmem:[#allocation2 + $0x148] sm:$0xff] %vm24683_vm1, %v316_v58  ;;  %445 = vst.msk [vmem:[#allocation2 + $0x150] sm:$0xff] %vm24683_vm1, %v317_v59  ;;  %v319_v61 = vld [vmem:[%s21384_s5 + $0x138] sm:$0xff]  ;;  %v320_v62 = vld [vmem:[%s21384_s5 + $0x140] sm:$0xff] }
  0x2d   : > { %19274 = vmatmul.mubr.msk.f32.gmra.mrb[6].mxu0 %vm24683_vm1, %v21458_v42  ;;  %18500 = vmatprep.mubr.msk.f32.mxu1 %vm24683_vm1, %v8509_v36  ;;  %446 = vst.msk [vmem:[#allocation2 + $0x158] sm:$0xff] %vm24683_vm1, %v318_v60  ;;  %447 = vst.msk [vmem:[#allocation2 + $0x160] sm:$0xff] %vm24683_vm1, %v319_v61  ;;  %v321_v63 = vld [vmem:[%s21384_s5 + $0x148] sm:$0xff]  ;;  %v322_v0 = vld [vmem:[%s21384_s5 + $0x150] sm:$0xff] }
  0x2e   : > { %19276 = vmatprep.mubr.msk.f32.mxu0 %vm24683_vm1, %v8513_v46  ;;  %448 = vst.msk [vmem:[#allocation2 + $0x168] sm:$0xff] %vm24683_vm1, %v320_v62  ;;  %v323_v1 = vld [vmem:[%s21384_s5 + $0x158] sm:$0xff]  ;;  %449 = vst.msk [vmem:[#allocation2 + $0x170] sm:$0xff] %vm24683_vm1, %v321_v63  ;;  %v8516_v3 = vld [vmem:[#allocation2 + $0x80] sm:$0xff] }
  0x2f   : > { %v8515_v2 = vld [vmem:[#allocation2 + $0x78] sm:$0xff]  ;;  %450 = vst.msk [vmem:[#allocation2 + $0x178] sm:$0xff] %vm24683_vm1, %v322_v0  ;;  %451 = vst.msk [vmem:[#allocation2 + $0x180] sm:$0xff] %vm24683_vm1, %v323_v1  ;;  %v8517_v4 = vld [vmem:[#allocation2 + $0x88] sm:$0xff] }
  0x30   : > { %18501 = vmatmul.mubr.msk.f32.gmra.mrb[8].mxu1 %vm24683_vm1, %v8510_v37  ;;  %v8518_v5 = vld [vmem:[#allocation2 + $0x90] sm:$0xff]  ;;  %v8519_v6 = vld [vmem:[#allocation2 + $0x98] sm:$0xff]  ;;  %v324_v7 = vld [vmem:[%s21384_s5 + $0x160] sm:$0xff] }
  0x31   : > { %19277 = vmatmul.mubr.msk.f32.gmra.mrb[8].mxu0 %vm24683_vm1, %v8514_v56  ;;  %18503 = vmatprep.mubr.msk.f32.mxu1 %vm24683_vm1, %v21453_v38  ;;  %v325_v8 = vld [vmem:[%s21384_s5 + $0x168] sm:$0xff]  ;;  %v326_v9 = vld [vmem:[%s21384_s5 + $0x170] sm:$0xff]  ;;  %v8520_v10 = vld [vmem:[#allocation2 + $0xa0] sm:$0xff]  ;;  %452 = vst.msk [vmem:[#allocation2 + $0x188] sm:$0xff] %vm24683_vm1, %v324_v7 }
  0x32   : > { %19279 = vmatprep.mubr.msk.f32.mxu0 %vm24683_vm1, %v8515_v2  ;;  %453 = vst.msk [vmem:[#allocation2 + $0x190] sm:$0xff] %vm24683_vm1, %v325_v8  ;;  %454 = vst.msk [vmem:[#allocation2 + $0x198] sm:$0xff] %vm24683_vm1, %v326_v9  ;;  %v327_v11 = vld [vmem:[%s21384_s5 + $0x178] sm:$0xff]  ;;  %v328_v12 = vld [vmem:[%s21384_s5 + $0x180] sm:$0xff] }
  0x33   : > { %v329_v13 = vld [vmem:[%s21384_s5 + $0x188] sm:$0xff]  ;;  %455 = vst.msk [vmem:[#allocation2 + $0x1a0] sm:$0xff] %vm24683_vm1, %v327_v11  ;;  %456 = vst.msk [vmem:[#allocation2 + $0x1a8] sm:$0xff] %vm24683_vm1, %v328_v12  ;;  %v330_v15 = vld [vmem:[%s21384_s5 + $0x190] sm:$0xff] }
  0x34   : > { %18504 = vmatmul.mubr.msk.f32.gmra.mrb[10].mxu1 %vm24683_vm1, %v21458_v42  ;;  %v8521_v14 = vld [vmem:[#allocation2 + $0xa8] sm:$0xff]  ;;  %457 = vst.msk [vmem:[#allocation2 + $0x1b0] sm:$0xff] %vm24683_vm1, %v329_v13  ;;  %v331_v16 = vld [vmem:[%s21384_s5 + $0x198] sm:$0xff]  ;;  %v332_v17 = vld [vmem:[%s21384_s5 + $0x1a0] sm:$0xff] }
  0x35   : > { %19280 = vmatmul.mubr.msk.f32.gmra.mrb[10].mxu0 %vm24683_vm1, %v8516_v3  ;;  %18506 = vmatprep.mubr.msk.f32.mxu1 %vm24683_vm1, %v8513_v46  ;;  %458 = vst.msk [vmem:[#allocation2 + $0x1b8] sm:$0xff] %vm24683_vm1, %v330_v15  ;;  %459 = vst.msk [vmem:[#allocation2 + $0x1c0] sm:$0xff] %vm24683_vm1, %v331_v16  ;;  %v333_v18 = vld [vmem:[%s21384_s5 + $0x1a8] sm:$0xff]  ;;  %v334_v19 = vld [vmem:[%s21384_s5 + $0x1b0] sm:$0xff] }
  0x36   : > { %19282 = vmatprep.mubr.msk.f32.mxu0 %vm24683_vm1, %v8517_v4  ;;  %460 = vst.msk [vmem:[#allocation2 + $0x1c8] sm:$0xff] %vm24683_vm1, %v332_v17  ;;  %v335_v20 = vld [vmem:[%s21384_s5 + $0x1b8] sm:$0xff]  ;;  %461 = vst.msk [vmem:[#allocation2 + $0x1d0] sm:$0xff] %vm24683_vm1, %v333_v18  ;;  %v336_v21 = vld [vmem:[%s21384_s5 + $0x1c0] sm:$0xff] }
  0x37   : > { %462 = vst.msk [vmem:[#allocation2 + $0x1d8] sm:$0xff] %vm24683_vm1, %v334_v19  ;;  %463 = vst.msk [vmem:[#allocation2 + $0x1e0] sm:$0xff] %vm24683_vm1, %v335_v20  ;;  %v337_v22 = vld [vmem:[%s21384_s5 + $0x1c8] sm:$0xff]  ;;  %v338_v23 = vld [vmem:[%s21384_s5 + $0x1d0] sm:$0xff] }
  0x38   : > { %18507 = vmatmul.mubr.msk.f32.gmra.mrb[12].mxu1 %vm24683_vm1, %v8514_v56  ;;  %464 = vst.msk [vmem:[#allocation2 + $0x1e8] sm:$0xff] %vm24683_vm1, %v336_v21  ;;  %465 = vst.msk [vmem:[#allocation2 + $0x1f0] sm:$0xff] %vm24683_vm1, %v337_v22  ;;  %v339_v24 = vld [vmem:[%s21384_s5 + $0x1d8] sm:$0xff]  ;;  %v340_v25 = vld [vmem:[%s21384_s5 + $0x1e0] sm:$0xff] }
  0x39   : > { %19283 = vmatmul.mubr.msk.f32.gmra.mrb[12].mxu0 %vm24683_vm1, %v8518_v5  ;;  %18509 = vmatprep.mubr.msk.f32.mxu1 %vm24683_vm1, %v8515_v2  ;;  %466 = vst.msk [vmem:[#allocation2 + $0x1f8] sm:$0xff] %vm24683_vm1, %v338_v23  ;;  %v341_v26 = vld [vmem:[%s21384_s5 + $0x1e8] sm:$0xff]  ;;  %467 = vst.msk [vmem:[#allocation2 + $0x200] sm:$0xff] %vm24683_vm1, %v339_v24  ;;  %v342_v27 = vld [vmem:[%s21384_s5 + $0x1f0] sm:$0xff] }
  0x3a   : > { %19285 = vmatprep.mubr.msk.f32.mxu0 %vm24683_vm1, %v8519_v6  ;;  %468 = vst.msk [vmem:[#allocation2 + $0x208] sm:$0xff] %vm24683_vm1, %v340_v25  ;;  %469 = vst.msk [vmem:[#allocation2 + $0x210] sm:$0xff] %vm24683_vm1, %v341_v26  ;;  %v343_v28 = vld [vmem:[%s21384_s5 + $0x1f8] sm:$0xff]  ;;  %v8522_v29 = vld [vmem:[#allocation2 + $0xb0] sm:$0xff] }
  0x3b   : > { %470 = vst.msk [vmem:[#allocation2 + $0x218] sm:$0xff] %vm24683_vm1, %v342_v27  ;;  %471 = vst.msk [vmem:[#allocation2 + $0x220] sm:$0xff] %vm24683_vm1, %v343_v28  ;;  %v21576_v30 = vld [vmem:[%s24671_s2 + $0x18] sm:$0x7]  ;;  %v8524_v32 = vld [vmem:[#allocation2 + $0xc0] sm:$0xff] }
  0x3c   : > { %18510 = vmatmul.mubr.msk.f32.gmra.mrb[14].mxu1 %vm24683_vm1, %v8516_v3  ;;  %v8523_v31 = vld [vmem:[#allocation2 + $0xb8] sm:$0xff]  ;;  %19650 = vmatprep.subr.msk.mxu0 %vm24674_vm0, %v21576_v30  ;;  %v8525_v33 = vld [vmem:[#allocation2 + $0xc8] sm:$0xff]  ;;  %v8526_v34 = vld [vmem:[#allocation2 + $0xd0] sm:$0xff] }
  0x3d   : > { %19286 = vmatmul.mubr.msk.f32.gmra.mrb[14].mxu0 %vm24683_vm1, %v8520_v10  ;;  %18512 = vmatprep.mubr.msk.f32.mxu1 %vm24683_vm1, %v8517_v4  ;;  %v344_v35 = vld [vmem:[%s21384_s5 + $0x200] sm:$0xff]  ;;  %v345_v36 = vld [vmem:[%s21384_s5 + $0x208] sm:$0xff]  ;;  %v8527_v37 = vld [vmem:[#allocation2 + $0xd8] sm:$0xff] }
  0x3e   : > { %19288 = vmatprep.mubr.msk.f32.mxu0 %vm24683_vm1, %v8521_v14  ;;  %472 = vst.msk [vmem:[#allocation2 + $0x228] sm:$0xff] %vm24683_vm1, %v344_v35  ;;  %473 = vst.msk [vmem:[#allocation2 + $0x230] sm:$0xff] %vm24683_vm1, %v345_v36  ;;  %v346_v38 = vld [vmem:[%s21384_s5 + $0x210] sm:$0xff]  ;;  %v347_v39 = vld [vmem:[%s21384_s5 + $0x218] sm:$0xff] }
  0x3f   : > { %474 = vst.msk [vmem:[#allocation2 + $0x238] sm:$0xff] %vm24683_vm1, %v346_v38  ;;  %v348_v40 = vld [vmem:[%s21384_s5 + $0x220] sm:$0xff]  ;;  %475 = vst.msk [vmem:[#allocation2 + $0x240] sm:$0xff] %vm24683_vm1, %v347_v39  ;;  %v349_v41 = vld [vmem:[%s21384_s5 + $0x228] sm:$0xff] }
  0x40   : > { %18513 = vmatmul.mubr.msk.f32.gmra.mrb[16].mxu1 %vm24683_vm1, %v8518_v5  ;;  %476 = vst.msk [vmem:[#allocation2 + $0x248] sm:$0xff] %vm24683_vm1, %v348_v40  ;;  %v8528_v42 = vld [vmem:[#allocation2 + $0xe0] sm:$0xff]  ;;  %477 = vst.msk [vmem:[#allocation2 + $0x250] sm:$0xff] %vm24683_vm1, %v349_v41  ;;  %v350_v43 = vld [vmem:[%s21384_s5 + $0x230] sm:$0xff] }
  0x41   : > { %19289 = vmatmul.mubr.msk.f32.gmra.mrb[16].mxu0 %vm24683_vm1, %v8522_v29  ;;  %18515 = vmatprep.mubr.msk.f32.mxu1 %vm24683_vm1, %v8519_v6  ;;  %v351_v44 = vld [vmem:[%s21384_s5 + $0x238] sm:$0xff]  ;;  %v8529_v45 = vld [vmem:[#allocation2 + $0xe8] sm:$0xff]  ;;  %478 = vst.msk [vmem:[#allocation2 + $0x258] sm:$0xff] %vm24683_vm1, %v350_v43  ;;  %v352_v46 = vld [vmem:[%s21384_s5 + $0x240] sm:$0xff] }
  0x42   : > { %19291 = vmatprep.mubr.msk.f32.mxu0 %vm24683_vm1, %v8523_v31  ;;  %479 = vst.msk [vmem:[#allocation2 + $0x260] sm:$0xff] %vm24683_vm1, %v351_v44  ;;  %480 = vst.msk [vmem:[#allocation2 + $0x268] sm:$0xff] %vm24683_vm1, %v352_v46  ;;  %v353_v47 = vld [vmem:[%s21384_s5 + $0x248] sm:$0xff]  ;;  %v354_v48 = vld [vmem:[%s21384_s5 + $0x250] sm:$0xff] }
  0x43   : > { %481 = vst.msk [vmem:[#allocation2 + $0x270] sm:$0xff] %vm24683_vm1, %v353_v47  ;;  %482 = vst.msk [vmem:[#allocation2 + $0x278] sm:$0xff] %vm24683_vm1, %v354_v48  ;;  %v355_v49 = vld [vmem:[%s21384_s5 + $0x258] sm:$0xff]  ;;  %v8530_v50 = vld [vmem:[#allocation2 + $0xf0] sm:$0xff] }
  0x44   : > { %18516 = vmatmul.mubr.msk.f32.gmra.mrb[18].mxu1 %vm24683_vm1, %v8520_v10  ;;  %483 = vst.msk [vmem:[#allocation2 + $0x280] sm:$0xff] %vm24683_vm1, %v355_v49  ;;  %v356_v51 = vld [vmem:[%s21384_s5 + $0x260] sm:$0xff]  ;;  %v8531_v52 = vld [vmem:[#allocation2 + $0xf8] sm:$0xff]  ;;  %v357_v53 = vld [vmem:[%s21384_s5 + $0x268] sm:$0xff] }
  0x45   : > { %19292 = vmatmul.mubr.msk.f32.gmra.mrb[18].mxu0 %vm24683_vm1, %v8524_v32  ;;  %18518 = vmatprep.mubr.msk.f32.mxu1 %vm24683_vm1, %v8521_v14  ;;  %484 = vst.msk [vmem:[#allocation2 + $0x288] sm:$0xff] %vm24683_vm1, %v356_v51  ;;  %485 = vst.msk [vmem:[#allocation2 + $0x290] sm:$0xff] %vm24683_vm1, %v357_v53  ;;  %v358_v54 = vld [vmem:[%s21384_s5 + $0x270] sm:$0xff]  ;;  %v8532_v55 = vld [vmem:[#allocation2 + $0x100] sm:$0xff] }
  0x46   : > { %19294 = vmatprep.mubr.msk.f32.mxu0 %vm24683_vm1, %v8525_v33  ;;  %486 = vst.msk [vmem:[#allocation2 + $0x298] sm:$0xff] %vm24683_vm1, %v358_v54  ;;  %v359_v56 = vld [vmem:[%s21384_s5 + $0x278] sm:$0xff]  ;;  %v8533_v57 = vld [vmem:[#allocation2 + $0x108] sm:$0xff]  ;;  %v360_v58 = vld [vmem:[%s21384_s5 + $0x280] sm:$0xff] }
  0x47   : > { %487 = vst.msk [vmem:[#allocation2 + $0x2a0] sm:$0xff] %vm24683_vm1, %v359_v56  ;;  %488 = vst.msk [vmem:[#allocation2 + $0x2a8] sm:$0xff] %vm24683_vm1, %v360_v58  ;;  %v361_v59 = vld [vmem:[%s21384_s5 + $0x288] sm:$0xff]  ;;  %v8534_v60 = vld [vmem:[#allocation2 + $0x110] sm:$0xff] }
  0x48   : > { %18519 = vmatmul.mubr.msk.f32.gmra.mrb[20].mxu1 %vm24683_vm1, %v8522_v29  ;;  %489 = vst.msk [vmem:[#allocation2 + $0x2b0] sm:$0xff] %vm24683_vm1, %v361_v59  ;;  %v362_v61 = vld [vmem:[%s21384_s5 + $0x290] sm:$0xff]  ;;  %v8535_v62 = vld [vmem:[#allocation2 + $0x118] sm:$0xff]  ;;  %v364_v0 = vld [vmem:[%s21384_s5 + $0x2a0] sm:$0xff] }
  0x49   : > { %19295 = vmatmul.mubr.msk.f32.gmra.mrb[20].mxu0 %vm24683_vm1, %v8526_v34  ;;  %18521 = vmatprep.mubr.msk.f32.mxu1 %vm24683_vm1, %v8523_v31  ;;  %490 = vst.msk [vmem:[#allocation2 + $0x2b8] sm:$0xff] %vm24683_vm1, %v362_v61  ;;  %v363_v63 = vld [vmem:[%s21384_s5 + $0x298] sm:$0xff]  ;;  %v365_v1 = vld [vmem:[%s21384_s5 + $0x2a8] sm:$0xff]  ;;  %492 = vst.msk [vmem:[#allocation2 + $0x2c8] sm:$0xff] %vm24683_vm1, %v364_v0 }
  0x4a   : > { %19297 = vmatprep.mubr.msk.f32.mxu0 %vm24683_vm1, %v8527_v37  ;;  %491 = vst.msk [vmem:[#allocation2 + $0x2c0] sm:$0xff] %vm24683_vm1, %v363_v63  ;;  %493 = vst.msk [vmem:[#allocation2 + $0x2d0] sm:$0xff] %vm24683_vm1, %v365_v1  ;;  %v366_v2 = vld [vmem:[%s21384_s5 + $0x2b0] sm:$0xff]  ;;  %v8536_v3 = vld [vmem:[#allocation2 + $0x120] sm:$0xff]  ;;  %v544_v1 = vlaneseq }
  0x4b   : > { %494 = vst.msk [vmem:[#allocation2 + $0x2d8] sm:$0xff] %vm24683_vm1, %v366_v2  ;;  %v367_v4 = vld [vmem:[%s21384_s5 + $0x2b8] sm:$0xff]  ;;  %v8537_v5 = vld [vmem:[#allocation2 + $0x128] sm:$0xff]  ;;  %v368_v6 = vld [vmem:[%s21384_s5 + $0x2c0] sm:$0xff] }
  0x4c   : > { %18522 = vmatmul.mubr.msk.f32.gmra.mrb[22].mxu1 %vm24683_vm1, %v8524_v32  ;;  %495 = vst.msk [vmem:[#allocation2 + $0x2e0] sm:$0xff] %vm24683_vm1, %v367_v4  ;;  %496 = vst.msk [vmem:[#allocation2 + $0x2e8] sm:$0xff] %vm24683_vm1, %v368_v6  ;;  %v369_v7 = vld [vmem:[%s21384_s5 + $0x2c8] sm:$0xff]  ;;  %v370_v8 = vld [vmem:[%s21384_s5 + $0x2d0] sm:$0xff]  ;;  %v21780_v6 = vshrl.u32 %v544_v1, 7  ;;  %v24922_v1 = vmov 0 }
  0x4d   : > { %19298 = vmatmul.mubr.msk.f32.gmra.mrb[22].mxu0 %vm24683_vm1, %v8528_v42  ;;  %18524 = vmatprep.mubr.msk.f32.mxu1 %vm24683_vm1, %v8525_v33  ;;  %497 = vst.msk [vmem:[#allocation2 + $0x2f0] sm:$0xff] %vm24683_vm1, %v369_v7  ;;  %v8538_v9 = vld [vmem:[#allocation2 + $0x130] sm:$0xff]  ;;  %498 = vst.msk [vmem:[#allocation2 + $0x2f8] sm:$0xff] %vm24683_vm1, %v370_v8  ;;  %v371_v10 = vld [vmem:[%s21384_s5 + $0x2d8] sm:$0xff] }
  0x4e   : > { %19300 = vmatprep.mubr.msk.f32.mxu0 %vm24683_vm1, %v8529_v45  ;;  %v8539_v11 = vld [vmem:[#allocation2 + $0x138] sm:$0xff]  ;;  %499 = vst.msk [vmem:[#allocation2 + $0x300] sm:$0xff] %vm24683_vm1, %v371_v10  ;;  %v372_v12 = vld [vmem:[%s21384_s5 + $0x2e0] sm:$0xff]  ;;  %v373_v13 = vld [vmem:[%s21384_s5 + $0x2e8] sm:$0xff] }
  0x4f   : > { %500 = vst.msk [vmem:[#allocation2 + $0x308] sm:$0xff] %vm24683_vm1, %v372_v12  ;;  %501 = vst.msk [vmem:[#allocation2 + $0x310] sm:$0xff] %vm24683_vm1, %v373_v13  ;;  %v374_v14 = vld [vmem:[%s21384_s5 + $0x2f0] sm:$0xff]  ;;  %v8540_v15 = vld [vmem:[#allocation2 + $0x140] sm:$0xff] }
  0x50   : > { %18525 = vmatmul.mubr.msk.f32.gmra.mrb[24].mxu1 %vm24683_vm1, %v8526_v34  ;;  %502 = vst.msk [vmem:[#allocation2 + $0x318] sm:$0xff] %vm24683_vm1, %v374_v14  ;;  %v375_v16 = vld [vmem:[%s21384_s5 + $0x2f8] sm:$0xff]  ;;  %v8541_v17 = vld [vmem:[#allocation2 + $0x148] sm:$0xff]  ;;  %v376_v18 = vld [vmem:[%s21384_s5 + $0x300] sm:$0xff] }
  0x51   : > { %19301 = vmatmul.mubr.msk.f32.gmra.mrb[24].mxu0 %vm24683_vm1, %v8530_v50  ;;  %18527 = vmatprep.mubr.msk.f32.mxu1 %vm24683_vm1, %v8527_v37  ;;  %503 = vst.msk [vmem:[#allocation2 + $0x320] sm:$0xff] %vm24683_vm1, %v375_v16  ;;  %504 = vst.msk [vmem:[#allocation2 + $0x328] sm:$0xff] %vm24683_vm1, %v376_v18  ;;  %v377_v19 = vld [vmem:[%s21384_s5 + $0x308] sm:$0xff]  ;;  %v378_v20 = vld [vmem:[%s21384_s5 + $0x310] sm:$0xff] }
  0x52   : > { %19303 = vmatprep.mubr.msk.f32.mxu0 %vm24683_vm1, %v8531_v52  ;;  %505 = vst.msk [vmem:[#allocation2 + $0x330] sm:$0xff] %vm24683_vm1, %v377_v19  ;;  %506 = vst.msk [vmem:[#allocation2 + $0x338] sm:$0xff] %vm24683_vm1, %v378_v20  ;;  %v379_v21 = vld [vmem:[%s21384_s5 + $0x318] sm:$0xff]  ;;  %v8542_v22 = vld [vmem:[#allocation2 + $0x150] sm:$0xff]  ;;  %v552_v19 = vadd.s32 56, %v21780_v6 }
  0x53   : > { %507 = vst.msk [vmem:[#allocation2 + $0x340] sm:$0xff] %vm24683_vm1, %v379_v21  ;;  %v8543_v23 = vld [vmem:[#allocation2 + $0x158] sm:$0xff]  ;;  %v380_v24 = vld [vmem:[%s21384_s5 + $0x320] sm:$0xff]  ;;  %v381_v25 = vld [vmem:[%s21384_s5 + $0x328] sm:$0xff] }
  0x54   : > { %18528 = vmatmul.mubr.msk.f32.gmra.mrb[26].mxu1 %vm24683_vm1, %v8528_v42  ;;  %508 = vst.msk [vmem:[#allocation2 + $0x348] sm:$0xff] %vm24683_vm1, %v380_v24  ;;  %509 = vst.msk [vmem:[#allocation2 + $0x350] sm:$0xff] %vm24683_vm1, %v381_v25  ;;  %v8544_v26 = vld [vmem:[#allocation2 + $0x160] sm:$0xff]  ;;  %v8545_v27 = vld [vmem:[#allocation2 + $0x168] sm:$0xff]  ;;  %v726_v24 = vand.u32 31, %v552_v19 }
  0x55   : > { %19304 = vmatmul.mubr.msk.f32.gmra.mrb[26].mxu0 %vm24683_vm1, %v8532_v55  ;;  %18530 = vmatprep.mubr.msk.f32.mxu1 %vm24683_vm1, %v8529_v45  ;;  %v382_v28 = vld [vmem:[%s21384_s5 + $0x330] sm:$0xff]  ;;  %v383_v29 = vld [vmem:[%s21384_s5 + $0x338] sm:$0xff]  ;;  %v384_v33 = vld [vmem:[%s21384_s5 + $0x340] sm:$0xff] }
  0x56   : > { %19306 = vmatprep.mubr.msk.f32.mxu0 %vm24683_vm1, %v8533_v57  ;;  %510 = vst.msk [vmem:[#allocation2 + $0x358] sm:$0xff] %vm24683_vm1, %v382_v28  ;;  %511 = vst.msk [vmem:[#allocation2 + $0x360] sm:$0xff] %vm24683_vm1, %v383_v29  ;;  %v8546_v31 = vld [vmem:[#allocation2 + $0x170] sm:$0xff]  ;;  %v8547_v32 = vld [vmem:[#allocation2 + $0x178] sm:$0xff]  ;;  %vm21823_vm3 = vcmp.ne.s32.totalorder %v726_v24, 31  ;;  %v24913_v28 = vmov 0 }
  0x57   : > { %512 = vst.msk [vmem:[#allocation2 + $0x368] sm:$0xff] %vm24683_vm1, %v384_v33  ;;  %v385_v34 = vld [vmem:[%s21384_s5 + $0x348] sm:$0xff]  ;;  %v8548_v35 = vld [vmem:[#allocation2 + $0x180] sm:$0xff]  ;;  %v386_v37 = vld [vmem:[%s21384_s5 + $0x350] sm:$0xff]  ;;  %v24914_v28 = vsel %vm21823_vm3, 4294967295, %v24913_v28 }
  0x58   : > { %18531 = vmatmul.mubr.msk.f32.gmra.mrb[28].mxu1 %vm24683_vm1, %v8530_v50  ;;  %513 = vst.msk [vmem:[#allocation2 + $0x370] sm:$0xff] %vm24683_vm1, %v385_v34  ;;  %v8549_v36 = vld [vmem:[#allocation2 + $0x188] sm:$0xff]  ;;  %514 = vst.msk [vmem:[#allocation2 + $0x378] sm:$0xff] %vm24683_vm1, %v386_v37  ;;  %v387_v38 = vld [vmem:[%s21384_s5 + $0x358] sm:$0xff] }
  0x59   : > { %19307 = vmatmul.mubr.msk.f32.gmra.mrb[28].mxu0 %vm24683_vm1, %v8534_v60  ;;  %18533 = vmatprep.mubr.msk.f32.mxu1 %vm24683_vm1, %v8531_v52  ;;  %515 = vst.msk [vmem:[#allocation2 + $0x380] sm:$0xff] %vm24683_vm1, %v387_v38  ;;  %v8550_v39 = vld [vmem:[#allocation2 + $0x190] sm:$0xff]  ;;  %v8551_v40 = vld [vmem:[#allocation2 + $0x198] sm:$0xff]  ;;  %v388_v41 = vld [vmem:[%s21384_s5 + $0x360] sm:$0xff] }
  0x5a   : > { %19309 = vmatprep.mubr.msk.f32.mxu0 %vm24683_vm1, %v8535_v62  ;;  %516 = vst.msk [vmem:[#allocation2 + $0x388] sm:$0xff] %vm24683_vm1, %v388_v41  ;;  %v389_v42 = vld [vmem:[%s21384_s5 + $0x368] sm:$0xff]  ;;  %v8552_v43 = vld [vmem:[#allocation2 + $0x1a0] sm:$0xff]  ;;  %v390_v45 = vld [vmem:[%s21384_s5 + $0x370] sm:$0xff]  ;;  %v24916_v41 = vmov 0 }
  0x5b   : > { %517 = vst.msk [vmem:[#allocation2 + $0x390] sm:$0xff] %vm24683_vm1, %v389_v42  ;;  %v8553_v44 = vld [vmem:[#allocation2 + $0x1a8] sm:$0xff]  ;;  %518 = vst.msk [vmem:[#allocation2 + $0x398] sm:$0xff] %vm24683_vm1, %v390_v45  ;;  %v391_v46 = vld [vmem:[%s21384_s5 + $0x378] sm:$0xff] }
  0x5c   : > { %18534 = vmatmul.mubr.msk.f32.gmra.mrb[30].mxu1 %vm24683_vm1, %v8532_v55  ;;  %519 = vst.msk [vmem:[#allocation2 + $0x3a0] sm:$0xff] %vm24683_vm1, %v391_v46  ;;  %v8554_v47 = vld [vmem:[#allocation2 + $0x1b0] sm:$0xff]  ;;  %v8555_v48 = vld [vmem:[#allocation2 + $0x1b8] sm:$0xff]  ;;  %v392_v49 = vld [vmem:[%s21384_s5 + $0x380] sm:$0xff] }
  0x5d   : > { %19310 = vmatmul.mubr.msk.f32.gmra.mrb[30].mxu0 %vm24683_vm1, %v8536_v3  ;;  %18536 = vmatprep.mubr.msk.f32.mxu1 %vm24683_vm1, %v8533_v57  ;;  %520 = vst.msk [vmem:[#allocation2 + $0x3a8] sm:$0xff] %vm24683_vm1, %v392_v49  ;;  %v393_v50 = vld [vmem:[%s21384_s5 + $0x388] sm:$0xff]  ;;  %v8556_v51 = vld [vmem:[#allocation2 + $0x1c0] sm:$0xff]  ;;  %v394_v53 = vld [vmem:[%s21384_s5 + $0x390] sm:$0xff] }
  0x5e   : > { %19312 = vmatprep.mubr.msk.f32.mxu0 %vm24683_vm1, %v8537_v5  ;;  %521 = vst.msk [vmem:[#allocation2 + $0x3b0] sm:$0xff] %vm24683_vm1, %v393_v50  ;;  %v8557_v52 = vld [vmem:[#allocation2 + $0x1c8] sm:$0xff]  ;;  %522 = vst.msk [vmem:[#allocation2 + $0x3b8] sm:$0xff] %vm24683_vm1, %v394_v53  ;;  %v395_v54 = vld [vmem:[%s21384_s5 + $0x398] sm:$0xff]  ;;  %v24919_v53 = vmov 0 }
  0x5f   : > { %523 = vst.msk [vmem:[#allocation2 + $0x3c0] sm:$0xff] %vm24683_vm1, %v395_v54  ;;  %v8558_v55 = vld [vmem:[#allocation2 + $0x1d0] sm:$0xff]  ;;  %v8559_v56 = vld [vmem:[#allocation2 + $0x1d8] sm:$0xff]  ;;  %v396_v57 = vld [vmem:[%s21384_s5 + $0x3a0] sm:$0xff] }
  0x60   : > { %18537 = vmatmul.mubr.msk.f32.gmra.mrb[32].mxu1 %vm24683_vm1, %v8534_v60  ;;  %524 = vst.msk [vmem:[#allocation2 + $0x3c8] sm:$0xff] %vm24683_vm1, %v396_v57  ;;  %v397_v58 = vld [vmem:[%s21384_s5 + $0x3a8] sm:$0xff]  ;;  %v8560_v59 = vld [vmem:[#allocation2 + $0x1e0] sm:$0xff]  ;;  %v398_v61 = vld [vmem:[%s21384_s5 + $0x3b0] sm:$0xff] }
  0x61   : > { %19313 = vmatmul.mubr.msk.f32.gmra.mrb[32].mxu0 %vm24683_vm1, %v8538_v9  ;;  %18539 = vmatprep.mubr.msk.f32.mxu1 %vm24683_vm1, %v8535_v62  ;;  %525 = vst.msk [vmem:[#allocation2 + $0x3d0] sm:$0xff] %vm24683_vm1, %v397_v58  ;;  %v8561_v60 = vld [vmem:[#allocation2 + $0x1e8] sm:$0xff]  ;;  %526 = vst.msk [vmem:[#allocation2 + $0x3d8] sm:$0xff] %vm24683_vm1, %v398_v61  ;;  %v399_v62 = vld [vmem:[%s21384_s5 + $0x3b8] sm:$0xff] }
  0x62   : > { %19315 = vmatprep.mubr.msk.f32.mxu0 %vm24683_vm1, %v8539_v11  ;;  %527 = vst.msk [vmem:[#allocation2 + $0x3e0] sm:$0xff] %vm24683_vm1, %v399_v62  ;;  %v8562_v63 = vld [vmem:[#allocation2 + $0x1f0] sm:$0xff]  ;;  %v8563_v0 = vld [vmem:[#allocation2 + $0x1f8] sm:$0xff]  ;;  %v400_v2 = vld [vmem:[%s21384_s5 + $0x3c0] sm:$0xff] }
  0x63   : > { %528 = vst.msk [vmem:[#allocation2 + $0x3e8] sm:$0xff] %vm24683_vm1, %v400_v2  ;;  %v8564_v4 = vld [vmem:[#allocation2 + $0x200] sm:$0xff]  ;;  %v402_v7 = vld [vmem:[%s21384_s5 + $0x3d0] sm:$0xff]  ;;  %v403_v8 = vld [vmem:[%s21384_s5 + $0x3d8] sm:$0xff] }
  0x64   : > { %18540 = vmatmul.mubr.msk.f32.gmra.mrb[34].mxu1 %vm24683_vm1, %v8536_v3  ;;  %v401_v3 = vld [vmem:[%s21384_s5 + $0x3c8] sm:$0xff]  ;;  %530 = vst.msk [vmem:[#allocation2 + $0x3f8] sm:$0xff] %vm24683_vm1, %v402_v7  ;;  %531 = vst.msk [vmem:[#allocation2 + $0x400] sm:$0xff] %vm24683_vm1, %v403_v8  ;;  %v8567_v10 = vld [vmem:[#allocation2 + $0x218] sm:$0xff] }
  0x65   : > { %19316 = vmatmul.mubr.msk.f32.gmra.mrb[34].mxu0 %vm24683_vm1, %v8540_v15  ;;  %18542 = vmatprep.mubr.msk.f32.mxu1 %vm24683_vm1, %v8537_v5  ;;  %529 = vst.msk [vmem:[#allocation2 + $0x3f0] sm:$0xff] %vm24683_vm1, %v401_v3  ;;  %v8565_v5 = vld [vmem:[#allocation2 + $0x208] sm:$0xff]  ;;  %v8568_v12 = vld [vmem:[#allocation2 + $0x220] sm:$0xff]  ;;  %v3047_v25 = vld [vmem:[#allocation2 + $0x230] sm:$0xff]  ;;  %v568_v3 = vadd.s32 184, %v21780_v6 }
  0x66   : > { %19318 = vmatprep.mubr.msk.f32.mxu0 %vm24683_vm1, %v8541_v17  ;;  %v9855_v13 = vld [vmem:[#allocation2 + $0x29] sm:$0xff]  ;;  %v9858_v18 = vld [vmem:[#allocation2 + $0x41] sm:$0xff]  ;;  %v9857_v20 = vld [vmem:[#allocation2 + $0x39] sm:$0xff]  ;;  %24915 = vst [vmem:[#allocation4_spill] sm:$0xff] %v24914_v28  ;;  %v25101_v28 = vmov 0 }
  0x67   : > { %v21802_v16 = vld [vmem:[%s24671_s2 + $0x8] sm:$0x7]  ;;  %v3051_v37 = vld [vmem:[#allocation2 + $0x250] sm:$0xff]  ;;  %v3065_v19 = vld [vmem:[#allocation2 + $0x2c0] sm:$0xff] }
  0x68   : > { %18543 = vmatmul.mubr.msk.f32.gmra.mrb[36].mxu1 %vm24683_vm1, %v8538_v9  ;;  %v8566_v9 = vld [vmem:[#allocation2 + $0x210] sm:$0xff]  ;;  %18874 = vmatprep.subr.msk.mxu1 %vm24674_vm0, %v21802_v16  ;;  %v9862_v29 = vld [vmem:[#allocation2 + $0x61] sm:$0xff] }
  0x69   : > { %19319 = vmatmul.mubr.msk.f32.gmra.mrb[36].mxu0 %vm24683_vm1, %v8542_v22  ;;  %18545 = vmatprep.mubr.msk.f32.mxu1 %vm24683_vm1, %v8539_v11  ;;  %v548_v11 = vadd.s32 24, %v21780_v6  ;;  %v9990_v33 = vsel %vm21823_vm3, %v9862_v29, 0.0  ;;  %v3050_v34 = vld [vmem:[#allocation2 + $0x248] sm:$0xff]  ;;  %v9864_v38 = vld [vmem:[#allocation2 + $0x71] sm:$0xff] }
  0x6a   : > { %19321 = vmatprep.mubr.msk.f32.mxu0 %vm24683_vm1, %v8543_v23  ;;  %v9866_v42 = vld [vmem:[#allocation2 + $0x81] sm:$0xff]  ;;  %v3055_v49 = vld [vmem:[#allocation2 + $0x270] sm:$0xff] }
  0x6b   : > { %v698_v14 = vand.u32 31, %v548_v11  ;;  %v3054_v46 = vld [vmem:[#allocation2 + $0x268] sm:$0xff]  ;;  %v9868_v50 = vld [vmem:[#allocation2 + $0x91] sm:$0xff] }
  0x6c   : > { %18546 = vmatmul.mubr.msk.f32.gmra.mrb[38].mxu1 %vm24683_vm1, %v8540_v15  ;;  %v9856_v15 = vld [vmem:[#allocation2 + $0x31] sm:$0xff]  ;;  %v9870_v54 = vld [vmem:[#allocation2 + $0xa1] sm:$0xff]  ;;  %v9875_v8 = vld [vmem:[#allocation2 + $0xc9] sm:$0xff] }
  0x6d   : > { %19322 = vmatmul.mubr.msk.f32.gmra.mrb[38].mxu0 %vm24683_vm1, %v8544_v26  ;;  %18548 = vmatprep.mubr.msk.f32.mxu1 %vm24683_vm1, %v8541_v17  ;;  %vm21804_vm2 = vcmp.ne.s32.totalorder %v698_v14, 31  ;;  %v24910_v17 = vmov 0  ;;  %v3058_v58 = vld [vmem:[#allocation2 + $0x288] sm:$0xff]  ;;  %v3059_v61 = vld [vmem:[#allocation2 + $0x290] sm:$0xff]  ;;  %v24925_v14 = vmov 0 }
  0x6e   : > { %19324 = vmatprep.mubr.msk.f32.mxu0 %vm24683_vm1, %v8545_v27  ;;  %v24911_v17 = vsel %vm21804_vm2, 4294967295, %v24910_v17  ;;  %v9986_v21 = vsel %vm21804_vm2, %v9858_v18, 0.0  ;;  %v9872_v62 = vld [vmem:[#allocation2 + $0xb1] sm:$0xff]  ;;  %v9874_v2 = vld [vmem:[#allocation2 + $0xc1] sm:$0xff]  ;;  %v572_v18 = vadd.s32 216, %v21780_v6 }
  0x6f   : > { %24912 = vst [vmem:[#allocation3_spill] sm:$0xff] %v24911_v17  ;;  %v3062_v7 = vld [vmem:[#allocation2 + $0x2a8] sm:$0xff]  ;;  %v9876_v11 = vld [vmem:[#allocation2 + $0xd1] sm:$0xff]  ;;  %v25104_v17 = vmov 0 }
  0x70   : > { %18549 = vmatmul.mubr.msk.f32.gmra.mrb[40].mxu1 %vm24683_vm1, %v8542_v22  ;;  %v3046_v22 = vld [vmem:[#allocation2 + $0x228] sm:$0xff]  ;;  %v3067_v24 = vld [vmem:[#allocation2 + $0x2d0] sm:$0xff] }
  0x71   : > { %19325 = vmatmul.mubr.msk.f32.gmra.mrb[40].mxu0 %vm24683_vm1, %v8546_v31  ;;  %18551 = vmatprep.mubr.msk.f32.mxu1 %vm24683_vm1, %v8543_v23  ;;  %v9859_v23 = vld [vmem:[#allocation2 + $0x49] sm:$0xff]  ;;  %v9882_v29 = vld [vmem:[#allocation2 + $0x101] sm:$0xff] }
  0x72   : > { %19327 = vmatprep.mubr.msk.f32.mxu0 %vm24683_vm1, %v8547_v32 }
  0x74   : > { %18552 = vmatmul.mubr.msk.f32.gmra.mrb[42].mxu1 %vm24683_vm1, %v8544_v26  ;;  %v3048_v26 = vld [vmem:[#allocation2 + $0x238] sm:$0xff] }
  0x75   : > { %19328 = vmatmul.mubr.msk.f32.gmra.mrb[42].mxu0 %vm24683_vm1, %v8548_v35  ;;  %18554 = vmatprep.mubr.msk.f32.mxu1 %vm24683_vm1, %v8545_v27  ;;  %v9861_v27 = vld [vmem:[#allocation2 + $0x59] sm:$0xff] }
  0x76   : > { %19330 = vmatprep.mubr.msk.f32.mxu0 %vm24683_vm1, %v8549_v36 }
  0x78   : > { %18555 = vmatmul.mubr.msk.f32.gmra.mrb[44].mxu1 %vm24683_vm1, %v8546_v31  ;;  %v556_v31 = vadd.s32 88, %v21780_v6 }
  0x79   : > { %19331 = vmatmul.mubr.msk.f32.gmra.mrb[44].mxu0 %vm24683_vm1, %v8550_v39  ;;  %18557 = vmatprep.mubr.msk.f32.mxu1 %vm24683_vm1, %v8547_v32  ;;  %v3049_v32 = vld [vmem:[#allocation2 + $0x240] sm:$0xff] }
  0x7a   : > { %19333 = vmatprep.mubr.msk.f32.mxu0 %vm24683_vm1, %v8551_v40 }
  0x7c   : > { %18558 = vmatmul.mubr.msk.f32.gmra.mrb[46].mxu1 %vm24683_vm1, %v8548_v35  ;;  %v9863_v35 = vld [vmem:[#allocation2 + $0x69] sm:$0xff] }
  0x7d   : > { %19334 = vmatmul.mubr.msk.f32.gmra.mrb[46].mxu0 %vm24683_vm1, %v8552_v43  ;;  %18560 = vmatprep.mubr.msk.f32.mxu1 %vm24683_vm1, %v8549_v36  ;;  %v754_v36 = vand.u32 31, %v556_v31  ;;  %v576_v31 = vadd.s32 248, %v21780_v6 }
  0x7e   : > { %19336 = vmatprep.mubr.msk.f32.mxu0 %vm24683_vm1, %v8553_v44 }
  0x7f   : > { %vm21838_vm4 = vcmp.ne.s32.totalorder %v754_v36, 31  ;;  %v894_v36 = vand.u32 31, %v576_v31  ;;  %v9900_v31 = vld [vmem:[#allocation2 + $0x191] sm:$0xff] }
  0x80   : > { %18561 = vmatmul.mubr.msk.f32.gmra.mrb[48].mxu1 %vm24683_vm1, %v8550_v39  ;;  %v3052_v39 = vld [vmem:[#allocation2 + $0x258] sm:$0xff]  ;;  %v24917_v41 = vsel %vm21838_vm4, 4294967295, %v24916_v41  ;;  %v9994_v45 = vsel %vm21838_vm4, %v9866_v42, 0.0  ;;  %v24931_v42 = vmov 0 }
  0x81   : > { %19337 = vmatmul.mubr.msk.f32.gmra.mrb[48].mxu0 %vm24683_vm1, %v8554_v47  ;;  %18563 = vmatprep.mubr.msk.f32.mxu1 %vm24683_vm1, %v8551_v40  ;;  %v9865_v40 = vld [vmem:[#allocation2 + $0x79] sm:$0xff]  ;;  %24918 = vst [vmem:[#allocation5_spill] sm:$0xff] %v24917_v41  ;;  %vm21913_vm9 = vcmp.ne.s32.totalorder %v894_v36, 31  ;;  %v596_v36 = vadd.s32 408, %v21780_v6 }
  0x82   : > { %19339 = vmatprep.mubr.msk.f32.mxu0 %vm24683_vm1, %v8555_v48  ;;  %v24932_v42 = vsel %vm21913_vm9, 4294967295, %v24931_v42 }
  0x83   : > { %24933 = vst [vmem:[#allocation10_spill] sm:$0xff] %v24932_v42 }
  0x84   : > { %18564 = vmatmul.mubr.msk.f32.gmra.mrb[50].mxu1 %vm24683_vm1, %v8552_v43  ;;  %v560_v43 = vadd.s32 120, %v21780_v6 }
  0x85   : > { %19340 = vmatmul.mubr.msk.f32.gmra.mrb[50].mxu0 %vm24683_vm1, %v8556_v51  ;;  %18566 = vmatprep.mubr.msk.f32.mxu1 %vm24683_vm1, %v8553_v44  ;;  %v3053_v44 = vld [vmem:[#allocation2 + $0x260] sm:$0xff] }
  0x86   : > { %19342 = vmatprep.mubr.msk.f32.mxu0 %vm24683_vm1, %v8557_v52 }
  0x88   : > { %18567 = vmatmul.mubr.msk.f32.gmra.mrb[52].mxu1 %vm24683_vm1, %v8554_v47  ;;  %v9867_v47 = vld [vmem:[#allocation2 + $0x89] sm:$0xff] }
  0x89   : > { %19343 = vmatmul.mubr.msk.f32.gmra.mrb[52].mxu0 %vm24683_vm1, %v8558_v55  ;;  %18569 = vmatprep.mubr.msk.f32.mxu1 %vm24683_vm1, %v8555_v48  ;;  %v782_v48 = vand.u32 31, %v560_v43  ;;  %v9886_v43 = vld [vmem:[#allocation2 + $0x121] sm:$0xff] }
  0x8a   : > { %19345 = vmatprep.mubr.msk.f32.mxu0 %vm24683_vm1, %v8559_v56 }
  0x8b   : > { %vm21853_vm5 = vcmp.ne.s32.totalorder %v782_v48, 31  ;;  %v9887_v48 = vld [vmem:[#allocation2 + $0x129] sm:$0xff] }
  0x8c   : > { %18570 = vmatmul.mubr.msk.f32.gmra.mrb[54].mxu1 %vm24683_vm1, %v8556_v51  ;;  %v3056_v51 = vld [vmem:[#allocation2 + $0x278] sm:$0xff]  ;;  %v24920_v53 = vsel %vm21853_vm5, 4294967295, %v24919_v53  ;;  %v9998_v57 = vsel %vm21853_vm5, %v9870_v54, 0.0 }
  0x8d   : > { %19346 = vmatmul.mubr.msk.f32.gmra.mrb[54].mxu0 %vm24683_vm1, %v8560_v59  ;;  %18572 = vmatprep.mubr.msk.f32.mxu1 %vm24683_vm1, %v8557_v52  ;;  %v9869_v52 = vld [vmem:[#allocation2 + $0x99] sm:$0xff]  ;;  %24921 = vst [vmem:[#allocation6_spill] sm:$0xff] %v24920_v53 }
  0x8e   : > { %19348 = vmatprep.mubr.msk.f32.mxu0 %vm24683_vm1, %v8561_v60  ;;  %v9889_v54 = vld [vmem:[#allocation2 + $0x139] sm:$0xff] }
  0x90   : > { %18573 = vmatmul.mubr.msk.f32.gmra.mrb[56].mxu1 %vm24683_vm1, %v8558_v55  ;;  %v564_v55 = vadd.s32 152, %v21780_v6 }
  0x91   : > { %19349 = vmatmul.mubr.msk.f32.gmra.mrb[56].mxu0 %vm24683_vm1, %v8562_v63  ;;  %18575 = vmatprep.mubr.msk.f32.mxu1 %vm24683_vm1, %v8559_v56  ;;  %v3057_v56 = vld [vmem:[#allocation2 + $0x280] sm:$0xff] }
  0x92   : > { %19351 = vmatprep.mubr.msk.f32.mxu0 %vm24683_vm1, %v8563_v0 }
  0x94   : > { %18576 = vmatmul.mubr.msk.f32.gmra.mrb[58].mxu1 %vm24683_vm1, %v8560_v59  ;;  %v9871_v59 = vld [vmem:[#allocation2 + $0xa9] sm:$0xff] }
  0x95   : > { %19352 = vmatmul.mubr.msk.f32.gmra.mrb[58].mxu0 %vm24683_vm1, %v8564_v4  ;;  %18578 = vmatprep.mubr.msk.f32.mxu1 %vm24683_vm1, %v8561_v60  ;;  %v810_v60 = vand.u32 31, %v564_v55  ;;  %v24934_v55 = vmov 0 }
  0x96   : > { %19354 = vmatprep.mubr.msk.f32.mxu0 %vm24683_vm1, %v8565_v5 }
  0x97   : > { %vm21868_vm6 = vcmp.ne.s32.totalorder %v810_v60, 31  ;;  %v3078_v60 = vld [vmem:[#allocation2 + $0x328] sm:$0xff] }
  0x98   : > { %18579 = vmatmul.mubr.msk.f32.gmra.mrb[60].mxu1 %vm24683_vm1, %v8562_v63  ;;  %v3060_v63 = vld [vmem:[#allocation2 + $0x298] sm:$0xff]  ;;  %v24923_v1 = vsel %vm21868_vm6, 4294967295, %v24922_v1 }
  0x99   : > { %19355 = vmatmul.mubr.msk.f32.gmra.mrb[60].mxu0 %vm24683_vm1, %v8566_v9  ;;  %18581 = vmatprep.mubr.msk.f32.mxu1 %vm24683_vm1, %v8563_v0  ;;  %v9873_v0 = vld [vmem:[#allocation2 + $0xb9] sm:$0xff]  ;;  %24924 = vst [vmem:[#allocation7_spill] sm:$0xff] %v24923_v1  ;;  %v9963_v1 = vld [vmem:[#allocation2 + $0x389] sm:$0xff] }
  0x9a   : > { %19357 = vmatprep.mubr.msk.f32.mxu0 %vm24683_vm1, %v8567_v10 }
  0x9c   : > { %18582 = vmatmul.mubr.msk.f32.gmra.mrb[62].mxu1 %vm24683_vm1, %v8564_v4  ;;  %v3061_v4 = vld [vmem:[#allocation2 + $0x2a0] sm:$0xff] }
  0x9d   : > { %19358 = vmatmul.mubr.msk.f32.gmra.mrb[62].mxu0 %vm24683_vm1, %v8568_v12  ;;  %18584 = vmatprep.mubr.msk.f32.mxu1 %vm24683_vm1, %v8565_v5  ;;  %v10002_v5 = vsel %vm21868_vm6, %v9874_v2, 0.0  ;;  %v3080_v2 = vld [vmem:[#allocation2 + $0x338] sm:$0xff] }
  0x9e   : > { %19458 = vmatprep.mubr.msk.f32.mxu0 %vm24683_vm1, %v9855_v13  ;;  %v9877_v13 = vld [vmem:[#allocation2 + $0xd9] sm:$0xff] }
  0xa0   : > { %18585 = vmatmul.mubr.msk.f32.gmra.mrb[64].mxu1 %vm24683_vm1, %v8566_v9  ;;  %v838_v9 = vand.u32 31, %v568_v3  ;;  %v9893_v3 = vld [vmem:[#allocation2 + $0x159] sm:$0xff] }
  0xa1   : > { %19459 = vmatmul.mubr.msk.f32.vlgmr.msra.gmra.mrb[0].mxu0 %vm24683_vm1, %v9856_v15  ;;  %18587 = vmatprep.mubr.msk.f32.mxu1 %vm24683_vm1, %v8567_v10  ;;  %v3063_v10 = vld [vmem:[#allocation2 + $0x2b0] sm:$0xff]  ;;  %v9878_v15 = vld [vmem:[#allocation2 + $0xe1] sm:$0xff] }
  0xa2   : > { %19651 = vmatpush3.msk.msra.mxu0 %vm24674_vm0, %v21576_v30  ;;  %19461 = vmatprep.mubr.msk.f32.mxu0 %vm24683_vm1, %v9857_v20  ;;  %v9860_v30 = vld [vmem:[#allocation2 + $0x51] sm:$0xff]  ;;  %vm21883_vm7 = vcmp.ne.s32.totalorder %v838_v9, 31 }
  0xa3   : > { %v24926_v14 = vsel %vm21883_vm7, 4294967295, %v24925_v14  ;;  %v10006_v20 = vsel %vm21883_vm7, %v9878_v15, 0.0  ;;  %v9896_v15 = vld [vmem:[#allocation2 + $0x171] sm:$0xff] }
  0xa4   : > { %18588 = vmatmul.mubr.msk.f32.gmra.mrb[66].mxu1 %vm24683_vm1, %v8568_v12  ;;  %v3064_v12 = vld [vmem:[#allocation2 + $0x2b8] sm:$0xff]  ;;  %24927 = vst [vmem:[#allocation8_spill] sm:$0xff] %v24926_v14  ;;  %v25089_v14 = vmov 0 }
  0xa5   : > { %19462 = vmatmul.mubr.msk.f32.gmra.mrb[2].mxu0 %vm24683_vm1, %v9986_v21  ;;  %18590 = vmatprep.mubr.msk.f32.mxu1 %vm24683_vm1, %v3046_v22  ;;  %v3066_v21 = vld [vmem:[#allocation2 + $0x2c8] sm:$0xff] }
  0xa6   : > { %19464 = vmatprep.mubr.msk.f32.mxu0 %vm24683_vm1, %v9859_v23  ;;  %v9879_v22 = vld [vmem:[#allocation2 + $0xe9] sm:$0xff]  ;;  %v866_v23 = vand.u32 31, %v572_v18  ;;  %v3084_v18 = vld [vmem:[#allocation2 + $0x358] sm:$0xff] }
  0xa8   : > { %18591 = vmatmul.mubr.msk.f32.gmra.mrb[68].mxu1 %vm24683_vm1, %v3047_v25  ;;  %v9880_v25 = vld [vmem:[#allocation2 + $0xf1] sm:$0xff]  ;;  %vm21898_vm8 = vcmp.ne.s32.totalorder %v866_v23, 31  ;;  %v3085_v23 = vld [vmem:[#allocation2 + $0x360] sm:$0xff] }
  0xa9   : > { %19465 = vmatmul.mubr.msk.f32.gmra.mrb[4].mxu0 %vm24683_vm1, %v9860_v30  ;;  %18593 = vmatprep.mubr.msk.f32.mxu1 %vm24683_vm1, %v3048_v26  ;;  %v3068_v30 = vld [vmem:[#allocation2 + $0x2d8] sm:$0xff] }
  0xaa   : > { %19467 = vmatprep.mubr.msk.f32.mxu0 %vm24683_vm1, %v9861_v27  ;;  %v9881_v26 = vld [vmem:[#allocation2 + $0xf9] sm:$0xff]  ;;  %v24928_v27 = vmov 0 }
  0xab   : > { %v24929_v27 = vsel %vm21898_vm8, 4294967295, %v24928_v27 }
  0xac   : > { %18594 = vmatmul.mubr.msk.f32.gmra.mrb[70].mxu1 %vm24683_vm1, %v3049_v32  ;;  %24930 = vst [vmem:[#allocation9_spill] sm:$0xff] %v24929_v27  ;;  %v3069_v32 = vld [vmem:[#allocation2 + $0x2e0] sm:$0xff]  ;;  %v25086_v27 = vmov 0 }
  0xad   : > { %19468 = vmatmul.mubr.msk.f32.gmra.mrb[6].mxu0 %vm24683_vm1, %v9990_v33  ;;  %18596 = vmatprep.mubr.msk.f32.mxu1 %vm24683_vm1, %v3050_v34  ;;  %v10010_v33 = vsel %vm21898_vm8, %v9882_v29, 0.0  ;;  %v3070_v34 = vld [vmem:[#allocation2 + $0x2e8] sm:$0xff]  ;;  %v3087_v29 = vld [vmem:[#allocation2 + $0x370] sm:$0xff] }
  0xae   : > { %19470 = vmatprep.mubr.msk.f32.mxu0 %vm24683_vm1, %v9863_v35  ;;  %v9883_v35 = vld [vmem:[#allocation2 + $0x109] sm:$0xff] }
  0xb0   : > { %18597 = vmatmul.mubr.msk.f32.gmra.mrb[72].mxu1 %vm24683_vm1, %v3051_v37  ;;  %v3071_v37 = vld [vmem:[#allocation2 + $0x2f0] sm:$0xff] }
  0xb1   : > { %19471 = vmatmul.mubr.msk.f32.gmra.mrb[8].mxu0 %vm24683_vm1, %v9864_v38  ;;  %18599 = vmatprep.mubr.msk.f32.mxu1 %vm24683_vm1, %v3052_v39  ;;  %v9884_v38 = vld [vmem:[#allocation2 + $0x111] sm:$0xff] }
  0xb2   : > { %19473 = vmatprep.mubr.msk.f32.mxu0 %vm24683_vm1, %v9865_v40  ;;  %v3072_v39 = vld [vmem:[#allocation2 + $0x2f8] sm:$0xff] }
  0xb3   : > { %v9885_v40 = vld [vmem:[#allocation2 + $0x119] sm:$0xff] }
  0xb4   : > { %18600 = vmatmul.mubr.msk.f32.gmra.mrb[74].mxu1 %vm24683_vm1, %v3053_v44  ;;  %v580_v44 = vadd.s32 280, %v21780_v6 }
  0xb5   : > { %19474 = vmatmul.mubr.msk.f32.gmra.mrb[10].mxu0 %vm24683_vm1, %v9994_v45  ;;  %18602 = vmatprep.mubr.msk.f32.mxu1 %vm24683_vm1, %v3054_v46  ;;  %v3073_v45 = vld [vmem:[#allocation2 + $0x300] sm:$0xff]  ;;  %v10014_v46 = vsel %vm21913_vm9, %v9886_v43, 0.0  ;;  %v1034_v43 = vand.u32 31, %v596_v36  ;;  %v3104_v36 = vld [vmem:[#allocation2 + $0x3f8] sm:$0xff] }
  0xb6   : > { %19476 = vmatprep.mubr.msk.f32.mxu0 %vm24683_vm1, %v9867_v47  ;;  %v3074_v47 = vld [vmem:[#allocation2 + $0x308] sm:$0xff] }
  0xb7   : > { %vm21988_vm14 = vcmp.ne.s32.totalorder %v1034_v43, 31  ;;  %v24958_v43 = vmov 0 }
  0xb8   : > { %18603 = vmatmul.mubr.msk.f32.gmra.mrb[76].mxu1 %vm24683_vm1, %v3055_v49  ;;  %v922_v49 = vand.u32 31, %v580_v44  ;;  %v3091_v44 = vld [vmem:[#allocation2 + $0x390] sm:$0xff] }
  0xb9   : > { %19477 = vmatmul.mubr.msk.f32.gmra.mrb[12].mxu0 %vm24683_vm1, %v9868_v50  ;;  %18605 = vmatprep.mubr.msk.f32.mxu1 %vm24683_vm1, %v3056_v51  ;;  %v3075_v50 = vld [vmem:[#allocation2 + $0x310] sm:$0xff] }
  0xba   : > { %19479 = vmatprep.mubr.msk.f32.mxu0 %vm24683_vm1, %v9869_v52  ;;  %v9888_v51 = vld [vmem:[#allocation2 + $0x131] sm:$0xff]  ;;  %vm21928_vm10 = vcmp.ne.s32.totalorder %v922_v49, 31  ;;  %v9906_v49 = vld [vmem:[#allocation2 + $0x1c1] sm:$0xff] }
  0xbb   : > { %v3076_v52 = vld [vmem:[#allocation2 + $0x318] sm:$0xff]  ;;  %v24935_v55 = vsel %vm21928_vm10, 4294967295, %v24934_v55 }
  0xbc   : > { %18606 = vmatmul.mubr.msk.f32.gmra.mrb[78].mxu1 %vm24683_vm1, %v3057_v56  ;;  %24936 = vst [vmem:[#allocation11_spill] sm:$0xff] %v24935_v55  ;;  %v9890_v56 = vld [vmem:[#allocation2 + $0x141] sm:$0xff] }
  0xbd   : > { %19480 = vmatmul.mubr.msk.f32.gmra.mrb[14].mxu0 %vm24683_vm1, %v9998_v57  ;;  %18608 = vmatprep.mubr.msk.f32.mxu1 %vm24683_vm1, %v3058_v58  ;;  %v584_v57 = vadd.s32 312, %v21780_v6  ;;  %v3077_v58 = vld [vmem:[#allocation2 + $0x320] sm:$0xff] }
  0xbe   : > { %19482 = vmatprep.mubr.msk.f32.mxu0 %vm24683_vm1, %v9871_v59  ;;  %v10018_v59 = vsel %vm21928_vm10, %v9890_v56, 0.0  ;;  %v9907_v56 = vld [vmem:[#allocation2 + $0x1c9] sm:$0xff] }
  0xc0   : > { %18609 = vmatmul.mubr.msk.f32.gmra.mrb[80].mxu1 %vm24683_vm1, %v3059_v61  ;;  %v9891_v61 = vld [vmem:[#allocation2 + $0x149] sm:$0xff] }
  0xc1   : > { %19483 = vmatmul.mubr.msk.f32.gmra.mrb[16].mxu0 %vm24683_vm1, %v9872_v62  ;;  %18611 = vmatprep.mubr.msk.f32.mxu1 %vm24683_vm1, %v3060_v63  ;;  %v950_v62 = vand.u32 31, %v584_v57  ;;  %v3079_v63 = vld [vmem:[#allocation2 + $0x330] sm:$0xff] }
  0xc2   : > { %19485 = vmatprep.mubr.msk.f32.mxu0 %vm24683_vm1, %v9873_v0  ;;  %v9892_v0 = vld [vmem:[#allocation2 + $0x151] sm:$0xff] }
  0xc3   : > { %vm21943_vm11 = vcmp.ne.s32.totalorder %v950_v62, 31  ;;  %v24949_v62 = vmov 0 }
  0xc4   : > { %18612 = vmatmul.mubr.msk.f32.gmra.mrb[82].mxu1 %vm24683_vm1, %v3061_v4  ;;  %v24937_v4 = vmov 0 }
  0xc5   : > { %19486 = vmatmul.mubr.msk.f32.gmra.mrb[18].mxu0 %vm24683_vm1, %v10002_v5  ;;  %18614 = vmatprep.mubr.msk.f32.mxu1 %vm24683_vm1, %v3062_v7  ;;  %v24938_v4 = vsel %vm21943_vm11, 4294967295, %v24937_v4  ;;  %v9894_v5 = vld [vmem:[#allocation2 + $0x161] sm:$0xff]  ;;  %v588_v7 = vadd.s32 344, %v21780_v6 }
  0xc6   : > { %19488 = vmatprep.mubr.msk.f32.mxu0 %vm24683_vm1, %v9875_v8  ;;  %24939 = vst [vmem:[#allocation12_spill] sm:$0xff] %v24938_v4  ;;  %v3081_v8 = vld [vmem:[#allocation2 + $0x340] sm:$0xff]  ;;  %v10022_v9 = vsel %vm21943_vm11, %v9894_v5, 0.0  ;;  %v3098_v5 = vld [vmem:[#allocation2 + $0x3c8] sm:$0xff] }
  0xc7   : > { %v9959_v4 = vld [vmem:[#allocation2 + $0x369] sm:$0xff] }
  0xc8   : > { %18615 = vmatmul.mubr.msk.f32.gmra.mrb[84].mxu1 %vm24683_vm1, %v3063_v10  ;;  %v3082_v10 = vld [vmem:[#allocation2 + $0x348] sm:$0xff] }
  0xc9   : > { %19489 = vmatmul.mubr.msk.f32.gmra.mrb[20].mxu0 %vm24683_vm1, %v9876_v11  ;;  %18617 = vmatprep.mubr.msk.f32.mxu1 %vm24683_vm1, %v3064_v12  ;;  %v9895_v11 = vld [vmem:[#allocation2 + $0x169] sm:$0xff]  ;;  %v978_v12 = vand.u32 31, %v588_v7 }
  0xca   : > { %19491 = vmatprep.mubr.msk.f32.mxu0 %vm24683_vm1, %v9877_v13  ;;  %v3083_v13 = vld [vmem:[#allocation2 + $0x350] sm:$0xff] }
  0xcb   : > { %vm21958_vm12 = vcmp.ne.s32.totalorder %v978_v12, 31  ;;  %v9911_v7 = vld [vmem:[#allocation2 + $0x1e9] sm:$0xff]  ;;  %v9913_v12 = vld [vmem:[#allocation2 + $0x1f9] sm:$0xff] }
  0xcc   : > { %18618 = vmatmul.mubr.msk.f32.gmra.mrb[86].mxu1 %vm24683_vm1, %v3065_v19  ;;  %v9897_v19 = vld [vmem:[#allocation2 + $0x179] sm:$0xff] }
  0xcd   : > { %19492 = vmatmul.mubr.msk.f32.gmra.mrb[22].mxu0 %vm24683_vm1, %v10006_v20  ;;  %18620 = vmatprep.mubr.msk.f32.mxu1 %vm24683_vm1, %v3066_v21  ;;  %v24940_v20 = vmov 0  ;;  %v9898_v21 = vld [vmem:[#allocation2 + $0x181] sm:$0xff] }
  0xce   : > { %19494 = vmatprep.mubr.msk.f32.mxu0 %vm24683_vm1, %v9879_v22  ;;  %v24941_v20 = vsel %vm21958_vm12, 4294967295, %v24940_v20  ;;  %v592_v22 = vadd.s32 376, %v21780_v6 }
  0xcf   : > { %24942 = vst [vmem:[#allocation13_spill] sm:$0xff] %v24941_v20  ;;  %v25077_v20 = vmov 0 }
  0xd0   : > { %18621 = vmatmul.mubr.msk.f32.gmra.mrb[88].mxu1 %vm24683_vm1, %v3067_v24  ;;  %v10026_v24 = vsel %vm21958_vm12, %v9898_v21, 0.0  ;;  %v405_v21 = vld [vmem:[%s21384_s5 + $0x3e8] sm:$0xff] }
  0xd1   : > { %19495 = vmatmul.mubr.msk.f32.gmra.mrb[24].mxu0 %vm24683_vm1, %v9880_v25  ;;  %18623 = vmatprep.mubr.msk.f32.mxu1 %vm24683_vm1, %v3068_v30  ;;  %v3086_v25 = vld [vmem:[#allocation2 + $0x368] sm:$0xff]  ;;  %533 = vst.msk [vmem:[#allocation2 + $0x410] sm:$0xff] %vm24683_vm1, %v405_v21 }
  0xd2   : > { %19497 = vmatprep.mubr.msk.f32.mxu0 %vm24683_vm1, %v9881_v26  ;;  %v9899_v30 = vld [vmem:[#allocation2 + $0x189] sm:$0xff]  ;;  %v1006_v26 = vand.u32 31, %v592_v22  ;;  %v9926_v21 = vld [vmem:[#allocation2 + $0x261] sm:$0xff] }
  0xd3   : > { %v406_v22 = vld [vmem:[%s21384_s5 + $0x3f0] sm:$0xff] }
  0xd4   : > { %18624 = vmatmul.mubr.msk.f32.gmra.mrb[90].mxu1 %vm24683_vm1, %v3069_v32  ;;  %v3088_v32 = vld [vmem:[#allocation2 + $0x378] sm:$0xff]  ;;  %vm21973_vm13 = vcmp.ne.s32.totalorder %v1006_v26, 31  ;;  %534 = vst.msk [vmem:[#allocation2 + $0x418] sm:$0xff] %vm24683_vm1, %v406_v22  ;;  %v620_v22 = vadd.s32 600, %v21780_v6 }
  0xd5   : > { %19498 = vmatmul.mubr.msk.f32.gmra.mrb[26].mxu0 %vm24683_vm1, %v10010_v33  ;;  %18626 = vmatprep.mubr.msk.f32.mxu1 %vm24683_vm1, %v3070_v34  ;;  %v9901_v33 = vld [vmem:[#allocation2 + $0x199] sm:$0xff]  ;;  %v24943_v34 = vmov 0 }
  0xd6   : > { %19500 = vmatprep.mubr.msk.f32.mxu0 %vm24683_vm1, %v9883_v35  ;;  %v24944_v34 = vsel %vm21973_vm13, 4294967295, %v24943_v34  ;;  %v9902_v35 = vld [vmem:[#allocation2 + $0x1a1] sm:$0xff] }
  0xd7   : > { %24945 = vst [vmem:[#allocation14_spill] sm:$0xff] %v24944_v34  ;;  %v25074_v34 = vmov 0 }
  0xd8   : > { %18627 = vmatmul.mubr.msk.f32.gmra.mrb[92].mxu1 %vm24683_vm1, %v3071_v37  ;;  %v3089_v37 = vld [vmem:[#allocation2 + $0x380] sm:$0xff] }
  0xd9   : > { %19501 = vmatmul.mubr.msk.f32.gmra.mrb[28].mxu0 %vm24683_vm1, %v9884_v38  ;;  %18629 = vmatprep.mubr.msk.f32.mxu1 %vm24683_vm1, %v3072_v39  ;;  %v10030_v38 = vsel %vm21973_vm13, %v9902_v35, 0.0  ;;  %v3090_v39 = vld [vmem:[#allocation2 + $0x388] sm:$0xff]  ;;  %v9916_v35 = vld [vmem:[#allocation2 + $0x211] sm:$0xff]  ;;  %vm24968_vm13 = vcmask 23552  }
  0xda   : > { %19503 = vmatprep.mubr.msk.f32.mxu0 %vm24683_vm1, %v9885_v40  ;;  %v9903_v40 = vld [vmem:[#allocation2 + $0x1a9] sm:$0xff]  ;;  %vm24969_vm12 = vmmov %vm24968_vm13 }
  0xdb   : > { %vm24971_vm10 = vmmov %vm24969_vm12 }
  0xdc   : > { %18630 = vmatmul.mubr.msk.f32.gmra.mrb[94].mxu1 %vm24683_vm1, %v3073_v45  ;;  %v9904_v45 = vld [vmem:[#allocation2 + $0x1b1] sm:$0xff]  ;;  %vm24975_vm9 = vmmov %vm24971_vm10 }
  0xdd   : > { %19504 = vmatmul.mubr.msk.f32.gmra.mrb[30].mxu0 %vm24683_vm1, %v10014_v46  ;;  %18632 = vmatprep.mubr.msk.f32.mxu1 %vm24683_vm1, %v3074_v47  ;;  %v3092_v46 = vld [vmem:[#allocation2 + $0x398] sm:$0xff] }
  0xde   : > { %19506 = vmatprep.mubr.msk.f32.mxu0 %vm24683_vm1, %v9887_v48  ;;  %v9905_v47 = vld [vmem:[#allocation2 + $0x1b9] sm:$0xff]  ;;  %v24946_v48 = vmov 0 }
  0xdf   : > { %v24947_v48 = vsel %vm21988_vm14, 4294967295, %v24946_v48 }
  0xe0   : > { %18633 = vmatmul.mubr.msk.f32.gmra.mrb[96].mxu1 %vm24683_vm1, %v3075_v50  ;;  %24948 = vst [vmem:[#allocation15_spill] sm:$0xff] %v24947_v48  ;;  %v600_v50 = vadd.s32 440, %v21780_v6 }
  0xe1   : > { %19507 = vmatmul.mubr.msk.f32.gmra.mrb[32].mxu0 %vm24683_vm1, %v9888_v51  ;;  %18635 = vmatprep.mubr.msk.f32.mxu1 %vm24683_vm1, %v3076_v52  ;;  %v3093_v51 = vld [vmem:[#allocation2 + $0x3a0] sm:$0xff]  ;;  %v10034_v52 = vsel %vm21988_vm14, %v9906_v49, 0.0  ;;  %vm24964_vm14 = vcmask 1042432  }
  0xe2   : > { %19509 = vmatprep.mubr.msk.f32.mxu0 %vm24683_vm1, %v9889_v54  ;;  %v3094_v54 = vld [vmem:[#allocation2 + $0x3a8] sm:$0xff]  ;;  %v1062_v57 = vand.u32 31, %v600_v50  ;;  %vm24970_vm11 = vmmov %vm24964_vm14 }
  0xe3   : > { %v9919_v50 = vld [vmem:[#allocation2 + $0x229] sm:$0xff] }
  0xe4   : > { %18636 = vmatmul.mubr.msk.f32.gmra.mrb[98].mxu1 %vm24683_vm1, %v3077_v58  ;;  %v3095_v58 = vld [vmem:[#allocation2 + $0x3b0] sm:$0xff]  ;;  %vm22003_vm15 = vcmp.ne.s32.totalorder %v1062_v57, 31  ;;  %v22069_v57 = vld [vmem:[%s24671_s2 + $0x1c] sm:$0x7] }
  0xe5   : > { %19510 = vmatmul.mubr.msk.f32.gmra.mrb[34].mxu0 %vm24683_vm1, %v10018_v59  ;;  %18638 = vmatprep.mubr.msk.f32.mxu1 %vm24683_vm1, %v3078_v60  ;;  %v9908_v59 = vld [vmem:[#allocation2 + $0x1d1] sm:$0xff]  ;;  %v24950_v62 = vsel %vm22003_vm15, 4294967295, %v24949_v62 }
  0xe6   : > { %19512 = vmatprep.mubr.msk.f32.mxu0 %vm24683_vm1, %v9891_v61  ;;  %v3096_v60 = vld [vmem:[#allocation2 + $0x3b8] sm:$0xff]  ;;  %24951 = vst [vmem:[#allocation16_spill] sm:$0xff] %v24950_v62  ;;  %19844 = vmatprep.subr.msk.mxu0 %vm24964_vm14, %v22069_v57  ;;  %vm24972_vm14 = vmmov %vm24971_vm10 }
  0xe7   : > { %v9909_v61 = vld [vmem:[#allocation2 + $0x1d9] sm:$0xff] }
  0xe8   : > { %18639 = vmatmul.mubr.msk.f32.gmra.mrb[100].mxu1 %vm24683_vm1, %v3079_v63  ;;  %v9910_v63 = vld [vmem:[#allocation2 + $0x1e1] sm:$0xff] }
  0xe9   : > { %19513 = vmatmul.mubr.msk.f32.gmra.mrb[36].mxu0 %vm24683_vm1, %v9892_v0  ;;  %18641 = vmatprep.mubr.msk.f32.mxu1 %vm24683_vm1, %v3080_v2  ;;  %v604_v0 = vadd.s32 472, %v21780_v6  ;;  %v3097_v2 = vld [vmem:[#allocation2 + $0x3c0] sm:$0xff] }
  0xea   : > { %19515 = vmatprep.mubr.msk.f32.mxu0 %vm24683_vm1, %v9893_v3  ;;  %v10038_v3 = vsel %vm22003_vm15, %v9910_v63, 0.0  ;;  %v9921_v63 = vld [vmem:[#allocation2 + $0x239] sm:$0xff] }
  0xec   : > { %18642 = vmatmul.mubr.msk.f32.gmra.mrb[102].mxu1 %vm24683_vm1, %v3081_v8  ;;  %v1090_v8 = vand.u32 31, %v604_v0  ;;  %v24965_v0 = vmov 0 }
  0xed   : > { %19516 = vmatmul.mubr.msk.f32.gmra.mrb[38].mxu0 %vm24683_vm1, %v10022_v9  ;;  %18644 = vmatprep.mubr.msk.f32.mxu1 %vm24683_vm1, %v3082_v10  ;;  %v404_v9 = vld [vmem:[%s21384_s5 + $0x3e0] sm:$0xff]  ;;  %v3099_v10 = vld [vmem:[#allocation2 + $0x3d0] sm:$0xff] }
  0xee   : > { %19518 = vmatprep.mubr.msk.f32.mxu0 %vm24683_vm1, %v9895_v11  ;;  %532 = vst.msk [vmem:[#allocation2 + $0x408] sm:$0xff] %vm24683_vm1, %v404_v9  ;;  %v9912_v11 = vld [vmem:[#allocation2 + $0x1f1] sm:$0xff]  ;;  %vm22020_vm0 = vcmp.ne.s32.totalorder %v1090_v8, 31  ;;  %v9923_v9 = vld [vmem:[#allocation2 + $0x249] sm:$0xff] }
  0xf0   : > { %18645 = vmatmul.mubr.msk.f32.gmra.mrb[104].mxu1 %vm24683_vm1, %v3083_v13  ;;  %v3100_v13 = vld [vmem:[#allocation2 + $0x3d8] sm:$0xff] }
  0xf1   : > { %19519 = vmatmul.mubr.msk.f32.gmra.mrb[40].mxu0 %vm24683_vm1, %v9896_v15  ;;  %18647 = vmatprep.mubr.msk.f32.mxu1 %vm24683_vm1, %v3084_v18  ;;  %v24952_v15 = vmov 0  ;;  %v9914_v18 = vld [vmem:[#allocation2 + $0x201] sm:$0xff] }
  0xf2   : > { %19521 = vmatprep.mubr.msk.f32.mxu0 %vm24683_vm1, %v9897_v19  ;;  %v24953_v15 = vsel %vm22020_vm0, 4294967295, %v24952_v15  ;;  %v608_v19 = vadd.s32 504, %v21780_v6 }
  0xf3   : > { %24954 = vst [vmem:[#allocation17_spill] sm:$0xff] %v24953_v15  ;;  %v9955_v15 = vld [vmem:[#allocation2 + $0x349] sm:$0xff] }
  0xf4   : > { %18648 = vmatmul.mubr.msk.f32.gmra.mrb[106].mxu1 %vm24683_vm1, %v3085_v23  ;;  %v3101_v23 = vld [vmem:[#allocation2 + $0x3e0] sm:$0xff]  ;;  %v1118_v26 = vand.u32 31, %v608_v19  ;;  %v24977_v19 = vmov 0 }
  0xf5   : > { %19522 = vmatmul.mubr.msk.f32.gmra.mrb[42].mxu0 %vm24683_vm1, %v10026_v24  ;;  %18650 = vmatprep.mubr.msk.f32.mxu1 %vm24683_vm1, %v3086_v25  ;;  %v10042_v24 = vsel %vm22020_vm0, %v9914_v18, 0.0  ;;  %v9915_v25 = vld [vmem:[#allocation2 + $0x209] sm:$0xff]  ;;  %v9925_v18 = vld [vmem:[#allocation2 + $0x259] sm:$0xff] }
  0xf6   : > { %19524 = vmatprep.mubr.msk.f32.mxu0 %vm24683_vm1, %v9899_v30  ;;  %v3102_v30 = vld [vmem:[#allocation2 + $0x3e8] sm:$0xff]  ;;  %vm22044_vm0 = vcmp.ne.s32.totalorder %v1118_v26, 31 }
  0xf8   : > { %18651 = vmatmul.mubr.msk.f32.gmra.mrb[108].mxu1 %vm24683_vm1, %v3087_v29  ;;  %v407_v29 = vld [vmem:[%s21384_s5 + $0x3f8] sm:$0xff] }
  0xf9   : > { %19525 = vmatmul.mubr.msk.f32.gmra.mrb[44].mxu0 %vm24683_vm1, %v9900_v31  ;;  %18653 = vmatprep.mubr.msk.f32.mxu1 %vm24683_vm1, %v3088_v32  ;;  %v536_v31 = vld [vmem:[%s21389_s8 + $0x20] sm:$0xff]  ;;  %v677_v32 = vand.u32 31, %v21780_v6  ;;  %535 = vst.msk [vmem:[#allocation2 + $0x420] sm:$0xff] %vm24683_vm1, %v407_v29 }
  0xfa   : > { %19527 = vmatprep.mubr.msk.f32.mxu0 %vm24683_vm1, %v9901_v33  ;;  %540 = vst.msk [vmem:[#allocation2 + $0x428] sm:$0xff] %vm24683_vm1, %v536_v31  ;;  %v3103_v33 = vld [vmem:[#allocation2 + $0x3f0] sm:$0xff] }
  0xfb   : > { %vm22049_vm15 = vcmp.ne.s32.totalorder %v677_v32, 0  ;;  %v9927_v31 = vld [vmem:[#allocation2 + $0x269] sm:$0xff]  ;;  %v1202_v32 = vand.u32 31, %v620_v22 }
  0xfc   : > { %18654 = vmatmul.mubr.msk.f32.gmra.mrb[110].mxu1 %vm24683_vm1, %v3089_v37  ;;  %v9917_v37 = vld [vmem:[#allocation2 + $0x219] sm:$0xff]  ;;  %v24959_v43 = vsel %vm22049_vm15, 4294967295, %v24958_v43  ;;  %v22190_v22 = vld [vmem:[#allocation2 + $0x8f] sm:$0xff] }
  0xfd   : > { %19528 = vmatmul.mubr.msk.f32.gmra.mrb[46].mxu0 %vm24683_vm1, %v10030_v38  ;;  %18656 = vmatprep.mubr.msk.f32.mxu1 %vm24683_vm1, %v3090_v39  ;;  %v24955_v38 = vmov 0  ;;  %v9918_v39 = vld [vmem:[#allocation2 + $0x221] sm:$0xff]  ;;  %24960 = vst [vmem:[#allocation19_spill] sm:$0xff] %v24959_v43  ;;  %v25182_v43 = vmov 0 }
  0xfe   : > { %19530 = vmatprep.mubr.msk.f32.mxu0 %vm24683_vm1, %v9903_v40  ;;  %v24956_v38 = vsel %vm22044_vm0, 4294967295, %v24955_v38  ;;  %v612_v40 = vadd.s32 536, %v21780_v6 }
  0xff   : > { %24957 = vst [vmem:[#allocation18_spill] sm:$0xff] %v24956_v38  ;;  %v25065_v38 = vmov 0 }
 0x100   : > { %18657 = vmatmul.mubr.msk.f32.gmra.mrb[112].mxu1 %vm24683_vm1, %v3091_v44  ;;  %v2465_v44 = vld [vmem:[#allocation2 + $0x7] sm:$0xff] }
 0x101   : > { %19531 = vmatmul.mubr.msk.f32.gmra.mrb[48].mxu0 %vm24683_vm1, %v9904_v45  ;;  %18659 = vmatprep.mubr.msk.f32.mxu1 %vm24683_vm1, %v3092_v46  ;;  %v549_v45 = vadd.s32 32, %v21780_v6  ;;  %v3105_v46 = vld [vmem:[#allocation2 + $0x400] sm:$0xff]  ;;  %v2849_v49 = vsel %vm22049_vm15, %v2465_v44, 0.0 }
 0x102   : > { %19533 = vmatprep.mubr.msk.f32.mxu0 %vm24683_vm1, %v9905_v47  ;;  %v10046_v47 = vsel %vm22044_vm0, %v9918_v39, 0.0  ;;  %v9929_v39 = vld [vmem:[#allocation2 + $0x279] sm:$0xff]  ;;  %v9930_v44 = vld [vmem:[#allocation2 + $0x281] sm:$0xff] }
 0x104   : > { %18660 = vmatmul.mubr.msk.f32.gmra.mrb[114].mxu1 %vm24683_vm1, %v3093_v51  ;;  %v1146_v51 = vand.u32 31, %v612_v40  ;;  %v24990_v40 = vmov 0 }
 0x105   : > { %19534 = vmatmul.mubr.msk.f32.gmra.mrb[50].mxu0 %vm24683_vm1, %v10034_v52  ;;  %18662 = vmatprep.mubr.msk.f32.mxu1 %vm24683_vm1, %v3094_v54  ;;  %v705_v52 = vand.u32 31, %v549_v45  ;;  %v2466_v54 = vld [vmem:[#allocation2 + $0xf] sm:$0xff]  ;;  %v624_v45 = vadd.s32 632, %v21780_v6 }
 0x106   : > { %19536 = vmatprep.mubr.msk.f32.mxu0 %vm24683_vm1, %v9907_v56  ;;  %v9920_v56 = vld [vmem:[#allocation2 + $0x231] sm:$0xff]  ;;  %vm22071_vm0 = vcmp.ne.s32.totalorder %v1146_v51, 31 }
 0x108   : > { %18663 = vmatmul.mubr.msk.f32.gmra.mrb[116].mxu1 %vm24683_vm1, %v3095_v58  ;;  %v2467_v58 = vld [vmem:[#allocation2 + $0x17] sm:$0xff] }
 0x109   : > { %19537 = vmatmul.mubr.msk.f32.gmra.mrb[52].mxu0 %vm24683_vm1, %v9908_v59  ;;  %18665 = vmatprep.mubr.msk.f32.mxu1 %vm24683_vm1, %v3096_v60  ;;  %v24961_v59 = vmov 0  ;;  %v9922_v60 = vld [vmem:[#allocation2 + $0x241] sm:$0xff] }
 0x10a   : > { %19539 = vmatprep.mubr.msk.f32.mxu0 %vm24683_vm1, %v9909_v61  ;;  %v24962_v59 = vsel %vm22071_vm0, 4294967295, %v24961_v59  ;;  %v616_v61 = vadd.s32 568, %v21780_v6 }
 0x10b   : > { %24963 = vst [vmem:[#allocation20_spill] sm:$0xff] %v24962_v59  ;;  %v25062_v59 = vmov 0 }
 0x10c   : > { %18666 = vmatmul.mubr.msk.f32.gmra.mrb[118].mxu1 %vm24683_vm1, %v3097_v2  ;;  %v2469_v2 = vld [vmem:[#allocation2 + $0x27] sm:$0xff] }
 0x10d   : > { %19540 = vmatmul.mubr.msk.f32.gmra.mrb[54].mxu0 %vm24683_vm1, %v10038_v3  ;;  %18668 = vmatprep.mubr.msk.f32.mxu1 %vm24683_vm1, %v3098_v5  ;;  %v553_v3 = vadd.s32 64, %v21780_v6  ;;  %v2468_v5 = vld [vmem:[#allocation2 + $0x1f] sm:$0xff] }
 0x10e   : > { %19542 = vmatprep.mubr.msk.f32.mxu0 %vm24683_vm1, %v9911_v7  ;;  %v10050_v7 = vsel %vm22071_vm0, %v9922_v60, 0.0  ;;  %vm24986_vm0 = vmmov %vm24975_vm9  ;;  %v22156_v60 = vld [vmem:[#allocation2 + $0x6f] sm:$0xff] }
 0x110   : > { %18669 = vmatmul.mubr.msk.f32.gmra.mrb[120].mxu1 %vm24683_vm1, %v3099_v10  ;;  %v1174_v10 = vand.u32 31, %v616_v61  ;;  %v9932_v61 = vld [vmem:[#allocation2 + $0x291] sm:$0xff] }
 0x111   : > { %19543 = vmatmul.mubr.msk.f32.gmra.mrb[56].mxu0 %vm24683_vm1, %v9912_v11  ;;  %18671 = vmatprep.mubr.msk.f32.mxu1 %vm24683_vm1, %v3100_v13  ;;  %v733_v11 = vand.u32 31, %v553_v3  ;;  %v2471_v13 = vld [vmem:[#allocation2 + $0x37] sm:$0xff]  ;;  %v25002_v3 = vmov 0 }
 0x112   : > { %19545 = vmatprep.mubr.msk.f32.mxu0 %vm24683_vm1, %v9913_v12  ;;  %v9924_v12 = vld [vmem:[#allocation2 + $0x251] sm:$0xff] }
 0x114   : > { %18672 = vmatmul.mubr.msk.f32.gmra.mrb[122].mxu1 %vm24683_vm1, %v3101_v23  ;;  %v24980_v23 = vmov 0 }
 0x115   : > { %19546 = vmatmul.mubr.msk.f32.gmra.mrb[58].mxu0 %vm24683_vm1, %v10042_v24  ;;  %18674 = vmatprep.mubr.msk.f32.mxu1 %vm24683_vm1, %v3102_v30  ;;  %v22106_v24 = vld [vmem:[#allocation2 + $0x47] sm:$0xff]  ;;  %v2472_v30 = vld [vmem:[#allocation2 + $0x3f] sm:$0xff] }
 0x116   : > { %19548 = vmatprep.mubr.msk.f32.mxu0 %vm24683_vm1, %v9915_v25  ;;  %v557_v25 = vadd.s32 96, %v21780_v6 }
 0x118   : > { %18675 = vmatmul.mubr.msk.f32.gmra.mrb[124].mxu1 %vm24683_vm1, %v3103_v33  ;;  %v761_v33 = vand.u32 31, %v557_v25  ;;  %v9936_v25 = vld [vmem:[#allocation2 + $0x2b1] sm:$0xff] }
 0x119   : > { %19549 = vmatmul.mubr.msk.f32.gmra.mrb[60].mxu0 %vm24683_vm1, %v9916_v35  ;;  %18677 = vmatprep.mubr.msk.f32.mxu1 %vm24683_vm1, %v3104_v36  ;;  %v22122_v35 = vld [vmem:[#allocation2 + $0x4f] sm:$0xff] }
 0x11a   : > { %19551 = vmatprep.mubr.msk.f32.mxu0 %vm24683_vm1, %v9917_v37  ;;  %v9928_v36 = vld [vmem:[#allocation2 + $0x271] sm:$0xff] }
 0x11b   : > { %v22124_v37 = vld [vmem:[#allocation2 + $0x57] sm:$0xff] }
 0x11c   : > { %18678 = vmatmul.mubr.msk.f32.gmra.mrb[126].mxu1 %vm24683_vm1, %v3105_v46  ;;  %v24993_v46 = vmov 0 }
 0x11d   : > { %19552 = vmatmul.mubr.msk.f32.gmra.mrb[62].mxu0 %vm24683_vm1, %v10046_v47  ;;  %18682 = vmatprep.mubr.msk.f32.mxu1 %vm24683_vm1, %v2849_v49  ;;  %v22135_v47 = vld [vmem:[#allocation2 + $0x67] sm:$0xff]  ;;  %v561_v49 = vadd.s32 128, %v21780_v6 }
 0x11e   : > { %19554 = vmatprep.mubr.msk.f32.mxu0 %vm24683_vm1, %v9919_v50  ;;  %vm22078_vm1 = vcmp.ne.s32.totalorder %v705_v52, 0  ;;  %v22144_v50 = vld [vmem:[#allocation2 + $0x5f] sm:$0xff] }
 0x11f   : > { %v24966_v0 = vsel %vm22078_vm1, 4294967295, %v24965_v0  ;;  %v2853_v8 = vsel %vm22078_vm1, %v2469_v2, 0.0  ;;  %v9933_v2 = vld [vmem:[#allocation2 + $0x299] sm:$0xff] }
 0x120   : > { %24967 = vst [vmem:[#allocation21_spill] sm:$0xff] %v24966_v0  ;;  %18683 = vmatmul.mubr.msk.f32.vlgmr.msra.gmra.mrb[0].mxu1 %vm24968_vm13, %v2466_v54  ;;  %vm24973_vm13 = vmmov %vm24971_vm10  ;;  %v9931_v54 = vld [vmem:[#allocation2 + $0x289] sm:$0xff]  ;;  %v25190_v0 = vmov 0 }
 0x121   : > { %19555 = vmatmul.mubr.msk.f32.gmra.mrb[64].mxu0 %vm24969_vm12, %v9920_v56  ;;  %18875 = vmatpush3.msk.msra.mxu1 %vm24970_vm11, %v21802_v16  ;;  %vm24974_vm12 = vmmov %vm24971_vm10  ;;  %v2470_v16 = vld [vmem:[#allocation2 + $0x2f] sm:$0xff]  ;;  %v1230_v56 = vand.u32 31, %v624_v45 }
 0x122   : > { %18685 = vmatprep.mubr.msk.f32.mxu1 %vm24971_vm10, %v2467_v58  ;;  %19557 = vmatprep.mubr.msk.f32.mxu0 %vm24972_vm14, %v9921_v63  ;;  %vm24976_vm11 = vmmov %vm24975_vm9  ;;  %vm22097_vm10 = vcmp.ne.s32.totalorder %v1174_v10, 31  ;;  %vm22102_vm14 = vcmp.ne.s32.totalorder %v733_v11, 0  ;;  %v789_v58 = vand.u32 31, %v561_v49  ;;  %v22158_v63 = vld [vmem:[#allocation2 + $0x77] sm:$0xff]  ;;  %v565_v10 = vadd.s32 160, %v21780_v6  ;;  %v22178_v11 = vld [vmem:[#allocation2 + $0x7f] sm:$0xff] }
 0x123   : > { %v24978_v19 = vsel %vm22097_vm10, 4294967295, %v24977_v19  ;;  %v24981_v23 = vsel %vm22102_vm14, 4294967295, %v24980_v23  ;;  %v10054_v26 = vsel %vm22097_vm10, %v9926_v21, 0.0  ;;  %v2857_v29 = vsel %vm22102_vm14, %v22106_v24, 0.0 }
 0x124   : > { %18686 = vmatmul.mubr.msk.f32.gmra.mrb[2].mxu1 %vm24973_vm13, %v2468_v5  ;;  %24979 = vst [vmem:[#allocation22_spill] sm:$0xff] %v24978_v19  ;;  %24982 = vst [vmem:[#allocation23_spill] sm:$0xff] %v24981_v23  ;;  %v9934_v5 = vld [vmem:[#allocation2 + $0x2a1] sm:$0xff]  ;;  %v817_v21 = vand.u32 31, %v565_v10  ;;  %v636_v10 = vadd.s32 728, %v21780_v6  ;;  %v25198_v23 = vmov 0 }
 0x125   : > { %19558 = vmatmul.mubr.msk.f32.gmra.mrb[66].mxu0 %vm24974_vm12, %v10050_v7  ;;  %18688 = vmatprep.mubr.msk.f32.mxu1 %vm24975_vm9, %v2853_v8  ;;  %vm24983_vm13 = vmmov %vm24975_vm9  ;;  %v628_v7 = vadd.s32 664, %v21780_v6  ;;  %v25005_v8 = vmov 0 }
 0x126   : > { %19560 = vmatprep.mubr.msk.f32.mxu0 %vm24976_vm11, %v9923_v9  ;;  %vm24984_vm12 = vmmov %vm24975_vm9  ;;  %v22169_v9 = vld [vmem:[#allocation2 + $0x87] sm:$0xff] }
 0x127   : > { %vm24985_vm11 = vmmov %vm24975_vm9 }
 0x128   : > { %18689 = vmatmul.mubr.msk.f32.gmra.mrb[4].mxu1 %vm24975_vm9, %v2470_v16  ;;  %vm24987_vm9 = vmmov %vm24986_vm0 }
 0x129   : > { %19561 = vmatmul.mubr.msk.f32.gmra.mrb[68].mxu0 %vm24983_vm13, %v9924_v12  ;;  %18691 = vmatprep.mubr.msk.f32.mxu1 %vm24984_vm12, %v2471_v13  ;;  %vm24988_vm13 = vmmov %vm24986_vm0  ;;  %v9935_v13 = vld [vmem:[#allocation2 + $0x2a9] sm:$0xff] }
 0x12a   : > { %19563 = vmatprep.mubr.msk.f32.mxu0 %vm24985_vm11, %v9925_v18  ;;  %vm24989_vm12 = vmmov %vm24986_vm0  ;;  %vm22126_vm11 = vcmp.ne.s32.totalorder %v1202_v32, 31  ;;  %v1258_v18 = vand.u32 31, %v628_v7  ;;  %v632_v32 = vadd.s32 696, %v21780_v6  ;;  %v9942_v7 = vld [vmem:[#allocation2 + $0x2e1] sm:$0xff] }
 0x12b   : > { %v24991_v40 = vsel %vm22126_vm11, 4294967295, %v24990_v40  ;;  %vm24998_vm10 = vmmov %vm24987_vm9  ;;  %v10058_v51 = vsel %vm22126_vm11, %v9930_v44, 0.0  ;;  %vm22160_vm11 = vcmp.ne.s32.totalorder %v1230_v56, 31  ;;  %v22212_v44 = vld [vmem:[#allocation2 + $0x9f] sm:$0xff]  ;;  %v22224_v56 = vld [vmem:[#allocation2 + $0xaf] sm:$0xff] }
 0x12c   : > { %18692 = vmatmul.mubr.msk.f32.gmra.mrb[6].mxu1 %vm24986_vm0, %v2472_v30  ;;  %24992 = vst [vmem:[#allocation24_spill] sm:$0xff] %v24991_v40  ;;  %vm22131_vm0 = vcmp.ne.s32.totalorder %v761_v33, 0  ;;  %v25003_v3 = vsel %vm22160_vm11, 4294967295, %v25002_v3  ;;  %v10062_v16 = vsel %vm22160_vm11, %v9934_v5, 0.0  ;;  %v22192_v30 = vld [vmem:[#allocation2 + $0x97] sm:$0xff]  ;;  %vm22194_vm11 = vcmp.ne.s32.totalorder %v1258_v18, 31 }
 0x12d   : > { %19564 = vmatmul.mubr.msk.f32.gmra.mrb[70].mxu0 %vm24987_vm9, %v10054_v26  ;;  %18694 = vmatprep.mubr.msk.f32.mxu1 %vm24988_vm13, %v2857_v29  ;;  %v24994_v46 = vsel %vm22131_vm0, 4294967295, %v24993_v46  ;;  %vm24996_vm13 = vmmov %vm24987_vm9  ;;  %v2861_v52 = vsel %vm22131_vm0, %v22135_v47, 0.0  ;;  %25004 = vst [vmem:[#allocation26_spill] sm:$0xff] %v25003_v3  ;;  %v9937_v26 = vld [vmem:[#allocation2 + $0x2b9] sm:$0xff]  ;;  %v25014_v29 = vmov 0  ;;  %v25017_v33 = vmov 0 }
 0x12e   : > { %19566 = vmatprep.mubr.msk.f32.mxu0 %vm24989_vm12, %v9927_v31  ;;  %24995 = vst [vmem:[#allocation25_spill] sm:$0xff] %v24994_v46  ;;  %vm24997_vm12 = vmmov %vm24987_vm9  ;;  %v25015_v29 = vsel %vm22194_vm11, 4294967295, %v25014_v29  ;;  %v9938_v31 = vld [vmem:[#allocation2 + $0x2c1] sm:$0xff]  ;;  %v25026_v5 = vmov 0  ;;  %v9951_v3 = vld [vmem:[#allocation2 + $0x329] sm:$0xff]  ;;  %v25206_v46 = vmov 0 }
 0x12f   : > { %25016 = vst [vmem:[#allocation28_spill] sm:$0xff] %v25015_v29  ;;  %v10066_v45 = vsel %vm22194_vm11, %v9938_v31, 0.0  ;;  %v22246_v18 = vld [vmem:[#allocation2 + $0xbf] sm:$0xff]  ;;  %v1314_v31 = vand.u32 31, %v636_v10  ;;  %v577_v10 = vadd.s32 256, %v21780_v6  ;;  %v25053_v29 = vmov 0 }
 0x130   : > { %18695 = vmatmul.mubr.msk.f32.gmra.mrb[8].mxu1 %vm24987_vm9, %v22122_v35 }
 0x131   : > { %19567 = vmatmul.mubr.msk.f32.gmra.mrb[72].mxu0 %vm24996_vm13, %v9928_v36  ;;  %18697 = vmatprep.mubr.msk.f32.mxu1 %vm24997_vm12, %v22124_v37  ;;  %vm24999_vm13 = vmmov %vm24987_vm9  ;;  %v22203_v36 = vld [vmem:[#allocation2 + $0xa7] sm:$0xff] }
 0x132   : > { %19569 = vmatprep.mubr.msk.f32.mxu0 %vm24998_vm10, %v9929_v39  ;;  %vm25000_vm12 = vmmov %vm24987_vm9  ;;  %v569_v39 = vadd.s32 192, %v21780_v6 }
 0x133   : > { %vm25001_vm10 = vmmov %vm24987_vm9 }
 0x134   : > { %18698 = vmatmul.mubr.msk.f32.gmra.mrb[10].mxu1 %vm24987_vm9, %v22144_v50  ;;  %vm22165_vm9 = vcmp.ne.s32.totalorder %v789_v58, 0  ;;  %vm25010_vm8 = vmmov %vm25001_vm10  ;;  %v9940_v58 = vld [vmem:[#allocation2 + $0x2d1] sm:$0xff] }
 0x135   : > { %19570 = vmatmul.mubr.msk.f32.gmra.mrb[74].mxu0 %vm24999_vm13, %v10058_v51  ;;  %18700 = vmatprep.mubr.msk.f32.mxu1 %vm25000_vm12, %v2861_v52  ;;  %v25006_v8 = vsel %vm22165_vm9, 4294967295, %v25005_v8  ;;  %vm25008_vm13 = vmmov %vm25001_vm10  ;;  %v2865_v12 = vsel %vm22165_vm9, %v22169_v9, 0.0  ;;  %v9939_v51 = vld [vmem:[#allocation2 + $0x2c9] sm:$0xff]  ;;  %v1286_v52 = vand.u32 31, %v632_v32 }
 0x136   : > { %19572 = vmatprep.mubr.msk.f32.mxu0 %vm25001_vm10, %v9931_v54  ;;  %25007 = vst [vmem:[#allocation27_spill] sm:$0xff] %v25006_v8  ;;  %vm25009_vm12 = vmmov %vm25001_vm10  ;;  %v845_v54 = vand.u32 31, %v569_v39  ;;  %v22258_v39 = vld [vmem:[#allocation2 + $0xcf] sm:$0xff]  ;;  %v25214_v8 = vmov 0 }
 0x137   : > { %vm25022_vm7 = vmmov %vm25010_vm8  ;;  %vm22228_vm11 = vcmp.ne.s32.totalorder %v1286_v52, 31  ;;  %v25038_v52 = vmov 0 }
 0x138   : > { %18701 = vmatmul.mubr.msk.f32.gmra.mrb[12].mxu1 %vm25008_vm13, %v22156_v60  ;;  %vm25011_vm13 = vmmov %vm25010_vm8  ;;  %v25027_v5 = vsel %vm22228_vm11, 4294967295, %v25026_v5 }
 0x139   : > { %19573 = vmatmul.mubr.msk.f32.gmra.mrb[76].mxu0 %vm25009_vm12, %v9932_v61  ;;  %18703 = vmatprep.mubr.msk.f32.mxu1 %vm25001_vm10, %v22158_v63  ;;  %vm25012_vm12 = vmmov %vm25010_vm8  ;;  %v22226_v61 = vld [vmem:[#allocation2 + $0xb7] sm:$0xff]  ;;  %25028 = vst [vmem:[#allocation30_spill] sm:$0xff] %v25027_v5  ;;  %v25050_v5 = vmov 0 }
 0x13a   : > { %19575 = vmatprep.mubr.msk.f32.mxu0 %vm25010_vm8, %v9933_v2  ;;  %vm25013_vm10 = vmmov %vm25010_vm8  ;;  %v9941_v2 = vld [vmem:[#allocation2 + $0x2d9] sm:$0xff] }
 0x13b   : > { %vm25034_vm6 = vmmov %vm25022_vm7 }
 0x13c   : > { %18704 = vmatmul.mubr.msk.f32.gmra.mrb[14].mxu1 %vm25011_vm13, %v22178_v11  ;;  %vm22199_vm13 = vcmp.ne.s32.totalorder %v817_v21, 0  ;;  %v10070_v21 = vsel %vm22228_vm11, %v9942_v7, 0.0  ;;  %vm22262_vm11 = vcmp.ne.s32.totalorder %v1314_v31, 31  ;;  %v22271_v7 = vld [vmem:[#allocation2 + $0xe7] sm:$0xff]  ;;  %vm25046_vm5 = vmmov %vm25034_vm6 }
 0x13d   : > { %19576 = vmatmul.mubr.msk.f32.gmra.mrb[78].mxu0 %vm25012_vm12, %v10062_v16  ;;  %18706 = vmatprep.mubr.msk.f32.mxu1 %vm25013_vm10, %v2865_v12  ;;  %v25018_v33 = vsel %vm22199_vm13, 4294967295, %v25017_v33  ;;  %vm25020_vm12 = vmmov %vm25010_vm8  ;;  %v2869_v49 = vsel %vm22199_vm13, %v22203_v36, 0.0  ;;  %v25029_v16 = vmov 0  ;;  %v22237_v12 = vld [vmem:[#allocation2 + $0xc7] sm:$0xff]  ;;  %v25039_v52 = vsel %vm22262_vm11, 4294967295, %v25038_v52 }
 0x13e   : > { %19578 = vmatprep.mubr.msk.f32.mxu0 %vm25010_vm8, %v9935_v13  ;;  %25019 = vst [vmem:[#allocation29_spill] sm:$0xff] %v25018_v33  ;;  %vm25021_vm10 = vmmov %vm25010_vm8  ;;  %v573_v13 = vadd.s32 224, %v21780_v6  ;;  %v25222_v33 = vmov 0 }
 0x13f   : > { %25040 = vst [vmem:[#allocation32_spill] sm:$0xff] %v25039_v52  ;;  %v9949_v52 = vld [vmem:[#allocation2 + $0x319] sm:$0xff]  ;;  %vm25058_vm4 = vmmov %vm25046_vm5 }
 0x140   : > { %18707 = vmatmul.mubr.msk.f32.gmra.mrb[16].mxu1 %vm25020_vm12, %v22190_v22  ;;  %vm25023_vm12 = vmmov %vm25022_vm7  ;;  %v873_v32 = vand.u32 31, %v573_v13  ;;  %v22280_v13 = vld [vmem:[#allocation2 + $0xdf] sm:$0xff] }
 0x141   : > { %19579 = vmatmul.mubr.msk.f32.gmra.mrb[80].mxu0 %vm25021_vm10, %v9936_v25  ;;  %18709 = vmatprep.mubr.msk.f32.mxu1 %vm25010_vm8, %v22192_v30  ;;  %vm25024_vm10 = vmmov %vm25022_vm7 }
 0x142   : > { %19581 = vmatprep.mubr.msk.f32.mxu0 %vm25022_vm7, %v9937_v26  ;;  %vm25025_vm8 = vmmov %vm25022_vm7  ;;  %v9943_v26 = vld [vmem:[#allocation2 + $0x2e9] sm:$0xff] }
 0x143   : > { %vm25070_vm3 = vmmov %vm25058_vm4 }
 0x144   : > { %18710 = vmatmul.mubr.msk.f32.gmra.mrb[18].mxu1 %vm25023_vm12, %v22212_v44  ;;  %vm22233_vm12 = vcmp.ne.s32.totalorder %v845_v54, 0  ;;  %v9946_v54 = vld [vmem:[#allocation2 + $0x301] sm:$0xff]  ;;  %vm25082_vm2 = vmmov %vm25070_vm3 }
 0x145   : > { %19582 = vmatmul.mubr.msk.f32.gmra.mrb[82].mxu0 %vm25024_vm10, %v10066_v45  ;;  %18712 = vmatprep.mubr.msk.f32.mxu1 %vm25025_vm8, %v2869_v49  ;;  %v25030_v16 = vsel %vm22233_vm12, 4294967295, %v25029_v16  ;;  %vm25032_vm10 = vmmov %vm25022_vm7  ;;  %v2873_v25 = vsel %vm22233_vm12, %v22237_v12, 0.0  ;;  %v9944_v45 = vld [vmem:[#allocation2 + $0x2f1] sm:$0xff] }
 0x146   : > { %19584 = vmatprep.mubr.msk.f32.mxu0 %vm25022_vm7, %v9939_v51  ;;  %25031 = vst [vmem:[#allocation31_spill] sm:$0xff] %v25030_v16  ;;  %vm25033_vm8 = vmmov %vm25022_vm7  ;;  %v22260_v49 = vld [vmem:[#allocation2 + $0xd7] sm:$0xff]  ;;  %v25230_v16 = vmov 0 }
 0x147   : > { %v9945_v51 = vld [vmem:[#allocation2 + $0x2f9] sm:$0xff] }
 0x148   : > { %18713 = vmatmul.mubr.msk.f32.gmra.mrb[20].mxu1 %vm25032_vm10, %v22224_v56  ;;  %vm25035_vm10 = vmmov %vm25034_vm6 }
 0x149   : > { %19585 = vmatmul.mubr.msk.f32.gmra.mrb[84].mxu0 %vm25033_vm8, %v9940_v58  ;;  %18715 = vmatprep.mubr.msk.f32.mxu1 %vm25022_vm7, %v22226_v61  ;;  %vm25036_vm8 = vmmov %vm25034_vm6  ;;  %v640_v58 = vadd.s32 760, %v21780_v6 }
 0x14a   : > { %19587 = vmatprep.mubr.msk.f32.mxu0 %vm25034_vm6, %v9941_v2  ;;  %vm25037_vm7 = vmmov %vm25034_vm6  ;;  %v25041_v2 = vmov 0 }
 0x14b   : > { %v1342_v31 = vand.u32 31, %v640_v58  ;;  %v9950_v58 = vld [vmem:[#allocation2 + $0x321] sm:$0xff] }
 0x14c   : > { %18716 = vmatmul.mubr.msk.f32.gmra.mrb[22].mxu1 %vm25035_vm10, %v22246_v18  ;;  %vm22267_vm10 = vcmp.ne.s32.totalorder %v873_v32, 0  ;;  %v901_v32 = vand.u32 31, %v577_v10  ;;  %v644_v10 = vadd.s32 792, %v21780_v6 }
 0x14d   : > { %19588 = vmatmul.mubr.msk.f32.gmra.mrb[86].mxu0 %vm25036_vm8, %v10070_v21  ;;  %18718 = vmatprep.mubr.msk.f32.mxu1 %vm25037_vm7, %v2873_v25  ;;  %v25042_v2 = vsel %vm22267_vm10, 4294967295, %v25041_v2  ;;  %vm25044_vm8 = vmmov %vm25034_vm6  ;;  %v10074_v21 = vsel %vm22262_vm11, %v9946_v54, 0.0  ;;  %v2877_v25 = vsel %vm22267_vm10, %v22271_v7, 0.0  ;;  %v22294_v54 = vld [vmem:[#allocation2 + $0xf7] sm:$0xff]  ;;  %vm22296_vm11 = vcmp.ne.s32.totalorder %v1342_v31, 31 }
 0x14e   : > { %19590 = vmatprep.mubr.msk.f32.mxu0 %vm25034_vm6, %v9943_v26  ;;  %25043 = vst [vmem:[#allocation33_spill] sm:$0xff] %v25042_v2  ;;  %vm25045_vm7 = vmmov %vm25034_vm6  ;;  %v9947_v26 = vld [vmem:[#allocation2 + $0x309] sm:$0xff]  ;;  %v25051_v5 = vsel %vm22296_vm11, 4294967295, %v25050_v5  ;;  %v10078_v31 = vsel %vm22296_vm11, %v9950_v58, 0.0  ;;  %v1370_v40 = vand.u32 31, %v644_v10  ;;  %v22328_v58 = vld [vmem:[#allocation2 + $0x117] sm:$0xff] }
 0x14f   : > { %25052 = vst [vmem:[#allocation34_spill] sm:$0xff] %v25051_v5  ;;  %v9953_v5 = vld [vmem:[#allocation2 + $0x339] sm:$0xff]  ;;  %v9954_v10 = vld [vmem:[#allocation2 + $0x341] sm:$0xff]  ;;  %v25239_v2 = vmov 0 }
 0x150   : > { %18719 = vmatmul.mubr.msk.f32.gmra.mrb[24].mxu1 %vm25044_vm8, %v22258_v39  ;;  %vm25047_vm8 = vmmov %vm25046_vm5  ;;  %vm22330_vm11 = vcmp.ne.s32.totalorder %v1370_v40, 31  ;;  %v22348_v40 = vld [vmem:[#allocation2 + $0x11f] sm:$0xff] }
 0x151   : > { %19591 = vmatmul.mubr.msk.f32.gmra.mrb[88].mxu0 %vm25045_vm7, %v9944_v45  ;;  %18721 = vmatprep.mubr.msk.f32.mxu1 %vm25034_vm6, %v22260_v49  ;;  %vm25048_vm7 = vmmov %vm25046_vm5  ;;  %v22292_v45 = vld [vmem:[#allocation2 + $0xef] sm:$0xff]  ;;  %v25063_v59 = vsel %vm22330_vm11, 4294967295, %v25062_v59 }
 0x152   : > { %19593 = vmatprep.mubr.msk.f32.mxu0 %vm25046_vm5, %v9945_v51  ;;  %vm25049_vm6 = vmmov %vm25046_vm5  ;;  %v9948_v51 = vld [vmem:[#allocation2 + $0x311] sm:$0xff]  ;;  %25064 = vst [vmem:[#allocation36_spill] sm:$0xff] %v25063_v59  ;;  %v9957_v59 = vld [vmem:[#allocation2 + $0x359] sm:$0xff] }
 0x154   : > { %18722 = vmatmul.mubr.msk.f32.gmra.mrb[26].mxu1 %vm25047_vm8, %v22280_v13  ;;  %vm22301_vm8 = vcmp.ne.s32.totalorder %v901_v32, 0 }
 0x155   : > { %19594 = vmatmul.mubr.msk.f32.gmra.mrb[90].mxu0 %vm25048_vm7, %v10074_v21  ;;  %18724 = vmatprep.mubr.msk.f32.mxu1 %vm25049_vm6, %v2877_v25  ;;  %v25054_v29 = vsel %vm22301_vm8, 4294967295, %v25053_v29  ;;  %v22305_v21 = vld [vmem:[#allocation2 + $0x107] sm:$0xff]  ;;  %v581_v25 = vadd.s32 288, %v21780_v6  ;;  %vm25056_vm7 = vmmov %vm25046_vm5 }
 0x156   : > { %19596 = vmatprep.mubr.msk.f32.mxu0 %vm25046_vm5, %v9947_v26  ;;  %25055 = vst [vmem:[#allocation35_spill] sm:$0xff] %v25054_v29  ;;  %vm25057_vm6 = vmmov %vm25046_vm5  ;;  %v22314_v26 = vld [vmem:[#allocation2 + $0xff] sm:$0xff]  ;;  %v2881_v32 = vsel %vm22301_vm8, %v22305_v21, 0.0  ;;  %v22908_v29 = vld [vmem:[#allocation2 + $0x337] sm:$0xff] }
 0x157   : > { %v929_v19 = vand.u32 31, %v581_v25  ;;  %v648_v25 = vadd.s32 824, %v21780_v6  ;;  %25250 = vst [vmem:[#allocation68_spill] sm:$0xff] %v22908_v29 }
 0x158   : > { %18725 = vmatmul.mubr.msk.f32.gmra.mrb[28].mxu1 %vm25056_vm7, %v22292_v45  ;;  %vm25059_vm7 = vmmov %vm25058_vm4 }
 0x159   : > { %19597 = vmatmul.mubr.msk.f32.gmra.mrb[92].mxu0 %vm25057_vm6, %v9948_v51  ;;  %18727 = vmatprep.mubr.msk.f32.mxu1 %vm25046_vm5, %v22294_v54  ;;  %vm25060_vm6 = vmmov %vm25058_vm4  ;;  %v9952_v51 = vld [vmem:[#allocation2 + $0x331] sm:$0xff]  ;;  %v1398_v62 = vand.u32 31, %v648_v25  ;;  %v9958_v25 = vld [vmem:[#allocation2 + $0x361] sm:$0xff] }
 0x15a   : > { %19599 = vmatprep.mubr.msk.f32.mxu0 %vm25058_vm4, %v9949_v52  ;;  %vm25061_vm5 = vmmov %vm25058_vm4  ;;  %v22326_v52 = vld [vmem:[#allocation2 + $0x10f] sm:$0xff] }
 0x15c   : > { %18728 = vmatmul.mubr.msk.f32.gmra.mrb[30].mxu1 %vm25059_vm7, %v22314_v26  ;;  %vm22335_vm7 = vcmp.ne.s32.totalorder %v929_v19, 0  ;;  %v10082_v19 = vsel %vm22330_vm11, %v9954_v10, 0.0  ;;  %v22362_v10 = vld [vmem:[#allocation2 + $0x137] sm:$0xff]  ;;  %vm22364_vm11 = vcmp.ne.s32.totalorder %v1398_v62, 31  ;;  %v22382_v62 = vld [vmem:[#allocation2 + $0x13f] sm:$0xff] }
 0x15d   : > { %19600 = vmatmul.mubr.msk.f32.gmra.mrb[94].mxu0 %vm25060_vm6, %v10078_v31  ;;  %18730 = vmatprep.mubr.msk.f32.mxu1 %vm25061_vm5, %v2881_v32  ;;  %v25066_v38 = vsel %vm22335_vm7, 4294967295, %v25065_v38  ;;  %v22339_v31 = vld [vmem:[#allocation2 + $0x127] sm:$0xff]  ;;  %vm25068_vm6 = vmmov %vm25058_vm4  ;;  %v25075_v34 = vsel %vm22364_vm11, 4294967295, %v25074_v34 }
 0x15e   : > { %19602 = vmatprep.mubr.msk.f32.mxu0 %vm25058_vm4, %v9951_v3  ;;  %25067 = vst [vmem:[#allocation37_spill] sm:$0xff] %v25066_v38  ;;  %v585_v3 = vadd.s32 320, %v21780_v6  ;;  %vm25069_vm5 = vmmov %vm25058_vm4  ;;  %v2885_v32 = vsel %vm22335_vm7, %v22339_v31, 0.0 }
 0x15f   : > { %25076 = vst [vmem:[#allocation38_spill] sm:$0xff] %v25075_v34  ;;  %v9961_v34 = vld [vmem:[#allocation2 + $0x379] sm:$0xff] }
 0x160   : > { %18731 = vmatmul.mubr.msk.f32.gmra.mrb[32].mxu1 %vm25068_vm6, %v22326_v52  ;;  %v957_v48 = vand.u32 31, %v585_v3  ;;  %vm25071_vm6 = vmmov %vm25070_vm3  ;;  %v652_v3 = vadd.s32 856, %v21780_v6 }
 0x161   : > { %19603 = vmatmul.mubr.msk.f32.gmra.mrb[96].mxu0 %vm25069_vm5, %v9952_v51  ;;  %18733 = vmatprep.mubr.msk.f32.mxu1 %vm25058_vm4, %v22328_v58  ;;  %vm25072_vm5 = vmmov %vm25070_vm3  ;;  %v9956_v51 = vld [vmem:[#allocation2 + $0x351] sm:$0xff] }
 0x162   : > { %19605 = vmatprep.mubr.msk.f32.mxu0 %vm25070_vm3, %v9953_v5  ;;  %vm25073_vm4 = vmmov %vm25070_vm3  ;;  %v22360_v5 = vld [vmem:[#allocation2 + $0x12f] sm:$0xff]  ;;  %v1426_v55 = vand.u32 31, %v652_v3  ;;  %v9962_v3 = vld [vmem:[#allocation2 + $0x381] sm:$0xff] }
 0x164   : > { %18734 = vmatmul.mubr.msk.f32.gmra.mrb[34].mxu1 %vm25071_vm6, %v22348_v40  ;;  %vm22369_vm6 = vcmp.ne.s32.totalorder %v957_v48, 0  ;;  %v10086_v48 = vsel %vm22364_vm11, %v9958_v25, 0.0  ;;  %v22396_v25 = vld [vmem:[#allocation2 + $0x157] sm:$0xff]  ;;  %vm22398_vm11 = vcmp.ne.s32.totalorder %v1426_v55, 31  ;;  %v22416_v55 = vld [vmem:[#allocation2 + $0x15f] sm:$0xff] }
 0x165   : > { %19606 = vmatmul.mubr.msk.f32.gmra.mrb[98].mxu0 %vm25072_vm5, %v10082_v19  ;;  %18736 = vmatprep.mubr.msk.f32.mxu1 %vm25073_vm4, %v2885_v32  ;;  %v25078_v20 = vsel %vm22369_vm6, 4294967295, %v25077_v20  ;;  %v22373_v19 = vld [vmem:[#allocation2 + $0x147] sm:$0xff]  ;;  %vm25080_vm5 = vmmov %vm25070_vm3  ;;  %v25087_v27 = vsel %vm22398_vm11, 4294967295, %v25086_v27  ;;  %25095 = vst [vmem:[#allocation42_spill] sm:$0xff] %v22416_v55 }
 0x166   : > { %19608 = vmatprep.mubr.msk.f32.mxu0 %vm25070_vm3, %v9955_v15  ;;  %25079 = vst [vmem:[#allocation39_spill] sm:$0xff] %v25078_v20  ;;  %v589_v15 = vadd.s32 352, %v21780_v6  ;;  %vm25081_vm4 = vmmov %vm25070_vm3  ;;  %v2889_v32 = vsel %vm22369_vm6, %v22373_v19, 0.0 }
 0x167   : > { %25088 = vst [vmem:[#allocation40_spill] sm:$0xff] %v25087_v27  ;;  %vm25094_vm6 = vmmov %vm25082_vm2  ;;  %v9965_v27 = vld [vmem:[#allocation2 + $0x399] sm:$0xff] }
 0x168   : > { %18737 = vmatmul.mubr.msk.f32.gmra.mrb[36].mxu1 %vm25080_vm5, %v22360_v5  ;;  %v985_v42 = vand.u32 31, %v589_v15  ;;  %vm25083_vm5 = vmmov %vm25082_vm2  ;;  %v656_v15 = vadd.s32 888, %v21780_v6 }
 0x169   : > { %19609 = vmatmul.mubr.msk.f32.gmra.mrb[100].mxu0 %vm25081_vm4, %v9956_v51  ;;  %18739 = vmatprep.mubr.msk.f32.mxu1 %vm25070_vm3, %v22362_v10  ;;  %vm25084_vm4 = vmmov %vm25082_vm2  ;;  %v9960_v51 = vld [vmem:[#allocation2 + $0x371] sm:$0xff] }
 0x16a   : > { %19611 = vmatprep.mubr.msk.f32.mxu0 %vm25082_vm2, %v9957_v59  ;;  %vm25085_vm3 = vmmov %vm25082_vm2  ;;  %v22394_v59 = vld [vmem:[#allocation2 + $0x14f] sm:$0xff]  ;;  %v1454_v53 = vand.u32 31, %v656_v15  ;;  %v9966_v15 = vld [vmem:[#allocation2 + $0x3a1] sm:$0xff] }
 0x16c   : > { %18740 = vmatmul.mubr.msk.f32.gmra.mrb[38].mxu1 %vm25083_vm5, %v22382_v62  ;;  %vm22403_vm5 = vcmp.ne.s32.totalorder %v985_v42, 0  ;;  %v10090_v42 = vsel %vm22398_vm11, %v9962_v3, 0.0  ;;  %v22430_v3 = vld [vmem:[#allocation2 + $0x177] sm:$0xff]  ;;  %vm22432_vm11 = vcmp.ne.s32.totalorder %v1454_v53, 31  ;;  %v22450_v53 = vld [vmem:[#allocation2 + $0x17f] sm:$0xff] }
 0x16d   : > { %19612 = vmatmul.mubr.msk.f32.gmra.mrb[102].mxu0 %vm25084_vm4, %v10086_v48  ;;  %18742 = vmatprep.mubr.msk.f32.mxu1 %vm25085_vm3, %v2889_v32  ;;  %v25090_v14 = vsel %vm22403_vm5, 4294967295, %v25089_v14  ;;  %v22407_v48 = vld [vmem:[#allocation2 + $0x167] sm:$0xff]  ;;  %vm25092_vm4 = vmmov %vm25082_vm2  ;;  %25100 = vst [vmem:[#allocation44_spill] sm:$0xff] %v22430_v3  ;;  %v25102_v28 = vsel %vm22432_vm11, 4294967295, %v25101_v28 }
 0x16e   : > { %19614 = vmatprep.mubr.msk.f32.mxu0 %vm25082_vm2, %v9959_v4  ;;  %25091 = vst [vmem:[#allocation41_spill] sm:$0xff] %v25090_v14  ;;  %v593_v4 = vadd.s32 384, %v21780_v6  ;;  %vm25093_vm3 = vmmov %vm25082_vm2  ;;  %v2893_v32 = vsel %vm22403_vm5, %v22407_v48, 0.0  ;;  %v9967_v14 = vld [vmem:[#allocation2 + $0x3a9] sm:$0xff] }
 0x16f   : > { %25103 = vst [vmem:[#allocation45_spill] sm:$0xff] %v25102_v28  ;;  %vm25110_vm5 = vmmov %vm25082_vm2  ;;  %v9969_v28 = vld [vmem:[#allocation2 + $0x3b9] sm:$0xff] }
 0x170   : > { %18743 = vmatmul.mubr.msk.f32.gmra.mrb[40].mxu1 %vm25092_vm4, %v22394_v59  ;;  %v1013_v41 = vand.u32 31, %v593_v4  ;;  %vm25096_vm4 = vmmov %vm25082_vm2  ;;  %v660_v4 = vadd.s32 920, %v21780_v6  ;;  %25111 = vst [vmem:[#allocation48_spill] sm:$0xff] %v22450_v53 }
 0x171   : > { %19615 = vmatmul.mubr.msk.f32.gmra.mrb[104].mxu0 %vm25093_vm3, %v9960_v51  ;;  %18745 = vmatprep.mubr.msk.f32.mxu1 %vm25082_vm2, %v22396_v25  ;;  %vm25097_vm3 = vmmov %vm25082_vm2  ;;  %v9964_v51 = vld [vmem:[#allocation2 + $0x391] sm:$0xff] }
 0x172   : > { %19617 = vmatprep.mubr.msk.f32.mxu0 %vm25094_vm6, %v9961_v34  ;;  %vm25098_vm6 = vmmov %vm25082_vm2  ;;  %v22428_v34 = vld [vmem:[#allocation2 + $0x16f] sm:$0xff]  ;;  %v1482_v20 = vand.u32 31, %v660_v4  ;;  %v9970_v4 = vld [vmem:[#allocation2 + $0x3c1] sm:$0xff] }
 0x173   : > { %25099 = vst [vmem:[#allocation43_spill] sm:$0xff] %v22428_v34 }
 0x174   : > { %18746 = vmatmul.mubr.msk.f32.gmra.mrb[42].mxu1 %vm25096_vm4, %v22416_v55  ;;  %vm22437_vm4 = vcmp.ne.s32.totalorder %v1013_v41, 0  ;;  %v10094_v41 = vsel %vm22432_vm11, %v9966_v15, 0.0  ;;  %v22464_v15 = vld [vmem:[#allocation2 + $0x197] sm:$0xff]  ;;  %vm22466_vm11 = vcmp.ne.s32.totalorder %v1482_v20, 31  ;;  %v22484_v20 = vld [vmem:[#allocation2 + $0x19f] sm:$0xff] }
 0x175   : > { %19618 = vmatmul.mubr.msk.f32.gmra.mrb[106].mxu0 %vm25097_vm3, %v10090_v42  ;;  %18748 = vmatprep.mubr.msk.f32.mxu1 %vm25082_vm2, %v2893_v32  ;;  %v25105_v17 = vsel %vm22437_vm4, 4294967295, %v25104_v17  ;;  %v22441_v42 = vld [vmem:[#allocation2 + $0x187] sm:$0xff]  ;;  %vm25108_vm3 = vmmov %vm25082_vm2  ;;  %25116 = vst [vmem:[#allocation50_spill] sm:$0xff] %v22464_v15 }
 0x176   : > { %19620 = vmatprep.mubr.msk.f32.mxu0 %vm25098_vm6, %v9963_v1  ;;  %25106 = vst [vmem:[#allocation46_spill] sm:$0xff] %v25105_v17  ;;  %25107 = vst [vmem:[#allocation47_spill] sm:$0xff] %v22441_v42  ;;  %v597_v1 = vadd.s32 416, %v21780_v6  ;;  %v2897_v32 = vsel %vm22437_vm4, %v22441_v42, 0.0  ;;  %v25117_v17 = vmov 0  ;;  %v9971_v42 = vld [vmem:[#allocation2 + $0x3c9] sm:$0xff] }
 0x177   : > { %vm25109_vm6 = vmmov %vm25082_vm2  ;;  %v25118_v17 = vsel %vm22466_vm11, 4294967295, %v25117_v17  ;;  %25127 = vst [vmem:[#allocation54_spill] sm:$0xff] %v22484_v20 }
 0x178   : > { %18749 = vmatmul.mubr.msk.f32.gmra.mrb[44].mxu1 %vm25108_vm3, %v22428_v34  ;;  %v1041_v55 = vand.u32 31, %v597_v1  ;;  %vm25112_vm3 = vmmov %vm25082_vm2  ;;  %25119 = vst [vmem:[#allocation51_spill] sm:$0xff] %v25118_v17  ;;  %v664_v1 = vadd.s32 952, %v21780_v6  ;;  %v9973_v17 = vld [vmem:[#allocation2 + $0x3d9] sm:$0xff] }
 0x179   : > { %19621 = vmatmul.mubr.msk.f32.gmra.mrb[108].mxu0 %vm25082_vm2, %v9964_v51  ;;  %18751 = vmatprep.mubr.msk.f32.mxu1 %vm25109_vm6, %v22430_v3  ;;  %vm25113_vm6 = vmmov %vm25082_vm2  ;;  %v9968_v51 = vld [vmem:[#allocation2 + $0x3b1] sm:$0xff] }
 0x17a   : > { %19623 = vmatprep.mubr.msk.f32.mxu0 %vm25110_vm5, %v9965_v27  ;;  %vm25114_vm5 = vmmov %vm25082_vm2  ;;  %v22462_v27 = vld [vmem:[#allocation2 + $0x18f] sm:$0xff]  ;;  %v1510_v3 = vand.u32 31, %v664_v1  ;;  %v9974_v1 = vld [vmem:[#allocation2 + $0x3e1] sm:$0xff] }
 0x17b   : > { %25115 = vst [vmem:[#allocation49_spill] sm:$0xff] %v22462_v27  ;;  %vm25126_vm4 = vmmov %vm25082_vm2 }
 0x17c   : > { %18752 = vmatmul.mubr.msk.f32.gmra.mrb[46].mxu1 %vm25112_vm3, %v22450_v53  ;;  %vm22471_vm3 = vcmp.ne.s32.totalorder %v1041_v55, 0  ;;  %v25120_v53 = vmov 0  ;;  %v10098_v55 = vsel %vm22466_vm11, %v9970_v4, 0.0  ;;  %v22498_v4 = vld [vmem:[#allocation2 + $0x1b7] sm:$0xff]  ;;  %vm22500_vm11 = vcmp.ne.s32.totalorder %v1510_v3, 31  ;;  %v22518_v3 = vld [vmem:[#allocation2 + $0x1bf] sm:$0xff] }
 0x17d   : > { %19624 = vmatmul.mubr.msk.f32.gmra.mrb[110].mxu0 %vm25082_vm2, %v10094_v41  ;;  %18754 = vmatprep.mubr.msk.f32.mxu1 %vm25113_vm6, %v2897_v32  ;;  %v25121_v53 = vsel %vm22471_vm3, 4294967295, %v25120_v53  ;;  %v22475_v41 = vld [vmem:[#allocation2 + $0x1a7] sm:$0xff]  ;;  %vm25124_vm6 = vmmov %vm25082_vm2  ;;  %25132 = vst [vmem:[#allocation56_spill] sm:$0xff] %v22498_v4  ;;  %v25261_v38 = vld [vmem:[#allocation47_spill] sm:$0xff] }
 0x17e   : > { %19626 = vmatprep.mubr.msk.f32.mxu0 %vm25114_vm5, %v9967_v14  ;;  %25122 = vst [vmem:[#allocation52_spill] sm:$0xff] %v25121_v53  ;;  %25123 = vst [vmem:[#allocation53_spill] sm:$0xff] %v22475_v41  ;;  %v601_v14 = vadd.s32 448, %v21780_v6  ;;  %v2901_v32 = vsel %vm22471_vm3, %v22475_v41, 0.0  ;;  %v25133_v53 = vmov 0  ;;  %v9975_v41 = vld [vmem:[#allocation2 + $0x3e9] sm:$0xff] }
 0x17f   : > { %vm25125_vm5 = vmmov %vm25082_vm2  ;;  %v25134_v53 = vsel %vm22500_vm11, 4294967295, %v25133_v53  ;;  %25143 = vst [vmem:[#allocation60_spill] sm:$0xff] %v22518_v3 }
 0x180   : > { %18755 = vmatmul.mubr.msk.f32.gmra.mrb[48].mxu1 %vm25082_vm2, %v22462_v27  ;;  %v1069_v34 = vand.u32 31, %v601_v14  ;;  %25135 = vst [vmem:[#allocation57_spill] sm:$0xff] %v25134_v53  ;;  %v668_v14 = vadd.s32 984, %v21780_v6  ;;  %v9977_v53 = vld [vmem:[#allocation2 + $0x3f9] sm:$0xff] }
 0x181   : > { %19627 = vmatmul.mubr.msk.f32.gmra.mrb[112].mxu0 %vm25124_vm6, %v9968_v51  ;;  %18757 = vmatprep.mubr.msk.f32.mxu1 %vm25125_vm5, %v22464_v15  ;;  %vm25128_vm6 = vmmov %vm25082_vm2  ;;  %v9972_v51 = vld [vmem:[#allocation2 + $0x3d1] sm:$0xff] }
 0x182   : > { %19629 = vmatprep.mubr.msk.f32.mxu0 %vm25126_vm4, %v9969_v28  ;;  %vm25129_vm5 = vmmov %vm25082_vm2  ;;  %v22496_v28 = vld [vmem:[#allocation2 + $0x1af] sm:$0xff]  ;;  %v1538_v15 = vand.u32 31, %v668_v14  ;;  %v9978_v14 = vld [vmem:[#allocation2 + $0x401] sm:$0xff] }
 0x183   : > { %vm25130_vm4 = vmmov %vm25082_vm2  ;;  %25131 = vst [vmem:[#allocation55_spill] sm:$0xff] %v22496_v28 }
 0x184   : > { %18758 = vmatmul.mubr.msk.f32.gmra.mrb[50].mxu1 %vm25082_vm2, %v22484_v20  ;;  %vm22505_vm2 = vcmp.ne.s32.totalorder %v1069_v34, 0  ;;  %v25136_v20 = vmov 0  ;;  %vm25142_vm3 = vmmov %vm25130_vm4  ;;  %v10102_v34 = vsel %vm22500_vm11, %v9974_v1, 0.0  ;;  %v22532_v1 = vld [vmem:[#allocation2 + $0x1d7] sm:$0xff]  ;;  %vm22534_vm11 = vcmp.ne.s32.totalorder %v1538_v15, 31  ;;  %v22552_v15 = vld [vmem:[#allocation2 + $0x1df] sm:$0xff] }
 0x185   : > { %19630 = vmatmul.mubr.msk.f32.gmra.mrb[114].mxu0 %vm25128_vm6, %v10098_v55  ;;  %18760 = vmatprep.mubr.msk.f32.mxu1 %vm25129_vm5, %v2901_v32  ;;  %v25137_v20 = vsel %vm22505_vm2, 4294967295, %v25136_v20  ;;  %v22509_v55 = vld [vmem:[#allocation2 + $0x1c7] sm:$0xff]  ;;  %vm25140_vm6 = vmmov %vm25130_vm4  ;;  %25156 = vst [vmem:[#allocation63_spill] sm:$0xff] %v22552_v15 }
 0x186   : > { %19632 = vmatprep.mubr.msk.f32.mxu0 %vm25130_vm4, %v9971_v42  ;;  %25138 = vst [vmem:[#allocation58_spill] sm:$0xff] %v25137_v20  ;;  %25139 = vst [vmem:[#allocation59_spill] sm:$0xff] %v22509_v55  ;;  %v605_v42 = vadd.s32 480, %v21780_v6  ;;  %v2905_v32 = vsel %vm22505_vm2, %v22509_v55, 0.0  ;;  %v25147_v20 = vmov 0  ;;  %v9979_v55 = vld [vmem:[#allocation2 + $0x409] sm:$0xff] }
 0x187   : > { %vm25141_vm5 = vmmov %vm25130_vm4  ;;  %v25148_v20 = vsel %vm22534_vm11, 4294967295, %v25147_v20 }
 0x188   : > { %18761 = vmatmul.mubr.msk.f32.gmra.mrb[52].mxu1 %vm25140_vm6, %v22496_v28  ;;  %v1097_v27 = vand.u32 31, %v605_v42  ;;  %vm25144_vm6 = vmmov %vm25142_vm3  ;;  %25149 = vst [vmem:[#allocation61_spill] sm:$0xff] %v25148_v20  ;;  %v672_v42 = vadd.s32 1016, %v21780_v6  ;;  %v9981_v20 = vld [vmem:[#allocation2 + $0x419] sm:$0xff] }
 0x189   : > { %19633 = vmatmul.mubr.msk.f32.gmra.mrb[116].mxu0 %vm25141_vm5, %v9972_v51  ;;  %18763 = vmatprep.mubr.msk.f32.mxu1 %vm25130_vm4, %v22498_v4  ;;  %vm25145_vm5 = vmmov %vm25142_vm3  ;;  %v9976_v51 = vld [vmem:[#allocation2 + $0x3f1] sm:$0xff] }
 0x18a   : > { %19635 = vmatprep.mubr.msk.f32.mxu0 %vm25142_vm3, %v9973_v17  ;;  %vm25146_vm4 = vmmov %vm25142_vm3  ;;  %v22530_v17 = vld [vmem:[#allocation2 + $0x1cf] sm:$0xff]  ;;  %v1566_v4 = vand.u32 31, %v672_v42  ;;  %v9982_v42 = vld [vmem:[#allocation2 + $0x421] sm:$0xff] }
 0x18b   : > { %vm25155_vm2 = vmmov %vm25142_vm3 }
 0x18c   : > { %18764 = vmatmul.mubr.msk.f32.gmra.mrb[54].mxu1 %vm25144_vm6, %v22518_v3  ;;  %vm22539_vm6 = vcmp.ne.s32.totalorder %v1097_v27, 0  ;;  %v25150_v3 = vmov 0  ;;  %v10106_v27 = vsel %vm22534_vm11, %v9978_v14, 0.0  ;;  %v22566_v14 = vld [vmem:[#allocation2 + $0x1f7] sm:$0xff]  ;;  %vm22568_vm11 = vcmp.ne.s32.totalorder %v1566_v4, 31  ;;  %v22585_v4 = vld [vmem:[#allocation2 + $0x1ff] sm:$0xff] }
 0x18d   : > { %19636 = vmatmul.mubr.msk.f32.gmra.mrb[118].mxu0 %vm25145_vm5, %v10102_v34  ;;  %18766 = vmatprep.mubr.msk.f32.mxu1 %vm25146_vm4, %v2905_v32  ;;  %v25151_v3 = vsel %vm22539_vm6, 4294967295, %v25150_v3  ;;  %v22543_v34 = vld [vmem:[#allocation2 + $0x1e7] sm:$0xff]  ;;  %vm25153_vm5 = vmmov %vm25142_vm3 }
 0x18e   : > { %19638 = vmatprep.mubr.msk.f32.mxu0 %vm25142_vm3, %v9975_v41  ;;  %25152 = vst [vmem:[#allocation62_spill] sm:$0xff] %v25151_v3  ;;  %v609_v41 = vadd.s32 512, %v21780_v6  ;;  %vm25154_vm4 = vmmov %vm25142_vm3  ;;  %v2909_v32 = vsel %vm22539_vm6, %v22543_v34, 0.0  ;;  %v25161_v3 = vmov 0 }
 0x18f   : > { %v25162_v3 = vsel %vm22568_vm11, 4294967295, %v25161_v3 }
 0x190   : > { %18767 = vmatmul.mubr.msk.f32.gmra.mrb[56].mxu1 %vm25153_vm5, %v22530_v17  ;;  %v1125_v28 = vand.u32 31, %v609_v41  ;;  %vm25157_vm5 = vmmov %vm25155_vm2  ;;  %25163 = vst [vmem:[#allocation65_spill] sm:$0xff] %v25162_v3  ;;  %v25251_v3 = vmov 0  ;;  %v7094_v41 = vld [vmem:[#allocation2 + $0x23f] sm:$0xff] }
 0x191   : > { %19639 = vmatmul.mubr.msk.f32.gmra.mrb[120].mxu0 %vm25154_vm4, %v9976_v51  ;;  %18769 = vmatprep.mubr.msk.f32.mxu1 %vm25142_vm3, %v22532_v1  ;;  %vm25158_vm4 = vmmov %vm25155_vm2  ;;  %v9980_v51 = vld [vmem:[#allocation2 + $0x411] sm:$0xff] }
 0x192   : > { %19641 = vmatprep.mubr.msk.f32.mxu0 %vm25155_vm2, %v9977_v53  ;;  %vm25159_vm3 = vmmov %vm25155_vm2  ;;  %v22564_v53 = vld [vmem:[#allocation2 + $0x1ef] sm:$0xff]  ;;  %vm22572_vm6 = vcmp.ne.s32.totalorder %v1125_v28, 0  ;;  %v10110_v28 = vsel %vm22568_vm11, %v9982_v42, 0.0  ;;  %v22607_v42 = vld [vmem:[#allocation2 + $0x217] sm:$0xff] }
 0x193   : > { %25160 = vst [vmem:[#allocation64_spill] sm:$0xff] %v22564_v53 }
 0x194   : > { %18770 = vmatmul.mubr.msk.f32.gmra.mrb[58].mxu1 %vm25157_vm5, %v22552_v15  ;;  %vm25166_vm5 = vmmov %vm25155_vm2 }
 0x195   : > { %19642 = vmatmul.mubr.msk.f32.gmra.mrb[122].mxu0 %vm25158_vm4, %v10106_v27  ;;  %18772 = vmatprep.mubr.msk.f32.mxu1 %vm25159_vm3, %v2909_v32  ;;  %v22576_v27 = vld [vmem:[#allocation2 + $0x207] sm:$0xff]  ;;  %v613_v32 = vadd.s32 544, %v21780_v6  ;;  %vm25167_vm4 = vmmov %vm25155_vm2 }
 0x196   : > { %19644 = vmatprep.mubr.msk.f32.mxu0 %vm25155_vm2, %v9979_v55  ;;  %vm25168_vm3 = vmmov %vm25155_vm2  ;;  %v2913_v55 = vsel %vm22572_vm6, %v22576_v27, 0.0 }
 0x197   : > { %v1153_v15 = vand.u32 31, %v613_v32  ;;  %v22615_v32 = vld [vmem:[#allocation2 + $0x227] sm:$0xff] }
 0x198   : > { %18773 = vmatmul.mubr.msk.f32.gmra.mrb[60].mxu1 %vm25166_vm5, %v22564_v53  ;;  %v11461_v53 = vsel %vm22049_vm15, %v22106_v24, 0.0  ;;  %vm25169_vm5 = vmmov %vm25155_vm2  ;;  %vm25172_vm15 = vcmask 1042432   ;;  %v25173_v24 = vmov 0 }
 0x199   : > { %19645 = vmatmul.mubr.msk.f32.gmra.mrb[124].mxu0 %vm25167_vm4, %v9980_v51  ;;  %18775 = vmatprep.mubr.msk.f32.mxu1 %vm25168_vm3, %v22566_v14  ;;  %vm25170_vm4 = vmmov %vm25155_vm2  ;;  %v22605_v51 = vld [vmem:[%s24671_s2 + $0xc] sm:$0x7]  ;;  %vm22611_vm11 = vcmp.ne.s32.totalorder %v1153_v15, 0  ;;  %v22626_v15 = vld [vmem:[#allocation2 + $0x21f] sm:$0xff] }
 0x19a   : > { %19647 = vmatprep.mubr.msk.f32.mxu0 %vm25155_vm2, %v9981_v20  ;;  %vm25171_vm3 = vmmov %vm25155_vm2  ;;  %v22600_v20 = vld [vmem:[#allocation2 + $0x20f] sm:$0xff]  ;;  %19068 = vmatprep.subr.msk.mxu1 %vm25172_vm15, %v22605_v51  ;;  %v25174_v24 = vsel %vm22611_vm11, 4294967295, %v25173_v24 }
 0x19c   : > { %18776 = vmatmul.mubr.msk.f32.gmra.mrb[62].mxu1 %vm25169_vm5, %v22585_v4  ;;  %vm25175_vm5 = vmmov %vm25155_vm2 }
 0x19d   : > { %19648 = vmatmul.mubr.msk.f32.gmra.mrb[126].mxu0 %vm25170_vm4, %v10110_v28  ;;  %18778 = vmatprep.mubr.msk.f32.mxu1 %vm25171_vm3, %v2913_v55  ;;  %vm25176_vm4 = vmmov %vm25155_vm2  ;;  %v2917_v28 = vsel %vm22611_vm11, %v22615_v32, 0.0  ;;  %v11465_v55 = vsel %vm22078_vm1, %v22135_v47, 0.0  ;;  %v22650_v47 = vld [vmem:[#allocation2 + $0x247] sm:$0xff] }
 0x19e   : > { %19652 = vmatprep.mubr.msk.f32.mxu0 %vm25155_vm2, %v11461_v53  ;;  %v617_v53 = vadd.s32 576, %v21780_v6  ;;  %vm25177_vm3 = vmmov %vm25172_vm15 }
 0x19f   : > { %vm25178_vm15 = vmmov %vm25155_vm2 }
 0x1a0   : > { %18779 = vmatmul.mubr.msk.f32.gmra.mrb[64].mxu1 %vm25175_vm5, %v22600_v20  ;;  %vm25179_vm5 = vmmov %vm25155_vm2 }
 0x1a1   : > { %19653 = vmatmul.mubr.msk.f32.vlgmr.msra.gmra.mrb[0].mxu0 %vm25176_vm4, %v22122_v35  ;;  %18781 = vmatprep.mubr.msk.f32.mxu1 %vm25155_vm2, %v22607_v42  ;;  %v1181_v35 = vand.u32 31, %v617_v53  ;;  %vm25180_vm4 = vmmov %vm25155_vm2  ;;  %v621_v53 = vadd.s32 608, %v21780_v6 }
 0x1a2   : > { %19845 = vmatpush3.msk.msra.mxu0 %vm25177_vm3, %v22069_v57  ;;  %19655 = vmatprep.mubr.msk.f32.mxu0 %vm25178_vm15, %v22124_v37  ;;  %vm25181_vm3 = vmmov %vm25155_vm2  ;;  %v22642_v57 = vld [vmem:[#allocation2 + $0x22f] sm:$0xff]  ;;  %v22644_v37 = vld [vmem:[#allocation2 + $0x237] sm:$0xff] }
 0x1a3   : > { %vm22646_vm15 = vcmp.ne.s32.totalorder %v1181_v35, 0  ;;  %v1209_v35 = vand.u32 31, %v621_v53  ;;  %v625_v53 = vadd.s32 640, %v21780_v6 }
 0x1a4   : > { %18782 = vmatmul.mubr.msk.f32.gmra.mrb[66].mxu1 %vm25179_vm5, %v22626_v15  ;;  %v25183_v43 = vsel %vm22646_vm15, 4294967295, %v25182_v43  ;;  %vm25184_vm5 = vmmov %vm25155_vm2 }
 0x1a5   : > { %19656 = vmatmul.mubr.msk.f32.gmra.mrb[2].mxu0 %vm25180_vm4, %v22144_v50  ;;  %18784 = vmatprep.mubr.msk.f32.mxu1 %vm25181_vm3, %v2917_v28  ;;  %vm25185_vm4 = vmmov %vm25155_vm2  ;;  %v22661_v50 = vld [vmem:[#allocation2 + $0x23f] sm:$0xff]  ;;  %v2921_v28 = vsel %vm22646_vm15, %v22650_v47, 0.0  ;;  %vm22679_vm1 = vcmp.ne.s32.totalorder %v1209_v35, 0  ;;  %v1237_v35 = vand.u32 31, %v625_v53  ;;  %v629_v53 = vadd.s32 672, %v21780_v6 }
 0x1a6   : > { %19658 = vmatprep.mubr.msk.f32.mxu0 %vm25155_vm2, %v11465_v55  ;;  %vm25186_vm3 = vmmov %vm25155_vm2  ;;  %v11469_v55 = vsel %vm22102_vm14, %v22169_v9, 0.0  ;;  %v25191_v0 = vsel %vm22679_vm1, 4294967295, %v25190_v0  ;;  %v22683_v9 = vld [vmem:[#allocation2 + $0x267] sm:$0xff] }
 0x1a7   : > { %vm22712_vm14 = vcmp.ne.s32.totalorder %v1237_v35, 0  ;;  %v1265_v35 = vand.u32 31, %v629_v53  ;;  %v633_v53 = vadd.s32 704, %v21780_v6 }
 0x1a8   : > { %18785 = vmatmul.mubr.msk.f32.gmra.mrb[68].mxu1 %vm25184_vm5, %v22642_v57  ;;  %vm25187_vm5 = vmmov %vm25155_vm2  ;;  %v25199_v23 = vsel %vm22712_vm14, 4294967295, %v25198_v23 }
 0x1a9   : > { %19659 = vmatmul.mubr.msk.f32.gmra.mrb[4].mxu0 %vm25185_vm4, %v22156_v60  ;;  %18787 = vmatprep.mubr.msk.f32.mxu1 %vm25186_vm3, %v22644_v37  ;;  %vm25188_vm4 = vmmov %vm25155_vm2  ;;  %v22675_v60 = vld [vmem:[#allocation2 + $0x24f] sm:$0xff] }
 0x1aa   : > { %19661 = vmatprep.mubr.msk.f32.mxu0 %vm25155_vm2, %v22158_v63  ;;  %vm25189_vm3 = vmmov %vm25155_vm2  ;;  %v22677_v63 = vld [vmem:[#allocation2 + $0x257] sm:$0xff] }
 0x1ac   : > { %18788 = vmatmul.mubr.msk.f32.gmra.mrb[70].mxu1 %vm25187_vm5, %v22661_v50  ;;  %vm25192_vm5 = vmmov %vm25155_vm2 }
 0x1ad   : > { %19662 = vmatmul.mubr.msk.f32.gmra.mrb[6].mxu0 %vm25188_vm4, %v22178_v11  ;;  %18790 = vmatprep.mubr.msk.f32.mxu1 %vm25189_vm3, %v2921_v28  ;;  %vm25193_vm4 = vmmov %vm25155_vm2  ;;  %v22694_v11 = vld [vmem:[#allocation2 + $0x25f] sm:$0xff]  ;;  %v2925_v28 = vsel %vm22679_vm1, %v22683_v9, 0.0 }
 0x1ae   : > { %19664 = vmatprep.mubr.msk.f32.mxu0 %vm25155_vm2, %v11469_v55  ;;  %vm25194_vm3 = vmmov %vm25155_vm2  ;;  %v11473_v55 = vsel %vm22131_vm0, %v22203_v36, 0.0  ;;  %v22716_v36 = vld [vmem:[#allocation2 + $0x287] sm:$0xff]  ;;  %vm22745_vm0 = vcmp.ne.s32.totalorder %v1265_v35, 0  ;;  %v1293_v35 = vand.u32 31, %v633_v53  ;;  %v637_v53 = vadd.s32 736, %v21780_v6 }
 0x1af   : > { %v25207_v46 = vsel %vm22745_vm0, 4294967295, %v25206_v46 }
 0x1b0   : > { %18791 = vmatmul.mubr.msk.f32.gmra.mrb[72].mxu1 %vm25192_vm5, %v22675_v60  ;;  %vm25195_vm5 = vmmov %vm25155_vm2 }
 0x1b1   : > { %19665 = vmatmul.mubr.msk.f32.gmra.mrb[8].mxu0 %vm25193_vm4, %v22190_v22  ;;  %18793 = vmatprep.mubr.msk.f32.mxu1 %vm25194_vm3, %v22677_v63  ;;  %vm25196_vm4 = vmmov %vm25155_vm2  ;;  %v22708_v22 = vld [vmem:[#allocation2 + $0x26f] sm:$0xff] }
 0x1b2   : > { %19667 = vmatprep.mubr.msk.f32.mxu0 %vm25155_vm2, %v22192_v30  ;;  %vm25197_vm3 = vmmov %vm25155_vm2  ;;  %v22710_v30 = vld [vmem:[#allocation2 + $0x277] sm:$0xff] }
 0x1b4   : > { %18794 = vmatmul.mubr.msk.f32.gmra.mrb[74].mxu1 %vm25195_vm5, %v22694_v11  ;;  %vm25200_vm5 = vmmov %vm25155_vm2 }
 0x1b5   : > { %19668 = vmatmul.mubr.msk.f32.gmra.mrb[10].mxu0 %vm25196_vm4, %v22212_v44  ;;  %18796 = vmatprep.mubr.msk.f32.mxu1 %vm25197_vm3, %v2925_v28  ;;  %vm25201_vm4 = vmmov %vm25155_vm2  ;;  %v22727_v44 = vld [vmem:[#allocation2 + $0x27f] sm:$0xff]  ;;  %v2929_v28 = vsel %vm22712_vm14, %v22716_v36, 0.0 }
 0x1b6   : > { %19670 = vmatprep.mubr.msk.f32.mxu0 %vm25155_vm2, %v11473_v55  ;;  %vm25202_vm3 = vmmov %vm25155_vm2  ;;  %v11477_v55 = vsel %vm22165_vm9, %v22237_v12, 0.0  ;;  %v22749_v12 = vld [vmem:[#allocation2 + $0x2a7] sm:$0xff]  ;;  %vm22778_vm9 = vcmp.ne.s32.totalorder %v1293_v35, 0  ;;  %v1321_v35 = vand.u32 31, %v637_v53  ;;  %v641_v53 = vadd.s32 768, %v21780_v6 }
 0x1b7   : > { %v25215_v8 = vsel %vm22778_vm9, 4294967295, %v25214_v8 }
 0x1b8   : > { %18797 = vmatmul.mubr.msk.f32.gmra.mrb[76].mxu1 %vm25200_vm5, %v22708_v22  ;;  %vm25203_vm5 = vmmov %vm25155_vm2 }
 0x1b9   : > { %19671 = vmatmul.mubr.msk.f32.gmra.mrb[12].mxu0 %vm25201_vm4, %v22224_v56  ;;  %18799 = vmatprep.mubr.msk.f32.mxu1 %vm25202_vm3, %v22710_v30  ;;  %vm25204_vm4 = vmmov %vm25155_vm2  ;;  %v22741_v56 = vld [vmem:[#allocation2 + $0x28f] sm:$0xff] }
 0x1ba   : > { %19673 = vmatprep.mubr.msk.f32.mxu0 %vm25155_vm2, %v22226_v61  ;;  %vm25205_vm3 = vmmov %vm25155_vm2  ;;  %v22743_v61 = vld [vmem:[#allocation2 + $0x297] sm:$0xff] }
 0x1bc   : > { %18800 = vmatmul.mubr.msk.f32.gmra.mrb[78].mxu1 %vm25203_vm5, %v22727_v44  ;;  %vm25208_vm5 = vmmov %vm25155_vm2 }
 0x1bd   : > { %19674 = vmatmul.mubr.msk.f32.gmra.mrb[14].mxu0 %vm25204_vm4, %v22246_v18  ;;  %18802 = vmatprep.mubr.msk.f32.mxu1 %vm25205_vm3, %v2929_v28  ;;  %vm25209_vm4 = vmmov %vm25155_vm2  ;;  %v22760_v18 = vld [vmem:[#allocation2 + $0x29f] sm:$0xff]  ;;  %v2933_v28 = vsel %vm22745_vm0, %v22749_v12, 0.0 }
 0x1be   : > { %19676 = vmatprep.mubr.msk.f32.mxu0 %vm25155_vm2, %v11477_v55  ;;  %vm25210_vm3 = vmmov %vm25155_vm2  ;;  %v11481_v55 = vsel %vm22199_vm13, %v22271_v7, 0.0  ;;  %v22782_v7 = vld [vmem:[#allocation2 + $0x2c7] sm:$0xff]  ;;  %vm22811_vm13 = vcmp.ne.s32.totalorder %v1321_v35, 0  ;;  %v1349_v35 = vand.u32 31, %v641_v53  ;;  %v645_v53 = vadd.s32 800, %v21780_v6 }
 0x1bf   : > { %v25223_v33 = vsel %vm22811_vm13, 4294967295, %v25222_v33 }
 0x1c0   : > { %18803 = vmatmul.mubr.msk.f32.gmra.mrb[80].mxu1 %vm25208_vm5, %v22741_v56  ;;  %vm25211_vm5 = vmmov %vm25155_vm2 }
 0x1c1   : > { %19677 = vmatmul.mubr.msk.f32.gmra.mrb[16].mxu0 %vm25209_vm4, %v22258_v39  ;;  %18805 = vmatprep.mubr.msk.f32.mxu1 %vm25210_vm3, %v22743_v61  ;;  %vm25212_vm4 = vmmov %vm25155_vm2  ;;  %v22774_v39 = vld [vmem:[#allocation2 + $0x2af] sm:$0xff] }
 0x1c2   : > { %19679 = vmatprep.mubr.msk.f32.mxu0 %vm25155_vm2, %v22260_v49  ;;  %vm25213_vm3 = vmmov %vm25155_vm2  ;;  %v22776_v49 = vld [vmem:[#allocation2 + $0x2b7] sm:$0xff] }
 0x1c4   : > { %18806 = vmatmul.mubr.msk.f32.gmra.mrb[82].mxu1 %vm25211_vm5, %v22760_v18  ;;  %vm25216_vm5 = vmmov %vm25155_vm2 }
 0x1c5   : > { %19680 = vmatmul.mubr.msk.f32.gmra.mrb[18].mxu0 %vm25212_vm4, %v22280_v13  ;;  %18808 = vmatprep.mubr.msk.f32.mxu1 %vm25213_vm3, %v2933_v28  ;;  %vm25217_vm4 = vmmov %vm25155_vm2  ;;  %v22793_v13 = vld [vmem:[#allocation2 + $0x2bf] sm:$0xff]  ;;  %v2937_v28 = vsel %vm22778_vm9, %v22782_v7, 0.0 }
 0x1c6   : > { %19682 = vmatprep.mubr.msk.f32.mxu0 %vm25155_vm2, %v11481_v55  ;;  %vm25218_vm3 = vmmov %vm25155_vm2  ;;  %v11485_v55 = vsel %vm22233_vm12, %v22305_v21, 0.0  ;;  %v22815_v21 = vld [vmem:[#allocation2 + $0x2e7] sm:$0xff]  ;;  %vm22844_vm12 = vcmp.ne.s32.totalorder %v1349_v35, 0  ;;  %v1377_v35 = vand.u32 31, %v645_v53  ;;  %v649_v53 = vadd.s32 832, %v21780_v6 }
 0x1c7   : > { %v25231_v16 = vsel %vm22844_vm12, 4294967295, %v25230_v16 }
 0x1c8   : > { %18809 = vmatmul.mubr.msk.f32.gmra.mrb[84].mxu1 %vm25216_vm5, %v22774_v39  ;;  %vm25219_vm5 = vmmov %vm25155_vm2  ;;  %25232 = vst [vmem:[#allocation66_spill] sm:$0xff] %v25231_v16 }
 0x1c9   : > { %19683 = vmatmul.mubr.msk.f32.gmra.mrb[20].mxu0 %vm25217_vm4, %v22292_v45  ;;  %18811 = vmatprep.mubr.msk.f32.mxu1 %vm25218_vm3, %v22776_v49  ;;  %vm25220_vm4 = vmmov %vm25155_vm2  ;;  %v22807_v45 = vld [vmem:[#allocation2 + $0x2cf] sm:$0xff] }
 0x1ca   : > { %19685 = vmatprep.mubr.msk.f32.mxu0 %vm25155_vm2, %v22294_v54  ;;  %vm25221_vm3 = vmmov %vm25155_vm2  ;;  %v22809_v54 = vld [vmem:[#allocation2 + $0x2d7] sm:$0xff] }
 0x1cc   : > { %18812 = vmatmul.mubr.msk.f32.gmra.mrb[86].mxu1 %vm25219_vm5, %v22793_v13  ;;  %vm25224_vm5 = vmmov %vm25155_vm2 }
 0x1cd   : > { %19686 = vmatmul.mubr.msk.f32.gmra.mrb[22].mxu0 %vm25220_vm4, %v22314_v26  ;;  %18814 = vmatprep.mubr.msk.f32.mxu1 %vm25221_vm3, %v2937_v28  ;;  %vm25225_vm4 = vmmov %vm25155_vm2  ;;  %v22826_v26 = vld [vmem:[#allocation2 + $0x2df] sm:$0xff]  ;;  %v2941_v28 = vsel %vm22811_vm13, %v22815_v21, 0.0 }
 0x1ce   : > { %19688 = vmatprep.mubr.msk.f32.mxu0 %vm25155_vm2, %v11485_v55  ;;  %vm25226_vm3 = vmmov %vm25155_vm2  ;;  %v11489_v55 = vsel %vm22267_vm10, %v22339_v31, 0.0  ;;  %v22848_v31 = vld [vmem:[#allocation2 + $0x307] sm:$0xff]  ;;  %vm22877_vm10 = vcmp.ne.s32.totalorder %v1377_v35, 0  ;;  %v1405_v35 = vand.u32 31, %v649_v53  ;;  %v653_v53 = vadd.s32 864, %v21780_v6 }
 0x1cf   : > { %v25240_v2 = vsel %vm22877_vm10, 4294967295, %v25239_v2 }
 0x1d0   : > { %18815 = vmatmul.mubr.msk.f32.gmra.mrb[88].mxu1 %vm25224_vm5, %v22807_v45  ;;  %vm25227_vm5 = vmmov %vm25155_vm2  ;;  %25241 = vst [vmem:[#allocation67_spill] sm:$0xff] %v25240_v2  ;;  %v25262_v2 = vld [vmem:[#allocation39_spill] sm:$0xff] }
 0x1d1   : > { %19689 = vmatmul.mubr.msk.f32.gmra.mrb[24].mxu0 %vm25225_vm4, %v22326_v52  ;;  %18817 = vmatprep.mubr.msk.f32.mxu1 %vm25226_vm3, %v22809_v54  ;;  %vm25228_vm4 = vmmov %vm25155_vm2  ;;  %v22840_v52 = vld [vmem:[#allocation2 + $0x2ef] sm:$0xff] }
 0x1d2   : > { %19691 = vmatprep.mubr.msk.f32.mxu0 %vm25155_vm2, %v22328_v58  ;;  %vm25229_vm3 = vmmov %vm25155_vm2  ;;  %v22842_v58 = vld [vmem:[#allocation2 + $0x2f7] sm:$0xff] }
 0x1d4   : > { %18818 = vmatmul.mubr.msk.f32.gmra.mrb[90].mxu1 %vm25227_vm5, %v22826_v26  ;;  %vm25233_vm5 = vmmov %vm25155_vm2 }
 0x1d5   : > { %19692 = vmatmul.mubr.msk.f32.gmra.mrb[26].mxu0 %vm25228_vm4, %v22348_v40  ;;  %18820 = vmatprep.mubr.msk.f32.mxu1 %vm25229_vm3, %v2941_v28  ;;  %vm25234_vm4 = vmmov %vm25155_vm2  ;;  %v22859_v40 = vld [vmem:[#allocation2 + $0x2ff] sm:$0xff]  ;;  %v2945_v28 = vsel %vm22844_vm12, %v22848_v31, 0.0 }
 0x1d6   : > { %19694 = vmatprep.mubr.msk.f32.mxu0 %vm25155_vm2, %v11489_v55  ;;  %vm25235_vm3 = vmmov %vm25155_vm2  ;;  %v11493_v55 = vsel %vm22301_vm8, %v22373_v19, 0.0  ;;  %v22881_v19 = vld [vmem:[#allocation2 + $0x327] sm:$0xff]  ;;  %vm22910_vm8 = vcmp.ne.s32.totalorder %v1405_v35, 0 }
 0x1d7   : > { %v25252_v3 = vsel %vm22910_vm8, 4294967295, %v25251_v3  ;;  %vm25341_vm12 = vmmov %vm25155_vm2 }
 0x1d8   : > { %18821 = vmatmul.mubr.msk.f32.gmra.mrb[92].mxu1 %vm25233_vm5, %v22840_v52  ;;  %vm25236_vm5 = vmmov %vm25155_vm2  ;;  %25253 = vst [vmem:[#allocation69_spill] sm:$0xff] %v25252_v3  ;;  %v25270_v3 = vmov 0 }
 0x1d9   : > { %19695 = vmatmul.mubr.msk.f32.gmra.mrb[28].mxu0 %vm25234_vm4, %v22360_v5  ;;  %18823 = vmatprep.mubr.msk.f32.mxu1 %vm25235_vm3, %v22842_v58  ;;  %vm25237_vm4 = vmmov %vm25155_vm2  ;;  %v22873_v5 = vld [vmem:[#allocation2 + $0x30f] sm:$0xff] }
 0x1da   : > { %19697 = vmatprep.mubr.msk.f32.mxu0 %vm25155_vm2, %v22362_v10  ;;  %vm25238_vm3 = vmmov %vm25155_vm2  ;;  %v22875_v10 = vld [vmem:[#allocation2 + $0x317] sm:$0xff] }
 0x1dc   : > { %18824 = vmatmul.mubr.msk.f32.gmra.mrb[94].mxu1 %vm25236_vm5, %v22859_v40  ;;  %vm25242_vm5 = vmmov %vm25155_vm2 }
 0x1dd   : > { %19698 = vmatmul.mubr.msk.f32.gmra.mrb[30].mxu0 %vm25237_vm4, %v22382_v62  ;;  %18826 = vmatprep.mubr.msk.f32.mxu1 %vm25238_vm3, %v2945_v28  ;;  %vm25243_vm4 = vmmov %vm25155_vm2  ;;  %v22892_v62 = vld [vmem:[#allocation2 + $0x31f] sm:$0xff]  ;;  %v2949_v28 = vsel %vm22877_vm10, %v22881_v19, 0.0 }
 0x1de   : > { %19700 = vmatprep.mubr.msk.f32.mxu0 %vm25155_vm2, %v11493_v55  ;;  %vm25244_vm3 = vmmov %vm25155_vm2  ;;  %v11497_v55 = vsel %vm22335_vm7, %v22407_v48, 0.0  ;;  %v22914_v48 = vld [vmem:[#allocation2 + $0x347] sm:$0xff]  ;;  %vm25263_vm7 = vnez %v25262_v2 }
 0x1df   : > { %25254 = vst [vmem:[#allocation70_spill] sm:$0xff] %v22914_v48  ;;  %v2953_v35 = vsel %vm22910_vm8, %v22914_v48, 0.0  ;;  %v11501_v16 = vsel %vm25263_vm7, %v25261_v38, 0.0  ;;  %v22947_v38 = vld [vmem:[#allocation2 + $0x367] sm:$0xff]  ;;  %vm25340_vm10 = vmmov %vm25155_vm2 }
 0x1e0   : > { %18827 = vmatmul.mubr.msk.f32.gmra.mrb[96].mxu1 %vm25242_vm5, %v22873_v5  ;;  %vm25245_vm5 = vmmov %vm25155_vm2  ;;  %25273 = vst [vmem:[#allocation71_spill] sm:$0xff] %v22947_v38  ;;  %v25280_v2 = vld [vmem:[#allocation53_spill] sm:$0xff] }
 0x1e1   : > { %19701 = vmatmul.mubr.msk.f32.gmra.mrb[32].mxu0 %vm25243_vm4, %v22394_v59  ;;  %18829 = vmatprep.mubr.msk.f32.mxu1 %vm25244_vm3, %v22875_v10  ;;  %v25246_v59 = vld [vmem:[#allocation42_spill] sm:$0xff]  ;;  %vm25247_vm4 = vmmov %vm25155_vm2 }
 0x1e2   : > { %19703 = vmatprep.mubr.msk.f32.mxu0 %vm25155_vm2, %v22396_v25  ;;  %vm25248_vm3 = vmmov %vm25155_vm2  ;;  %v22906_v25 = vld [vmem:[#allocation2 + $0x32f] sm:$0xff] }
 0x1e3   : > { %25249 = vst [vmem:[#allocation42_spill] sm:$0xff] %v22906_v25 }
 0x1e4   : > { %18830 = vmatmul.mubr.msk.f32.gmra.mrb[98].mxu1 %vm25245_vm5, %v22892_v62  ;;  %vm25255_vm5 = vmmov %vm25155_vm2 }
 0x1e5   : > { %19704 = vmatmul.mubr.msk.f32.gmra.mrb[34].mxu0 %vm25247_vm4, %v25246_v59  ;;  %18832 = vmatprep.mubr.msk.f32.mxu1 %vm25248_vm3, %v2949_v28  ;;  %v25256_v59 = vld [vmem:[#allocation43_spill] sm:$0xff]  ;;  %vm25257_vm4 = vmmov %vm25155_vm2  ;;  %v25259_v28 = vld [vmem:[#allocation44_spill] sm:$0xff] }
 0x1e6   : > { %19706 = vmatprep.mubr.msk.f32.mxu0 %vm25155_vm2, %v11497_v55  ;;  %vm25258_vm3 = vmmov %vm25155_vm2  ;;  %v22925_v55 = vld [vmem:[#allocation2 + $0x33f] sm:$0xff] }
 0x1e7   : > { %25260 = vst [vmem:[#allocation43_spill] sm:$0xff] %v22925_v55 }
 0x1e8   : > { %18833 = vmatmul.mubr.msk.f32.gmra.mrb[100].mxu1 %vm25255_vm5, %v22906_v25  ;;  %v1433_v25 = vand.u32 31, %v653_v53  ;;  %vm25264_vm5 = vmmov %vm25155_vm2  ;;  %v657_v53 = vadd.s32 896, %v21780_v6 }
 0x1e9   : > { %19707 = vmatmul.mubr.msk.f32.gmra.mrb[36].mxu0 %vm25257_vm4, %v25256_v59  ;;  %18835 = vmatprep.mubr.msk.f32.mxu1 %vm25258_vm3, %v22908_v29  ;;  %v25265_v59 = vld [vmem:[#allocation48_spill] sm:$0xff]  ;;  %vm25266_vm4 = vmmov %vm25155_vm2 }
 0x1ea   : > { %19709 = vmatprep.mubr.msk.f32.mxu0 %vm25155_vm2, %v25259_v28  ;;  %vm25267_vm3 = vmmov %vm25155_vm2  ;;  %v22939_v28 = vld [vmem:[#allocation2 + $0x34f] sm:$0xff]  ;;  %v22941_v29 = vld [vmem:[#allocation2 + $0x357] sm:$0xff]  ;;  %vm22943_vm8 = vcmp.ne.s32.totalorder %v1433_v25, 0 }
 0x1eb   : > { %25268 = vst [vmem:[#allocation44_spill] sm:$0xff] %v22939_v28  ;;  %25269 = vst [vmem:[#allocation47_spill] sm:$0xff] %v22941_v29  ;;  %v25271_v3 = vsel %vm22943_vm8, 4294967295, %v25270_v3  ;;  %v22958_v25 = vld [vmem:[#allocation2 + $0x35f] sm:$0xff] }
 0x1ec   : > { %18836 = vmatmul.mubr.msk.f32.gmra.mrb[102].mxu1 %vm25264_vm5, %v22925_v55  ;;  %25272 = vst [vmem:[#allocation48_spill] sm:$0xff] %v25271_v3  ;;  %vm25274_vm5 = vmmov %vm25155_vm2  ;;  %v25281_v55 = vld [vmem:[#allocation41_spill] sm:$0xff]  ;;  %v25289_v3 = vmov 0 }
 0x1ed   : > { %19710 = vmatmul.mubr.msk.f32.gmra.mrb[38].mxu0 %vm25266_vm4, %v25265_v59  ;;  %18838 = vmatprep.mubr.msk.f32.mxu1 %vm25267_vm3, %v2953_v35  ;;  %v25275_v59 = vld [vmem:[#allocation49_spill] sm:$0xff]  ;;  %vm25276_vm4 = vmmov %vm25155_vm2  ;;  %v2957_v35 = vsel %vm22943_vm8, %v22947_v38, 0.0  ;;  %vm25282_vm7 = vnez %v25281_v55  ;;  %v25297_v55 = vld [vmem:[#allocation59_spill] sm:$0xff] }
 0x1ee   : > { %19712 = vmatprep.mubr.msk.f32.mxu0 %vm25155_vm2, %v11501_v16  ;;  %vm25277_vm3 = vmmov %vm25155_vm2  ;;  %v25278_v16 = vld [vmem:[#allocation50_spill] sm:$0xff]  ;;  %25279 = vst [vmem:[#allocation49_spill] sm:$0xff] %v22958_v25  ;;  %v11505_v48 = vsel %vm25282_vm7, %v25280_v2, 0.0 }
 0x1ef   : > { %v22980_v2 = vld [vmem:[#allocation2 + $0x387] sm:$0xff] }
 0x1f0   : > { %18839 = vmatmul.mubr.msk.f32.gmra.mrb[104].mxu1 %vm25274_vm5, %v22939_v28  ;;  %v1461_v28 = vand.u32 31, %v657_v53  ;;  %vm25283_vm5 = vmmov %vm25155_vm2  ;;  %v661_v53 = vadd.s32 928, %v21780_v6 }
 0x1f1   : > { %19713 = vmatmul.mubr.msk.f32.gmra.mrb[40].mxu0 %vm25276_vm4, %v25275_v59  ;;  %18841 = vmatprep.mubr.msk.f32.mxu1 %vm25277_vm3, %v22941_v29  ;;  %v25284_v59 = vld [vmem:[#allocation54_spill] sm:$0xff]  ;;  %vm25285_vm4 = vmmov %vm25155_vm2  ;;  %v22974_v29 = vld [vmem:[#allocation2 + $0x377] sm:$0xff] }
 0x1f2   : > { %19715 = vmatprep.mubr.msk.f32.mxu0 %vm25155_vm2, %v25278_v16  ;;  %vm25286_vm3 = vmmov %vm25155_vm2  ;;  %v22972_v16 = vld [vmem:[#allocation2 + $0x36f] sm:$0xff]  ;;  %25288 = vst [vmem:[#allocation53_spill] sm:$0xff] %v22974_v29  ;;  %vm22976_vm8 = vcmp.ne.s32.totalorder %v1461_v28, 0  ;;  %v22991_v28 = vld [vmem:[#allocation2 + $0x37f] sm:$0xff] }
 0x1f3   : > { %25287 = vst [vmem:[#allocation50_spill] sm:$0xff] %v22972_v16  ;;  %v25290_v3 = vsel %vm22976_vm8, 4294967295, %v25289_v3 }
 0x1f4   : > { %18842 = vmatmul.mubr.msk.f32.gmra.mrb[106].mxu1 %vm25283_vm5, %v22958_v25  ;;  %25291 = vst [vmem:[#allocation54_spill] sm:$0xff] %v25290_v3  ;;  %vm25292_vm5 = vmmov %vm25155_vm2  ;;  %v25298_v25 = vld [vmem:[#allocation46_spill] sm:$0xff]  ;;  %v25305_v3 = vmov 0 }
 0x1f5   : > { %19716 = vmatmul.mubr.msk.f32.gmra.mrb[42].mxu0 %vm25285_vm4, %v25284_v59  ;;  %18844 = vmatprep.mubr.msk.f32.mxu1 %vm25286_vm3, %v2957_v35  ;;  %v25293_v59 = vld [vmem:[#allocation55_spill] sm:$0xff]  ;;  %vm25294_vm4 = vmmov %vm25155_vm2  ;;  %v2961_v35 = vsel %vm22976_vm8, %v22980_v2, 0.0  ;;  %vm25299_vm7 = vnez %v25298_v25 }
 0x1f6   : > { %19718 = vmatprep.mubr.msk.f32.mxu0 %vm25155_vm2, %v11505_v48  ;;  %vm25295_vm3 = vmmov %vm25155_vm2  ;;  %v25296_v48 = vld [vmem:[#allocation56_spill] sm:$0xff]  ;;  %v11509_v38 = vsel %vm25299_vm7, %v25297_v55, 0.0  ;;  %v23013_v55 = vld [vmem:[#allocation2 + $0x3a7] sm:$0xff] }
 0x1f8   : > { %18845 = vmatmul.mubr.msk.f32.gmra.mrb[108].mxu1 %vm25292_vm5, %v22972_v16  ;;  %v1489_v16 = vand.u32 31, %v661_v53  ;;  %vm25300_vm5 = vmmov %vm25155_vm2  ;;  %v665_v53 = vadd.s32 960, %v21780_v6 }
 0x1f9   : > { %19719 = vmatmul.mubr.msk.f32.gmra.mrb[44].mxu0 %vm25294_vm4, %v25293_v59  ;;  %18847 = vmatprep.mubr.msk.f32.mxu1 %vm25295_vm3, %v22974_v29  ;;  %v25301_v59 = vld [vmem:[#allocation60_spill] sm:$0xff]  ;;  %vm25302_vm4 = vmmov %vm25155_vm2 }
 0x1fa   : > { %19721 = vmatprep.mubr.msk.f32.mxu0 %vm25155_vm2, %v25296_v48  ;;  %vm25303_vm3 = vmmov %vm25155_vm2  ;;  %v23005_v48 = vld [vmem:[#allocation2 + $0x38f] sm:$0xff]  ;;  %v23007_v29 = vld [vmem:[#allocation2 + $0x397] sm:$0xff]  ;;  %vm23009_vm8 = vcmp.ne.s32.totalorder %v1489_v16, 0  ;;  %v1517_v25 = vand.u32 31, %v665_v53  ;;  %v669_v53 = vadd.s32 992, %v21780_v6 }
 0x1fb   : > { %25304 = vst [vmem:[#allocation55_spill] sm:$0xff] %v23007_v29  ;;  %v25306_v3 = vsel %vm23009_vm8, 4294967295, %v25305_v3  ;;  %v2965_v16 = vsel %vm23009_vm8, %v23013_v55, 0.0  ;;  %v25324_v6 = vld [vmem:[#allocation58_spill] sm:$0xff] }
 0x1fc   : > { %18848 = vmatmul.mubr.msk.f32.gmra.mrb[110].mxu1 %vm25300_vm5, %v22991_v28  ;;  %25307 = vst [vmem:[#allocation56_spill] sm:$0xff] %v25306_v3  ;;  %vm25308_vm5 = vmmov %vm25155_vm2  ;;  %vm23042_vm8 = vcmp.ne.s32.totalorder %v1517_v25, 0  ;;  %v25317_v3 = vmov 0  ;;  %v23057_v25 = vld [vmem:[#allocation2 + $0x3bf] sm:$0xff] }
 0x1fd   : > { %19722 = vmatmul.mubr.msk.f32.gmra.mrb[46].mxu0 %vm25302_vm4, %v25301_v59  ;;  %18850 = vmatprep.mubr.msk.f32.mxu1 %vm25303_vm3, %v2961_v35  ;;  %vm25309_vm4 = vmmov %vm25155_vm2  ;;  %v25311_v35 = vld [vmem:[#allocation52_spill] sm:$0xff]  ;;  %v25318_v3 = vsel %vm23042_vm8, 4294967295, %v25317_v3 }
 0x1fe   : > { %19724 = vmatprep.mubr.msk.f32.mxu0 %vm25155_vm2, %v11509_v38  ;;  %vm25310_vm3 = vmmov %vm25155_vm2  ;;  %v23024_v38 = vld [vmem:[#allocation2 + $0x39f] sm:$0xff]  ;;  %vm25312_vm7 = vnez %v25311_v35  ;;  %25319 = vst [vmem:[#allocation59_spill] sm:$0xff] %v25318_v3  ;;  %v1545_v35 = vand.u32 31, %v669_v53  ;;  %v537_v53 = vld [vmem:[%s21389_s8 + $0x28] sm:$0xff] }
 0x1ff   : > { %v11513_v59 = vsel %vm25312_vm7, %v22543_v34, 0.0  ;;  %v23046_v34 = vld [vmem:[#allocation2 + $0x3c7] sm:$0xff]  ;;  %vm25325_vm7 = vnez %v25324_v6  ;;  %v25329_v6 = vmov 0  ;;  %v538_v3 = vld [vmem:[%s21389_s8 + $0x30] sm:$0xff] }
 0x200   : > { %18851 = vmatmul.mubr.msk.f32.gmra.mrb[112].mxu1 %vm25308_vm5, %v23005_v48  ;;  %vm25313_vm5 = vmmov %vm25155_vm2 }
 0x201   : > { %19725 = vmatmul.mubr.msk.f32.gmra.mrb[48].mxu0 %vm25309_vm4, %v22530_v17  ;;  %18853 = vmatprep.mubr.msk.f32.mxu1 %vm25310_vm3, %v23007_v29  ;;  %v25314_v17 = vld [vmem:[#allocation63_spill] sm:$0xff]  ;;  %vm25315_vm4 = vmmov %vm25155_vm2 }
 0x202   : > { %19727 = vmatprep.mubr.msk.f32.mxu0 %vm25155_vm2, %v22532_v1  ;;  %vm25316_vm3 = vmmov %vm25155_vm2  ;;  %v23038_v1 = vld [vmem:[#allocation2 + $0x3af] sm:$0xff]  ;;  %v23040_v29 = vld [vmem:[#allocation2 + $0x3b7] sm:$0xff] }
 0x204   : > { %18854 = vmatmul.mubr.msk.f32.gmra.mrb[114].mxu1 %vm25313_vm5, %v23024_v38  ;;  %vm25320_vm5 = vmmov %vm25155_vm2 }
 0x205   : > { %19728 = vmatmul.mubr.msk.f32.gmra.mrb[50].mxu0 %vm25315_vm4, %v25314_v17  ;;  %18856 = vmatprep.mubr.msk.f32.mxu1 %vm25316_vm3, %v2965_v16  ;;  %v25321_v17 = vld [vmem:[#allocation64_spill] sm:$0xff]  ;;  %vm25322_vm4 = vmmov %vm25155_vm2  ;;  %v2969_v16 = vsel %vm23042_vm8, %v23046_v34, 0.0  ;;  %vm23075_vm8 = vcmp.ne.s32.totalorder %v1545_v35, 0 }
 0x206   : > { %19730 = vmatprep.mubr.msk.f32.mxu0 %vm25155_vm2, %v11513_v59  ;;  %vm25323_vm3 = vmmov %vm25155_vm2  ;;  %v11517_v59 = vsel %vm25325_vm7, %v22576_v27, 0.0  ;;  %v25330_v6 = vsel %vm23075_vm8, 4294967295, %v25329_v6  ;;  %v23079_v27 = vld [vmem:[#allocation2 + $0x3e7] sm:$0xff] }
 0x207   : > { %vm25334_vm7 = vmmov %vm25155_vm2  ;;  %v2973_v35 = vsel %vm23075_vm8, %v23079_v27, 0.0 }
 0x208   : > { %18857 = vmatmul.mubr.msk.f32.gmra.mrb[116].mxu1 %vm25320_vm5, %v23038_v1  ;;  %vm25326_vm5 = vmmov %vm25155_vm2 }
 0x209   : > { %19731 = vmatmul.mubr.msk.f32.gmra.mrb[52].mxu0 %vm25322_vm4, %v25321_v17  ;;  %18859 = vmatprep.mubr.msk.f32.mxu1 %vm25323_vm3, %v23040_v29  ;;  %vm25327_vm4 = vmmov %vm25155_vm2  ;;  %v23073_v17 = vld [vmem:[#allocation2 + $0x3d7] sm:$0xff] }
 0x20a   : > { %19733 = vmatprep.mubr.msk.f32.mxu0 %vm25155_vm2, %v22566_v14  ;;  %vm25328_vm3 = vmmov %vm25155_vm2  ;;  %v23071_v14 = vld [vmem:[#allocation2 + $0x3cf] sm:$0xff] }
 0x20c   : > { %18860 = vmatmul.mubr.msk.f32.gmra.mrb[118].mxu1 %vm25326_vm5, %v23057_v25  ;;  %vm25331_vm5 = vmmov %vm25155_vm2 }
 0x20d   : > { %19734 = vmatmul.mubr.msk.f32.gmra.mrb[54].mxu0 %vm25327_vm4, %v22585_v4  ;;  %18862 = vmatprep.mubr.msk.f32.mxu1 %vm25328_vm3, %v2969_v16  ;;  %vm25332_vm4 = vmmov %vm25155_vm2  ;;  %v23091_v4 = vld [vmem:[#allocation2 + $0x3df] sm:$0xff]  ;;  %v25335_v16 = vld [vmem:[#allocation62_spill] sm:$0xff] }
 0x20e   : > { %19736 = vmatprep.mubr.msk.f32.mxu0 %vm25155_vm2, %v11517_v59  ;;  %vm25333_vm3 = vmmov %vm25155_vm2 }
 0x20f   : > { %541 = vst.msk [vmem:[#allocation2 + $0x430] sm:$0xff] %vm25333_vm3, %v537_v53  ;;  %vm25338_vm3 = vmmov %vm25155_vm2  ;;  %v23111_v53 = vld [vmem:[#allocation2 + $0x3f7] sm:$0xff] }
 0x210   : > { %18863 = vmatmul.mubr.msk.f32.gmra.mrb[120].mxu1 %vm25331_vm5, %v23071_v14  ;;  %vm25336_vm5 = vnez %v25335_v16 }
 0x211   : > { %19737 = vmatmul.mubr.msk.f32.gmra.mrb[56].mxu0 %vm25332_vm4, %v22600_v20  ;;  %18865 = vmatprep.mubr.msk.f32.mxu1 %vm25155_vm2, %v23073_v17  ;;  %v11521_v59 = vsel %vm25336_vm5, %v22615_v32, 0.0  ;;  %vm25337_vm4 = vmmov %vm25155_vm2  ;;  %v539_v20 = vld [vmem:[%s21389_s8 + $0x38] sm:$0xff]  ;;  %v5293_v32 = vld [vmem:[#allocation2 + $0x9] sm:$0xff] }
 0x212   : > { %19739 = vmatprep.mubr.msk.f32.mxu0 %vm25334_vm7, %v22607_v42  ;;  %542 = vst.msk [vmem:[#allocation2 + $0x438] sm:$0xff] %vm25337_vm4, %v538_v3  ;;  %vm25339_vm7 = vmmov %vm25155_vm2  ;;  %v23109_v42 = vld [vmem:[#allocation2 + $0x3ef] sm:$0xff]  ;;  %v23121_v3 = vld [vmem:[#allocation2 + $0x3ff] sm:$0xff] }
 0x213   : > { %543 = vst.msk [vmem:[#allocation2 + $0x440] sm:$0xff] %vm25339_vm7, %v539_v20  ;;  %vm25342_vm5 = vmmov %vm25155_vm2  ;;  %v5297_v20 = vld [vmem:[#allocation2 + $0x29] sm:$0xff] }
 0x214   : > { %18866 = vmatmul.mubr.msk.f32.gmra.mrb[122].mxu1 %vm25338_vm3, %v23091_v4  ;;  %vm25343_vm4 = vmmov %vm25155_vm2 }
 0x215   : > { %19740 = vmatmul.mubr.msk.f32.gmra.mrb[58].mxu0 %vm25155_vm2, %v22626_v15  ;;  %18868 = vmatprep.mubr.msk.f32.mxu1 %vm25340_vm10, %v2973_v35  ;;  %vm25344_vm3 = vmmov %vm25155_vm2  ;;  %v11525_v15 = vsel %vm22572_vm6, %v22650_v47, 0.0  ;;  %v5295_v35 = vld [vmem:[#allocation2 + $0x19] sm:$0xff]  ;;  %v25353_v47 = vld [vmem:[#allocation3_spill] sm:$0xff] }
 0x216   : > { %19742 = vmatprep.mubr.msk.f32.mxu0 %vm25341_vm12, %v11521_v59  ;;  %vm25345_vm12 = vmmov %vm25155_vm2  ;;  %v5296_v59 = vld [vmem:[#allocation2 + $0x21] sm:$0xff] }
 0x217   : > { %vm25346_vm10 = vmmov %vm25155_vm2 }
 0x218   : > { %18869 = vmatmul.mubr.msk.f32.gmra.mrb[124].mxu1 %vm25342_vm5, %v23109_v42  ;;  %vm25347_vm5 = vmmov %vm25155_vm2 }
 0x219   : > { %19743 = vmatmul.mubr.msk.f32.gmra.mrb[60].mxu0 %vm25343_vm4, %v22642_v57  ;;  %18871 = vmatprep.mubr.msk.f32.mxu1 %vm25344_vm3, %v23111_v53  ;;  %vm25348_vm7 = vmmov %vm25155_vm2  ;;  %v5294_v57 = vld [vmem:[#allocation2 + $0x11] sm:$0xff]  ;;  %vm25349_vm4 = vcmask 1042432  }
 0x21a   : > { %19745 = vmatprep.mubr.msk.f32.mxu0 %vm25155_vm2, %v22644_v37  ;;  %v23135_v37 = vld [vmem:[%s24671_s2 + $0x20] sm:$0x7]  ;;  %vm25350_vm3 = vmmov %vm25155_vm2 }
 0x21b   : > { %20038 = vmatprep.subr.msk.mxu0 %vm25349_vm4, %v23135_v37 }
 0x21c   : > { %18872 = vmatmul.mubr.msk.f32.gmra.mrb[126].mxu1 %vm25345_vm12, %v23121_v3  ;;  %vm25351_vm12 = vmmov %vm25349_vm4 }
 0x21d   : > { %19746 = vmatmul.mubr.msk.f32.gmra.mrb[62].mxu0 %vm25346_vm10, %v22661_v50  ;;  %18876 = vmatprep.mubr.msk.f32.mxu1 %vm25347_vm5, %v5293_v32  ;;  %vm25352_vm10 = vmmov %vm25155_vm2  ;;  %vm25354_vm5 = vnez %v25353_v47  ;;  %v11529_v32 = vsel %vm22611_vm11, %v22683_v9, 0.0  ;;  %v5300_v9 = vld [vmem:[#allocation2 + $0x41] sm:$0xff] }
 0x21e   : > { %19748 = vmatprep.mubr.msk.f32.mxu0 %vm25348_vm7, %v11525_v15  ;;  %v5680_v50 = vsel %vm25354_vm5, %v5296_v59, 0.0  ;;  %vm25355_vm7 = vmmov %vm25155_vm2  ;;  %v25363_v15 = vld [vmem:[#allocation4_spill] sm:$0xff] }
 0x21f   : > { %vm25360_vm11 = vmmov %vm25155_vm2  ;;  %v5303_v59 = vld [vmem:[#allocation2 + $0x59] sm:$0xff] }
 0x220   : > { %18877 = vmatmul.mubr.msk.f32.vlgmr.msra.gmra.mrb[0].mxu1 %vm25350_vm3, %v5294_v57  ;;  %vm25356_vm3 = vmmov %vm25155_vm2  ;;  %v5301_v57 = vld [vmem:[#allocation2 + $0x49] sm:$0xff] }
 0x221   : > { %19749 = vmatmul.mubr.msk.f32.gmra.mrb[64].mxu0 %vm25155_vm2, %v22675_v60  ;;  %19069 = vmatpush3.msk.msra.mxu1 %vm25351_vm12, %v22605_v51  ;;  %v23155_v60 = vld [vmem:[%s24671_s2 + $0x10] sm:$0x7]  ;;  %vm25357_vm12 = vmmov %vm25155_vm2 }
 0x222   : > { %18879 = vmatprep.mubr.msk.f32.mxu1 %vm25352_vm10, %v5295_v35  ;;  %19751 = vmatprep.mubr.msk.f32.mxu0 %vm25355_vm7, %v22677_v63  ;;  %vm25358_vm10 = vmmov %vm25155_vm2  ;;  %v5298_v51 = vld [vmem:[#allocation2 + $0x31] sm:$0xff]  ;;  %v5299_v63 = vld [vmem:[#allocation2 + $0x39] sm:$0xff]  ;;  %v11533_v35 = vsel %vm22646_vm15, %v22716_v36, 0.0 }
 0x223   : > { %20232 = vmatprep.subr.msk.mxu1 %vm25349_vm4, %v23155_v60  ;;  %vm25359_vm7 = vmmov %vm25155_vm2  ;;  %v25372_v36 = vld [vmem:[#allocation5_spill] sm:$0xff] }
 0x224   : > { %18880 = vmatmul.mubr.msk.f32.gmra.mrb[2].mxu1 %vm25356_vm3, %v5680_v50  ;;  %vm25361_vm5 = vmmov %vm25155_vm2  ;;  %vm25364_vm3 = vnez %v25363_v15  ;;  %v5305_v50 = vld [vmem:[#allocation2 + $0x69] sm:$0xff] }
 0x225   : > { %19752 = vmatmul.mubr.msk.f32.gmra.mrb[66].mxu0 %vm25155_vm2, %v22694_v11  ;;  %18882 = vmatprep.mubr.msk.f32.mxu1 %vm25357_vm12, %v5297_v20  ;;  %vm25362_vm4 = vmmov %vm25155_vm2  ;;  %v5684_v11 = vsel %vm25364_vm3, %v5300_v9, 0.0  ;;  %v11537_v20 = vsel %vm22679_vm1, %v22749_v12, 0.0  ;;  %v25381_v12 = vld [vmem:[#allocation6_spill] sm:$0xff]  ;;  %v5311_v9 = vld [vmem:[#allocation2 + $0x99] sm:$0xff] }
 0x226   : > { %19754 = vmatprep.mubr.msk.f32.mxu0 %vm25358_vm10, %v11529_v32  ;;  %vm25365_vm12 = vmmov %vm25155_vm2  ;;  %v5307_v32 = vld [vmem:[#allocation2 + $0x79] sm:$0xff] }
 0x227   : > { %vm25366_vm10 = vmmov %vm25155_vm2 }
 0x228   : > { %18883 = vmatmul.mubr.msk.f32.gmra.mrb[4].mxu1 %vm25359_vm7, %v5298_v51  ;;  %vm25369_vm7 = vmmov %vm25155_vm2  ;;  %v5309_v51 = vld [vmem:[#allocation2 + $0x89] sm:$0xff] }
 0x229   : > { %19755 = vmatmul.mubr.msk.f32.gmra.mrb[68].mxu0 %vm25360_vm11, %v22708_v22  ;;  %18885 = vmatprep.mubr.msk.f32.mxu1 %vm25361_vm5, %v5299_v63  ;;  %vm25367_vm11 = vmmov %vm25155_vm2  ;;  %v5302_v22 = vld [vmem:[#allocation2 + $0x51] sm:$0xff]  ;;  %v11541_v63 = vsel %vm22712_vm14, %v22782_v7, 0.0 }
 0x22a   : > { %19757 = vmatprep.mubr.msk.f32.mxu0 %vm25362_vm4, %v22710_v30  ;;  %v5304_v30 = vld [vmem:[#allocation2 + $0x61] sm:$0xff]  ;;  %vm25368_vm5 = vmmov %vm25155_vm2  ;;  %v25390_v7 = vld [vmem:[#allocation7_spill] sm:$0xff] }
 0x22b   : > { %vm25370_vm4 = vmmov %vm25155_vm2 }
 0x22c   : > { %18886 = vmatmul.mubr.msk.f32.gmra.mrb[6].mxu1 %vm25155_vm2, %v5684_v11  ;;  %vm25371_vm15 = vmmov %vm25155_vm2  ;;  %vm25373_vm2 = vnez %v25372_v36  ;;  %v5313_v11 = vld [vmem:[#allocation2 + $0xa9] sm:$0xff] }
 0x22d   : > { %19758 = vmatmul.mubr.msk.f32.gmra.mrb[70].mxu0 %vm25365_vm12, %v22727_v44  ;;  %18888 = vmatprep.mubr.msk.f32.mxu1 %vm25366_vm10, %v5301_v57  ;;  %v5688_v44 = vsel %vm25373_vm2, %v5304_v30, 0.0  ;;  %vm25374_vm12 = vmmov %vm25370_vm4  ;;  %v11545_v57 = vsel %vm22745_vm0, %v22815_v21, 0.0  ;;  %v25399_v21 = vld [vmem:[#allocation8_spill] sm:$0xff] }
 0x22e   : > { %19760 = vmatprep.mubr.msk.f32.mxu0 %vm25367_vm11, %v11533_v35  ;;  %vm25375_vm10 = vmmov %vm25370_vm4  ;;  %v5315_v35 = vld [vmem:[#allocation2 + $0xb9] sm:$0xff] }
 0x22f   : > { %vm25376_vm11 = vmmov %vm25370_vm4  ;;  %v5319_v30 = vld [vmem:[#allocation2 + $0xd9] sm:$0xff] }
 0x230   : > { %18889 = vmatmul.mubr.msk.f32.gmra.mrb[8].mxu1 %vm25368_vm5, %v5302_v22  ;;  %vm25377_vm5 = vmmov %vm25370_vm4  ;;  %v5317_v22 = vld [vmem:[#allocation2 + $0xc9] sm:$0xff] }
 0x231   : > { %19761 = vmatmul.mubr.msk.f32.gmra.mrb[72].mxu0 %vm25369_vm7, %v22741_v56  ;;  %18891 = vmatprep.mubr.msk.f32.mxu1 %vm25370_vm4, %v5303_v59  ;;  %v5306_v56 = vld [vmem:[#allocation2 + $0x71] sm:$0xff]  ;;  %vm25379_vm7 = vmmov %vm25370_vm4  ;;  %v11549_v59 = vsel %vm22778_vm9, %v22848_v31, 0.0  ;;  %v25408_v31 = vld [vmem:[#allocation9_spill] sm:$0xff] }
 0x232   : > { %19763 = vmatprep.mubr.msk.f32.mxu0 %vm25371_vm15, %v22743_v61  ;;  %v5308_v61 = vld [vmem:[#allocation2 + $0x81] sm:$0xff]  ;;  %vm25378_vm15 = vmmov %vm25370_vm4 }
 0x233   : > { %vm25380_vm1 = vmmov %vm25370_vm4 }
 0x234   : > { %18892 = vmatmul.mubr.msk.f32.gmra.mrb[10].mxu1 %vm25374_vm12, %v5688_v44  ;;  %vm25382_vm12 = vnez %v25381_v12  ;;  %vm25389_vm14 = vmmov %vm25380_vm1  ;;  %v5321_v44 = vld [vmem:[#allocation2 + $0xe9] sm:$0xff] }
 0x235   : > { %19764 = vmatmul.mubr.msk.f32.gmra.mrb[74].mxu0 %vm25375_vm10, %v22760_v18  ;;  %18894 = vmatprep.mubr.msk.f32.mxu1 %vm25376_vm11, %v5305_v50  ;;  %v5692_v18 = vsel %vm25382_vm12, %v5308_v61, 0.0  ;;  %vm25383_vm10 = vmmov %vm25380_vm1  ;;  %v11553_v50 = vsel %vm22811_vm13, %v22881_v19, 0.0  ;;  %v25417_v19 = vld [vmem:[#allocation68_spill] sm:$0xff]  ;;  %v5325_v61 = vld [vmem:[#allocation2 + $0x109] sm:$0xff] }
 0x236   : > { %19766 = vmatprep.mubr.msk.f32.mxu0 %vm25377_vm5, %v11537_v20  ;;  %vm25384_vm11 = vmmov %vm25380_vm1  ;;  %v5323_v20 = vld [vmem:[#allocation2 + $0xf9] sm:$0xff] }
 0x237   : > { %vm25385_vm5 = vmmov %vm25380_vm1 }
 0x238   : > { %18895 = vmatmul.mubr.msk.f32.gmra.mrb[12].mxu1 %vm25378_vm15, %v5306_v56  ;;  %vm25386_vm15 = vmmov %vm25380_vm1  ;;  %v25414_v56 = vld [vmem:[#allocation42_spill] sm:$0xff] }
 0x239   : > { %19767 = vmatmul.mubr.msk.f32.gmra.mrb[76].mxu0 %vm25379_vm7, %v22774_v39  ;;  %18897 = vmatprep.mubr.msk.f32.mxu1 %vm25370_vm4, %v5307_v32  ;;  %v5310_v39 = vld [vmem:[#allocation2 + $0x91] sm:$0xff]  ;;  %vm25387_vm7 = vmmov %vm25380_vm1  ;;  %v25419_v32 = vld [vmem:[#allocation10_spill] sm:$0xff] }
 0x23a   : > { %19769 = vmatprep.mubr.msk.f32.mxu0 %vm25380_vm1, %v22776_v49  ;;  %v5312_v49 = vld [vmem:[#allocation2 + $0xa1] sm:$0xff]  ;;  %vm25388_vm4 = vmmov %vm25380_vm1 }
 0x23b   : > { %vm25398_vm0 = vmmov %vm25380_vm1 }
 0x23c   : > { %18898 = vmatmul.mubr.msk.f32.gmra.mrb[14].mxu1 %vm25383_vm10, %v5692_v18  ;;  %vm25391_vm10 = vnez %v25390_v7  ;;  %vm25407_vm9 = vmmov %vm25398_vm0  ;;  %v25421_v18 = vld [vmem:[#allocation70_spill] sm:$0xff] }
 0x23d   : > { %19770 = vmatmul.mubr.msk.f32.gmra.mrb[78].mxu0 %vm25384_vm11, %v22793_v13  ;;  %18900 = vmatprep.mubr.msk.f32.mxu1 %vm25385_vm5, %v5309_v51  ;;  %v5696_v13 = vsel %vm25391_vm10, %v5312_v49, 0.0  ;;  %vm25392_vm11 = vmmov %vm25380_vm1  ;;  %v25422_v51 = vld [vmem:[#allocation66_spill] sm:$0xff]  ;;  %v5327_v49 = vld [vmem:[#allocation2 + $0x119] sm:$0xff] }
 0x23e   : > { %19772 = vmatprep.mubr.msk.f32.mxu0 %vm25386_vm15, %v11541_v63  ;;  %vm25393_vm5 = vmmov %vm25380_vm1 }
 0x23f   : > { %vm25394_vm15 = vmmov %vm25380_vm1 }
 0x240   : > { %18901 = vmatmul.mubr.msk.f32.gmra.mrb[16].mxu1 %vm25380_vm1, %v5310_v39  ;;  %vm25418_vm13 = vmmov %vm25398_vm0  ;;  %v25425_v39 = vld [vmem:[#allocation43_spill] sm:$0xff] }
 0x241   : > { %19773 = vmatmul.mubr.msk.f32.gmra.mrb[80].mxu0 %vm25387_vm7, %v22807_v45  ;;  %18903 = vmatprep.mubr.msk.f32.mxu1 %vm25388_vm4, %v5311_v9  ;;  %v5314_v45 = vld [vmem:[#allocation2 + $0xb1] sm:$0xff]  ;;  %vm25396_vm7 = vmmov %vm25380_vm1 }
 0x242   : > { %19775 = vmatprep.mubr.msk.f32.mxu0 %vm25389_vm14, %v22809_v54  ;;  %v5316_v54 = vld [vmem:[#allocation2 + $0xc1] sm:$0xff]  ;;  %vm25395_vm14 = vmmov %vm25380_vm1  ;;  %v5326_v9 = vld [vmem:[#allocation2 + $0x111] sm:$0xff] }
 0x243   : > { %vm25397_vm4 = vmmov %vm25380_vm1 }
 0x244   : > { %18904 = vmatmul.mubr.msk.f32.gmra.mrb[18].mxu1 %vm25392_vm11, %v5696_v13  ;;  %vm25400_vm11 = vnez %v25399_v21  ;;  %v5328_v13 = vld [vmem:[#allocation2 + $0x121] sm:$0xff] }
 0x245   : > { %19776 = vmatmul.mubr.msk.f32.gmra.mrb[82].mxu0 %vm25393_vm5, %v22826_v26  ;;  %18906 = vmatprep.mubr.msk.f32.mxu1 %vm25394_vm15, %v5313_v11  ;;  %v5700_v26 = vsel %vm25400_vm11, %v5316_v54, 0.0  ;;  %vm25401_vm5 = vmmov %vm25398_vm0  ;;  %v25429_v11 = vld [vmem:[#allocation44_spill] sm:$0xff]  ;;  %v5329_v54 = vld [vmem:[#allocation2 + $0x129] sm:$0xff] }
 0x246   : > { %19778 = vmatprep.mubr.msk.f32.mxu0 %vm25380_vm1, %v11545_v57  ;;  %vm25402_vm15 = vmmov %vm25398_vm0  ;;  %v25432_v57 = vld [vmem:[#allocation47_spill] sm:$0xff] }
 0x247   : > { %vm25403_vm1 = vmmov %vm25398_vm0 }
 0x248   : > { %18907 = vmatmul.mubr.msk.f32.gmra.mrb[20].mxu1 %vm25395_vm14, %v5314_v45  ;;  %vm25404_vm14 = vmmov %vm25398_vm0  ;;  %v25434_v45 = vld [vmem:[#allocation11_spill] sm:$0xff] }
 0x249   : > { %19779 = vmatmul.mubr.msk.f32.gmra.mrb[84].mxu0 %vm25396_vm7, %v22840_v52  ;;  %18909 = vmatprep.mubr.msk.f32.mxu1 %vm25397_vm4, %v5315_v35  ;;  %v5318_v52 = vld [vmem:[#allocation2 + $0xd1] sm:$0xff]  ;;  %vm25405_vm7 = vmmov %vm25398_vm0 }
 0x24a   : > { %19781 = vmatprep.mubr.msk.f32.mxu0 %vm25398_vm0, %v22842_v58  ;;  %v5320_v58 = vld [vmem:[#allocation2 + $0xe1] sm:$0xff]  ;;  %vm25406_vm4 = vmmov %vm25398_vm0 }
 0x24c   : > { %18910 = vmatmul.mubr.msk.f32.gmra.mrb[22].mxu1 %vm25401_vm5, %v5700_v26  ;;  %vm25409_vm5 = vnez %v25408_v31  ;;  %v25436_v26 = vld [vmem:[#allocation71_spill] sm:$0xff] }
 0x24d   : > { %19782 = vmatmul.mubr.msk.f32.gmra.mrb[86].mxu0 %vm25402_vm15, %v22859_v40  ;;  %18912 = vmatprep.mubr.msk.f32.mxu1 %vm25403_vm1, %v5317_v22  ;;  %v5704_v40 = vsel %vm25409_vm5, %v5320_v58, 0.0  ;;  %vm25410_vm15 = vmmov %vm25398_vm0  ;;  %v25437_v22 = vld [vmem:[#allocation67_spill] sm:$0xff]  ;;  %v5331_v58 = vld [vmem:[#allocation2 + $0x139] sm:$0xff] }
 0x24e   : > { %19784 = vmatprep.mubr.msk.f32.mxu0 %vm25404_vm14, %v11549_v59  ;;  %vm25411_vm1 = vmmov %vm25398_vm0 }
 0x24f   : > { %vm25412_vm14 = vmmov %vm25398_vm0 }
 0x250   : > { %18913 = vmatmul.mubr.msk.f32.gmra.mrb[24].mxu1 %vm25398_vm0, %v5318_v52  ;;  %v25440_v52 = vld [vmem:[#allocation49_spill] sm:$0xff] }
 0x251   : > { %19785 = vmatmul.mubr.msk.f32.gmra.mrb[88].mxu0 %vm25405_vm7, %v22873_v5  ;;  %18915 = vmatprep.mubr.msk.f32.mxu1 %vm25406_vm4, %v5319_v30  ;;  %v5322_v5 = vld [vmem:[#allocation2 + $0xf1] sm:$0xff]  ;;  %vm25415_vm7 = vmmov %vm25398_vm0 }
 0x252   : > { %19787 = vmatprep.mubr.msk.f32.mxu0 %vm25407_vm9, %v22875_v10  ;;  %v5324_v10 = vld [vmem:[#allocation2 + $0x101] sm:$0xff]  ;;  %vm25413_vm9 = vmmov %vm25398_vm0  ;;  %v5330_v30 = vld [vmem:[#allocation2 + $0x131] sm:$0xff] }
 0x253   : > { %vm25416_vm4 = vmmov %vm25398_vm0 }
 0x254   : > { %18916 = vmatmul.mubr.msk.f32.gmra.mrb[26].mxu1 %vm25410_vm15, %v5704_v40  ;;  %vm25420_vm15 = vnez %v25419_v32  ;;  %v5332_v40 = vld [vmem:[#allocation2 + $0x141] sm:$0xff] }
 0x255   : > { %19788 = vmatmul.mubr.msk.f32.gmra.mrb[90].mxu0 %vm25411_vm1, %v22892_v62  ;;  %18918 = vmatprep.mubr.msk.f32.mxu1 %vm25412_vm14, %v5321_v44  ;;  %v5708_v62 = vsel %vm25420_vm15, %v5324_v10, 0.0  ;;  %vm25423_vm1 = vnez %v25422_v51  ;;  %vm25424_vm14 = vmmov %vm25398_vm0  ;;  %v25445_v44 = vld [vmem:[#allocation50_spill] sm:$0xff] }
 0x256   : > { %19790 = vmatprep.mubr.msk.f32.mxu0 %vm25398_vm0, %v11553_v50  ;;  %v11557_v63 = vsel %vm25423_vm1, %v25421_v18, 0.0  ;;  %vm25431_vm15 = vmmov %vm25398_vm0  ;;  %v25447_v50 = vld [vmem:[#allocation53_spill] sm:$0xff]  ;;  %v5333_v10 = vld [vmem:[#allocation2 + $0x149] sm:$0xff] }
 0x257   : > { %vm25433_vm1 = vmmov %vm25398_vm0  ;;  %v5336_v18 = vld [vmem:[#allocation2 + $0x161] sm:$0xff] }
 0x258   : > { %18919 = vmatmul.mubr.msk.f32.gmra.mrb[28].mxu1 %vm25413_vm9, %v5322_v5  ;;  %vm25426_vm9 = vmmov %vm25398_vm0  ;;  %v25449_v5 = vld [vmem:[#allocation12_spill] sm:$0xff] }
 0x259   : > { %19791 = vmatmul.mubr.msk.f32.gmra.mrb[92].mxu0 %vm25415_vm7, %v25414_v56  ;;  %18921 = vmatprep.mubr.msk.f32.mxu1 %vm25416_vm4, %v5323_v20  ;;  %vm25427_vm7 = vmmov %vm25398_vm0  ;;  %v25451_v56 = vld [vmem:[#allocation69_spill] sm:$0xff] }
 0x25a   : > { %19793 = vmatprep.mubr.msk.f32.mxu0 %vm25418_vm13, %v25417_v19  ;;  %vm25428_vm13 = vmmov %vm25398_vm0 }
 0x25b   : > { %vm25430_vm4 = vmmov %vm25398_vm0 }
 0x25c   : > { %18922 = vmatmul.mubr.msk.f32.gmra.mrb[30].mxu1 %vm25424_vm14, %v5708_v62  ;;  %vm25435_vm14 = vnez %v25434_v45  ;;  %v5334_v62 = vld [vmem:[#allocation2 + $0x151] sm:$0xff] }
 0x25d   : > { %19794 = vmatmul.mubr.msk.f32.gmra.mrb[94].mxu0 %vm25398_vm0, %v25425_v39  ;;  %18924 = vmatprep.mubr.msk.f32.mxu1 %vm25426_vm9, %v5325_v61  ;;  %v5712_v35 = vsel %vm25435_vm14, %v5328_v13, 0.0  ;;  %vm25438_vm0 = vnez %v25437_v22  ;;  %vm25439_vm9 = vmmov %vm25433_vm1  ;;  %v5335_v61 = vld [vmem:[#allocation2 + $0x159] sm:$0xff]  ;;  %v5337_v39 = vld [vmem:[#allocation2 + $0x169] sm:$0xff] }
 0x25e   : > { %19796 = vmatprep.mubr.msk.f32.mxu0 %vm25427_vm7, %v11557_v63  ;;  %v11561_v59 = vsel %vm25438_vm0, %v25436_v26, 0.0  ;;  %vm25441_vm7 = vmmov %vm25433_vm1  ;;  %v25461_v63 = vld [vmem:[#allocation13_spill] sm:$0xff] }
 0x25f   : > { %vm25446_vm14 = vmmov %vm25433_vm1  ;;  %v5339_v13 = vld [vmem:[#allocation2 + $0x179] sm:$0xff] }
 0x260   : > { %18925 = vmatmul.mubr.msk.f32.gmra.mrb[32].mxu1 %vm25428_vm13, %v5326_v9  ;;  %vm25442_vm13 = vmmov %vm25433_vm1  ;;  %v25463_v9 = vld [vmem:[#allocation48_spill] sm:$0xff] }
 0x261   : > { %19797 = vmatmul.mubr.msk.f32.gmra.mrb[96].mxu0 %vm25430_vm4, %v25429_v11  ;;  %18927 = vmatprep.mubr.msk.f32.mxu1 %vm25431_vm15, %v5327_v49  ;;  %vm25443_vm4 = vmmov %vm25433_vm1  ;;  %v5340_v11 = vld [vmem:[#allocation2 + $0x181] sm:$0xff]  ;;  %v5343_v26 = vld [vmem:[#allocation2 + $0x199] sm:$0xff] }
 0x262   : > { %19799 = vmatprep.mubr.msk.f32.mxu0 %vm25433_vm1, %v25432_v57  ;;  %vm25444_vm15 = vmmov %vm25433_vm1  ;;  %v5341_v57 = vld [vmem:[#allocation2 + $0x189] sm:$0xff] }
 0x263   : > { %vm25448_vm0 = vmmov %vm25433_vm1 }
 0x264   : > { %18928 = vmatmul.mubr.msk.f32.gmra.mrb[34].mxu1 %vm25439_vm9, %v5712_v35  ;;  %vm25450_vm9 = vnez %v25449_v5  ;;  %v25474_v35 = vld [vmem:[#allocation54_spill] sm:$0xff] }
 0x265   : > { %19800 = vmatmul.mubr.msk.f32.gmra.mrb[98].mxu0 %vm25441_vm7, %v25440_v52  ;;  %18930 = vmatprep.mubr.msk.f32.mxu1 %vm25442_vm13, %v5329_v54  ;;  %v5716_v20 = vsel %vm25450_vm9, %v5332_v40, 0.0  ;;  %vm25452_vm7 = vnez %v25451_v56  ;;  %vm25453_vm13 = vmmov %vm25448_vm0  ;;  %v25485_v52 = vld [vmem:[#allocation56_spill] sm:$0xff]  ;;  %v11453_v40 = vld [vmem:[#allocation2 + $0x407] sm:$0xff] }
 0x266   : > { %19802 = vmatprep.mubr.msk.f32.mxu0 %vm25443_vm4, %v11561_v59  ;;  %v11565_v19 = vsel %vm25452_vm7, %v22980_v2, 0.0  ;;  %vm25454_vm4 = vmmov %vm25448_vm0  ;;  %v25459_v2 = vld [vmem:[#allocation55_spill] sm:$0xff] }
 0x267   : > { %vm25458_vm9 = vmmov %vm25448_vm0  ;;  %v5345_v59 = vld [vmem:[#allocation2 + $0x1a9] sm:$0xff] }
 0x268   : > { %18931 = vmatmul.mubr.msk.f32.gmra.mrb[36].mxu1 %vm25444_vm15, %v5330_v30  ;;  %vm25455_vm15 = vmmov %vm25448_vm0 }
 0x269   : > { %19803 = vmatmul.mubr.msk.f32.gmra.mrb[100].mxu0 %vm25433_vm1, %v25445_v44  ;;  %18933 = vmatprep.mubr.msk.f32.mxu1 %vm25446_vm14, %v5331_v58  ;;  %vm25456_vm1 = vmmov %vm25448_vm0  ;;  %v5347_v58 = vld [vmem:[#allocation2 + $0x1b9] sm:$0xff]  ;;  %v5349_v44 = vld [vmem:[#allocation2 + $0x1c9] sm:$0xff] }
 0x26a   : > { %19805 = vmatprep.mubr.msk.f32.mxu0 %vm25448_vm0, %v25447_v50  ;;  %vm25457_vm14 = vmmov %vm25448_vm0  ;;  %v25496_v50 = vld [vmem:[#allocation59_spill] sm:$0xff] }
 0x26b   : > { %vm25460_vm7 = vmmov %vm25448_vm0 }
 0x26c   : > { %18934 = vmatmul.mubr.msk.f32.gmra.mrb[38].mxu1 %vm25453_vm13, %v5716_v20  ;;  %vm25462_vm13 = vnez %v25461_v63 }
 0x26d   : > { %19806 = vmatmul.mubr.msk.f32.gmra.mrb[102].mxu0 %vm25454_vm4, %v22991_v28  ;;  %18936 = vmatprep.mubr.msk.f32.mxu1 %vm25455_vm15, %v5333_v10  ;;  %v5720_v28 = vsel %vm25462_vm13, %v5336_v18, 0.0  ;;  %vm25464_vm4 = vnez %v25463_v9  ;;  %vm25465_vm15 = vmmov %vm25448_vm0  ;;  %v11454_v10 = vld [vmem:[#allocation2 + $0x40f] sm:$0xff]  ;;  %v25506_v18 = vld [vmem:[#allocation17_spill] sm:$0xff] }
 0x26e   : > { %19808 = vmatprep.mubr.msk.f32.mxu0 %vm25456_vm1, %v11565_v19  ;;  %v11569_v49 = vsel %vm25464_vm4, %v23013_v55, 0.0  ;;  %vm25466_vm1 = vmmov %vm25448_vm0  ;;  %v25472_v55 = vld [vmem:[#allocation14_spill] sm:$0xff]  ;;  %v5351_v19 = vld [vmem:[#allocation2 + $0x1d9] sm:$0xff] }
 0x26f   : > { %vm25470_vm13 = vmmov %vm25448_vm0 }
 0x270   : > { %18937 = vmatmul.mubr.msk.f32.gmra.mrb[40].mxu1 %vm25457_vm14, %v5334_v62  ;;  %vm25467_vm14 = vmmov %vm25448_vm0  ;;  %v5352_v62 = vld [vmem:[#allocation2 + $0x1e1] sm:$0xff] }
 0x271   : > { %19809 = vmatmul.mubr.msk.f32.gmra.mrb[104].mxu0 %vm25448_vm0, %v23005_v48  ;;  %18939 = vmatprep.mubr.msk.f32.mxu1 %vm25458_vm9, %v5335_v61  ;;  %v5338_v48 = vld [vmem:[#allocation2 + $0x171] sm:$0xff]  ;;  %vm25468_vm9 = vmmov %vm25448_vm0  ;;  %v11457_v61 = vld [vmem:[#allocation2 + $0x427] sm:$0xff] }
 0x272   : > { %19811 = vmatprep.mubr.msk.f32.mxu0 %vm25460_vm7, %v25459_v2  ;;  %vm25469_vm7 = vmmov %vm25448_vm0  ;;  %v11456_v2 = vld [vmem:[#allocation2 + $0x41f] sm:$0xff] }
 0x273   : > { %vm25471_vm4 = vmmov %vm25448_vm0 }
 0x274   : > { %18940 = vmatmul.mubr.msk.f32.gmra.mrb[42].mxu1 %vm25465_vm15, %v5720_v28  ;;  %vm25473_vm15 = vnez %v25472_v55  ;;  %v5353_v28 = vld [vmem:[#allocation2 + $0x1e9] sm:$0xff] }
 0x275   : > { %19812 = vmatmul.mubr.msk.f32.gmra.mrb[106].mxu0 %vm25466_vm1, %v23024_v38  ;;  %18942 = vmatprep.mubr.msk.f32.mxu1 %vm25467_vm14, %v5337_v39  ;;  %v5724_v38 = vsel %vm25473_vm15, %v5340_v11, 0.0  ;;  %vm25475_vm1 = vnez %v25474_v35  ;;  %vm25476_vm14 = vmmov %vm25448_vm0  ;;  %v11585_v39 = vsel %vm23075_vm8, %v11457_v61, 0.0  ;;  %v11459_v11 = vld [vmem:[#allocation2 + $0x437] sm:$0xff] }
 0x276   : > { %19814 = vmatprep.mubr.msk.f32.mxu0 %vm25448_vm0, %v11569_v49  ;;  %v11573_v54 = vsel %vm25475_vm1, %v23046_v34, 0.0  ;;  %vm25481_vm15 = vmmov %vm25448_vm0  ;;  %v25483_v34 = vld [vmem:[#allocation15_spill] sm:$0xff] }
 0x277   : > { %vm25482_vm1 = vmmov %vm25448_vm0  ;;  %v5354_v49 = vld [vmem:[#allocation2 + $0x1f1] sm:$0xff] }
 0x278   : > { %18943 = vmatmul.mubr.msk.f32.gmra.mrb[44].mxu1 %vm25468_vm9, %v5338_v48  ;;  %vm25477_vm9 = vmmov %vm25448_vm0  ;;  %v11458_v48 = vld [vmem:[#allocation2 + $0x42f] sm:$0xff] }
 0x279   : > { %19815 = vmatmul.mubr.msk.f32.gmra.mrb[108].mxu0 %vm25469_vm7, %v23038_v1  ;;  %18945 = vmatprep.mubr.msk.f32.mxu1 %vm25470_vm13, %v5339_v13  ;;  %vm25478_vm7 = vmmov %vm25448_vm0  ;;  %v5342_v1 = vld [vmem:[#allocation2 + $0x191] sm:$0xff]  ;;  %v5355_v13 = vld [vmem:[#allocation2 + $0x1f9] sm:$0xff] }
 0x27a   : > { %19817 = vmatprep.mubr.msk.f32.mxu0 %vm25471_vm4, %v23040_v29  ;;  %v5344_v29 = vld [vmem:[#allocation2 + $0x1a1] sm:$0xff]  ;;  %vm25479_vm13 = vmmov %vm25448_vm0 }
 0x27b   : > { %vm25480_vm4 = vmmov %vm25448_vm0 }
 0x27c   : > { %18946 = vmatmul.mubr.msk.f32.gmra.mrb[46].mxu1 %vm25476_vm14, %v5724_v38  ;;  %vm25484_vm14 = vnez %v25483_v34  ;;  %v5356_v38 = vld [vmem:[#allocation2 + $0x201] sm:$0xff] }
 0x27d   : > { %19818 = vmatmul.mubr.msk.f32.gmra.mrb[110].mxu0 %vm25448_vm0, %v23057_v25  ;;  %18948 = vmatprep.mubr.msk.f32.mxu1 %vm25477_vm9, %v5341_v57  ;;  %v5728_v25 = vsel %vm25484_vm14, %v5344_v29, 0.0  ;;  %vm25486_vm0 = vnez %v25485_v52  ;;  %vm25487_vm9 = vmmov %vm25482_vm1  ;;  %v25515_v57 = vld [vmem:[#allocation18_spill] sm:$0xff] }
 0x27e   : > { %19820 = vmatprep.mubr.msk.f32.mxu0 %vm25478_vm7, %v11573_v54  ;;  %v11577_v30 = vsel %vm25486_vm0, %v23079_v27, 0.0  ;;  %vm25488_vm7 = vmmov %vm25482_vm1  ;;  %v25494_v27 = vld [vmem:[#allocation16_spill] sm:$0xff]  ;;  %v12811_v29 = vld [vmem:[#allocation2 + $0x48] sm:$0xff] }
 0x27f   : > { %vm25492_vm14 = vmmov %vm25482_vm1 }
 0x280   : > { %18949 = vmatmul.mubr.msk.f32.gmra.mrb[48].mxu1 %vm25479_vm13, %v5342_v1  ;;  %vm25489_vm13 = vmmov %vm25482_vm1  ;;  %v11460_v1 = vld [vmem:[#allocation2 + $0x43f] sm:$0xff] }
 0x281   : > { %19821 = vmatmul.mubr.msk.f32.gmra.mrb[112].mxu0 %vm25480_vm4, %v23071_v14  ;;  %18951 = vmatprep.mubr.msk.f32.mxu1 %vm25481_vm15, %v5343_v26  ;;  %vm25490_vm4 = vmmov %vm25482_vm1  ;;  %v5346_v14 = vld [vmem:[#allocation2 + $0x1b1] sm:$0xff]  ;;  %v5357_v26 = vld [vmem:[#allocation2 + $0x209] sm:$0xff] }
 0x282   : > { %19823 = vmatprep.mubr.msk.f32.mxu0 %vm25482_vm1, %v23073_v17  ;;  %v5348_v17 = vld [vmem:[#allocation2 + $0x1c1] sm:$0xff]  ;;  %vm25491_vm15 = vmmov %vm25482_vm1 }
 0x283   : > { %vm25499_vm0 = vmmov %vm25482_vm1 }
 0x284   : > { %18952 = vmatmul.mubr.msk.f32.gmra.mrb[50].mxu1 %vm25487_vm9, %v5728_v25  ;;  %vm25493_vm9 = vmmov %vm25482_vm1  ;;  %v5358_v25 = vld [vmem:[#allocation2 + $0x211] sm:$0xff] }
 0x285   : > { %19824 = vmatmul.mubr.msk.f32.gmra.mrb[114].mxu0 %vm25488_vm7, %v23091_v4  ;;  %18954 = vmatprep.mubr.msk.f32.mxu1 %vm25489_vm13, %v5345_v59  ;;  %vm25495_vm7 = vnez %v25494_v27  ;;  %vm25497_vm13 = vnez %v25496_v50  ;;  %v12812_v59 = vld [vmem:[#allocation2 + $0x50] sm:$0xff] }
 0x286   : > { %19826 = vmatprep.mubr.msk.f32.mxu0 %vm25490_vm4, %v11577_v30  ;;  %v5732_v4 = vsel %vm25495_vm7, %v5348_v17, 0.0  ;;  %v11581_v20 = vsel %vm25497_vm13, %v11453_v40, 0.0  ;;  %vm25498_vm4 = vmmov %vm25482_vm1  ;;  %v5359_v30 = vld [vmem:[#allocation2 + $0x219] sm:$0xff] }
 0x287   : > { %vm25504_vm13 = vmmov %vm25499_vm0  ;;  %v25524_v17 = vld [vmem:[#allocation20_spill] sm:$0xff] }
 0x288   : > { %18955 = vmatmul.mubr.msk.f32.gmra.mrb[52].mxu1 %vm25491_vm15, %v5346_v14  ;;  %vm25500_vm15 = vmmov %vm25499_vm0  ;;  %v5360_v14 = vld [vmem:[#allocation2 + $0x221] sm:$0xff] }
 0x289   : > { %19827 = vmatmul.mubr.msk.f32.gmra.mrb[116].mxu0 %vm25482_vm1, %v23109_v42  ;;  %18957 = vmatprep.mubr.msk.f32.mxu1 %vm25492_vm14, %v5347_v58  ;;  %vm25501_vm1 = vmmov %vm25499_vm0  ;;  %v5350_v42 = vld [vmem:[#allocation2 + $0x1d1] sm:$0xff] }
 0x28a   : > { %19829 = vmatprep.mubr.msk.f32.mxu0 %vm25493_vm9, %v23111_v53  ;;  %v11455_v53 = vld [vmem:[#allocation2 + $0x417] sm:$0xff]  ;;  %vm25502_vm14 = vmmov %vm25499_vm0 }
 0x28b   : > { %vm25503_vm9 = vmmov %vm25499_vm0  ;;  %v12813_v58 = vld [vmem:[#allocation2 + $0x58] sm:$0xff] }
 0x28c   : > { %18958 = vmatmul.mubr.msk.f32.gmra.mrb[54].mxu1 %vm25498_vm4, %v5732_v4  ;;  %vm25505_vm4 = vmmov %vm25499_vm0  ;;  %v12814_v4 = vld [vmem:[#allocation2 + $0x60] sm:$0xff] }
 0x28d   : > { %19830 = vmatmul.mubr.msk.f32.gmra.mrb[118].mxu0 %vm25499_vm0, %v23121_v3  ;;  %18960 = vmatprep.mubr.msk.f32.mxu1 %vm25500_vm15, %v5349_v44  ;;  %vm25507_vm0 = vnez %v25506_v18  ;;  %vm25508_vm15 = vmmov %vm25501_vm1  ;;  %v5361_v44 = vld [vmem:[#allocation2 + $0x229] sm:$0xff] }
 0x28e   : > { %19832 = vmatprep.mubr.msk.f32.mxu0 %vm25501_vm1, %v11581_v20  ;;  %v5736_v3 = vsel %vm25507_vm0, %v5352_v62, 0.0  ;;  %vm25509_vm7 = vmmov %vm25501_vm1  ;;  %v12815_v20 = vld [vmem:[#allocation2 + $0x68] sm:$0xff] }
 0x28f   : > { %vm25514_vm8 = vmmov %vm25501_vm1  ;;  %v25534_v62 = vld [vmem:[#allocation22_spill] sm:$0xff] }
 0x290   : > { %18961 = vmatmul.mubr.msk.f32.gmra.mrb[56].mxu1 %vm25502_vm14, %v5350_v42  ;;  %vm25510_vm14 = vmmov %vm25501_vm1  ;;  %v5362_v42 = vld [vmem:[#allocation2 + $0x231] sm:$0xff] }
 0x291   : > { %19833 = vmatmul.mubr.msk.f32.gmra.mrb[120].mxu0 %vm25503_vm9, %v11454_v10  ;;  %18963 = vmatprep.mubr.msk.f32.mxu1 %vm25504_vm13, %v5351_v19  ;;  %vm25511_vm13 = vmmov %vm25501_vm1  ;;  %v5363_v10 = vld [vmem:[#allocation2 + $0x239] sm:$0xff] }
 0x292   : > { %19835 = vmatprep.mubr.msk.f32.mxu0 %vm25505_vm4, %v11455_v53  ;;  %vm25512_vm9 = vmmov %vm25501_vm1  ;;  %v12817_v19 = vld [vmem:[#allocation2 + $0x78] sm:$0xff]  ;;  %v5364_v53 = vld [vmem:[#allocation2 + $0x241] sm:$0xff] }
 0x293   : > { %vm25513_vm4 = vmmov %vm25501_vm1 }
 0x294   : > { %18964 = vmatmul.mubr.msk.f32.gmra.mrb[58].mxu1 %vm25508_vm15, %v5736_v3  ;;  %vm25516_vm15 = vnez %v25515_v57  ;;  %vm25519_vm0 = vmmov %vm25501_vm1  ;;  %v12818_v3 = vld [vmem:[#allocation2 + $0x80] sm:$0xff] }
 0x295   : > { %19836 = vmatmul.mubr.msk.f32.gmra.mrb[122].mxu0 %vm25501_vm1, %v11456_v2  ;;  %18966 = vmatprep.mubr.msk.f32.mxu1 %vm25509_vm7, %v5353_v28  ;;  %v5740_v54 = vsel %vm25516_vm15, %v5356_v38, 0.0  ;;  %vm25517_vm7 = vmmov %vm25501_vm1  ;;  %v5365_v2 = vld [vmem:[#allocation2 + $0x249] sm:$0xff]  ;;  %v25543_v38 = vld [vmem:[#allocation24_spill] sm:$0xff] }
 0x296   : > { %19838 = vmatprep.mubr.msk.f32.mxu0 %vm25510_vm14, %v11585_v39  ;;  %vm25518_vm14 = vmmov %vm25501_vm1  ;;  %v12819_v28 = vld [vmem:[#allocation2 + $0x88] sm:$0xff]  ;;  %v5366_v39 = vld [vmem:[#allocation2 + $0x251] sm:$0xff] }
 0x298   : > { %18967 = vmatmul.mubr.msk.f32.gmra.mrb[60].mxu1 %vm25511_vm13, %v5354_v49  ;;  %vm25521_vm13 = vmmov %vm25519_vm0  ;;  %v12820_v49 = vld [vmem:[#allocation2 + $0x90] sm:$0xff] }
 0x299   : > { %19839 = vmatmul.mubr.msk.f32.gmra.mrb[124].mxu0 %vm25512_vm9, %v11458_v48  ;;  %18969 = vmatprep.mubr.msk.f32.mxu1 %vm25513_vm4, %v5355_v13  ;;  %vm25522_vm9 = vcmask 1042432   ;;  %vm25523_vm4 = vmmov %vm25519_vm0  ;;  %v5367_v48 = vld [vmem:[#allocation2 + $0x259] sm:$0xff] }
 0x29a   : > { %19841 = vmatprep.mubr.msk.f32.mxu0 %vm25514_vm8, %v11459_v11  ;;  %vm25520_vm8 = vmmov %vm25519_vm0  ;;  %v12821_v13 = vld [vmem:[#allocation2 + $0x98] sm:$0xff]  ;;  %v5368_v11 = vld [vmem:[#allocation2 + $0x261] sm:$0xff] }
 0x29c   : > { %18970 = vmatmul.mubr.msk.f32.gmra.mrb[62].mxu1 %vm25517_vm7, %v5740_v54  ;;  %vm25525_vm7 = vnez %v25524_v17 }
 0x29d   : > { %19842 = vmatmul.mubr.msk.f32.gmra.mrb[126].mxu0 %vm25501_vm1, %v11460_v1  ;;  %18972 = vmatprep.mubr.msk.f32.mxu1 %vm25518_vm14, %v5357_v26  ;;  %v5744_v40 = vsel %vm25525_vm7, %v5360_v14, 0.0  ;;  %vm25526_vm1 = vmmov %vm25519_vm0  ;;  %v12822_v1 = vld [vmem:[#allocation2 + $0xa0] sm:$0xff]  ;;  %v5369_v26 = vld [vmem:[#allocation2 + $0x269] sm:$0xff] }
 0x29e   : > { %19846 = vmatprep.mubr.msk.f32.mxu0 %vm25519_vm0, %v12811_v29  ;;  %vm25527_vm14 = vmmov %vm25519_vm0  ;;  %v12823_v29 = vld [vmem:[#allocation2 + $0xa8] sm:$0xff]  ;;  %v12825_v14 = vld [vmem:[#allocation2 + $0xb8] sm:$0xff] }
 0x29f   : > { %vm25533_vm7 = vmmov %vm25519_vm0 }
 0x2a0   : > { %18973 = vmatmul.mubr.msk.f32.gmra.mrb[64].mxu1 %vm25520_vm8, %v5358_v25  ;;  %vm25528_vm8 = vmmov %vm25519_vm0  ;;  %v5370_v25 = vld [vmem:[#allocation2 + $0x271] sm:$0xff] }
 0x2a1   : > { %19847 = vmatmul.mubr.msk.f32.vlgmr.msra.gmra.mrb[0].mxu0 %vm25521_vm13, %v12812_v59  ;;  %18975 = vmatprep.mubr.msk.f32.mxu1 %vm25523_vm4, %v5359_v30  ;;  %vm25529_vm13 = vmmov %vm25519_vm0  ;;  %v12824_v59 = vld [vmem:[#allocation2 + $0xb0] sm:$0xff]  ;;  %v5371_v30 = vld [vmem:[#allocation2 + $0x279] sm:$0xff] }
 0x2a2   : > { %20039 = vmatpush3.msk.msra.mxu0 %vm25522_vm9, %v23135_v37  ;;  %19849 = vmatprep.mubr.msk.f32.mxu0 %vm25526_vm1, %v12813_v58  ;;  %v12816_v37 = vld [vmem:[#allocation2 + $0x70] sm:$0xff]  ;;  %vm25530_vm9 = vmmov %vm25519_vm0  ;;  %v5372_v58 = vld [vmem:[#allocation2 + $0x281] sm:$0xff] }
 0x2a3   : > { %vm25531_vm4 = vmmov %vm25519_vm0 }
 0x2a4   : > { %18976 = vmatmul.mubr.msk.f32.gmra.mrb[66].mxu1 %vm25519_vm0, %v5744_v40  ;;  %vm25532_vm1 = vmmov %vm25519_vm0  ;;  %vm25535_vm0 = vnez %v25534_v62  ;;  %v25553_v40 = vld [vmem:[#allocation26_spill] sm:$0xff] }
 0x2a5   : > { %19850 = vmatmul.mubr.msk.f32.gmra.mrb[2].mxu0 %vm25527_vm14, %v12814_v4  ;;  %18978 = vmatprep.mubr.msk.f32.mxu1 %vm25528_vm8, %v5361_v44  ;;  %v5748_v61 = vsel %vm25535_vm0, %v5364_v53, 0.0  ;;  %vm25536_vm14 = vmmov %vm25532_vm1  ;;  %v12826_v44 = vld [vmem:[#allocation2 + $0xc0] sm:$0xff]  ;;  %v12829_v53 = vld [vmem:[#allocation2 + $0xd8] sm:$0xff] }
 0x2a6   : > { %19852 = vmatprep.mubr.msk.f32.mxu0 %vm25529_vm13, %v12815_v20  ;;  %vm25537_vm8 = vmmov %vm25532_vm1  ;;  %v5373_v20 = vld [vmem:[#allocation2 + $0x289] sm:$0xff] }
 0x2a7   : > { %vm25538_vm13 = vmmov %vm25532_vm1 }
 0x2a8   : > { %18979 = vmatmul.mubr.msk.f32.gmra.mrb[68].mxu1 %vm25530_vm9, %v5362_v42  ;;  %vm25539_vm15 = vmmov %vm25532_vm1  ;;  %v12827_v42 = vld [vmem:[#allocation2 + $0xc8] sm:$0xff] }
 0x2a9   : > { %19853 = vmatmul.mubr.msk.f32.gmra.mrb[4].mxu0 %vm25531_vm4, %v12816_v37  ;;  %18981 = vmatprep.mubr.msk.f32.mxu1 %vm25532_vm1, %v5363_v10  ;;  %vm25541_vm9 = vmmov %vm25532_vm1  ;;  %v5374_v37 = vld [vmem:[#allocation2 + $0x291] sm:$0xff] }
 0x2aa   : > { %19855 = vmatprep.mubr.msk.f32.mxu0 %vm25533_vm7, %v12817_v19  ;;  %vm25540_vm7 = vmmov %vm25532_vm1  ;;  %v12828_v10 = vld [vmem:[#allocation2 + $0xd0] sm:$0xff]  ;;  %v5375_v19 = vld [vmem:[#allocation2 + $0x299] sm:$0xff] }
 0x2ab   : > { %vm25542_vm4 = vmmov %vm25532_vm1 }
 0x2ac   : > { %18982 = vmatmul.mubr.msk.f32.gmra.mrb[70].mxu1 %vm25536_vm14, %v5748_v61  ;;  %vm25544_vm14 = vnez %v25543_v38  ;;  %vm25548_vm0 = vmmov %vm25532_vm1  ;;  %v5376_v61 = vld [vmem:[#allocation2 + $0x2a1] sm:$0xff] }
 0x2ad   : > { %19856 = vmatmul.mubr.msk.f32.gmra.mrb[6].mxu0 %vm25537_vm8, %v12818_v3  ;;  %18984 = vmatprep.mubr.msk.f32.mxu1 %vm25538_vm13, %v5365_v2  ;;  %v5752_v54 = vsel %vm25544_vm14, %v5368_v11, 0.0  ;;  %vm25546_vm8 = vmmov %vm25532_vm1  ;;  %v25562_v3 = vld [vmem:[#allocation28_spill] sm:$0xff] }
 0x2ae   : > { %19858 = vmatprep.mubr.msk.f32.mxu0 %vm25539_vm15, %v12819_v28  ;;  %vm25545_vm15 = vmmov %vm25532_vm1  ;;  %v12830_v28 = vld [vmem:[#allocation2 + $0xe0] sm:$0xff] }
 0x2af   : > { %vm25547_vm13 = vmmov %vm25532_vm1  ;;  %v5379_v11 = vld [vmem:[#allocation2 + $0x2b9] sm:$0xff] }
 0x2b0   : > { %18985 = vmatmul.mubr.msk.f32.gmra.mrb[72].mxu1 %vm25540_vm7, %v5366_v39  ;;  %vm25549_vm7 = vmmov %vm25548_vm0  ;;  %v5377_v39 = vld [vmem:[#allocation2 + $0x2a9] sm:$0xff] }
 0x2b1   : > { %19859 = vmatmul.mubr.msk.f32.gmra.mrb[8].mxu0 %vm25541_vm9, %v12820_v49  ;;  %18987 = vmatprep.mubr.msk.f32.mxu1 %vm25542_vm4, %v5367_v48  ;;  %vm25550_vm9 = vmmov %vm25548_vm0  ;;  %v12831_v49 = vld [vmem:[#allocation2 + $0xe8] sm:$0xff]  ;;  %v5378_v48 = vld [vmem:[#allocation2 + $0x2b1] sm:$0xff] }
 0x2b2   : > { %19861 = vmatprep.mubr.msk.f32.mxu0 %vm25532_vm1, %v12821_v13  ;;  %vm25551_vm4 = vmmov %vm25548_vm0  ;;  %v12832_v13 = vld [vmem:[#allocation2 + $0xf0] sm:$0xff] }
 0x2b3   : > { %vm25552_vm1 = vmmov %vm25548_vm0 }
 0x2b4   : > { %18988 = vmatmul.mubr.msk.f32.gmra.mrb[74].mxu1 %vm25545_vm15, %v5752_v54  ;;  %vm25554_vm15 = vnez %v25553_v40  ;;  %vm25557_vm14 = vmmov %vm25548_vm0  ;;  %v12833_v54 = vld [vmem:[#allocation2 + $0xf8] sm:$0xff] }
 0x2b5   : > { %19862 = vmatmul.mubr.msk.f32.gmra.mrb[10].mxu0 %vm25546_vm8, %v12822_v1  ;;  %18990 = vmatprep.mubr.msk.f32.mxu1 %vm25547_vm13, %v5369_v26  ;;  %v5756_v4 = vsel %vm25554_vm15, %v5372_v58, 0.0  ;;  %vm25555_vm8 = vmmov %vm25548_vm0  ;;  %v5380_v1 = vld [vmem:[#allocation2 + $0x2c1] sm:$0xff]  ;;  %v12836_v58 = vld [vmem:[#allocation2 + $0x110] sm:$0xff] }
 0x2b6   : > { %19864 = vmatprep.mubr.msk.f32.mxu0 %vm25548_vm0, %v12823_v29  ;;  %vm25556_vm13 = vmmov %vm25548_vm0  ;;  %v25571_v26 = vld [vmem:[#allocation30_spill] sm:$0xff] }
 0x2b8   : > { %18991 = vmatmul.mubr.msk.f32.gmra.mrb[76].mxu1 %vm25549_vm7, %v5370_v25  ;;  %vm25558_vm7 = vmmov %vm25548_vm0  ;;  %v12834_v25 = vld [vmem:[#allocation2 + $0x100] sm:$0xff] }
 0x2b9   : > { %19865 = vmatmul.mubr.msk.f32.gmra.mrb[12].mxu0 %vm25550_vm9, %v12824_v59  ;;  %18993 = vmatprep.mubr.msk.f32.mxu1 %vm25551_vm4, %v5371_v30  ;;  %vm25559_vm9 = vmmov %vm25548_vm0  ;;  %v5381_v59 = vld [vmem:[#allocation2 + $0x2c9] sm:$0xff] }
 0x2ba   : > { %19867 = vmatprep.mubr.msk.f32.mxu0 %vm25552_vm1, %v12825_v14  ;;  %vm25560_vm4 = vmmov %vm25548_vm0  ;;  %v12835_v30 = vld [vmem:[#allocation2 + $0x108] sm:$0xff]  ;;  %v5382_v14 = vld [vmem:[#allocation2 + $0x2d1] sm:$0xff] }
 0x2bb   : > { %vm25561_vm1 = vmmov %vm25548_vm0 }
 0x2bc   : > { %18994 = vmatmul.mubr.msk.f32.gmra.mrb[78].mxu1 %vm25548_vm0, %v5756_v4  ;;  %vm25563_vm0 = vnez %v25562_v3  ;;  %vm25567_vm15 = vmmov %vm25561_vm1  ;;  %v5383_v4 = vld [vmem:[#allocation2 + $0x2d9] sm:$0xff] }
 0x2bd   : > { %19868 = vmatmul.mubr.msk.f32.gmra.mrb[14].mxu0 %vm25555_vm8, %v12826_v44  ;;  %18996 = vmatprep.mubr.msk.f32.mxu1 %vm25556_vm13, %v5373_v20  ;;  %v5760_v2 = vsel %vm25563_vm0, %v5376_v61, 0.0  ;;  %vm25565_vm8 = vmmov %vm25561_vm1  ;;  %v12837_v44 = vld [vmem:[#allocation2 + $0x118] sm:$0xff]  ;;  %v5384_v20 = vld [vmem:[#allocation2 + $0x2e1] sm:$0xff] }
 0x2be   : > { %19870 = vmatprep.mubr.msk.f32.mxu0 %vm25557_vm14, %v12827_v42  ;;  %vm25564_vm14 = vmmov %vm25561_vm1  ;;  %v25581_v42 = vld [vmem:[#allocation32_spill] sm:$0xff] }
 0x2bf   : > { %vm25566_vm13 = vmmov %vm25561_vm1  ;;  %v5386_v61 = vld [vmem:[#allocation2 + $0x2f1] sm:$0xff] }
 0x2c0   : > { %18997 = vmatmul.mubr.msk.f32.gmra.mrb[80].mxu1 %vm25558_vm7, %v5374_v37  ;;  %vm25568_vm7 = vmmov %vm25561_vm1 }
 0x2c1   : > { %19871 = vmatmul.mubr.msk.f32.gmra.mrb[16].mxu0 %vm25559_vm9, %v12828_v10  ;;  %18999 = vmatprep.mubr.msk.f32.mxu1 %vm25560_vm4, %v5375_v19  ;;  %vm25569_vm9 = vmmov %vm25561_vm1  ;;  %v12838_v10 = vld [vmem:[#allocation2 + $0x120] sm:$0xff]  ;;  %v5385_v19 = vld [vmem:[#allocation2 + $0x2e9] sm:$0xff] }
 0x2c2   : > { %19873 = vmatprep.mubr.msk.f32.mxu0 %vm25561_vm1, %v12829_v53  ;;  %vm25570_vm4 = vmmov %vm25561_vm1  ;;  %v12839_v53 = vld [vmem:[#allocation2 + $0x128] sm:$0xff] }
 0x2c3   : > { %vm25576_vm0 = vmmov %vm25561_vm1 }
 0x2c4   : > { %19000 = vmatmul.mubr.msk.f32.gmra.mrb[82].mxu1 %vm25564_vm14, %v5760_v2  ;;  %vm25572_vm14 = vnez %v25571_v26  ;;  %v12840_v2 = vld [vmem:[#allocation2 + $0x130] sm:$0xff] }
 0x2c5   : > { %19874 = vmatmul.mubr.msk.f32.gmra.mrb[18].mxu0 %vm25565_vm8, %v12830_v28  ;;  %19002 = vmatprep.mubr.msk.f32.mxu1 %vm25566_vm13, %v5377_v39  ;;  %v5764_v29 = vsel %vm25572_vm14, %v5380_v1, 0.0  ;;  %vm25574_vm8 = vmmov %vm25561_vm1  ;;  %v5387_v28 = vld [vmem:[#allocation2 + $0x2f9] sm:$0xff]  ;;  %v12843_v1 = vld [vmem:[#allocation2 + $0x148] sm:$0xff] }
 0x2c6   : > { %19876 = vmatprep.mubr.msk.f32.mxu0 %vm25567_vm15, %v12831_v49  ;;  %vm25573_vm15 = vmmov %vm25561_vm1  ;;  %v12841_v39 = vld [vmem:[#allocation2 + $0x138] sm:$0xff]  ;;  %v5388_v49 = vld [vmem:[#allocation2 + $0x301] sm:$0xff] }
 0x2c7   : > { %vm25575_vm13 = vmmov %vm25561_vm1 }
 0x2c8   : > { %19003 = vmatmul.mubr.msk.f32.gmra.mrb[84].mxu1 %vm25568_vm7, %v5378_v48  ;;  %vm25577_vm7 = vmmov %vm25576_vm0  ;;  %v25590_v48 = vld [vmem:[#allocation34_spill] sm:$0xff] }
 0x2c9   : > { %19877 = vmatmul.mubr.msk.f32.gmra.mrb[20].mxu0 %vm25569_vm9, %v12832_v13  ;;  %19005 = vmatprep.mubr.msk.f32.mxu1 %vm25570_vm4, %v5379_v11  ;;  %vm25578_vm9 = vmmov %vm25576_vm0  ;;  %v12842_v11 = vld [vmem:[#allocation2 + $0x140] sm:$0xff] }
 0x2ca   : > { %19879 = vmatprep.mubr.msk.f32.mxu0 %vm25561_vm1, %v12833_v54  ;;  %vm25579_vm4 = vmmov %vm25576_vm0  ;;  %v5389_v54 = vld [vmem:[#allocation2 + $0x309] sm:$0xff] }
 0x2cb   : > { %vm25580_vm1 = vmmov %vm25576_vm0 }
 0x2cc   : > { %19006 = vmatmul.mubr.msk.f32.gmra.mrb[86].mxu1 %vm25573_vm15, %v5764_v29  ;;  %vm25582_vm15 = vnez %v25581_v42  ;;  %vm25585_vm14 = vmmov %vm25576_vm0  ;;  %v5390_v29 = vld [vmem:[#allocation2 + $0x311] sm:$0xff] }
 0x2cd   : > { %19880 = vmatmul.mubr.msk.f32.gmra.mrb[22].mxu0 %vm25574_vm8, %v12834_v25  ;;  %19008 = vmatprep.mubr.msk.f32.mxu1 %vm25575_vm13, %v5381_v59  ;;  %v5768_v37 = vsel %vm25582_vm15, %v5384_v20, 0.0  ;;  %vm25583_vm8 = vmmov %vm25576_vm0  ;;  %v12844_v25 = vld [vmem:[#allocation2 + $0x150] sm:$0xff]  ;;  %v5391_v59 = vld [vmem:[#allocation2 + $0x319] sm:$0xff] }
 0x2ce   : > { %19882 = vmatprep.mubr.msk.f32.mxu0 %vm25576_vm0, %v12835_v30  ;;  %vm25584_vm13 = vmmov %vm25576_vm0  ;;  %v12845_v30 = vld [vmem:[#allocation2 + $0x158] sm:$0xff]  ;;  %v5393_v20 = vld [vmem:[#allocation2 + $0x329] sm:$0xff] }
 0x2d0   : > { %19009 = vmatmul.mubr.msk.f32.gmra.mrb[88].mxu1 %vm25577_vm7, %v5382_v14  ;;  %vm25586_vm7 = vmmov %vm25576_vm0  ;;  %v5392_v14 = vld [vmem:[#allocation2 + $0x321] sm:$0xff] }
 0x2d1   : > { %19883 = vmatmul.mubr.msk.f32.gmra.mrb[24].mxu0 %vm25578_vm9, %v12836_v58  ;;  %19011 = vmatprep.mubr.msk.f32.mxu1 %vm25579_vm4, %v5383_v4  ;;  %vm25587_vm9 = vmmov %vm25576_vm0  ;;  %v25599_v58 = vld [vmem:[#allocation36_spill] sm:$0xff] }
 0x2d2   : > { %19885 = vmatprep.mubr.msk.f32.mxu0 %vm25580_vm1, %v12837_v44  ;;  %vm25588_vm4 = vmmov %vm25576_vm0  ;;  %v12846_v44 = vld [vmem:[#allocation2 + $0x160] sm:$0xff] }
 0x2d3   : > { %vm25589_vm1 = vmmov %vm25576_vm0 }
 0x2d4   : > { %19012 = vmatmul.mubr.msk.f32.gmra.mrb[90].mxu1 %vm25576_vm0, %v5768_v37  ;;  %vm25591_vm0 = vnez %v25590_v48  ;;  %vm25595_vm15 = vmmov %vm25589_vm1  ;;  %v12847_v37 = vld [vmem:[#allocation2 + $0x168] sm:$0xff] }
 0x2d5   : > { %19886 = vmatmul.mubr.msk.f32.gmra.mrb[26].mxu0 %vm25583_vm8, %v12838_v10  ;;  %19014 = vmatprep.mubr.msk.f32.mxu1 %vm25584_vm13, %v5385_v19  ;;  %v5772_v13 = vsel %vm25591_vm0, %v5388_v49, 0.0  ;;  %vm25593_vm8 = vmmov %vm25589_vm1  ;;  %v5394_v10 = vld [vmem:[#allocation2 + $0x331] sm:$0xff]  ;;  %v12850_v49 = vld [vmem:[#allocation2 + $0x180] sm:$0xff] }
 0x2d6   : > { %19888 = vmatprep.mubr.msk.f32.mxu0 %vm25585_vm14, %v12839_v53  ;;  %vm25592_vm14 = vmmov %vm25589_vm1  ;;  %v12848_v19 = vld [vmem:[#allocation2 + $0x170] sm:$0xff]  ;;  %v5395_v53 = vld [vmem:[#allocation2 + $0x339] sm:$0xff] }
 0x2d7   : > { %vm25594_vm13 = vmmov %vm25589_vm1 }
 0x2d8   : > { %19015 = vmatmul.mubr.msk.f32.gmra.mrb[92].mxu1 %vm25586_vm7, %v5386_v61  ;;  %vm25596_vm7 = vmmov %vm25589_vm1  ;;  %v12849_v61 = vld [vmem:[#allocation2 + $0x178] sm:$0xff] }
 0x2d9   : > { %19889 = vmatmul.mubr.msk.f32.gmra.mrb[28].mxu0 %vm25587_vm9, %v12840_v2  ;;  %19017 = vmatprep.mubr.msk.f32.mxu1 %vm25588_vm4, %v5387_v28  ;;  %vm25597_vm9 = vmmov %vm25589_vm1  ;;  %v5396_v2 = vld [vmem:[#allocation2 + $0x341] sm:$0xff] }
 0x2da   : > { %19891 = vmatprep.mubr.msk.f32.mxu0 %vm25589_vm1, %v12841_v39  ;;  %vm25598_vm4 = vmmov %vm25589_vm1  ;;  %v25609_v28 = vld [vmem:[#allocation38_spill] sm:$0xff] }
 0x2db   : > { %vm25604_vm0 = vmmov %vm25589_vm1 }
 0x2dc   : > { %19018 = vmatmul.mubr.msk.f32.gmra.mrb[94].mxu1 %vm25592_vm14, %v5772_v13  ;;  %vm25600_vm14 = vnez %v25599_v58  ;;  %v5397_v13 = vld [vmem:[#allocation2 + $0x349] sm:$0xff] }
 0x2dd   : > { %19892 = vmatmul.mubr.msk.f32.gmra.mrb[30].mxu0 %vm25593_vm8, %v12842_v11  ;;  %19020 = vmatprep.mubr.msk.f32.mxu1 %vm25594_vm13, %v5389_v54  ;;  %v5776_v4 = vsel %vm25600_vm14, %v5392_v14, 0.0  ;;  %vm25602_vm8 = vmmov %vm25589_vm1  ;;  %v12851_v11 = vld [vmem:[#allocation2 + $0x188] sm:$0xff]  ;;  %v5398_v54 = vld [vmem:[#allocation2 + $0x351] sm:$0xff] }
 0x2de   : > { %19894 = vmatprep.mubr.msk.f32.mxu0 %vm25595_vm15, %v12843_v1  ;;  %vm25601_vm15 = vmmov %vm25589_vm1  ;;  %v12852_v1 = vld [vmem:[#allocation2 + $0x190] sm:$0xff] }
 0x2df   : > { %vm25603_vm13 = vmmov %vm25589_vm1 }
 0x2e0   : > { %19021 = vmatmul.mubr.msk.f32.gmra.mrb[96].mxu1 %vm25596_vm7, %v5390_v29  ;;  %vm25605_vm7 = vmmov %vm25604_vm0  ;;  %v5399_v29 = vld [vmem:[#allocation2 + $0x359] sm:$0xff] }
 0x2e1   : > { %19895 = vmatmul.mubr.msk.f32.gmra.mrb[32].mxu0 %vm25597_vm9, %v12844_v25  ;;  %19023 = vmatprep.mubr.msk.f32.mxu1 %vm25598_vm4, %v5391_v59  ;;  %vm25606_vm9 = vmmov %vm25604_vm0  ;;  %v12853_v25 = vld [vmem:[#allocation2 + $0x198] sm:$0xff]  ;;  %v5400_v59 = vld [vmem:[#allocation2 + $0x361] sm:$0xff] }
 0x2e2   : > { %19897 = vmatprep.mubr.msk.f32.mxu0 %vm25589_vm1, %v12845_v30  ;;  %vm25607_vm4 = vmmov %vm25604_vm0  ;;  %v25618_v30 = vld [vmem:[#allocation40_spill] sm:$0xff] }
 0x2e3   : > { %vm25608_vm1 = vmmov %vm25604_vm0 }
 0x2e4   : > { %19024 = vmatmul.mubr.msk.f32.gmra.mrb[98].mxu1 %vm25601_vm15, %v5776_v4  ;;  %vm25610_vm15 = vnez %v25609_v28  ;;  %vm25613_vm14 = vmmov %vm25604_vm0  ;;  %v12854_v4 = vld [vmem:[#allocation2 + $0x1a0] sm:$0xff] }
 0x2e5   : > { %19898 = vmatmul.mubr.msk.f32.gmra.mrb[34].mxu0 %vm25602_vm8, %v12846_v44  ;;  %19026 = vmatprep.mubr.msk.f32.mxu1 %vm25603_vm13, %v5393_v20  ;;  %v5780_v39 = vsel %vm25610_vm15, %v5396_v2, 0.0  ;;  %vm25611_vm8 = vmmov %vm25604_vm0  ;;  %v5401_v44 = vld [vmem:[#allocation2 + $0x369] sm:$0xff]  ;;  %v25627_v2 = vld [vmem:[#allocation45_spill] sm:$0xff] }
 0x2e6   : > { %19900 = vmatprep.mubr.msk.f32.mxu0 %vm25604_vm0, %v12847_v37  ;;  %vm25612_vm13 = vmmov %vm25604_vm0  ;;  %v12855_v20 = vld [vmem:[#allocation2 + $0x1a8] sm:$0xff]  ;;  %v5402_v37 = vld [vmem:[#allocation2 + $0x371] sm:$0xff] }
 0x2e8   : > { %19027 = vmatmul.mubr.msk.f32.gmra.mrb[100].mxu1 %vm25605_vm7, %v5394_v10  ;;  %vm25614_vm7 = vmmov %vm25604_vm0  ;;  %v12856_v10 = vld [vmem:[#allocation2 + $0x1b0] sm:$0xff] }
 0x2e9   : > { %19901 = vmatmul.mubr.msk.f32.gmra.mrb[36].mxu0 %vm25606_vm9, %v12848_v19  ;;  %19029 = vmatprep.mubr.msk.f32.mxu1 %vm25607_vm4, %v5395_v53  ;;  %vm25615_vm9 = vmmov %vm25604_vm0  ;;  %v5403_v19 = vld [vmem:[#allocation2 + $0x379] sm:$0xff] }
 0x2ea   : > { %19903 = vmatprep.mubr.msk.f32.mxu0 %vm25608_vm1, %v12849_v61  ;;  %vm25616_vm4 = vmmov %vm25604_vm0  ;;  %v12857_v53 = vld [vmem:[#allocation2 + $0x1b8] sm:$0xff]  ;;  %v5404_v61 = vld [vmem:[#allocation2 + $0x381] sm:$0xff] }
 0x2eb   : > { %vm25617_vm1 = vmmov %vm25604_vm0 }
 0x2ec   : > { %19030 = vmatmul.mubr.msk.f32.gmra.mrb[102].mxu1 %vm25604_vm0, %v5780_v39  ;;  %vm25619_vm0 = vnez %v25618_v30  ;;  %vm25623_vm15 = vmmov %vm25617_vm1 }
 0x2ed   : > { %19904 = vmatmul.mubr.msk.f32.gmra.mrb[38].mxu0 %vm25611_vm8, %v12850_v49  ;;  %19032 = vmatprep.mubr.msk.f32.mxu1 %vm25612_vm13, %v5397_v13  ;;  %v5784_v14 = vsel %vm25619_vm0, %v5400_v59, 0.0  ;;  %vm25621_vm8 = vmmov %vm25617_vm1  ;;  %v12858_v49 = vld [vmem:[#allocation2 + $0x1c0] sm:$0xff]  ;;  %v5405_v13 = vld [vmem:[#allocation2 + $0x389] sm:$0xff] }
 0x2ee   : > { %19906 = vmatprep.mubr.msk.f32.mxu0 %vm25613_vm14, %v12851_v11  ;;  %vm25620_vm14 = vmmov %vm25617_vm1  ;;  %v12859_v11 = vld [vmem:[#allocation2 + $0x1c8] sm:$0xff] }
 0x2ef   : > { %vm25622_vm13 = vmmov %vm25617_vm1  ;;  %v5408_v59 = vld [vmem:[#allocation2 + $0x3a1] sm:$0xff] }
 0x2f0   : > { %19033 = vmatmul.mubr.msk.f32.gmra.mrb[104].mxu1 %vm25614_vm7, %v5398_v54  ;;  %vm25624_vm7 = vmmov %vm25617_vm1  ;;  %v5406_v54 = vld [vmem:[#allocation2 + $0x391] sm:$0xff] }
 0x2f1   : > { %19907 = vmatmul.mubr.msk.f32.gmra.mrb[40].mxu0 %vm25615_vm9, %v12852_v1  ;;  %19035 = vmatprep.mubr.msk.f32.mxu1 %vm25616_vm4, %v5399_v29  ;;  %vm25625_vm9 = vmmov %vm25617_vm1  ;;  %v12860_v1 = vld [vmem:[#allocation2 + $0x1d0] sm:$0xff]  ;;  %v5407_v29 = vld [vmem:[#allocation2 + $0x399] sm:$0xff] }
 0x2f2   : > { %19909 = vmatprep.mubr.msk.f32.mxu0 %vm25617_vm1, %v12853_v25  ;;  %vm25626_vm4 = vmmov %vm25617_vm1  ;;  %v12861_v25 = vld [vmem:[#allocation2 + $0x1d8] sm:$0xff] }
 0x2f3   : > { %vm25632_vm0 = vmmov %vm25617_vm1 }
 0x2f4   : > { %19036 = vmatmul.mubr.msk.f32.gmra.mrb[106].mxu1 %vm25620_vm14, %v5784_v14  ;;  %vm25628_vm14 = vnez %v25627_v2  ;;  %v25637_v14 = vld [vmem:[#allocation51_spill] sm:$0xff] }
 0x2f5   : > { %19910 = vmatmul.mubr.msk.f32.gmra.mrb[42].mxu0 %vm25621_vm8, %v12854_v4  ;;  %19038 = vmatprep.mubr.msk.f32.mxu1 %vm25622_vm13, %v5401_v44  ;;  %v5788_v39 = vsel %vm25628_vm14, %v5404_v61, 0.0  ;;  %vm25630_vm8 = vmmov %vm25617_vm1  ;;  %v12862_v44 = vld [vmem:[#allocation2 + $0x1e0] sm:$0xff]  ;;  %v12865_v61 = vld [vmem:[#allocation2 + $0x1f8] sm:$0xff] }
 0x2f6   : > { %19912 = vmatprep.mubr.msk.f32.mxu0 %vm25623_vm15, %v12855_v20  ;;  %vm25629_vm15 = vmmov %vm25617_vm1  ;;  %v5409_v20 = vld [vmem:[#allocation2 + $0x3a9] sm:$0xff] }
 0x2f7   : > { %vm25631_vm13 = vmmov %vm25617_vm1 }
 0x2f8   : > { %19039 = vmatmul.mubr.msk.f32.gmra.mrb[108].mxu1 %vm25624_vm7, %v5402_v37  ;;  %vm25633_vm7 = vmmov %vm25632_vm0  ;;  %v12863_v37 = vld [vmem:[#allocation2 + $0x1e8] sm:$0xff] }
 0x2f9   : > { %19913 = vmatmul.mubr.msk.f32.gmra.mrb[44].mxu0 %vm25625_vm9, %v12856_v10  ;;  %19041 = vmatprep.mubr.msk.f32.mxu1 %vm25626_vm4, %v5403_v19  ;;  %vm25634_vm9 = vmmov %vm25632_vm0  ;;  %v5410_v10 = vld [vmem:[#allocation2 + $0x3b1] sm:$0xff] }
 0x2fa   : > { %19915 = vmatprep.mubr.msk.f32.mxu0 %vm25617_vm1, %v12857_v53  ;;  %vm25635_vm4 = vmmov %vm25632_vm0  ;;  %v12864_v19 = vld [vmem:[#allocation2 + $0x1f0] sm:$0xff]  ;;  %v5411_v53 = vld [vmem:[#allocation2 + $0x3b9] sm:$0xff] }
 0x2fb   : > { %vm25636_vm1 = vmmov %vm25632_vm0 }
 0x2fc   : > { %19042 = vmatmul.mubr.msk.f32.gmra.mrb[110].mxu1 %vm25629_vm15, %v5788_v39  ;;  %vm25638_vm15 = vnez %v25637_v14  ;;  %vm25641_vm14 = vmmov %vm25632_vm0  ;;  %v5412_v39 = vld [vmem:[#allocation2 + $0x3c1] sm:$0xff] }
 0x2fd   : > { %19916 = vmatmul.mubr.msk.f32.gmra.mrb[46].mxu0 %vm25630_vm8, %v12858_v49  ;;  %19044 = vmatprep.mubr.msk.f32.mxu1 %vm25631_vm13, %v5405_v13  ;;  %v5792_v4 = vsel %vm25638_vm15, %v5408_v59, 0.0  ;;  %vm25639_vm8 = vmmov %vm25632_vm0  ;;  %v25646_v49 = vld [vmem:[#allocation57_spill] sm:$0xff] }
 0x2fe   : > { %19918 = vmatprep.mubr.msk.f32.mxu0 %vm25632_vm0, %v12859_v11  ;;  %vm25640_vm13 = vmmov %vm25632_vm0  ;;  %v12866_v11 = vld [vmem:[#allocation2 + $0x200] sm:$0xff] }
 0x2ff   : > { %v5415_v59 = vld [vmem:[#allocation2 + $0x3d9] sm:$0xff] }
 0x300   : > { %19045 = vmatmul.mubr.msk.f32.gmra.mrb[112].mxu1 %vm25633_vm7, %v5406_v54  ;;  %vm25642_vm7 = vmmov %vm25632_vm0  ;;  %v5413_v54 = vld [vmem:[#allocation2 + $0x3c9] sm:$0xff] }
 0x301   : > { %19919 = vmatmul.mubr.msk.f32.gmra.mrb[48].mxu0 %vm25634_vm9, %v12860_v1  ;;  %19047 = vmatprep.mubr.msk.f32.mxu1 %vm25635_vm4, %v5407_v29  ;;  %vm25643_vm9 = vmmov %vm25632_vm0  ;;  %v12867_v1 = vld [vmem:[#allocation2 + $0x208] sm:$0xff]  ;;  %v5414_v29 = vld [vmem:[#allocation2 + $0x3d1] sm:$0xff] }
 0x302   : > { %19921 = vmatprep.mubr.msk.f32.mxu0 %vm25636_vm1, %v12861_v25  ;;  %vm25644_vm4 = vmmov %vm25632_vm0  ;;  %v12868_v25 = vld [vmem:[#allocation2 + $0x210] sm:$0xff] }
 0x303   : > { %vm25645_vm1 = vmmov %vm25632_vm0 }
 0x304   : > { %19048 = vmatmul.mubr.msk.f32.gmra.mrb[114].mxu1 %vm25632_vm0, %v5792_v4  ;;  %vm25647_vm0 = vnez %v25646_v49  ;;  %vm25651_vm15 = vmmov %vm25645_vm1  ;;  %v12869_v4 = vld [vmem:[#allocation2 + $0x218] sm:$0xff] }
 0x305   : > { %19922 = vmatmul.mubr.msk.f32.gmra.mrb[50].mxu0 %vm25639_vm8, %v12862_v44  ;;  %19050 = vmatprep.mubr.msk.f32.mxu1 %vm25640_vm13, %v5409_v20  ;;  %v5796_v13 = vsel %vm25647_vm0, %v5412_v39, 0.0  ;;  %vm25649_vm8 = vmmov %vm25645_vm1  ;;  %v5416_v44 = vld [vmem:[#allocation2 + $0x3e1] sm:$0xff]  ;;  %v12872_v39 = vld [vmem:[#allocation2 + $0x230] sm:$0xff] }
 0x306   : > { %19924 = vmatprep.mubr.msk.f32.mxu0 %vm25641_vm14, %v12863_v37  ;;  %vm25648_vm14 = vmmov %vm25645_vm1  ;;  %v25655_v20 = vld [vmem:[#allocation61_spill] sm:$0xff] }
 0x307   : > { %vm25650_vm13 = vmmov %vm25645_vm1 }
 0x308   : > { %19051 = vmatmul.mubr.msk.f32.gmra.mrb[116].mxu1 %vm25642_vm7, %v5410_v10  ;;  %vm25652_vm7 = vmmov %vm25645_vm1  ;;  %v12870_v10 = vld [vmem:[#allocation2 + $0x220] sm:$0xff] }
 0x309   : > { %19925 = vmatmul.mubr.msk.f32.gmra.mrb[52].mxu0 %vm25643_vm9, %v12864_v19  ;;  %19053 = vmatprep.mubr.msk.f32.mxu1 %vm25644_vm4, %v5411_v53  ;;  %vm25653_vm9 = vmmov %vm25645_vm1  ;;  %v5417_v19 = vld [vmem:[#allocation2 + $0x3e9] sm:$0xff] }
 0x30a   : > { %19927 = vmatprep.mubr.msk.f32.mxu0 %vm25645_vm1, %v12865_v61  ;;  %vm25654_vm4 = vmmov %vm25645_vm1  ;;  %v12871_v53 = vld [vmem:[#allocation2 + $0x228] sm:$0xff]  ;;  %v5418_v61 = vld [vmem:[#allocation2 + $0x3f1] sm:$0xff] }
 0x30b   : > { %vm25660_vm0 = vmmov %vm25645_vm1 }
 0x30c   : > { %19054 = vmatmul.mubr.msk.f32.gmra.mrb[118].mxu1 %vm25648_vm14, %v5796_v13  ;;  %vm25656_vm14 = vnez %v25655_v20  ;;  %v5419_v13 = vld [vmem:[#allocation2 + $0x3f9] sm:$0xff] }
 0x30d   : > { %19928 = vmatmul.mubr.msk.f32.gmra.mrb[54].mxu0 %vm25649_vm8, %v12866_v11  ;;  %19056 = vmatprep.mubr.msk.f32.mxu1 %vm25650_vm13, %v5413_v54  ;;  %v5800_v37 = vsel %vm25656_vm14, %v5416_v44, 0.0  ;;  %vm25658_vm8 = vmmov %vm25645_vm1  ;;  %v12873_v11 = vld [vmem:[#allocation2 + $0x238] sm:$0xff]  ;;  %v5420_v54 = vld [vmem:[#allocation2 + $0x401] sm:$0xff] }
 0x30e   : > { %19930 = vmatprep.mubr.msk.f32.mxu0 %vm25651_vm15, %v12867_v1  ;;  %vm25657_vm15 = vmmov %vm25645_vm1  ;;  %v7027_v1 = vld [vmem:[#allocation2 + $0x27] sm:$0xff] }
 0x30f   : > { %vm25659_vm13 = vmmov %vm25645_vm1 }
 0x310   : > { %19057 = vmatmul.mubr.msk.f32.gmra.mrb[120].mxu1 %vm25652_vm7, %v5414_v29  ;;  %vm25661_vm7 = vmmov %vm25660_vm0  ;;  %v25665_v29 = vld [vmem:[#allocation65_spill] sm:$0xff] }
 0x311   : > { %19931 = vmatmul.mubr.msk.f32.gmra.mrb[56].mxu0 %vm25653_vm9, %v12868_v25  ;;  %19059 = vmatprep.mubr.msk.f32.mxu1 %vm25654_vm4, %v5415_v59  ;;  %vm25662_vm9 = vmmov %vm25660_vm0  ;;  %v12874_v59 = vld [vmem:[#allocation2 + $0x240] sm:$0xff] }
 0x312   : > { %19933 = vmatprep.mubr.msk.f32.mxu0 %vm25645_vm1, %v12869_v4  ;;  %vm25663_vm4 = vmmov %vm25660_vm0  ;;  %v25667_v4 = vld [vmem:[#allocation19_spill] sm:$0xff] }
 0x313   : > { %vm25664_vm1 = vmmov %vm25660_vm0 }
 0x314   : > { %19060 = vmatmul.mubr.msk.f32.gmra.mrb[122].mxu1 %vm25657_vm15, %v5800_v37  ;;  %vm25666_vm15 = vnez %v25665_v29  ;;  %v12875_v37 = vld [vmem:[#allocation2 + $0x248] sm:$0xff]  ;;  %vm25671_vm14 = vmmov %vm25664_vm1 }
 0x315   : > { %19934 = vmatmul.mubr.msk.f32.gmra.mrb[58].mxu0 %vm25658_vm8, %v12870_v10  ;;  %19062 = vmatprep.mubr.msk.f32.mxu1 %vm25659_vm13, %v5417_v19  ;;  %v5804_v25 = vsel %vm25666_vm15, %v5420_v54, 0.0  ;;  %vm25669_vm8 = vmmov %vm25664_vm1  ;;  %v7028_v10 = vld [vmem:[#allocation2 + $0x2f] sm:$0xff]  ;;  %v25678_v54 = vld [vmem:[#allocation21_spill] sm:$0xff] }
 0x316   : > { %19936 = vmatprep.mubr.msk.f32.mxu0 %vm25660_vm0, %v12871_v53  ;;  %vm25668_vm0 = vnez %v25667_v4  ;;  %vm25670_vm13 = vmmov %vm25664_vm1  ;;  %v12876_v19 = vld [vmem:[#allocation2 + $0x250] sm:$0xff] }
 0x317   : > { %v7155_v44 = vsel %vm25668_vm0, %v7027_v1, 0.0  ;;  %v7029_v53 = vld [vmem:[#allocation2 + $0x37] sm:$0xff] }
 0x318   : > { %19063 = vmatmul.mubr.msk.f32.gmra.mrb[124].mxu1 %vm25661_vm7, %v5418_v61  ;;  %vm25672_vm7 = vmmov %vm25664_vm1  ;;  %v12877_v61 = vld [vmem:[#allocation2 + $0x258] sm:$0xff] }
 0x319   : > { %19937 = vmatmul.mubr.msk.f32.gmra.mrb[60].mxu0 %vm25662_vm9, %v12872_v39  ;;  %19065 = vmatprep.mubr.msk.f32.mxu1 %vm25663_vm4, %v5419_v13  ;;  %v7031_v39 = vld [vmem:[#allocation2 + $0x47] sm:$0xff]  ;;  %vm25673_vm9 = vmmov %vm25664_vm1  ;;  %v7030_v13 = vld [vmem:[#allocation2 + $0x3f] sm:$0xff] }
 0x31a   : > { %19939 = vmatprep.mubr.msk.f32.mxu0 %vm25664_vm1, %v12873_v11  ;;  %vm25674_vm4 = vmmov %vm25664_vm1  ;;  %vm25675_vm1 = vcmask 1042432   ;;  %v12878_v11 = vld [vmem:[#allocation2 + $0x260] sm:$0xff]  ;;  %v7033_v4 = vld [vmem:[#allocation2 + $0x57] sm:$0xff] }
 0x31b   : > { %vm25676_vm0 = vmmov %vm25674_vm4 }
 0x31c   : > { %19066 = vmatmul.mubr.msk.f32.gmra.mrb[126].mxu1 %vm25669_vm8, %v5804_v25  ;;  %vm25677_vm8 = vmmov %vm25676_vm0  ;;  %v12879_v25 = vld [vmem:[#allocation2 + $0x268] sm:$0xff] }
 0x31d   : > { %19940 = vmatmul.mubr.msk.f32.gmra.mrb[62].mxu0 %vm25670_vm13, %v12874_v59  ;;  %19070 = vmatprep.mubr.msk.f32.mxu1 %vm25671_vm14, %v7155_v44  ;;  %vm25679_vm14 = vnez %v25678_v54  ;;  %vm25680_vm13 = vmmov %vm25676_vm0  ;;  %v7032_v59 = vld [vmem:[#allocation2 + $0x4f] sm:$0xff]  ;;  %v12881_v44 = vld [vmem:[#allocation2 + $0x278] sm:$0xff] }
 0x31e   : > { %19942 = vmatprep.mubr.msk.f32.mxu0 %vm25672_vm7, %v12875_v37  ;;  %v7159_v1 = vsel %vm25679_vm14, %v7031_v39, 0.0  ;;  %vm25681_vm7 = vmmov %vm25676_vm0  ;;  %v7035_v37 = vld [vmem:[#allocation2 + $0x67] sm:$0xff]  ;;  %v7037_v54 = vld [vmem:[#allocation2 + $0x77] sm:$0xff] }
 0x31f   : > { %vm25686_vm14 = vmmov %vm25676_vm0  ;;  %v12883_v39 = vld [vmem:[#allocation2 + $0x288] sm:$0xff] }
 0x320   : > { %19071 = vmatmul.mubr.msk.f32.vlgmr.msra.gmra.mrb[0].mxu1 %vm25673_vm9, %v7028_v10  ;;  %vm25682_vm9 = vmmov %vm25676_vm0  ;;  %v7034_v10 = vld [vmem:[#allocation2 + $0x5f] sm:$0xff] }
 0x321   : > { %19943 = vmatmul.mubr.msk.f32.gmra.mrb[64].mxu0 %vm25674_vm4, %v12876_v19  ;;  %20233 = vmatpush3.msk.msra.mxu1 %vm25675_vm1, %v23155_v60  ;;  %vm25683_vm4 = vmmov %vm25676_vm0  ;;  %v12880_v60 = vld [vmem:[#allocation2 + $0x270] sm:$0xff]  ;;  %v12882_v19 = vld [vmem:[#allocation2 + $0x280] sm:$0xff] }
 0x322   : > { %19073 = vmatprep.mubr.msk.f32.mxu1 %vm25676_vm0, %v7029_v53  ;;  %19945 = vmatprep.mubr.msk.f32.mxu0 %vm25677_vm8, %v12877_v61  ;;  %vm25684_vm1 = vmmov %vm25676_vm0  ;;  %v25687_v53 = vld [vmem:[#allocation23_spill] sm:$0xff] }
 0x323   : > { %vm25685_vm8 = vmmov %vm25676_vm0 }
 0x324   : > { %19074 = vmatmul.mubr.msk.f32.gmra.mrb[2].mxu1 %vm25680_vm13, %v7030_v13  ;;  %vm25688_vm13 = vnez %v25687_v53  ;;  %vm25692_vm15 = vmmov %vm25676_vm0  ;;  %v7036_v13 = vld [vmem:[#allocation2 + $0x6f] sm:$0xff]  ;;  %v7041_v53 = vld [vmem:[#allocation2 + $0x97] sm:$0xff] }
 0x325   : > { %19946 = vmatmul.mubr.msk.f32.gmra.mrb[66].mxu0 %vm25681_vm7, %v12878_v11  ;;  %19076 = vmatprep.mubr.msk.f32.mxu1 %vm25682_vm9, %v7159_v1  ;;  %v7163_v61 = vsel %vm25688_vm13, %v7035_v37, 0.0  ;;  %vm25689_vm7 = vmmov %vm25676_vm0  ;;  %v12884_v11 = vld [vmem:[#allocation2 + $0x290] sm:$0xff]  ;;  %v12885_v1 = vld [vmem:[#allocation2 + $0x298] sm:$0xff] }
 0x326   : > { %19948 = vmatprep.mubr.msk.f32.mxu0 %vm25683_vm4, %v12879_v25  ;;  %vm25690_vm9 = vmmov %vm25676_vm0  ;;  %v7039_v25 = vld [vmem:[#allocation2 + $0x87] sm:$0xff] }
 0x327   : > { %vm25691_vm4 = vmmov %vm25676_vm0  ;;  %v12887_v37 = vld [vmem:[#allocation2 + $0x2a8] sm:$0xff] }
 0x328   : > { %19077 = vmatmul.mubr.msk.f32.gmra.mrb[4].mxu1 %vm25684_vm1, %v7032_v59  ;;  %vm25693_vm1 = vmmov %vm25676_vm0  ;;  %v7038_v59 = vld [vmem:[#allocation2 + $0x7f] sm:$0xff] }
 0x329   : > { %19949 = vmatmul.mubr.msk.f32.gmra.mrb[68].mxu0 %vm25676_vm0, %v12880_v60  ;;  %19079 = vmatprep.mubr.msk.f32.mxu1 %vm25685_vm8, %v7033_v4  ;;  %vm25694_vm8 = vmmov %vm25676_vm0  ;;  %v12886_v60 = vld [vmem:[#allocation2 + $0x2a0] sm:$0xff] }
 0x32a   : > { %19951 = vmatprep.mubr.msk.f32.mxu0 %vm25686_vm14, %v12881_v44  ;;  %vm25695_vm14 = vmmov %vm25676_vm0  ;;  %v25696_v4 = vld [vmem:[#allocation25_spill] sm:$0xff] }
 0x32b   : > { %vm25697_vm13 = vnez %v25696_v4  ;;  %v7045_v4 = vld [vmem:[#allocation2 + $0xb7] sm:$0xff] }
 0x32c   : > { %19080 = vmatmul.mubr.msk.f32.gmra.mrb[6].mxu1 %vm25689_vm7, %v7034_v10  ;;  %v7167_v44 = vsel %vm25697_vm13, %v7039_v25, 0.0  ;;  %vm25699_vm7 = vmmov %vm25676_vm0  ;;  %v7040_v10 = vld [vmem:[#allocation2 + $0x8f] sm:$0xff] }
 0x32d   : > { %19952 = vmatmul.mubr.msk.f32.gmra.mrb[70].mxu0 %vm25690_vm9, %v12882_v19  ;;  %19082 = vmatprep.mubr.msk.f32.mxu1 %vm25691_vm4, %v7163_v61  ;;  %vm25700_vm9 = vmmov %vm25676_vm0  ;;  %v12888_v19 = vld [vmem:[#allocation2 + $0x2b0] sm:$0xff]  ;;  %v12889_v61 = vld [vmem:[#allocation2 + $0x2b8] sm:$0xff] }
 0x32e   : > { %19954 = vmatprep.mubr.msk.f32.mxu0 %vm25692_vm15, %v12883_v39  ;;  %vm25698_vm15 = vmmov %vm25676_vm0  ;;  %v7043_v39 = vld [vmem:[#allocation2 + $0xa7] sm:$0xff] }
 0x32f   : > { %vm25701_vm4 = vmmov %vm25676_vm0  ;;  %v12891_v25 = vld [vmem:[#allocation2 + $0x2c8] sm:$0xff] }
 0x330   : > { %19083 = vmatmul.mubr.msk.f32.gmra.mrb[8].mxu1 %vm25693_vm1, %v7036_v13  ;;  %vm25702_vm1 = vmmov %vm25676_vm0  ;;  %v7042_v13 = vld [vmem:[#allocation2 + $0x9f] sm:$0xff] }
 0x331   : > { %19955 = vmatmul.mubr.msk.f32.gmra.mrb[72].mxu0 %vm25676_vm0, %v12884_v11  ;;  %19085 = vmatprep.mubr.msk.f32.mxu1 %vm25694_vm8, %v7037_v54  ;;  %vm25703_vm8 = vmmov %vm25676_vm0  ;;  %v12890_v11 = vld [vmem:[#allocation2 + $0x2c0] sm:$0xff]  ;;  %v25705_v54 = vld [vmem:[#allocation27_spill] sm:$0xff] }
 0x332   : > { %19957 = vmatprep.mubr.msk.f32.mxu0 %vm25695_vm14, %v12885_v1  ;;  %vm25704_vm14 = vmmov %vm25676_vm0  ;;  %vm25706_vm13 = vnez %v25705_v54  ;;  %v7049_v54 = vld [vmem:[#allocation2 + $0xd7] sm:$0xff] }
 0x333   : > { %v7171_v1 = vsel %vm25706_vm13, %v7043_v39, 0.0  ;;  %v12895_v39 = vld [vmem:[#allocation2 + $0x2e8] sm:$0xff] }
 0x334   : > { %19086 = vmatmul.mubr.msk.f32.gmra.mrb[10].mxu1 %vm25698_vm15, %v7038_v59  ;;  %vm25707_vm15 = vmmov %vm25676_vm0  ;;  %v7044_v59 = vld [vmem:[#allocation2 + $0xaf] sm:$0xff] }
 0x335   : > { %19958 = vmatmul.mubr.msk.f32.gmra.mrb[74].mxu0 %vm25699_vm7, %v12886_v60  ;;  %19088 = vmatprep.mubr.msk.f32.mxu1 %vm25700_vm9, %v7167_v44  ;;  %vm25708_vm7 = vmmov %vm25676_vm0  ;;  %v12892_v60 = vld [vmem:[#allocation2 + $0x2d0] sm:$0xff]  ;;  %v12893_v44 = vld [vmem:[#allocation2 + $0x2d8] sm:$0xff] }
 0x336   : > { %19960 = vmatprep.mubr.msk.f32.mxu0 %vm25701_vm4, %v12887_v37  ;;  %vm25709_vm9 = vmmov %vm25676_vm0  ;;  %v7047_v37 = vld [vmem:[#allocation2 + $0xc7] sm:$0xff] }
 0x337   : > { %vm25710_vm4 = vmmov %vm25676_vm0 }
 0x338   : > { %19089 = vmatmul.mubr.msk.f32.gmra.mrb[12].mxu1 %vm25702_vm1, %v7040_v10  ;;  %vm25711_vm1 = vmmov %vm25676_vm0  ;;  %v7046_v10 = vld [vmem:[#allocation2 + $0xbf] sm:$0xff] }
 0x339   : > { %19961 = vmatmul.mubr.msk.f32.gmra.mrb[76].mxu0 %vm25676_vm0, %v12888_v19  ;;  %19091 = vmatprep.mubr.msk.f32.mxu1 %vm25703_vm8, %v7041_v53  ;;  %vm25712_vm8 = vmmov %vm25676_vm0  ;;  %v12894_v19 = vld [vmem:[#allocation2 + $0x2e0] sm:$0xff] }
 0x33a   : > { %19963 = vmatprep.mubr.msk.f32.mxu0 %vm25704_vm14, %v12889_v61  ;;  %vm25713_vm14 = vmmov %vm25676_vm0  ;;  %v25714_v53 = vld [vmem:[#allocation29_spill] sm:$0xff] }
 0x33b   : > { %vm25715_vm13 = vnez %v25714_v53  ;;  %v7053_v53 = vld [vmem:[#allocation2 + $0xf7] sm:$0xff] }
 0x33c   : > { %19092 = vmatmul.mubr.msk.f32.gmra.mrb[14].mxu1 %vm25707_vm15, %v7042_v13  ;;  %v7175_v61 = vsel %vm25715_vm13, %v7047_v37, 0.0  ;;  %vm25716_vm15 = vmmov %vm25676_vm0  ;;  %v7048_v13 = vld [vmem:[#allocation2 + $0xcf] sm:$0xff] }
 0x33d   : > { %19964 = vmatmul.mubr.msk.f32.gmra.mrb[78].mxu0 %vm25708_vm7, %v12890_v11  ;;  %19094 = vmatprep.mubr.msk.f32.mxu1 %vm25709_vm9, %v7171_v1  ;;  %vm25717_vm7 = vmmov %vm25676_vm0  ;;  %v12896_v11 = vld [vmem:[#allocation2 + $0x2f0] sm:$0xff]  ;;  %v12897_v1 = vld [vmem:[#allocation2 + $0x2f8] sm:$0xff] }
 0x33e   : > { %19966 = vmatprep.mubr.msk.f32.mxu0 %vm25710_vm4, %v12891_v25  ;;  %vm25718_vm9 = vmmov %vm25676_vm0  ;;  %v7051_v25 = vld [vmem:[#allocation2 + $0xe7] sm:$0xff] }
 0x33f   : > { %vm25719_vm4 = vmmov %vm25676_vm0  ;;  %v12899_v37 = vld [vmem:[#allocation2 + $0x308] sm:$0xff] }
 0x340   : > { %19095 = vmatmul.mubr.msk.f32.gmra.mrb[16].mxu1 %vm25711_vm1, %v7044_v59  ;;  %vm25720_vm1 = vmmov %vm25676_vm0  ;;  %v7050_v59 = vld [vmem:[#allocation2 + $0xdf] sm:$0xff] }
 0x341   : > { %19967 = vmatmul.mubr.msk.f32.gmra.mrb[80].mxu0 %vm25676_vm0, %v12892_v60  ;;  %19097 = vmatprep.mubr.msk.f32.mxu1 %vm25712_vm8, %v7045_v4  ;;  %vm25721_vm8 = vmmov %vm25676_vm0  ;;  %v12898_v60 = vld [vmem:[#allocation2 + $0x300] sm:$0xff]  ;;  %v25723_v4 = vld [vmem:[#allocation31_spill] sm:$0xff] }
 0x342   : > { %19969 = vmatprep.mubr.msk.f32.mxu0 %vm25713_vm14, %v12893_v44  ;;  %vm25722_vm14 = vmmov %vm25676_vm0  ;;  %vm25724_vm13 = vnez %v25723_v4  ;;  %v7057_v4 = vld [vmem:[#allocation2 + $0x117] sm:$0xff] }
 0x343   : > { %v7179_v44 = vsel %vm25724_vm13, %v7051_v25, 0.0  ;;  %v12903_v25 = vld [vmem:[#allocation2 + $0x328] sm:$0xff] }
 0x344   : > { %19098 = vmatmul.mubr.msk.f32.gmra.mrb[18].mxu1 %vm25716_vm15, %v7046_v10  ;;  %vm25725_vm15 = vmmov %vm25676_vm0  ;;  %v7052_v10 = vld [vmem:[#allocation2 + $0xef] sm:$0xff] }
 0x345   : > { %19970 = vmatmul.mubr.msk.f32.gmra.mrb[82].mxu0 %vm25717_vm7, %v12894_v19  ;;  %19100 = vmatprep.mubr.msk.f32.mxu1 %vm25718_vm9, %v7175_v61  ;;  %vm25726_vm7 = vmmov %vm25676_vm0  ;;  %v12900_v19 = vld [vmem:[#allocation2 + $0x310] sm:$0xff]  ;;  %v12901_v61 = vld [vmem:[#allocation2 + $0x318] sm:$0xff] }
 0x346   : > { %19972 = vmatprep.mubr.msk.f32.mxu0 %vm25719_vm4, %v12895_v39  ;;  %vm25727_vm9 = vmmov %vm25676_vm0  ;;  %v7055_v39 = vld [vmem:[#allocation2 + $0x107] sm:$0xff] }
 0x347   : > { %vm25728_vm4 = vmmov %vm25676_vm0 }
 0x348   : > { %19101 = vmatmul.mubr.msk.f32.gmra.mrb[20].mxu1 %vm25720_vm1, %v7048_v13  ;;  %vm25729_vm1 = vmmov %vm25676_vm0  ;;  %v7054_v13 = vld [vmem:[#allocation2 + $0xff] sm:$0xff] }
 0x349   : > { %19973 = vmatmul.mubr.msk.f32.gmra.mrb[84].mxu0 %vm25676_vm0, %v12896_v11  ;;  %19103 = vmatprep.mubr.msk.f32.mxu1 %vm25721_vm8, %v7049_v54  ;;  %vm25730_vm8 = vmmov %vm25676_vm0  ;;  %v12902_v11 = vld [vmem:[#allocation2 + $0x320] sm:$0xff] }
 0x34a   : > { %19975 = vmatprep.mubr.msk.f32.mxu0 %vm25722_vm14, %v12897_v1  ;;  %vm25731_vm14 = vmmov %vm25676_vm0  ;;  %v25732_v54 = vld [vmem:[#allocation33_spill] sm:$0xff] }
 0x34b   : > { %vm25733_vm13 = vnez %v25732_v54  ;;  %v7061_v54 = vld [vmem:[#allocation2 + $0x137] sm:$0xff] }
 0x34c   : > { %19104 = vmatmul.mubr.msk.f32.gmra.mrb[22].mxu1 %vm25725_vm15, %v7050_v59  ;;  %v7183_v1 = vsel %vm25733_vm13, %v7055_v39, 0.0  ;;  %vm25734_vm15 = vmmov %vm25676_vm0  ;;  %v7056_v59 = vld [vmem:[#allocation2 + $0x10f] sm:$0xff] }
 0x34d   : > { %19976 = vmatmul.mubr.msk.f32.gmra.mrb[86].mxu0 %vm25726_vm7, %v12898_v60  ;;  %19106 = vmatprep.mubr.msk.f32.mxu1 %vm25727_vm9, %v7179_v44  ;;  %vm25735_vm7 = vmmov %vm25676_vm0  ;;  %v12904_v60 = vld [vmem:[#allocation2 + $0x330] sm:$0xff]  ;;  %v12905_v44 = vld [vmem:[#allocation2 + $0x338] sm:$0xff] }
 0x34e   : > { %19978 = vmatprep.mubr.msk.f32.mxu0 %vm25728_vm4, %v12899_v37  ;;  %vm25736_vm9 = vmmov %vm25676_vm0  ;;  %v7059_v37 = vld [vmem:[#allocation2 + $0x127] sm:$0xff] }
 0x34f   : > { %vm25737_vm4 = vmmov %vm25676_vm0  ;;  %v12907_v39 = vld [vmem:[#allocation2 + $0x348] sm:$0xff] }
 0x350   : > { %19107 = vmatmul.mubr.msk.f32.gmra.mrb[24].mxu1 %vm25729_vm1, %v7052_v10  ;;  %vm25738_vm1 = vmmov %vm25676_vm0  ;;  %v7058_v10 = vld [vmem:[#allocation2 + $0x11f] sm:$0xff] }
 0x351   : > { %19979 = vmatmul.mubr.msk.f32.gmra.mrb[88].mxu0 %vm25676_vm0, %v12900_v19  ;;  %19109 = vmatprep.mubr.msk.f32.mxu1 %vm25730_vm8, %v7053_v53  ;;  %vm25739_vm8 = vmmov %vm25676_vm0  ;;  %v12906_v19 = vld [vmem:[#allocation2 + $0x340] sm:$0xff]  ;;  %v25741_v53 = vld [vmem:[#allocation35_spill] sm:$0xff] }
 0x352   : > { %19981 = vmatprep.mubr.msk.f32.mxu0 %vm25731_vm14, %v12901_v61  ;;  %vm25740_vm14 = vmmov %vm25676_vm0  ;;  %vm25742_vm13 = vnez %v25741_v53  ;;  %v7065_v53 = vld [vmem:[#allocation2 + $0x157] sm:$0xff] }
 0x353   : > { %v7187_v61 = vsel %vm25742_vm13, %v7059_v37, 0.0  ;;  %v12911_v37 = vld [vmem:[#allocation2 + $0x368] sm:$0xff] }
 0x354   : > { %19110 = vmatmul.mubr.msk.f32.gmra.mrb[26].mxu1 %vm25734_vm15, %v7054_v13  ;;  %vm25743_vm15 = vmmov %vm25676_vm0  ;;  %v7060_v13 = vld [vmem:[#allocation2 + $0x12f] sm:$0xff] }
 0x355   : > { %19982 = vmatmul.mubr.msk.f32.gmra.mrb[90].mxu0 %vm25735_vm7, %v12902_v11  ;;  %19112 = vmatprep.mubr.msk.f32.mxu1 %vm25736_vm9, %v7183_v1  ;;  %vm25744_vm7 = vmmov %vm25676_vm0  ;;  %v12908_v11 = vld [vmem:[#allocation2 + $0x350] sm:$0xff]  ;;  %v12909_v1 = vld [vmem:[#allocation2 + $0x358] sm:$0xff] }
 0x356   : > { %19984 = vmatprep.mubr.msk.f32.mxu0 %vm25737_vm4, %v12903_v25  ;;  %vm25745_vm9 = vmmov %vm25676_vm0  ;;  %v7063_v25 = vld [vmem:[#allocation2 + $0x147] sm:$0xff] }
 0x357   : > { %vm25746_vm4 = vmmov %vm25676_vm0 }
 0x358   : > { %19113 = vmatmul.mubr.msk.f32.gmra.mrb[28].mxu1 %vm25738_vm1, %v7056_v59  ;;  %vm25747_vm1 = vmmov %vm25676_vm0  ;;  %v7062_v59 = vld [vmem:[#allocation2 + $0x13f] sm:$0xff] }
 0x359   : > { %19985 = vmatmul.mubr.msk.f32.gmra.mrb[92].mxu0 %vm25676_vm0, %v12904_v60  ;;  %19115 = vmatprep.mubr.msk.f32.mxu1 %vm25739_vm8, %v7057_v4  ;;  %vm25748_vm8 = vmmov %vm25676_vm0  ;;  %v12910_v60 = vld [vmem:[#allocation2 + $0x360] sm:$0xff] }
 0x35a   : > { %19987 = vmatprep.mubr.msk.f32.mxu0 %vm25740_vm14, %v12905_v44  ;;  %vm25749_vm14 = vmmov %vm25676_vm0  ;;  %v25750_v4 = vld [vmem:[#allocation37_spill] sm:$0xff] }
 0x35b   : > { %vm25751_vm13 = vnez %v25750_v4  ;;  %v7069_v4 = vld [vmem:[#allocation2 + $0x177] sm:$0xff] }
 0x35c   : > { %19116 = vmatmul.mubr.msk.f32.gmra.mrb[30].mxu1 %vm25743_vm15, %v7058_v10  ;;  %v7191_v44 = vsel %vm25751_vm13, %v7063_v25, 0.0  ;;  %vm25752_vm15 = vmmov %vm25676_vm0  ;;  %v7064_v10 = vld [vmem:[#allocation2 + $0x14f] sm:$0xff] }
 0x35d   : > { %19988 = vmatmul.mubr.msk.f32.gmra.mrb[94].mxu0 %vm25744_vm7, %v12906_v19  ;;  %19118 = vmatprep.mubr.msk.f32.mxu1 %vm25745_vm9, %v7187_v61  ;;  %vm25753_vm7 = vmmov %vm25676_vm0  ;;  %v12912_v19 = vld [vmem:[#allocation2 + $0x370] sm:$0xff]  ;;  %v12913_v61 = vld [vmem:[#allocation2 + $0x378] sm:$0xff] }
 0x35e   : > { %19990 = vmatprep.mubr.msk.f32.mxu0 %vm25746_vm4, %v12907_v39  ;;  %vm25754_vm9 = vmmov %vm25676_vm0  ;;  %v7067_v39 = vld [vmem:[#allocation2 + $0x167] sm:$0xff] }
 0x35f   : > { %vm25755_vm4 = vmmov %vm25676_vm0  ;;  %v12915_v25 = vld [vmem:[#allocation2 + $0x388] sm:$0xff] }
 0x360   : > { %19119 = vmatmul.mubr.msk.f32.gmra.mrb[32].mxu1 %vm25747_vm1, %v7060_v13  ;;  %vm25756_vm1 = vmmov %vm25676_vm0  ;;  %v7066_v13 = vld [vmem:[#allocation2 + $0x15f] sm:$0xff] }
 0x361   : > { %19991 = vmatmul.mubr.msk.f32.gmra.mrb[96].mxu0 %vm25676_vm0, %v12908_v11  ;;  %19121 = vmatprep.mubr.msk.f32.mxu1 %vm25748_vm8, %v7061_v54  ;;  %vm25757_vm8 = vmmov %vm25676_vm0  ;;  %v12914_v11 = vld [vmem:[#allocation2 + $0x380] sm:$0xff]  ;;  %v25759_v54 = vld [vmem:[#allocation39_spill] sm:$0xff] }
 0x362   : > { %19993 = vmatprep.mubr.msk.f32.mxu0 %vm25749_vm14, %v12909_v1  ;;  %vm25758_vm14 = vmmov %vm25676_vm0  ;;  %vm25760_vm13 = vnez %v25759_v54  ;;  %v7073_v54 = vld [vmem:[#allocation2 + $0x197] sm:$0xff] }
 0x363   : > { %v7195_v1 = vsel %vm25760_vm13, %v7067_v39, 0.0  ;;  %v12919_v39 = vld [vmem:[#allocation2 + $0x3a8] sm:$0xff] }
 0x364   : > { %19122 = vmatmul.mubr.msk.f32.gmra.mrb[34].mxu1 %vm25752_vm15, %v7062_v59  ;;  %vm25761_vm15 = vmmov %vm25676_vm0  ;;  %v7068_v59 = vld [vmem:[#allocation2 + $0x16f] sm:$0xff] }
 0x365   : > { %19994 = vmatmul.mubr.msk.f32.gmra.mrb[98].mxu0 %vm25753_vm7, %v12910_v60  ;;  %19124 = vmatprep.mubr.msk.f32.mxu1 %vm25754_vm9, %v7191_v44  ;;  %vm25762_vm7 = vmmov %vm25676_vm0  ;;  %v12916_v60 = vld [vmem:[#allocation2 + $0x390] sm:$0xff]  ;;  %v12917_v44 = vld [vmem:[#allocation2 + $0x398] sm:$0xff] }
 0x366   : > { %19996 = vmatprep.mubr.msk.f32.mxu0 %vm25755_vm4, %v12911_v37  ;;  %vm25763_vm9 = vmmov %vm25676_vm0  ;;  %v7071_v37 = vld [vmem:[#allocation2 + $0x187] sm:$0xff] }
 0x367   : > { %vm25764_vm4 = vmmov %vm25676_vm0 }
 0x368   : > { %19125 = vmatmul.mubr.msk.f32.gmra.mrb[36].mxu1 %vm25756_vm1, %v7064_v10  ;;  %vm25765_vm1 = vmmov %vm25676_vm0  ;;  %v7070_v10 = vld [vmem:[#allocation2 + $0x17f] sm:$0xff] }
 0x369   : > { %19997 = vmatmul.mubr.msk.f32.gmra.mrb[100].mxu0 %vm25676_vm0, %v12912_v19  ;;  %19127 = vmatprep.mubr.msk.f32.mxu1 %vm25757_vm8, %v7065_v53  ;;  %vm25766_vm8 = vmmov %vm25676_vm0  ;;  %v12918_v19 = vld [vmem:[#allocation2 + $0x3a0] sm:$0xff] }
 0x36a   : > { %19999 = vmatprep.mubr.msk.f32.mxu0 %vm25758_vm14, %v12913_v61  ;;  %vm25767_vm14 = vmmov %vm25676_vm0  ;;  %v25768_v53 = vld [vmem:[#allocation41_spill] sm:$0xff] }
 0x36b   : > { %vm25769_vm13 = vnez %v25768_v53  ;;  %v7077_v53 = vld [vmem:[#allocation2 + $0x1b7] sm:$0xff] }
 0x36c   : > { %19128 = vmatmul.mubr.msk.f32.gmra.mrb[38].mxu1 %vm25761_vm15, %v7066_v13  ;;  %v7199_v61 = vsel %vm25769_vm13, %v7071_v37, 0.0  ;;  %vm25770_vm15 = vmmov %vm25676_vm0  ;;  %v7072_v13 = vld [vmem:[#allocation2 + $0x18f] sm:$0xff] }
 0x36d   : > { %20000 = vmatmul.mubr.msk.f32.gmra.mrb[102].mxu0 %vm25762_vm7, %v12914_v11  ;;  %19130 = vmatprep.mubr.msk.f32.mxu1 %vm25763_vm9, %v7195_v1  ;;  %vm25771_vm7 = vmmov %vm25676_vm0  ;;  %v12920_v11 = vld [vmem:[#allocation2 + $0x3b0] sm:$0xff]  ;;  %v12921_v1 = vld [vmem:[#allocation2 + $0x3b8] sm:$0xff] }
 0x36e   : > { %20002 = vmatprep.mubr.msk.f32.mxu0 %vm25764_vm4, %v12915_v25  ;;  %vm25772_vm9 = vmmov %vm25676_vm0  ;;  %v7075_v25 = vld [vmem:[#allocation2 + $0x1a7] sm:$0xff] }
 0x36f   : > { %vm25773_vm4 = vmmov %vm25676_vm0  ;;  %v12923_v37 = vld [vmem:[#allocation2 + $0x3c8] sm:$0xff] }
 0x370   : > { %19131 = vmatmul.mubr.msk.f32.gmra.mrb[40].mxu1 %vm25765_vm1, %v7068_v59  ;;  %vm25774_vm1 = vmmov %vm25676_vm0  ;;  %v7074_v59 = vld [vmem:[#allocation2 + $0x19f] sm:$0xff] }
 0x371   : > { %20003 = vmatmul.mubr.msk.f32.gmra.mrb[104].mxu0 %vm25676_vm0, %v12916_v60  ;;  %19133 = vmatprep.mubr.msk.f32.mxu1 %vm25766_vm8, %v7069_v4  ;;  %vm25775_vm8 = vmmov %vm25676_vm0  ;;  %v12922_v60 = vld [vmem:[#allocation2 + $0x3c0] sm:$0xff]  ;;  %v25777_v4 = vld [vmem:[#allocation46_spill] sm:$0xff] }
 0x372   : > { %20005 = vmatprep.mubr.msk.f32.mxu0 %vm25767_vm14, %v12917_v44  ;;  %vm25776_vm14 = vmmov %vm25676_vm0  ;;  %vm25778_vm13 = vnez %v25777_v4  ;;  %v7081_v4 = vld [vmem:[#allocation2 + $0x1d7] sm:$0xff] }
 0x373   : > { %v7203_v44 = vsel %vm25778_vm13, %v7075_v25, 0.0  ;;  %v12927_v25 = vld [vmem:[#allocation2 + $0x3e8] sm:$0xff] }
 0x374   : > { %19134 = vmatmul.mubr.msk.f32.gmra.mrb[42].mxu1 %vm25770_vm15, %v7070_v10  ;;  %vm25779_vm15 = vmmov %vm25676_vm0  ;;  %v7076_v10 = vld [vmem:[#allocation2 + $0x1af] sm:$0xff] }
 0x375   : > { %20006 = vmatmul.mubr.msk.f32.gmra.mrb[106].mxu0 %vm25771_vm7, %v12918_v19  ;;  %19136 = vmatprep.mubr.msk.f32.mxu1 %vm25772_vm9, %v7199_v61  ;;  %vm25780_vm7 = vmmov %vm25676_vm0  ;;  %v12924_v19 = vld [vmem:[#allocation2 + $0x3d0] sm:$0xff]  ;;  %v12925_v61 = vld [vmem:[#allocation2 + $0x3d8] sm:$0xff] }
 0x376   : > { %20008 = vmatprep.mubr.msk.f32.mxu0 %vm25773_vm4, %v12919_v39  ;;  %vm25781_vm9 = vmmov %vm25676_vm0  ;;  %v7079_v39 = vld [vmem:[#allocation2 + $0x1c7] sm:$0xff] }
 0x377   : > { %vm25782_vm4 = vmmov %vm25676_vm0 }
 0x378   : > { %19137 = vmatmul.mubr.msk.f32.gmra.mrb[44].mxu1 %vm25774_vm1, %v7072_v13  ;;  %vm25783_vm1 = vmmov %vm25676_vm0  ;;  %v7078_v13 = vld [vmem:[#allocation2 + $0x1bf] sm:$0xff] }
 0x379   : > { %20009 = vmatmul.mubr.msk.f32.gmra.mrb[108].mxu0 %vm25676_vm0, %v12920_v11  ;;  %19139 = vmatprep.mubr.msk.f32.mxu1 %vm25775_vm8, %v7073_v54  ;;  %vm25784_vm8 = vmmov %vm25676_vm0  ;;  %v12926_v11 = vld [vmem:[#allocation2 + $0x3e0] sm:$0xff]  ;;  %v25786_v54 = vld [vmem:[#allocation52_spill] sm:$0xff] }
 0x37a   : > { %20011 = vmatprep.mubr.msk.f32.mxu0 %vm25776_vm14, %v12921_v1  ;;  %vm25785_vm14 = vmmov %vm25676_vm0  ;;  %vm25787_vm13 = vnez %v25786_v54  ;;  %v7085_v54 = vld [vmem:[#allocation2 + $0x1f7] sm:$0xff] }
 0x37b   : > { %v7207_v1 = vsel %vm25787_vm13, %v7079_v39, 0.0  ;;  %v12931_v39 = vld [vmem:[#allocation2 + $0x408] sm:$0xff] }
 0x37c   : > { %19140 = vmatmul.mubr.msk.f32.gmra.mrb[46].mxu1 %vm25779_vm15, %v7074_v59  ;;  %vm25788_vm15 = vmmov %vm25676_vm0  ;;  %v7080_v59 = vld [vmem:[#allocation2 + $0x1cf] sm:$0xff] }
 0x37d   : > { %20012 = vmatmul.mubr.msk.f32.gmra.mrb[110].mxu0 %vm25780_vm7, %v12922_v60  ;;  %19142 = vmatprep.mubr.msk.f32.mxu1 %vm25781_vm9, %v7203_v44  ;;  %vm25789_vm7 = vmmov %vm25676_vm0  ;;  %v12928_v60 = vld [vmem:[#allocation2 + $0x3f0] sm:$0xff]  ;;  %v12929_v44 = vld [vmem:[#allocation2 + $0x3f8] sm:$0xff] }
 0x37e   : > { %20014 = vmatprep.mubr.msk.f32.mxu0 %vm25782_vm4, %v12923_v37  ;;  %vm25790_vm9 = vmmov %vm25676_vm0  ;;  %v7083_v37 = vld [vmem:[#allocation2 + $0x1e7] sm:$0xff] }
 0x37f   : > { %vm25791_vm4 = vmmov %vm25676_vm0 }
 0x380   : > { %19143 = vmatmul.mubr.msk.f32.gmra.mrb[48].mxu1 %vm25783_vm1, %v7076_v10  ;;  %vm25792_vm1 = vmmov %vm25676_vm0  ;;  %v7082_v10 = vld [vmem:[#allocation2 + $0x1df] sm:$0xff] }
 0x381   : > { %20015 = vmatmul.mubr.msk.f32.gmra.mrb[112].mxu0 %vm25676_vm0, %v12924_v19  ;;  %19145 = vmatprep.mubr.msk.f32.mxu1 %vm25784_vm8, %v7077_v53  ;;  %vm25793_vm8 = vmmov %vm25676_vm0  ;;  %v12930_v19 = vld [vmem:[#allocation2 + $0x400] sm:$0xff]  ;;  %v25795_v53 = vld [vmem:[#allocation58_spill] sm:$0xff] }
 0x382   : > { %20017 = vmatprep.mubr.msk.f32.mxu0 %vm25785_vm14, %v12925_v61  ;;  %vm25794_vm14 = vmmov %vm25676_vm0  ;;  %vm25796_vm13 = vnez %v25795_v53  ;;  %v12937_v53 = vld [vmem:[#allocation2 + $0x438] sm:$0xff] }
 0x383   : > { %v7211_v61 = vsel %vm25796_vm13, %v7083_v37, 0.0  ;;  %vm25804_vm13 = vnez %v25335_v16  ;;  %v7088_v37 = vld [vmem:[#allocation2 + $0x20f] sm:$0xff]  ;;  %v7090_v16 = vld [vmem:[#allocation2 + $0x21f] sm:$0xff] }
 0x384   : > { %19146 = vmatmul.mubr.msk.f32.gmra.mrb[50].mxu1 %vm25788_vm15, %v7078_v13  ;;  %vm25797_vm15 = vmmov %vm25676_vm0  ;;  %v7084_v13 = vld [vmem:[#allocation2 + $0x1ef] sm:$0xff] }
 0x385   : > { %20018 = vmatmul.mubr.msk.f32.gmra.mrb[114].mxu0 %vm25789_vm7, %v12926_v11  ;;  %19148 = vmatprep.mubr.msk.f32.mxu1 %vm25790_vm9, %v7207_v1  ;;  %vm25798_vm7 = vmmov %vm25676_vm0  ;;  %v12932_v11 = vld [vmem:[#allocation2 + $0x410] sm:$0xff]  ;;  %v12933_v1 = vld [vmem:[#allocation2 + $0x418] sm:$0xff] }
 0x386   : > { %20020 = vmatprep.mubr.msk.f32.mxu0 %vm25791_vm4, %v12927_v25  ;;  %vm25799_vm9 = vmmov %vm25676_vm0  ;;  %v7087_v25 = vld [vmem:[#allocation2 + $0x207] sm:$0xff] }
 0x387   : > { %vm25800_vm4 = vmmov %vm25676_vm0 }
 0x388   : > { %19149 = vmatmul.mubr.msk.f32.gmra.mrb[52].mxu1 %vm25792_vm1, %v7080_v59  ;;  %vm25801_vm1 = vmmov %vm25676_vm0  ;;  %v7086_v59 = vld [vmem:[#allocation2 + $0x1ff] sm:$0xff] }
 0x389   : > { %20021 = vmatmul.mubr.msk.f32.gmra.mrb[116].mxu0 %vm25676_vm0, %v12928_v60  ;;  %19151 = vmatprep.mubr.msk.f32.mxu1 %vm25793_vm8, %v7081_v4  ;;  %vm25802_vm8 = vmmov %vm25676_vm0  ;;  %v12934_v60 = vld [vmem:[#allocation2 + $0x420] sm:$0xff]  ;;  %v7215_v4 = vsel %vm25804_vm13, %v7087_v25, 0.0  ;;  %v7093_v25 = vld [vmem:[#allocation2 + $0x237] sm:$0xff] }
 0x38a   : > { %20023 = vmatprep.mubr.msk.f32.mxu0 %vm25794_vm14, %v12929_v44  ;;  %vm25803_vm14 = vmmov %vm25676_vm0  ;;  %v12935_v44 = vld [vmem:[#allocation2 + $0x428] sm:$0xff] }
 0x38b   : > { %vm25812_vm13 = vmmov %vm25676_vm0 }
 0x38c   : > { %19152 = vmatmul.mubr.msk.f32.gmra.mrb[54].mxu1 %vm25797_vm15, %v7082_v10  ;;  %vm25805_vm15 = vmmov %vm25676_vm0  ;;  %v12936_v10 = vld [vmem:[#allocation2 + $0x430] sm:$0xff] }
 0x38d   : > { %20024 = vmatmul.mubr.msk.f32.gmra.mrb[118].mxu0 %vm25798_vm7, %v12930_v19  ;;  %19154 = vmatprep.mubr.msk.f32.mxu1 %vm25799_vm9, %v7211_v61  ;;  %vm25806_vm7 = vmmov %vm25676_vm0  ;;  %v7089_v19 = vld [vmem:[#allocation2 + $0x217] sm:$0xff]  ;;  %v7091_v61 = vld [vmem:[#allocation2 + $0x227] sm:$0xff] }
 0x38e   : > { %20026 = vmatprep.mubr.msk.f32.mxu0 %vm25800_vm4, %v12931_v39  ;;  %vm25807_vm9 = vmmov %vm25676_vm0  ;;  %v12938_v39 = vld [vmem:[#allocation2 + $0x440] sm:$0xff] }
 0x38f   : > { %vm25808_vm4 = vmmov %vm25676_vm0 }
 0x390   : > { %19155 = vmatmul.mubr.msk.f32.gmra.mrb[56].mxu1 %vm25801_vm1, %v7084_v13  ;;  %vm25809_vm1 = vmmov %vm25676_vm0  ;;  %v7219_v13 = vsel %vm22572_vm6, %v7091_v61, 0.0  ;;  %v7097_v61 = vld [vmem:[#allocation2 + $0x257] sm:$0xff] }
 0x391   : > { %20027 = vmatmul.mubr.msk.f32.gmra.mrb[120].mxu0 %vm25676_vm0, %v12932_v11  ;;  %19157 = vmatprep.mubr.msk.f32.mxu1 %vm25802_vm8, %v7085_v54  ;;  %vm25810_vm8 = vmmov %vm25676_vm0  ;;  %v14161_v11 = vld [vmem:[#allocation2 + $0x49] sm:$0xff] }
 0x392   : > { %20029 = vmatprep.mubr.msk.f32.mxu0 %vm25803_vm14, %v12933_v1  ;;  %vm25811_vm14 = vmmov %vm25676_vm0  ;;  %v7092_v54 = vld [vmem:[#allocation2 + $0x22f] sm:$0xff] }
 0x393   : > { %v14162_v1 = vld [vmem:[#allocation2 + $0x51] sm:$0xff]  ;;  %vm25818_vm6 = vmmov %vm25676_vm0 }
 0x394   : > { %19158 = vmatmul.mubr.msk.f32.gmra.mrb[58].mxu1 %vm25805_vm15, %v7086_v59  ;;  %vm25813_vm15 = vmmov %vm25676_vm0  ;;  %v14163_v59 = vld [vmem:[#allocation2 + $0x59] sm:$0xff] }
 0x395   : > { %20030 = vmatmul.mubr.msk.f32.gmra.mrb[122].mxu0 %vm25806_vm7, %v12934_v60  ;;  %19160 = vmatprep.mubr.msk.f32.mxu1 %vm25807_vm9, %v7215_v4  ;;  %vm25814_vm7 = vmmov %vm25676_vm0  ;;  %v14164_v60 = vld [vmem:[#allocation2 + $0x61] sm:$0xff] }
 0x396   : > { %20032 = vmatprep.mubr.msk.f32.mxu0 %vm25808_vm4, %v12935_v44  ;;  %vm25815_vm9 = vmmov %vm25676_vm0  ;;  %v7095_v4 = vld [vmem:[#allocation2 + $0x247] sm:$0xff] }
 0x397   : > { %vm25816_vm4 = vmmov %vm25676_vm0 }
 0x398   : > { %19161 = vmatmul.mubr.msk.f32.gmra.mrb[60].mxu1 %vm25809_vm1, %v7088_v37  ;;  %vm25817_vm1 = vmmov %vm25676_vm0 }
 0x399   : > { %20033 = vmatmul.mubr.msk.f32.gmra.mrb[124].mxu0 %vm25676_vm0, %v12936_v10  ;;  %19163 = vmatprep.mubr.msk.f32.mxu1 %vm25810_vm8, %v7089_v19  ;;  %vm25819_vm8 = vnez %v25353_v47  ;;  %v14165_v10 = vld [vmem:[#allocation2 + $0x69] sm:$0xff] }
 0x39a   : > { %20035 = vmatprep.mubr.msk.f32.mxu0 %vm25811_vm14, %v12937_v53  ;;  %v14292_v44 = vsel %vm25819_vm8, %v14164_v60, 0.0  ;;  %vm25820_vm14 = vnez %v25174_v24  ;;  %v7096_v19 = vld [vmem:[#allocation2 + $0x24f] sm:$0xff]  ;;  %v7098_v24 = vld [vmem:[#allocation2 + $0x25f] sm:$0xff]  ;;  %vm25828_vm8 = vnez %v25183_v43 }
 0x39b   : > { %v7223_v37 = vsel %vm25820_vm14, %v7095_v4, 0.0  ;;  %v14166_v53 = vld [vmem:[#allocation2 + $0x71] sm:$0xff]  ;;  %vm25829_vm14 = vmmov %vm25676_vm0  ;;  %v14171_v60 = vld [vmem:[#allocation2 + $0x99] sm:$0xff] }
 0x39c   : > { %19164 = vmatmul.mubr.msk.f32.gmra.mrb[62].mxu1 %vm25812_vm13, %v7090_v16  ;;  %vm25821_vm13 = vmmov %vm25676_vm0  ;;  %v14167_v16 = vld [vmem:[#allocation2 + $0x79] sm:$0xff]  ;;  %v14172_v4 = vld [vmem:[#allocation2 + $0xa1] sm:$0xff] }
 0x39d   : > { %20036 = vmatmul.mubr.msk.f32.gmra.mrb[126].mxu0 %vm25813_vm15, %v12938_v39  ;;  %19166 = vmatprep.mubr.msk.f32.mxu1 %vm25814_vm7, %v7219_v13  ;;  %vm25822_vm15 = vmmov %vm25676_vm0  ;;  %v14168_v39 = vld [vmem:[#allocation2 + $0x81] sm:$0xff]  ;;  %v14300_v15 = vsel %vm25373_vm2, %v14172_v4, 0.0  ;;  %v14181_v4 = vld [vmem:[#allocation2 + $0xe9] sm:$0xff] }
 0x39e   : > { %20040 = vmatprep.mubr.msk.f32.mxu0 %vm25815_vm9, %v14161_v11  ;;  %vm25823_vm7 = vmmov %vm25676_vm0  ;;  %v7099_v13 = vld [vmem:[#allocation2 + $0x267] sm:$0xff]  ;;  %v14296_v47 = vsel %vm25364_vm3, %v14168_v39, 0.0  ;;  %v7102_v43 = vld [vmem:[#allocation2 + $0x27f] sm:$0xff] }
 0x39f   : > { %vm25824_vm9 = vmmov %vm25676_vm0  ;;  %v7227_v11 = vsel %vm25828_vm8, %v7099_v13, 0.0  ;;  %v7107_v39 = vld [vmem:[#allocation2 + $0x2a7] sm:$0xff] }
 0x3a0   : > { %19167 = vmatmul.mubr.msk.f32.gmra.mrb[64].mxu1 %vm25816_vm4, %v7092_v54  ;;  %vm25825_vm4 = vmmov %vm25676_vm0  ;;  %v14169_v54 = vld [vmem:[#allocation2 + $0x89] sm:$0xff] }
 0x3a1   : > { %20041 = vmatmul.mubr.msk.f32.vlgmr.msra.gmra.mrb[0].mxu0 %vm25817_vm1, %v14162_v1  ;;  %19169 = vmatprep.mubr.msk.f32.mxu1 %vm25818_vm6, %v7093_v25  ;;  %vm25826_vm1 = vmmov %vm25676_vm0  ;;  %v7100_v1 = vld [vmem:[#allocation2 + $0x26f] sm:$0xff] }
 0x3a2   : > { %20043 = vmatprep.mubr.msk.f32.mxu0 %vm25676_vm0, %v14163_v59  ;;  %vm25827_vm6 = vmmov %vm25676_vm0  ;;  %v14170_v25 = vld [vmem:[#allocation2 + $0x91] sm:$0xff] }
 0x3a3   : > { %v7101_v59 = vld [vmem:[#allocation2 + $0x277] sm:$0xff]  ;;  %vm25834_vm3 = vmmov %vm25676_vm0 }
 0x3a4   : > { %19170 = vmatmul.mubr.msk.f32.gmra.mrb[66].mxu1 %vm25821_vm13, %v7094_v41  ;;  %vm25830_vm13 = vmmov %vm25676_vm0  ;;  %v7103_v41 = vld [vmem:[#allocation2 + $0x287] sm:$0xff] }
 0x3a5   : > { %20044 = vmatmul.mubr.msk.f32.gmra.mrb[2].mxu0 %vm25822_vm15, %v14292_v44  ;;  %19172 = vmatprep.mubr.msk.f32.mxu1 %vm25823_vm7, %v7223_v37  ;;  %vm25831_vm15 = vmmov %vm25676_vm0  ;;  %v14173_v37 = vld [vmem:[#allocation2 + $0xa9] sm:$0xff] }
 0x3a6   : > { %20046 = vmatprep.mubr.msk.f32.mxu0 %vm25824_vm9, %v14165_v10  ;;  %vm25832_vm7 = vmmov %vm25676_vm0  ;;  %v7104_v10 = vld [vmem:[#allocation2 + $0x28f] sm:$0xff] }
 0x3a7   : > { %vm25833_vm9 = vmmov %vm25676_vm0 }
 0x3a8   : > { %19173 = vmatmul.mubr.msk.f32.gmra.mrb[68].mxu1 %vm25825_vm4, %v7096_v19  ;;  %vm25835_vm4 = vmmov %vm25676_vm0  ;;  %v14174_v19 = vld [vmem:[#allocation2 + $0xb1] sm:$0xff] }
 0x3a9   : > { %20047 = vmatmul.mubr.msk.f32.gmra.mrb[4].mxu0 %vm25826_vm1, %v14166_v53  ;;  %19175 = vmatprep.mubr.msk.f32.mxu1 %vm25827_vm6, %v7097_v61  ;;  %vm25836_vm1 = vmmov %vm25676_vm0  ;;  %vm25837_vm6 = vnez %v25191_v0  ;;  %v7105_v53 = vld [vmem:[#allocation2 + $0x297] sm:$0xff]  ;;  %v7106_v0 = vld [vmem:[#allocation2 + $0x29f] sm:$0xff] }
 0x3aa   : > { %20049 = vmatprep.mubr.msk.f32.mxu0 %vm25676_vm0, %v14167_v16  ;;  %v7231_v44 = vsel %vm25837_vm6, %v7103_v41, 0.0  ;;  %vm25838_vm8 = vmmov %vm25676_vm0  ;;  %v14175_v61 = vld [vmem:[#allocation2 + $0xb9] sm:$0xff]  ;;  %v14176_v16 = vld [vmem:[#allocation2 + $0xc1] sm:$0xff] }
 0x3ab   : > { %vm25842_vm2 = vmmov %vm25676_vm0  ;;  %v14304_v36 = vsel %vm25382_vm12, %v14176_v16, 0.0  ;;  %v7112_v41 = vld [vmem:[#allocation2 + $0x2cf] sm:$0xff] }
 0x3ac   : > { %19176 = vmatmul.mubr.msk.f32.gmra.mrb[70].mxu1 %vm25829_vm14, %v7098_v24  ;;  %vm25839_vm14 = vmmov %vm25676_vm0  ;;  %v14177_v24 = vld [vmem:[#allocation2 + $0xc9] sm:$0xff]  ;;  %v14186_v16 = vld [vmem:[#allocation2 + $0x111] sm:$0xff] }
 0x3ad   : > { %20050 = vmatmul.mubr.msk.f32.gmra.mrb[6].mxu0 %vm25830_vm13, %v14296_v47  ;;  %19178 = vmatprep.mubr.msk.f32.mxu1 %vm25831_vm15, %v7227_v11  ;;  %vm25840_vm13 = vmmov %vm25676_vm0  ;;  %v7108_v47 = vld [vmem:[#allocation2 + $0x2af] sm:$0xff] }
 0x3ae   : > { %20052 = vmatprep.mubr.msk.f32.mxu0 %vm25832_vm7, %v14169_v54  ;;  %vm25841_vm15 = vmmov %vm25676_vm0  ;;  %v14178_v11 = vld [vmem:[#allocation2 + $0xd1] sm:$0xff] }
 0x3af   : > { %vm25843_vm7 = vmmov %vm25676_vm0  ;;  %v7109_v54 = vld [vmem:[#allocation2 + $0x2b7] sm:$0xff] }
 0x3b0   : > { %19179 = vmatmul.mubr.msk.f32.gmra.mrb[72].mxu1 %vm25833_vm9, %v7100_v1  ;;  %vm25844_vm9 = vmmov %vm25676_vm0  ;;  %v14179_v1 = vld [vmem:[#allocation2 + $0xd9] sm:$0xff] }
 0x3b1   : > { %20053 = vmatmul.mubr.msk.f32.gmra.mrb[8].mxu0 %vm25834_vm3, %v14170_v25  ;;  %19181 = vmatprep.mubr.msk.f32.mxu1 %vm25835_vm4, %v7101_v59  ;;  %vm25845_vm3 = vnez %v25199_v23  ;;  %vm25846_vm4 = vmmov %vm25676_vm0  ;;  %v14180_v25 = vld [vmem:[#allocation2 + $0xe1] sm:$0xff] }
 0x3b2   : > { %20055 = vmatprep.mubr.msk.f32.mxu0 %vm25836_vm1, %v14171_v60  ;;  %v7235_v13 = vsel %vm25845_vm3, %v7107_v39, 0.0  ;;  %vm25847_vm1 = vmmov %vm25676_vm0  ;;  %v7111_v59 = vld [vmem:[#allocation2 + $0x2c7] sm:$0xff]  ;;  %v7110_v23 = vld [vmem:[#allocation2 + $0x2bf] sm:$0xff]  ;;  %v14308_v12 = vsel %vm25391_vm10, %v14180_v25, 0.0 }
 0x3b3   : > { %vm25848_vm6 = vmmov %vm25676_vm0  ;;  %v7117_v39 = vld [vmem:[#allocation2 + $0x2f7] sm:$0xff] }
 0x3b4   : > { %19182 = vmatmul.mubr.msk.f32.gmra.mrb[74].mxu1 %vm25676_vm0, %v7102_v43  ;;  %vm25850_vm12 = vmmov %vm25676_vm0  ;;  %v14182_v43 = vld [vmem:[#allocation2 + $0xf1] sm:$0xff]  ;;  %v14191_v25 = vld [vmem:[#allocation2 + $0x139] sm:$0xff] }
 0x3b5   : > { %20056 = vmatmul.mubr.msk.f32.gmra.mrb[10].mxu0 %vm25838_vm8, %v14300_v15  ;;  %19184 = vmatprep.mubr.msk.f32.mxu1 %vm25839_vm14, %v7231_v44  ;;  %vm25849_vm8 = vmmov %vm25676_vm0  ;;  %v7113_v15 = vld [vmem:[#allocation2 + $0x2d7] sm:$0xff] }
 0x3b6   : > { %20058 = vmatprep.mubr.msk.f32.mxu0 %vm25840_vm13, %v14173_v37  ;;  %vm25851_vm14 = vmmov %vm25676_vm0  ;;  %v14183_v44 = vld [vmem:[#allocation2 + $0xf9] sm:$0xff]  ;;  %v14184_v37 = vld [vmem:[#allocation2 + $0x101] sm:$0xff] }
 0x3b7   : > { %vm25852_vm13 = vmmov %vm25676_vm0  ;;  %v14312_v7 = vsel %vm25400_vm11, %v14184_v37, 0.0  ;;  %v7127_v37 = vld [vmem:[#allocation2 + $0x347] sm:$0xff] }
 0x3b8   : > { %19185 = vmatmul.mubr.msk.f32.gmra.mrb[76].mxu1 %vm25841_vm15, %v7104_v10  ;;  %vm25853_vm15 = vnez %v25207_v46  ;;  %vm25857_vm3 = vmmov %vm25676_vm0  ;;  %v7115_v10 = vld [vmem:[#allocation2 + $0x2e7] sm:$0xff]  ;;  %v7114_v46 = vld [vmem:[#allocation2 + $0x2df] sm:$0xff] }
 0x3b9   : > { %20059 = vmatmul.mubr.msk.f32.gmra.mrb[12].mxu0 %vm25842_vm2, %v14174_v19  ;;  %19187 = vmatprep.mubr.msk.f32.mxu1 %vm25843_vm7, %v7105_v53  ;;  %v7239_v60 = vsel %vm25853_vm15, %v7111_v59, 0.0  ;;  %vm25854_vm2 = vmmov %vm25676_vm0  ;;  %v14185_v53 = vld [vmem:[#allocation2 + $0x109] sm:$0xff]  ;;  %v14192_v59 = vld [vmem:[#allocation2 + $0x141] sm:$0xff] }
 0x3ba   : > { %20061 = vmatprep.mubr.msk.f32.mxu0 %vm25844_vm9, %v14175_v61  ;;  %vm25855_vm7 = vmmov %vm25676_vm0  ;;  %v7116_v61 = vld [vmem:[#allocation2 + $0x2ef] sm:$0xff] }
 0x3bb   : > { %vm25856_vm9 = vmmov %vm25676_vm0 }
 0x3bc   : > { %19188 = vmatmul.mubr.msk.f32.gmra.mrb[78].mxu1 %vm25846_vm4, %v7106_v0  ;;  %vm25858_vm4 = vmmov %vm25676_vm0  ;;  %v14187_v0 = vld [vmem:[#allocation2 + $0x119] sm:$0xff] }
 0x3bd   : > { %20062 = vmatmul.mubr.msk.f32.gmra.mrb[14].mxu0 %vm25847_vm1, %v14304_v36  ;;  %19190 = vmatprep.mubr.msk.f32.mxu1 %vm25848_vm6, %v7235_v13  ;;  %vm25859_vm10 = vmmov %vm25676_vm0  ;;  %v14188_v36 = vld [vmem:[#allocation2 + $0x121] sm:$0xff] }
 0x3be   : > { %20064 = vmatprep.mubr.msk.f32.mxu0 %vm25676_vm0, %v14177_v24  ;;  %vm25860_vm1 = vmmov %vm25676_vm0  ;;  %v7119_v13 = vld [vmem:[#allocation2 + $0x307] sm:$0xff]  ;;  %v14316_v21 = vsel %vm25409_vm5, %v14188_v36, 0.0 }
 0x3bf   : > { %vm25861_vm6 = vmmov %vm25676_vm0  ;;  %vm25862_vm0 = vnez %v25215_v8  ;;  %v7118_v8 = vld [vmem:[#allocation2 + $0x2ff] sm:$0xff]  ;;  %v14201_v36 = vld [vmem:[#allocation2 + $0x189] sm:$0xff] }
 0x3c0   : > { %19191 = vmatmul.mubr.msk.f32.gmra.mrb[80].mxu1 %vm25849_vm8, %v7108_v47  ;;  %v7243_v19 = vsel %vm25862_vm0, %v7115_v10, 0.0  ;;  %vm25863_vm8 = vmmov %vm25860_vm1  ;;  %v14189_v47 = vld [vmem:[#allocation2 + $0x129] sm:$0xff] }
 0x3c1   : > { %20065 = vmatmul.mubr.msk.f32.gmra.mrb[16].mxu0 %vm25850_vm12, %v14178_v11  ;;  %19193 = vmatprep.mubr.msk.f32.mxu1 %vm25851_vm14, %v7109_v54  ;;  %vm25864_vm12 = vmmov %vm25860_vm1  ;;  %v7120_v11 = vld [vmem:[#allocation2 + $0x30f] sm:$0xff] }
 0x3c2   : > { %20067 = vmatprep.mubr.msk.f32.mxu0 %vm25852_vm13, %v14179_v1  ;;  %vm25865_vm14 = vmmov %vm25860_vm1  ;;  %v14190_v54 = vld [vmem:[#allocation2 + $0x131] sm:$0xff] }
 0x3c3   : > { %vm25866_vm13 = vmmov %vm25860_vm1  ;;  %v7121_v1 = vld [vmem:[#allocation2 + $0x317] sm:$0xff] }
 0x3c4   : > { %19194 = vmatmul.mubr.msk.f32.gmra.mrb[82].mxu1 %vm25854_vm2, %v7110_v23  ;;  %vm25867_vm15 = vmmov %vm25860_vm1  ;;  %v7123_v23 = vld [vmem:[#allocation2 + $0x327] sm:$0xff] }
 0x3c5   : > { %20068 = vmatmul.mubr.msk.f32.gmra.mrb[18].mxu0 %vm25855_vm7, %v14308_v12  ;;  %19196 = vmatprep.mubr.msk.f32.mxu1 %vm25856_vm9, %v7239_v60  ;;  %vm25868_vm11 = vmmov %vm25860_vm1  ;;  %vm25871_vm9 = vnez %v25223_v33  ;;  %v7122_v33 = vld [vmem:[#allocation2 + $0x31f] sm:$0xff]  ;;  %v14193_v60 = vld [vmem:[#allocation2 + $0x149] sm:$0xff] }
 0x3c6   : > { %20070 = vmatprep.mubr.msk.f32.mxu0 %vm25857_vm3, %v14181_v4  ;;  %vm25869_vm2 = vmmov %vm25860_vm1  ;;  %v7247_v24 = vsel %vm25871_vm9, %v7119_v13, 0.0  ;;  %v7124_v4 = vld [vmem:[#allocation2 + $0x32f] sm:$0xff] }
 0x3c7   : > { %vm25870_vm7 = vmmov %vm25860_vm1  ;;  %v7132_v13 = vld [vmem:[#allocation2 + $0x36f] sm:$0xff] }
 0x3c8   : > { %19197 = vmatmul.mubr.msk.f32.gmra.mrb[84].mxu1 %vm25858_vm4, %v7112_v41  ;;  %vm25872_vm3 = vmmov %vm25860_vm1  ;;  %v14194_v41 = vld [vmem:[#allocation2 + $0x151] sm:$0xff] }
 0x3c9   : > { %20071 = vmatmul.mubr.msk.f32.gmra.mrb[20].mxu0 %vm25859_vm10, %v14182_v43  ;;  %19199 = vmatprep.mubr.msk.f32.mxu1 %vm25860_vm1, %v7113_v15  ;;  %vm25873_vm4 = vmmov %vm25860_vm1  ;;  %v7125_v43 = vld [vmem:[#allocation2 + $0x337] sm:$0xff] }
 0x3ca   : > { %20073 = vmatprep.mubr.msk.f32.mxu0 %vm25861_vm6, %v14183_v44  ;;  %vm25874_vm10 = vmmov %vm25860_vm1  ;;  %v14195_v15 = vld [vmem:[#allocation2 + $0x159] sm:$0xff]  ;;  %v14196_v44 = vld [vmem:[#allocation2 + $0x161] sm:$0xff] }
 0x3cb   : > { %vm25875_vm6 = vmmov %vm25860_vm1 }
 0x3cc   : > { %19200 = vmatmul.mubr.msk.f32.gmra.mrb[86].mxu1 %vm25863_vm8, %v7114_v46  ;;  %vm25876_vm5 = vmmov %vm25860_vm1  ;;  %v14197_v46 = vld [vmem:[#allocation2 + $0x169] sm:$0xff] }
 0x3cd   : > { %20074 = vmatmul.mubr.msk.f32.gmra.mrb[22].mxu0 %vm25864_vm12, %v14312_v7  ;;  %19202 = vmatprep.mubr.msk.f32.mxu1 %vm25865_vm14, %v7243_v19  ;;  %vm25877_vm0 = vmmov %vm25860_vm1  ;;  %vm25879_vm12 = vnez %v25419_v32  ;;  %vm25880_vm14 = vnez %v25422_v51  ;;  %v7126_v32 = vld [vmem:[#allocation2 + $0x33f] sm:$0xff]  ;;  %v7128_v7 = vld [vmem:[#allocation2 + $0x34f] sm:$0xff] }
 0x3ce   : > { %20076 = vmatprep.mubr.msk.f32.mxu0 %vm25866_vm13, %v14185_v53  ;;  %vm25878_vm8 = vmmov %vm25877_vm0  ;;  %v14320_v31 = vsel %vm25879_vm12, %v14192_v59, 0.0  ;;  %v7251_v12 = vsel %vm25880_vm14, %v7123_v23, 0.0  ;;  %v14198_v19 = vld [vmem:[#allocation2 + $0x171] sm:$0xff] }
 0x3cf   : > { %vm25881_vm13 = vmmov %vm25877_vm0  ;;  %v7129_v53 = vld [vmem:[#allocation2 + $0x357] sm:$0xff]  ;;  %v7136_v23 = vld [vmem:[#allocation2 + $0x38f] sm:$0xff] }
 0x3d0   : > { %19203 = vmatmul.mubr.msk.f32.gmra.mrb[88].mxu1 %vm25867_vm15, %v7116_v61  ;;  %vm25882_vm15 = vmmov %vm25877_vm0  ;;  %v14199_v61 = vld [vmem:[#allocation2 + $0x179] sm:$0xff] }
 0x3d1   : > { %20077 = vmatmul.mubr.msk.f32.gmra.mrb[24].mxu0 %vm25868_vm11, %v14186_v16  ;;  %19205 = vmatprep.mubr.msk.f32.mxu1 %vm25869_vm2, %v7117_v39  ;;  %vm25883_vm11 = vmmov %vm25877_vm0  ;;  %v14200_v16 = vld [vmem:[#allocation2 + $0x181] sm:$0xff] }
 0x3d2   : > { %20079 = vmatprep.mubr.msk.f32.mxu0 %vm25870_vm7, %v14187_v0  ;;  %vm25884_vm2 = vmmov %vm25877_vm0  ;;  %v7131_v39 = vld [vmem:[#allocation2 + $0x367] sm:$0xff] }
 0x3d3   : > { %vm25885_vm7 = vmmov %vm25877_vm0 }
 0x3d4   : > { %19206 = vmatmul.mubr.msk.f32.gmra.mrb[90].mxu1 %vm25872_vm3, %v7118_v8  ;;  %vm25886_vm9 = vmmov %vm25877_vm0  ;;  %v14202_v8 = vld [vmem:[#allocation2 + $0x191] sm:$0xff] }
 0x3d5   : > { %20080 = vmatmul.mubr.msk.f32.gmra.mrb[26].mxu0 %vm25873_vm4, %v14316_v21  ;;  %19208 = vmatprep.mubr.msk.f32.mxu1 %vm25874_vm10, %v7247_v24  ;;  %vm25887_vm3 = vmmov %vm25877_vm0  ;;  %vm25889_vm10 = vnez %v25434_v45  ;;  %v7130_v45 = vld [vmem:[#allocation2 + $0x35f] sm:$0xff]  ;;  %v7133_v21 = vld [vmem:[#allocation2 + $0x377] sm:$0xff] }
 0x3d6   : > { %20082 = vmatprep.mubr.msk.f32.mxu0 %vm25860_vm1, %v14189_v47  ;;  %vm25888_vm4 = vmmov %vm25877_vm0  ;;  %v14324_v51 = vsel %vm25889_vm10, %v14196_v44, 0.0  ;;  %vm25890_vm1 = vnez %v25437_v22  ;;  %v14203_v24 = vld [vmem:[#allocation2 + $0x199] sm:$0xff]  ;;  %v14204_v47 = vld [vmem:[#allocation2 + $0x1a1] sm:$0xff] }
 0x3d7   : > { %v7255_v10 = vsel %vm25890_vm1, %v7127_v37, 0.0  ;;  %vm25894_vm12 = vmmov %vm25877_vm0  ;;  %v14209_v44 = vld [vmem:[#allocation2 + $0x1c9] sm:$0xff] }
 0x3d8   : > { %19209 = vmatmul.mubr.msk.f32.gmra.mrb[92].mxu1 %vm25875_vm6, %v7120_v11  ;;  %vm25891_vm6 = vmmov %vm25877_vm0  ;;  %v7135_v11 = vld [vmem:[#allocation2 + $0x387] sm:$0xff] }
 0x3d9   : > { %20083 = vmatmul.mubr.msk.f32.gmra.mrb[28].mxu0 %vm25876_vm5, %v14190_v54  ;;  %19211 = vmatprep.mubr.msk.f32.mxu1 %vm25877_vm0, %v7121_v1  ;;  %vm25892_vm5 = vmmov %vm25877_vm0  ;;  %v14205_v1 = vld [vmem:[#allocation2 + $0x1a9] sm:$0xff] }
 0x3da   : > { %20085 = vmatprep.mubr.msk.f32.mxu0 %vm25878_vm8, %v14191_v25  ;;  %vm25893_vm8 = vmmov %vm25877_vm0 }
 0x3db   : > { %vm25895_vm14 = vmmov %vm25877_vm0 }
 0x3dc   : > { %19212 = vmatmul.mubr.msk.f32.gmra.mrb[94].mxu1 %vm25881_vm13, %v7122_v33  ;;  %vm25896_vm13 = vmmov %vm25877_vm0  ;;  %v14206_v33 = vld [vmem:[#allocation2 + $0x1b1] sm:$0xff] }
 0x3dd   : > { %20086 = vmatmul.mubr.msk.f32.gmra.mrb[30].mxu0 %vm25882_vm15, %v14320_v31  ;;  %19214 = vmatprep.mubr.msk.f32.mxu1 %vm25883_vm11, %v7251_v12  ;;  %vm25897_vm15 = vmmov %vm25877_vm0  ;;  %vm25898_vm11 = vnez %v25449_v5  ;;  %v7134_v5 = vld [vmem:[#allocation2 + $0x37f] sm:$0xff] }
 0x3de   : > { %20088 = vmatprep.mubr.msk.f32.mxu0 %vm25884_vm2, %v14193_v60  ;;  %v14328_v22 = vsel %vm25898_vm11, %v14200_v16, 0.0  ;;  %vm25899_vm2 = vnez %v25451_v56  ;;  %vm25904_vm10 = vmmov %vm25877_vm0  ;;  %v14207_v31 = vld [vmem:[#allocation2 + $0x1b9] sm:$0xff]  ;;  %v14208_v12 = vld [vmem:[#allocation2 + $0x1c1] sm:$0xff] }
 0x3df   : > { %v7259_v0 = vsel %vm25899_vm2, %v7131_v39, 0.0  ;;  %vm25905_vm1 = vmmov %vm25877_vm0  ;;  %v7139_v60 = vld [vmem:[#allocation2 + $0x3a7] sm:$0xff] }
 0x3e0   : > { %19215 = vmatmul.mubr.msk.f32.gmra.mrb[96].mxu1 %vm25885_vm7, %v7124_v4  ;;  %vm25900_vm7 = vmmov %vm25877_vm0 }
 0x3e1   : > { %20089 = vmatmul.mubr.msk.f32.gmra.mrb[32].mxu0 %vm25886_vm9, %v14194_v41  ;;  %19217 = vmatprep.mubr.msk.f32.mxu1 %vm25887_vm3, %v7125_v43  ;;  %vm25901_vm9 = vmmov %vm25877_vm0  ;;  %v7138_v41 = vld [vmem:[#allocation2 + $0x39f] sm:$0xff] }
 0x3e2   : > { %20091 = vmatprep.mubr.msk.f32.mxu0 %vm25888_vm4, %v14195_v15  ;;  %vm25902_vm3 = vmmov %vm25877_vm0 }
 0x3e3   : > { %vm25903_vm4 = vmmov %vm25877_vm0 }
 0x3e4   : > { %19218 = vmatmul.mubr.msk.f32.gmra.mrb[98].mxu1 %vm25891_vm6, %v7126_v32  ;;  %vm25906_vm6 = vmmov %vm25877_vm0 }
 0x3e5   : > { %20092 = vmatmul.mubr.msk.f32.gmra.mrb[34].mxu0 %vm25892_vm5, %v14324_v51  ;;  %19220 = vmatprep.mubr.msk.f32.mxu1 %vm25877_vm0, %v7255_v10  ;;  %vm25907_vm5 = vmmov %vm25877_vm0  ;;  %vm25908_vm0 = vnez %v25461_v63  ;;  %v7137_v63 = vld [vmem:[#allocation2 + $0x397] sm:$0xff]  ;;  %v7140_v51 = vld [vmem:[#allocation2 + $0x3af] sm:$0xff] }
 0x3e6   : > { %20094 = vmatprep.mubr.msk.f32.mxu0 %vm25893_vm8, %v14197_v46  ;;  %v14332_v56 = vsel %vm25908_vm0, %v14204_v47, 0.0  ;;  %vm25909_vm8 = vnez %v25463_v9  ;;  %vm25914_vm11 = vmmov %vm25905_vm1  ;;  %v14210_v10 = vld [vmem:[#allocation2 + $0x1d1] sm:$0xff]  ;;  %v14211_v46 = vld [vmem:[#allocation2 + $0x1d9] sm:$0xff] }
 0x3e7   : > { %v7263_v54 = vsel %vm25909_vm8, %v7135_v11, 0.0  ;;  %vm25915_vm2 = vmmov %vm25905_vm1  ;;  %v7146_v11 = vld [vmem:[#allocation2 + $0x3df] sm:$0xff] }
 0x3e8   : > { %19221 = vmatmul.mubr.msk.f32.gmra.mrb[100].mxu1 %vm25894_vm12, %v7128_v7  ;;  %vm25910_vm12 = vmmov %vm25905_vm1  ;;  %v14212_v7 = vld [vmem:[#allocation2 + $0x1e1] sm:$0xff] }
 0x3e9   : > { %20095 = vmatmul.mubr.msk.f32.gmra.mrb[36].mxu0 %vm25895_vm14, %v14198_v19  ;;  %19223 = vmatprep.mubr.msk.f32.mxu1 %vm25896_vm13, %v7129_v53  ;;  %vm25911_vm14 = vmmov %vm25905_vm1  ;;  %v7143_v19 = vld [vmem:[#allocation2 + $0x3c7] sm:$0xff] }
 0x3ea   : > { %20097 = vmatprep.mubr.msk.f32.mxu0 %vm25897_vm15, %v14199_v61  ;;  %vm25912_vm13 = vmmov %vm25905_vm1  ;;  %v7142_v61 = vld [vmem:[#allocation2 + $0x3bf] sm:$0xff] }
 0x3eb   : > { %vm25913_vm15 = vmmov %vm25905_vm1 }
 0x3ec   : > { %19224 = vmatmul.mubr.msk.f32.gmra.mrb[102].mxu1 %vm25900_vm7, %v7130_v45  ;;  %vm25916_vm7 = vmmov %vm25905_vm1  ;;  %v14213_v45 = vld [vmem:[#allocation2 + $0x1e9] sm:$0xff] }
 0x3ed   : > { %20098 = vmatmul.mubr.msk.f32.gmra.mrb[38].mxu0 %vm25901_vm9, %v14328_v22  ;;  %19226 = vmatprep.mubr.msk.f32.mxu1 %vm25902_vm3, %v7259_v0  ;;  %vm25917_vm9 = vmmov %vm25905_vm1  ;;  %vm25918_vm3 = vnez %v25472_v55  ;;  %v7141_v55 = vld [vmem:[#allocation2 + $0x3b7] sm:$0xff] }
 0x3ee   : > { %20100 = vmatprep.mubr.msk.f32.mxu0 %vm25903_vm4, %v14201_v36  ;;  %v14336_v43 = vsel %vm25918_vm3, %v14208_v12, 0.0  ;;  %vm25919_vm4 = vnez %v25474_v35  ;;  %vm25923_vm0 = vmmov %vm25905_vm1  ;;  %v7144_v36 = vld [vmem:[#allocation2 + $0x3cf] sm:$0xff]  ;;  %v14220_v12 = vld [vmem:[#allocation2 + $0x221] sm:$0xff] }
 0x3ef   : > { %v7267_v15 = vsel %vm25919_vm4, %v7139_v60, 0.0  ;;  %vm25924_vm8 = vmmov %vm25923_vm0  ;;  %v7151_v60 = vld [vmem:[#allocation2 + $0x407] sm:$0xff] }
 0x3f0   : > { %19227 = vmatmul.mubr.msk.f32.gmra.mrb[104].mxu1 %vm25904_vm10, %v7132_v13  ;;  %vm25920_vm10 = vmmov %vm25905_vm1  ;;  %v14214_v13 = vld [vmem:[#allocation2 + $0x1f1] sm:$0xff] }
 0x3f1   : > { %20101 = vmatmul.mubr.msk.f32.gmra.mrb[40].mxu0 %vm25905_vm1, %v14202_v8  ;;  %19229 = vmatprep.mubr.msk.f32.mxu1 %vm25906_vm6, %v7133_v21  ;;  %vm25921_vm6 = vmmov %vm25905_vm1  ;;  %v14215_v8 = vld [vmem:[#allocation2 + $0x1f9] sm:$0xff]  ;;  %v14216_v21 = vld [vmem:[#allocation2 + $0x201] sm:$0xff] }
 0x3f2   : > { %20103 = vmatprep.mubr.msk.f32.mxu0 %vm25907_vm5, %v14203_v24  ;;  %vm25922_vm5 = vmmov %vm25905_vm1  ;;  %v7147_v24 = vld [vmem:[#allocation2 + $0x3e7] sm:$0xff] }
 0x3f3   : > { %v23847_v25 = vpop.f32.mrb[0].mxu1  ;;  %vm25933_vm3 = vmmov %vm25923_vm0 }
 0x3f4   : > { %v23849_v59 = vpop.f32.mrb[1].mxu1  ;;  %19230 = vmatmul.mubr.msk.f32.gmra.mrb[106].mxu1 %vm25910_vm12, %v7134_v5  ;;  %vm25925_vm12 = vmmov %vm25923_vm0 }
 0x3f5   : > { %20104 = vmatmul.mubr.msk.f32.gmra.mrb[42].mxu0 %vm25911_vm14, %v14332_v56  ;;  %19232 = vmatprep.mubr.msk.f32.mxu1 %vm25912_vm13, %v7263_v54  ;;  %vm25926_vm14 = vmmov %vm25923_vm0  ;;  %vm25927_vm13 = vnez %v25483_v34  ;;  %v7145_v34 = vld [vmem:[#allocation2 + $0x3d7] sm:$0xff]  ;;  %v14217_v54 = vld [vmem:[#allocation2 + $0x209] sm:$0xff] }
 0x3f6   : > { %20106 = vmatprep.mubr.msk.f32.mxu0 %vm25913_vm15, %v14205_v1  ;;  %v14340_v16 = vsel %vm25927_vm13, %v14212_v7, 0.0  ;;  %vm25928_vm15 = vnez %v25485_v52  ;;  %vm25934_vm4 = vmmov %vm25923_vm0  ;;  %v14222_v7 = vld [vmem:[#allocation2 + $0x231] sm:$0xff] }
 0x3f7   : > { %v23855_v9 = vpop.f32.mrb[2].mxu1  ;;  %v7271_v39 = vsel %vm25928_vm15, %v7143_v19, 0.0  ;;  %vm25942_vm13 = vmmov %vm25923_vm0  ;;  %v14223_v19 = vld [vmem:[#allocation2 + $0x239] sm:$0xff] }
 0x3f8   : > { %v23857_v4 = vpop.f32.mrb[3].mxu1  ;;  %19233 = vmatmul.mubr.msk.f32.gmra.mrb[108].mxu1 %vm25914_vm11, %v7136_v23  ;;  %vm25929_vm11 = vmmov %vm25923_vm0 }
 0x3f9   : > { %20107 = vmatmul.mubr.msk.f32.gmra.mrb[44].mxu0 %vm25915_vm2, %v14206_v33  ;;  %19235 = vmatprep.mubr.msk.f32.mxu1 %vm25916_vm7, %v7137_v63  ;;  %vm25930_vm2 = vmmov %vm25923_vm0  ;;  %v7148_v33 = vld [vmem:[#allocation2 + $0x3ef] sm:$0xff] }
 0x3fa   : > { %20109 = vmatprep.mubr.msk.f32.mxu0 %vm25917_vm9, %v14207_v31  ;;  %vm25931_vm7 = vmmov %vm25923_vm0  ;;  %v14218_v63 = vld [vmem:[#allocation2 + $0x211] sm:$0xff]  ;;  %v14219_v31 = vld [vmem:[#allocation2 + $0x219] sm:$0xff] }
 0x3fb   : > { %v23867_v37 = vpop.f32.mrb[4].mxu1  ;;  %vm25932_vm9 = vmmov %vm25923_vm0 }
 0x3fc   : > { %v23869_v32 = vpop.f32.mrb[5].mxu1  ;;  %19236 = vmatmul.mubr.msk.f32.gmra.mrb[110].mxu1 %vm25920_vm10, %v7138_v41  ;;  %vm25935_vm10 = vmmov %vm25923_vm0 }
 0x3fd   : > { %20110 = vmatmul.mubr.msk.f32.gmra.mrb[46].mxu0 %vm25905_vm1, %v14336_v43  ;;  %19238 = vmatprep.mubr.msk.f32.mxu1 %vm25921_vm6, %v7267_v15  ;;  %vm25936_vm1 = vmmov %vm25923_vm0  ;;  %vm25937_vm6 = vnez %v25494_v27  ;;  %v7149_v27 = vld [vmem:[#allocation2 + $0x3f7] sm:$0xff]  ;;  %v7150_v43 = vld [vmem:[#allocation2 + $0x3ff] sm:$0xff] }
 0x3fe   : > { %20112 = vmatprep.mubr.msk.f32.mxu0 %vm25922_vm5, %v14209_v44  ;;  %v14344_v5 = vsel %vm25937_vm6, %v14216_v21, 0.0  ;;  %vm25938_vm5 = vnez %v25496_v50  ;;  %vm25943_vm15 = vmmov %vm25923_vm0  ;;  %v8570_v21 = vld [vmem:[#allocation2 + $0x230] sm:$0xff] }
 0x3ff   : > { %v23875_v35 = vpop.f32.mrb[6].mxu1  ;;  %v7275_v56 = vsel %vm25938_vm5, %v7147_v24, 0.0  ;;  %vm25952_vm6 = vmmov %vm25923_vm0  ;;  %v14226_v24 = vld [vmem:[#allocation2 + $0x251] sm:$0xff] }
 0x400   : > { %v23877_v53 = vpop.f32.mrb[7].mxu1  ;;  %19239 = vmatmul.mubr.msk.f32.gmra.mrb[112].mxu1 %vm25923_vm0, %v7140_v51  ;;  %v14221_v51 = vld [vmem:[#allocation2 + $0x229] sm:$0xff]  ;;  %vm25953_vm5 = vmmov %vm25923_vm0 }
 0x401   : > { %20113 = vmatmul.mubr.msk.f32.gmra.mrb[48].mxu0 %vm25924_vm8, %v14210_v10  ;;  %19241 = vmatprep.mubr.msk.f32.mxu1 %vm25925_vm12, %v7141_v55  ;;  %vm25939_vm8 = vmmov %vm25923_vm0 }
 0x402   : > { %20115 = vmatprep.mubr.msk.f32.mxu0 %vm25926_vm14, %v14211_v46  ;;  %vm25940_vm12 = vmmov %vm25923_vm0  ;;  %v7152_v46 = vld [vmem:[#allocation2 + $0x40f] sm:$0xff] }
 0x403   : > { %v23887_v22 = vpop.f32.mrb[8].mxu1  ;;  %vm25941_vm14 = vmmov %vm25923_vm0 }
 0x404   : > { %v23889_v0 = vpop.f32.mrb[9].mxu1  ;;  %19242 = vmatmul.mubr.msk.f32.gmra.mrb[114].mxu1 %vm25929_vm11, %v7142_v61  ;;  %vm25944_vm11 = vmmov %vm25923_vm0  ;;  %v14224_v61 = vld [vmem:[#allocation2 + $0x241] sm:$0xff] }
 0x405   : > { %20116 = vmatmul.mubr.msk.f32.gmra.mrb[50].mxu0 %vm25930_vm2, %v14340_v16  ;;  %19244 = vmatprep.mubr.msk.f32.mxu1 %vm25931_vm7, %v7271_v39  ;;  %vm25945_vm2 = vmmov %vm25923_vm0  ;;  %vm25946_vm7 = vnez %v25506_v18  ;;  %v7153_v18 = vld [vmem:[#allocation2 + $0x417] sm:$0xff]  ;;  %v7154_v39 = vld [vmem:[#allocation2 + $0x41f] sm:$0xff] }
 0x406   : > { %20118 = vmatprep.mubr.msk.f32.mxu0 %vm25932_vm9, %v14213_v45  ;;  %v14348_v15 = vsel %vm25946_vm7, %v14220_v12, 0.0  ;;  %vm25947_vm9 = vnez %v25330_v6  ;;  %vm25961_vm7 = vmmov %vm25923_vm0 }
 0x407   : > { %v23895_v52 = vpop.f32.mrb[10].mxu1  ;;  %v7279_v44 = vsel %vm25947_vm9, %v7151_v60, 0.0  ;;  %vm25962_vm9 = vmmov %vm25923_vm0 }
 0x408   : > { %v23897_v47 = vpop.f32.mrb[11].mxu1  ;;  %19245 = vmatmul.mubr.msk.f32.gmra.mrb[116].mxu1 %vm25933_vm3, %v7144_v36  ;;  %vm25948_vm3 = vmmov %vm25923_vm0  ;;  %v8569_v36 = vld [vmem:[#allocation2 + $0x228] sm:$0xff] }
 0x409   : > { %20119 = vmatmul.mubr.msk.f32.gmra.mrb[52].mxu0 %vm25934_vm4, %v14214_v13  ;;  %19247 = vmatprep.mubr.msk.f32.mxu1 %vm25935_vm10, %v7145_v34  ;;  %vm25949_vm4 = vmmov %vm25923_vm0  ;;  %v14225_v13 = vld [vmem:[#allocation2 + $0x249] sm:$0xff] }
 0x40a   : > { %20121 = vmatprep.mubr.msk.f32.mxu0 %vm25936_vm1, %v14215_v8  ;;  %vm25950_vm10 = vmmov %vm25923_vm0 }
 0x40b   : > { %v23907_v1 = vpop.f32.mrb[12].mxu1  ;;  %vm25951_vm1 = vmmov %vm25923_vm0 }
 0x40c   : > { %v23909_v23 = vpop.f32.mrb[13].mxu1  ;;  %19248 = vmatmul.mubr.msk.f32.gmra.mrb[118].mxu1 %vm25923_vm0, %v7146_v11  ;;  %v8571_v11 = vld [vmem:[#allocation2 + $0x238] sm:$0xff] }
 0x40d   : > { %20122 = vmatmul.mubr.msk.f32.gmra.mrb[54].mxu0 %vm25939_vm8, %v14344_v5  ;;  %19250 = vmatprep.mubr.msk.f32.mxu1 %vm25940_vm12, %v7275_v56  ;;  %vm25954_vm8 = vmmov %vm25923_vm0  ;;  %vm25955_vm12 = vnez %v25515_v57  ;;  %v14227_v5 = vld [vmem:[#allocation2 + $0x259] sm:$0xff]  ;;  %v14228_v57 = vld [vmem:[#allocation2 + $0x261] sm:$0xff] }
 0x40e   : > { %20124 = vmatprep.mubr.msk.f32.mxu0 %vm25941_vm14, %v14217_v54  ;;  %v14352_v45 = vsel %vm25955_vm12, %v14224_v61, 0.0  ;;  %vm25956_vm14 = vmmov %vm25923_vm0  ;;  %v8577_v61 = vld [vmem:[#allocation2 + $0x268] sm:$0xff] }
 0x40f   : > { %v23915_v50 = vpop.f32.mrb[14].mxu1  ;;  %vm25970_vm12 = vmmov %vm25923_vm0 }
 0x410   : > { %v23917_v41 = vpop.f32.mrb[15].mxu1  ;;  %19251 = vmatmul.mubr.msk.f32.gmra.mrb[120].mxu1 %vm25942_vm13, %v7148_v33  ;;  %vm25957_vm13 = vmmov %vm25923_vm0  ;;  %v8572_v33 = vld [vmem:[#allocation2 + $0x240] sm:$0xff] }
 0x411   : > { %20125 = vmatmul.mubr.msk.f32.gmra.mrb[56].mxu0 %vm25943_vm15, %v14218_v63  ;;  %19253 = vmatprep.mubr.msk.f32.mxu1 %vm25944_vm11, %v7149_v27  ;;  %vm25958_vm15 = vmmov %vm25923_vm0  ;;  %v8573_v27 = vld [vmem:[#allocation2 + $0x248] sm:$0xff] }
 0x412   : > { %20127 = vmatprep.mubr.msk.f32.mxu0 %vm25945_vm2, %v14219_v31  ;;  %vm25959_vm11 = vmmov %vm25923_vm0  ;;  %v14229_v31 = vld [vmem:[#allocation2 + $0x269] sm:$0xff] }
 0x413   : > { %v23927_v10 = vpop.f32.mrb[16].mxu1  ;;  %vm25960_vm2 = vmmov %vm25923_vm0 }
 0x414   : > { %v23929_v55 = vpop.f32.mrb[17].mxu1  ;;  %19254 = vmatmul.mubr.msk.f32.gmra.mrb[122].mxu1 %vm25948_vm3, %v7150_v43  ;;  %vm25963_vm3 = vmmov %vm25923_vm0  ;;  %v8574_v43 = vld [vmem:[#allocation2 + $0x250] sm:$0xff] }
 0x415   : > { %20128 = vmatmul.mubr.msk.f32.gmra.mrb[58].mxu0 %vm25949_vm4, %v14348_v15  ;;  %19256 = vmatprep.mubr.msk.f32.mxu1 %vm25950_vm10, %v7279_v44  ;;  %vm25964_vm4 = vnez %v25524_v17  ;;  %vm25965_vm10 = vmmov %vm25923_vm0  ;;  %v14230_v15 = vld [vmem:[#allocation2 + $0x271] sm:$0xff]  ;;  %v14232_v17 = vld [vmem:[#allocation2 + $0x281] sm:$0xff] }
 0x416   : > { %20130 = vmatprep.mubr.msk.f32.mxu0 %vm25951_vm1, %v14221_v51  ;;  %v14356_v63 = vsel %vm25964_vm4, %v14228_v57, 0.0  ;;  %vm25966_vm1 = vmmov %vm25923_vm0  ;;  %v8575_v44 = vld [vmem:[#allocation2 + $0x258] sm:$0xff] }
 0x417   : > { %v23935_v6 = vpop.f32.mrb[18].mxu1  ;;  %v14231_v51 = vld [vmem:[#allocation2 + $0x279] sm:$0xff]  ;;  %vm25979_vm4 = vmmov %vm25923_vm0 }
 0x418   : > { %v23937_v16 = vpop.f32.mrb[19].mxu1  ;;  %19257 = vmatmul.mubr.msk.f32.gmra.mrb[124].mxu1 %vm25952_vm6, %v7152_v46  ;;  %vm25967_vm6 = vmmov %vm25923_vm0 }
 0x419   : > { %20131 = vmatmul.mubr.msk.f32.gmra.mrb[60].mxu0 %vm25953_vm5, %v14222_v7  ;;  %19259 = vmatprep.mubr.msk.f32.mxu1 %vm25923_vm0, %v7153_v18  ;;  %vm25968_vm5 = vmmov %vm25923_vm0  ;;  %v8576_v18 = vld [vmem:[#allocation2 + $0x260] sm:$0xff] }
 0x41a   : > { %20133 = vmatprep.mubr.msk.f32.mxu0 %vm25954_vm8, %v14223_v19  ;;  %vm25969_vm8 = vmmov %vm25923_vm0 }
 0x41b   : > { %v23945_v34 = vpop.f32.mrb[20].mxu1 }
 0x41c   : > { %v23947_v8 = vpop.f32.mrb[21].mxu1  ;;  %19260 = vmatmul.mubr.msk.f32.gmra.mrb[126].mxu1 %vm25956_vm14, %v7154_v39  ;;  %vm25971_vm14 = vmmov %vm25923_vm0  ;;  %v14233_v39 = vld [vmem:[#allocation2 + $0x289] sm:$0xff] }
 0x41d   : > { %20134 = vmatmul.mubr.msk.f32.gmra.mrb[62].mxu0 %vm25957_vm13, %v14352_v45  ;;  %19360 = vmatprep.mubr.msk.f32.mxu1 %vm25958_vm15, %v8569_v36  ;;  %vm25972_vm13 = vnez %v25534_v62  ;;  %vm25973_vm15 = vmmov %vm25923_vm0  ;;  %v14236_v62 = vld [vmem:[#allocation2 + $0x2a1] sm:$0xff] }
 0x41e   : > { %20136 = vmatprep.mubr.msk.f32.mxu0 %vm25959_vm11, %v14225_v13  ;;  %v14360_v19 = vsel %vm25972_vm13, %v14232_v17, 0.0  ;;  %vm25974_vm11 = vmmov %vm25923_vm0  ;;  %v8578_v13 = vld [vmem:[#allocation2 + $0x270] sm:$0xff]  ;;  %v8583_v17 = vld [vmem:[#allocation2 + $0x298] sm:$0xff] }
 0x41f   : > { %v23953_v56 = vpop.f32.mrb[22].mxu1  ;;  %vm25987_vm13 = vmmov %vm25923_vm0 }
 0x420   : > { %v23955_v54 = vpop.f32.mrb[23].mxu1  ;;  %19361 = vmatmul.mubr.msk.f32.vlgmr.msra.gmra.mrb[64].mxu1 %vm25960_vm2, %v8570_v21  ;;  %vm25975_vm2 = vmmov %vm25923_vm0  ;;  %v14234_v21 = vld [vmem:[#allocation2 + $0x291] sm:$0xff] }
 0x421   : > { %20137 = vmatmul.mubr.msk.f32.gmra.mrb[64].mxu0 %vm25961_vm7, %v14226_v24  ;;  %19363 = vmatprep.mubr.msk.f32.mxu1 %vm25962_vm9, %v8571_v11  ;;  %vm25976_vm7 = vmmov %vm25923_vm0  ;;  %v8579_v24 = vld [vmem:[#allocation2 + $0x278] sm:$0xff] }
 0x422   : > { %20139 = vmatprep.mubr.msk.f32.mxu0 %vm25963_vm3, %v14227_v5  ;;  %v14235_v11 = vld [vmem:[#allocation2 + $0x299] sm:$0xff]  ;;  %vm25977_vm9 = vmmov %vm25923_vm0 }
 0x423   : > { %v23963_v12 = vpop.f32.mrb[24].mxu1  ;;  %vm25978_vm3 = vmmov %vm25923_vm0 }
 0x424   : > { %v23965_v60 = vpop.f32.mrb[25].mxu1  ;;  %19364 = vmatmul.mubr.msk.f32.gmra.mrb[66].mxu1 %vm25965_vm10, %v8572_v33  ;;  %vm25980_vm10 = vmmov %vm25923_vm0  ;;  %v8580_v33 = vld [vmem:[#allocation2 + $0x280] sm:$0xff] }
 0x425   : > { %20140 = vmatmul.mubr.msk.f32.gmra.mrb[66].mxu0 %vm25966_vm1, %v14356_v63  ;;  %19366 = vmatprep.mubr.msk.f32.mxu1 %vm25967_vm6, %v8573_v27  ;;  %vm25981_vm1 = vnez %v25543_v38  ;;  %v8581_v27 = vld [vmem:[#allocation2 + $0x288] sm:$0xff]  ;;  %vm25982_vm6 = vmmov %vm25923_vm0 }
 0x426   : > { %20142 = vmatprep.mubr.msk.f32.mxu0 %vm25968_vm5, %v14229_v31  ;;  %v14364_v63 = vsel %vm25981_vm1, %v14236_v62, 0.0  ;;  %v14237_v31 = vld [vmem:[#allocation2 + $0x2a9] sm:$0xff]  ;;  %vm25983_vm5 = vmmov %vm25923_vm0  ;;  %v14240_v38 = vld [vmem:[#allocation2 + $0x2c1] sm:$0xff] }
 0x427   : > { %v23971_v46 = vpop.f32.mrb[26].mxu1  ;;  %vm25996_vm1 = vmmov %vm25923_vm0 }
 0x428   : > { %v23973_v7 = vpop.f32.mrb[27].mxu1  ;;  %19367 = vmatmul.mubr.msk.f32.gmra.mrb[68].mxu1 %vm25923_vm0, %v8574_v43 }
 0x429   : > { %20143 = vmatmul.mubr.msk.f32.gmra.mrb[68].mxu0 %vm25969_vm8, %v14230_v15  ;;  %19369 = vmatprep.mubr.msk.f32.mxu1 %vm25970_vm12, %v8575_v44  ;;  %vm25984_vm8 = vmmov %vm25923_vm0  ;;  %v8582_v44 = vld [vmem:[#allocation2 + $0x290] sm:$0xff] }
 0x42a   : > { %20145 = vmatprep.mubr.msk.f32.mxu0 %vm25971_vm14, %v14231_v51  ;;  %v14238_v51 = vld [vmem:[#allocation2 + $0x2b1] sm:$0xff]  ;;  %vm25985_vm12 = vmmov %vm25923_vm0 }
 0x42b   : > { %v23981_v45 = vpop.f32.mrb[28].mxu1  ;;  %vm25986_vm14 = vmmov %vm25923_vm0 }
 0x42c   : > { %v23983_v36 = vpop.f32.mrb[29].mxu1  ;;  %19370 = vmatmul.mubr.msk.f32.gmra.mrb[70].mxu1 %vm25973_vm15, %v8576_v18  ;;  %v14239_v18 = vld [vmem:[#allocation2 + $0x2b9] sm:$0xff]  ;;  %vm25988_vm15 = vmmov %vm25923_vm0 }
 0x42d   : > { %20146 = vmatmul.mubr.msk.f32.gmra.mrb[70].mxu0 %vm25974_vm11, %v14360_v19  ;;  %19372 = vmatprep.mubr.msk.f32.mxu1 %vm25975_vm2, %v8577_v61  ;;  %vm25989_vm11 = vnez %v25553_v40  ;;  %vm25990_vm2 = vmmov %vm25923_vm0  ;;  %v14244_v40 = vld [vmem:[#allocation2 + $0x2e1] sm:$0xff] }
 0x42e   : > { %20148 = vmatprep.mubr.msk.f32.mxu0 %vm25976_vm7, %v14233_v39  ;;  %v8584_v39 = vld [vmem:[#allocation2 + $0x2a0] sm:$0xff]  ;;  %vm25991_vm7 = vmmov %vm25923_vm0 }
 0x42f   : > { %v23989_v5 = vpop.f32.mrb[30].mxu1 }
 0x430   : > { %v23991_v57 = vpop.f32.mrb[31].mxu1  ;;  %19373 = vmatmul.mubr.msk.f32.gmra.mrb[72].mxu1 %vm25977_vm9, %v8578_v13  ;;  %v14368_v13 = vsel %vm25989_vm11, %v14240_v38, 0.0  ;;  %vm25992_vm9 = vmmov %vm25923_vm0  ;;  %v8589_v38 = vld [vmem:[#allocation2 + $0x2c8] sm:$0xff] }
 0x431   : > { %20149 = vmatmul.mubr.msk.f32.gmra.mrb[72].mxu0 %vm25978_vm3, %v14234_v21  ;;  %19375 = vmatprep.mubr.msk.f32.mxu1 %vm25979_vm4, %v8579_v24  ;;  %v8585_v21 = vld [vmem:[#allocation2 + $0x2a8] sm:$0xff]  ;;  %vm25993_vm3 = vmmov %vm25923_vm0 }
 0x432   : > { %20151 = vmatprep.mubr.msk.f32.mxu0 %vm25980_vm10, %v14235_v11  ;;  %v14241_v24 = vld [vmem:[#allocation2 + $0x2c9] sm:$0xff]  ;;  %vm25994_vm4 = vmmov %vm25923_vm0 }
 0x433   : > { %v23999_v43 = vpop.f32.mrb[32].mxu1  ;;  %vm25995_vm10 = vmmov %vm25923_vm0 }
 0x434   : > { %v24001_v15 = vpop.f32.mrb[33].mxu1  ;;  %19376 = vmatmul.mubr.msk.f32.gmra.mrb[74].mxu1 %vm25982_vm6, %v8580_v33  ;;  %v8586_v33 = vld [vmem:[#allocation2 + $0x2b0] sm:$0xff]  ;;  %vm25997_vm6 = vmmov %vm25923_vm0 }
 0x435   : > { %20152 = vmatmul.mubr.msk.f32.gmra.mrb[74].mxu0 %vm25983_vm5, %v14364_v63  ;;  %19378 = vmatprep.mubr.msk.f32.mxu1 %vm25923_vm0, %v8581_v27  ;;  %v14242_v63 = vld [vmem:[#allocation2 + $0x2d1] sm:$0xff]  ;;  %vm25998_vm5 = vnez %v25562_v3  ;;  %v14248_v3 = vld [vmem:[#allocation2 + $0x301] sm:$0xff]  ;;  %vm26007_vm11 = vmmov %vm25923_vm0 }
 0x436   : > { %20154 = vmatprep.mubr.msk.f32.mxu0 %vm25984_vm8, %v14237_v31  ;;  %v8587_v27 = vld [vmem:[#allocation2 + $0x2b8] sm:$0xff]  ;;  %vm26001_vm8 = vmmov %vm25923_vm0 }
 0x437   : > { %v24007_v19 = vpop.f32.mrb[34].mxu1  ;;  %v14243_v31 = vld [vmem:[#allocation2 + $0x2d9] sm:$0xff] }
 0x438   : > { %v24009_v61 = vpop.f32.mrb[35].mxu1  ;;  %19379 = vmatmul.mubr.msk.f32.gmra.mrb[76].mxu1 %vm25985_vm12, %v8582_v44  ;;  %vm26002_vm12 = vmmov %vm25923_vm0 }
 0x439   : > { %20155 = vmatmul.mubr.msk.f32.gmra.mrb[76].mxu0 %vm25986_vm14, %v14238_v51  ;;  %19381 = vmatprep.mubr.msk.f32.mxu1 %vm25987_vm13, %v8583_v17  ;;  %v8588_v17 = vld [vmem:[#allocation2 + $0x2c0] sm:$0xff]  ;;  %vm26003_vm14 = vmmov %vm25923_vm0 }
 0x43a   : > { %20157 = vmatprep.mubr.msk.f32.mxu0 %vm25988_vm15, %v14239_v18  ;;  %v14372_v18 = vsel %vm25998_vm5, %v14244_v40, 0.0  ;;  %vm26005_vm13 = vmmov %vm25923_vm0 }
 0x43b   : > { %v24017_v11 = vpop.f32.mrb[36].mxu1  ;;  %vm26006_vm15 = vmmov %vm25923_vm0 }
 0x43c   : > { %v24019_v62 = vpop.f32.mrb[37].mxu1  ;;  %19382 = vmatmul.mubr.msk.f32.gmra.mrb[78].mxu1 %vm25990_vm2, %v8584_v39  ;;  %v14245_v39 = vld [vmem:[#allocation2 + $0x2e9] sm:$0xff]  ;;  %vm26008_vm2 = vmmov %vm25923_vm0 }
 0x43d   : > { %20158 = vmatmul.mubr.msk.f32.gmra.mrb[78].mxu0 %vm25991_vm7, %v14368_v13  ;;  %19384 = vmatprep.mubr.msk.f32.mxu1 %vm25992_vm9, %v8585_v21  ;;  %vm26009_vm7 = vnez %v25571_v26  ;;  %vm26012_vm9 = vmmov %vm25923_vm0  ;;  %v14252_v26 = vld [vmem:[#allocation2 + $0x321] sm:$0xff] }
 0x43e   : > { %20160 = vmatprep.mubr.msk.f32.mxu0 %vm25993_vm3, %v14241_v24  ;;  %v8590_v24 = vld [vmem:[#allocation2 + $0x2d0] sm:$0xff]  ;;  %vm26013_vm3 = vmmov %vm25923_vm0 }
 0x43f   : > { %v24025_v44 = vpop.f32.mrb[38].mxu1  ;;  %vm26019_vm5 = vmmov %vm25923_vm0 }
 0x440   : > { %v24027_v51 = vpop.f32.mrb[39].mxu1  ;;  %19385 = vmatmul.mubr.msk.f32.gmra.mrb[80].mxu1 %vm25994_vm4, %v8586_v33  ;;  %v14246_v33 = vld [vmem:[#allocation2 + $0x2f1] sm:$0xff]  ;;  %vm26014_vm4 = vmmov %vm25923_vm0 }
 0x441   : > { %20161 = vmatmul.mubr.msk.f32.gmra.mrb[80].mxu0 %vm25995_vm10, %v14242_v63  ;;  %19387 = vmatprep.mubr.msk.f32.mxu1 %vm25996_vm1, %v8587_v27  ;;  %v8591_v63 = vld [vmem:[#allocation2 + $0x2d8] sm:$0xff]  ;;  %vm26015_vm10 = vmmov %vm25923_vm0 }
 0x442   : > { %20163 = vmatprep.mubr.msk.f32.mxu0 %vm25997_vm6, %v14243_v31  ;;  %v14247_v27 = vld [vmem:[#allocation2 + $0x2f9] sm:$0xff]  ;;  %vm26017_vm1 = vmmov %vm25923_vm0 }
 0x443   : > { %v24035_v13 = vpop.f32.mrb[40].mxu1  ;;  %vm26018_vm6 = vmmov %vm25923_vm0 }
 0x444   : > { %25999 = vst [vmem:[#allocation60_spill] sm:$0xff] %v24035_v13  ;;  %v24037_v21 = vpop.f32.mrb[41].mxu1  ;;  %19388 = vmatmul.mubr.msk.f32.gmra.mrb[82].mxu1 %vm25923_vm0, %v8588_v17  ;;  %v8592_v17 = vld [vmem:[#allocation2 + $0x2e0] sm:$0xff] }
 0x445   : > { %26000 = vst [vmem:[#allocation63_spill] sm:$0xff] %v24037_v21  ;;  %20164 = vmatmul.mubr.msk.f32.gmra.mrb[82].mxu0 %vm26001_vm8, %v14372_v18  ;;  %19390 = vmatprep.mubr.msk.f32.mxu1 %vm26002_vm12, %v8589_v38  ;;  %v14376_v18 = vsel %vm26009_vm7, %v14248_v3, 0.0  ;;  %v8593_v38 = vld [vmem:[#allocation2 + $0x2e8] sm:$0xff]  ;;  %vm26020_vm8 = vnez %v25581_v42  ;;  %vm26023_vm12 = vmmov %vm25923_vm0 }
 0x446   : > { %20166 = vmatprep.mubr.msk.f32.mxu0 %vm26003_vm14, %v14245_v39  ;;  %v14249_v39 = vld [vmem:[#allocation2 + $0x309] sm:$0xff]  ;;  %vm26024_vm14 = vmmov %vm25923_vm0  ;;  %v14256_v42 = vld [vmem:[#allocation2 + $0x341] sm:$0xff] }
 0x447   : > { %v24043_v31 = vpop.f32.mrb[42].mxu1  ;;  %vm26030_vm7 = vmmov %vm25923_vm0 }
 0x448   : > { %v24045_v40 = vpop.f32.mrb[43].mxu1  ;;  %19391 = vmatmul.mubr.msk.f32.gmra.mrb[84].mxu1 %vm26005_vm13, %v8590_v24  ;;  %v8594_v24 = vld [vmem:[#allocation2 + $0x2f0] sm:$0xff]  ;;  %vm26025_vm13 = vmmov %vm25923_vm0 }
 0x449   : > { %26004 = vst [vmem:[#allocation64_spill] sm:$0xff] %v24045_v40  ;;  %20167 = vmatmul.mubr.msk.f32.gmra.mrb[84].mxu0 %vm26006_vm15, %v14246_v33  ;;  %19393 = vmatprep.mubr.msk.f32.mxu1 %vm26007_vm11, %v8591_v63  ;;  %v14250_v33 = vld [vmem:[#allocation2 + $0x311] sm:$0xff]  ;;  %vm26026_vm15 = vmmov %vm25923_vm0 }
 0x44a   : > { %20169 = vmatprep.mubr.msk.f32.mxu0 %vm26008_vm2, %v14247_v27  ;;  %v8595_v63 = vld [vmem:[#allocation2 + $0x2f8] sm:$0xff]  ;;  %vm26028_vm11 = vmmov %vm25923_vm0 }
 0x44b   : > { %v24053_v21 = vpop.f32.mrb[44].mxu1  ;;  %v14251_v27 = vld [vmem:[#allocation2 + $0x319] sm:$0xff]  ;;  %vm26029_vm2 = vmmov %vm25923_vm0 }
 0x44c   : > { %26010 = vst [vmem:[#allocation62_spill] sm:$0xff] %v24053_v21  ;;  %v24055_v13 = vpop.f32.mrb[45].mxu1  ;;  %19394 = vmatmul.mubr.msk.f32.gmra.mrb[86].mxu1 %vm26012_vm9, %v8592_v17  ;;  %v8596_v17 = vld [vmem:[#allocation2 + $0x300] sm:$0xff]  ;;  %vm26031_vm9 = vmmov %vm25923_vm0 }
 0x44d   : > { %26011 = vst [vmem:[#allocation3_spill] sm:$0xff] %v24055_v13  ;;  %20170 = vmatmul.mubr.msk.f32.gmra.mrb[86].mxu0 %vm26013_vm3, %v14376_v18  ;;  %19396 = vmatprep.mubr.msk.f32.mxu1 %vm26014_vm4, %v8593_v38  ;;  %v14380_v18 = vsel %vm26020_vm8, %v14252_v26, 0.0  ;;  %v8597_v38 = vld [vmem:[#allocation2 + $0x308] sm:$0xff]  ;;  %vm26032_vm3 = vnez %v25590_v48  ;;  %vm26035_vm4 = vmmov %vm25923_vm0 }
 0x44e   : > { %20172 = vmatprep.mubr.msk.f32.mxu0 %vm26015_vm10, %v14249_v39  ;;  %v14253_v39 = vld [vmem:[#allocation2 + $0x329] sm:$0xff]  ;;  %vm26036_vm10 = vmmov %vm25923_vm0  ;;  %v14260_v48 = vld [vmem:[#allocation2 + $0x361] sm:$0xff] }
 0x44f   : > { %v24061_v3 = vpop.f32.mrb[46].mxu1  ;;  %vm26041_vm8 = vmmov %vm25923_vm0 }
 0x450   : > { %v24063_v40 = vpop.f32.mrb[47].mxu1  ;;  %19397 = vmatmul.mubr.msk.f32.gmra.mrb[88].mxu1 %vm26017_vm1, %v8594_v24  ;;  %v8598_v24 = vld [vmem:[#allocation2 + $0x310] sm:$0xff]  ;;  %vm26037_vm1 = vmmov %vm25923_vm0 }
 0x451   : > { %26016 = vst [vmem:[#allocation4_spill] sm:$0xff] %v24063_v40  ;;  %20173 = vmatmul.mubr.msk.f32.gmra.mrb[88].mxu0 %vm26018_vm6, %v14250_v33  ;;  %19399 = vmatprep.mubr.msk.f32.mxu1 %vm26019_vm5, %v8595_v63  ;;  %v14254_v33 = vld [vmem:[#allocation2 + $0x331] sm:$0xff]  ;;  %vm26038_vm6 = vmmov %vm25923_vm0 }
 0x452   : > { %20175 = vmatprep.mubr.msk.f32.mxu0 %vm25923_vm0, %v14251_v27  ;;  %v8599_v63 = vld [vmem:[#allocation2 + $0x318] sm:$0xff]  ;;  %vm26040_vm5 = vmmov %vm25923_vm0 }
 0x453   : > { %v24071_v13 = vpop.f32.mrb[48].mxu1  ;;  %v14255_v27 = vld [vmem:[#allocation2 + $0x339] sm:$0xff] }
 0x454   : > { %26021 = vst [vmem:[#allocation5_spill] sm:$0xff] %v24071_v13  ;;  %v24073_v21 = vpop.f32.mrb[49].mxu1  ;;  %19400 = vmatmul.mubr.msk.f32.gmra.mrb[90].mxu1 %vm26023_vm12, %v8596_v17  ;;  %v8600_v17 = vld [vmem:[#allocation2 + $0x320] sm:$0xff]  ;;  %vm26042_vm12 = vmmov %vm25923_vm0 }
 0x455   : > { %26022 = vst [vmem:[#allocation6_spill] sm:$0xff] %v24073_v21  ;;  %20176 = vmatmul.mubr.msk.f32.gmra.mrb[90].mxu0 %vm26024_vm14, %v14380_v18  ;;  %19402 = vmatprep.mubr.msk.f32.mxu1 %vm26025_vm13, %v8597_v38  ;;  %v14384_v18 = vsel %vm26032_vm3, %v14256_v42, 0.0  ;;  %v8601_v38 = vld [vmem:[#allocation2 + $0x328] sm:$0xff]  ;;  %vm26043_vm14 = vnez %v25599_v58  ;;  %vm26046_vm13 = vmmov %vm25923_vm0 }
 0x456   : > { %20178 = vmatprep.mubr.msk.f32.mxu0 %vm26026_vm15, %v14253_v39  ;;  %v14257_v39 = vld [vmem:[#allocation2 + $0x349] sm:$0xff]  ;;  %vm26047_vm15 = vmmov %vm25923_vm0  ;;  %v14264_v58 = vld [vmem:[#allocation2 + $0x381] sm:$0xff] }
 0x457   : > { %v24079_v26 = vpop.f32.mrb[50].mxu1  ;;  %vm26054_vm3 = vmmov %vm25923_vm0 }
 0x458   : > { %v24081_v40 = vpop.f32.mrb[51].mxu1  ;;  %19403 = vmatmul.mubr.msk.f32.gmra.mrb[92].mxu1 %vm26028_vm11, %v8598_v24  ;;  %v8602_v24 = vld [vmem:[#allocation2 + $0x330] sm:$0xff]  ;;  %vm26048_vm11 = vmmov %vm25923_vm0 }
 0x459   : > { %26027 = vst [vmem:[#allocation7_spill] sm:$0xff] %v24081_v40  ;;  %20179 = vmatmul.mubr.msk.f32.gmra.mrb[92].mxu0 %vm26029_vm2, %v14254_v33  ;;  %19405 = vmatprep.mubr.msk.f32.mxu1 %vm26030_vm7, %v8599_v63  ;;  %v14258_v33 = vld [vmem:[#allocation2 + $0x351] sm:$0xff]  ;;  %vm26049_vm2 = vmmov %vm25923_vm0 }
 0x45a   : > { %20181 = vmatprep.mubr.msk.f32.mxu0 %vm26031_vm9, %v14255_v27  ;;  %v8603_v63 = vld [vmem:[#allocation2 + $0x338] sm:$0xff]  ;;  %vm26052_vm7 = vmmov %vm25923_vm0 }
 0x45b   : > { %v24089_v21 = vpop.f32.mrb[52].mxu1  ;;  %v14259_v27 = vld [vmem:[#allocation2 + $0x359] sm:$0xff]  ;;  %vm26053_vm9 = vmmov %vm25923_vm0 }
 0x45c   : > { %26033 = vst [vmem:[#allocation8_spill] sm:$0xff] %v24089_v21  ;;  %v24091_v13 = vpop.f32.mrb[53].mxu1  ;;  %19406 = vmatmul.mubr.msk.f32.gmra.mrb[94].mxu1 %vm26035_vm4, %v8600_v17  ;;  %v8604_v17 = vld [vmem:[#allocation2 + $0x340] sm:$0xff]  ;;  %vm26055_vm4 = vmmov %vm25923_vm0 }
 0x45d   : > { %26034 = vst [vmem:[#allocation9_spill] sm:$0xff] %v24091_v13  ;;  %20182 = vmatmul.mubr.msk.f32.gmra.mrb[94].mxu0 %vm26036_vm10, %v14384_v18  ;;  %19408 = vmatprep.mubr.msk.f32.mxu1 %vm26037_vm1, %v8601_v38  ;;  %v14388_v18 = vsel %vm26043_vm14, %v14260_v48, 0.0  ;;  %v8605_v38 = vld [vmem:[#allocation2 + $0x348] sm:$0xff]  ;;  %vm26056_vm10 = vnez %v25609_v28  ;;  %vm26059_vm1 = vmmov %vm25923_vm0 }
 0x45e   : > { %20184 = vmatprep.mubr.msk.f32.mxu0 %vm26038_vm6, %v14257_v39  ;;  %v14261_v39 = vld [vmem:[#allocation2 + $0x369] sm:$0xff]  ;;  %vm26060_vm6 = vmmov %vm25923_vm0  ;;  %v14268_v28 = vld [vmem:[#allocation2 + $0x3a1] sm:$0xff] }
 0x45f   : > { %v24097_v42 = vpop.f32.mrb[54].mxu1  ;;  %vm26066_vm14 = vmmov %vm25923_vm0 }
 0x460   : > { %v24099_v40 = vpop.f32.mrb[55].mxu1  ;;  %19409 = vmatmul.mubr.msk.f32.gmra.mrb[96].mxu1 %vm26040_vm5, %v8602_v24  ;;  %v8606_v24 = vld [vmem:[#allocation2 + $0x350] sm:$0xff]  ;;  %vm26061_vm5 = vmmov %vm25923_vm0 }
 0x461   : > { %26039 = vst [vmem:[#allocation42_spill] sm:$0xff] %v24099_v40  ;;  %20185 = vmatmul.mubr.msk.f32.gmra.mrb[96].mxu0 %vm25923_vm0, %v14258_v33  ;;  %19411 = vmatprep.mubr.msk.f32.mxu1 %vm26041_vm8, %v8603_v63  ;;  %v14262_v33 = vld [vmem:[#allocation2 + $0x371] sm:$0xff]  ;;  %vm26064_vm8 = vmmov %vm25923_vm0 }
 0x462   : > { %20187 = vmatprep.mubr.msk.f32.mxu0 %vm26042_vm12, %v14259_v27  ;;  %v8607_v63 = vld [vmem:[#allocation2 + $0x358] sm:$0xff]  ;;  %vm26065_vm12 = vmmov %vm25923_vm0 }
 0x463   : > { %v24107_v13 = vpop.f32.mrb[56].mxu1  ;;  %v14263_v27 = vld [vmem:[#allocation2 + $0x379] sm:$0xff] }
 0x464   : > { %26044 = vst [vmem:[#allocation68_spill] sm:$0xff] %v24107_v13  ;;  %v24109_v21 = vpop.f32.mrb[57].mxu1  ;;  %19412 = vmatmul.mubr.msk.f32.gmra.mrb[98].mxu1 %vm26046_vm13, %v8604_v17  ;;  %v8608_v17 = vld [vmem:[#allocation2 + $0x360] sm:$0xff]  ;;  %vm26067_vm13 = vmmov %vm25923_vm0 }
 0x465   : > { %26045 = vst [vmem:[#allocation10_spill] sm:$0xff] %v24109_v21  ;;  %20188 = vmatmul.mubr.msk.f32.gmra.mrb[98].mxu0 %vm26047_vm15, %v14388_v18  ;;  %19414 = vmatprep.mubr.msk.f32.mxu1 %vm26048_vm11, %v8605_v38  ;;  %v14392_v18 = vsel %vm26056_vm10, %v14264_v58, 0.0  ;;  %v8609_v38 = vld [vmem:[#allocation2 + $0x368] sm:$0xff]  ;;  %vm26068_vm15 = vnez %v25618_v30  ;;  %vm26069_vm11 = vmmov %vm25923_vm0  ;;  %v8614_v30 = vld [vmem:[#allocation2 + $0x390] sm:$0xff] }
 0x466   : > { %20190 = vmatprep.mubr.msk.f32.mxu0 %vm26049_vm2, %v14261_v39  ;;  %v14265_v39 = vld [vmem:[#allocation2 + $0x389] sm:$0xff]  ;;  %vm26070_vm2 = vmmov %vm25923_vm0 }
 0x467   : > { %v24115_v48 = vpop.f32.mrb[58].mxu1  ;;  %vm26074_vm10 = vmmov %vm25923_vm0 }
 0x468   : > { %26050 = vst [vmem:[#allocation70_spill] sm:$0xff] %v24115_v48  ;;  %v24117_v40 = vpop.f32.mrb[59].mxu1  ;;  %19415 = vmatmul.mubr.msk.f32.gmra.mrb[100].mxu1 %vm26052_vm7, %v8606_v24  ;;  %v8610_v24 = vld [vmem:[#allocation2 + $0x370] sm:$0xff]  ;;  %vm26071_vm7 = vmmov %vm25923_vm0  ;;  %v14272_v48 = vld [vmem:[#allocation2 + $0x3c1] sm:$0xff] }
 0x469   : > { %26051 = vst [vmem:[#allocation66_spill] sm:$0xff] %v24117_v40  ;;  %20191 = vmatmul.mubr.msk.f32.gmra.mrb[100].mxu0 %vm26053_vm9, %v14262_v33  ;;  %19417 = vmatprep.mubr.msk.f32.mxu1 %vm26054_vm3, %v8607_v63  ;;  %v14266_v33 = vld [vmem:[#allocation2 + $0x391] sm:$0xff]  ;;  %vm26072_vm9 = vmmov %vm25923_vm0  ;;  %vm15902_vm3 = vcmask 523264  }
 0x46a   : > { %20193 = vmatprep.mubr.msk.f32.mxu0 %vm26055_vm4, %v14263_v27  ;;  %v8611_v63 = vld [vmem:[#allocation2 + $0x378] sm:$0xff]  ;;  %vm26073_vm4 = vmmov %vm25923_vm0 }
 0x46b   : > { %v24125_v21 = vpop.f32.mrb[60].mxu1  ;;  %v14267_v27 = vld [vmem:[#allocation2 + $0x399] sm:$0xff] }
 0x46c   : > { %26057 = vst [vmem:[#allocation43_spill] sm:$0xff] %v24125_v21  ;;  %v24127_v13 = vpop.f32.mrb[61].mxu1  ;;  %19418 = vmatmul.mubr.msk.f32.gmra.mrb[102].mxu1 %vm26059_vm1, %v8608_v17  ;;  %v8612_v17 = vld [vmem:[#allocation2 + $0x380] sm:$0xff]  ;;  %vm26075_vm1 = vmmov %vm25923_vm0 }
 0x46d   : > { %26058 = vst [vmem:[#allocation44_spill] sm:$0xff] %v24127_v13  ;;  %20194 = vmatmul.mubr.msk.f32.gmra.mrb[102].mxu0 %vm26060_vm6, %v14392_v18  ;;  %19420 = vmatprep.mubr.msk.f32.mxu1 %vm26061_vm5, %v8609_v38  ;;  %v14396_v18 = vsel %vm26068_vm15, %v14268_v28, 0.0  ;;  %v8613_v38 = vld [vmem:[#allocation2 + $0x388] sm:$0xff]  ;;  %v14271_v21 = vld [vmem:[#allocation2 + $0x3b9] sm:$0xff]  ;;  %vm26076_vm6 = vmmov %vm25923_vm0  ;;  %vm26077_vm5 = vnez %v25627_v2 }
 0x46e   : > { %20196 = vmatprep.mubr.msk.f32.mxu0 %vm25923_vm0, %v14265_v39  ;;  %v14269_v39 = vld [vmem:[#allocation2 + $0x3a9] sm:$0xff]  ;;  %vm26082_vm15 = vmmov %vm25923_vm0 }
 0x46f   : > { %v24133_v58 = vpop.f32.mrb[62].mxu1 }
 0x470   : > { %26062 = vst [vmem:[#allocation47_spill] sm:$0xff] %v24133_v58  ;;  %v24135_v40 = vpop.f32.mrb[63].mxu1  ;;  %19421 = vmatmul.mubr.msk.f32.gmra.mrb[104].mxu1 %vm26064_vm8, %v8610_v24  ;;  %v8615_v58 = vld [vmem:[#allocation2 + $0x398] sm:$0xff]  ;;  %vm26078_vm8 = vmmov %vm25923_vm0 }
 0x471   : > { %26063 = vst [vmem:[#allocation11_spill] sm:$0xff] %v24135_v40  ;;  %20197 = vmatmul.mubr.msk.f32.gmra.mrb[104].mxu0 %vm26065_vm12, %v14266_v33  ;;  %19423 = vmatprep.mubr.msk.f32.mxu1 %vm26066_vm14, %v8611_v63  ;;  %v24146_v40 = vld [vmem:[%s24672_s3] ss:$0 sm:$0xff]  ;;  %vm26079_vm12 = vmmov %vm25923_vm0 }
 0x472   : > { %20199 = vmatprep.mubr.msk.f32.mxu0 %vm26067_vm13, %v14267_v27  ;;  %v14270_v27 = vld [vmem:[#allocation2 + $0x3b1] sm:$0xff]  ;;  %vm26080_vm14 = vmmov %vm25923_vm0 }
 0x473   : > { %vm26081_vm13 = vmmov %vm25923_vm0 }
 0x474   : > { %v20042_v13 = vpop.f32.mrb[0].mxu0  ;;  %19424 = vmatmul.mubr.msk.f32.gmra.mrb[106].mxu1 %vm26069_vm11, %v8612_v17  ;;  %vm26083_vm11 = vmmov %vm25923_vm0 }
 0x475   : > { %v20234_v24 = vadd.f32 %v20042_v13, %v23847_v25  ;;  %v14872_v33 = vpop.f32.mrb[1].mxu0  ;;  %20200 = vmatmul.mubr.msk.f32.gmra.mrb[106].mxu0 %vm26070_vm2, %v14396_v18  ;;  %19426 = vmatprep.mubr.msk.f32.mxu1 %vm26071_vm7, %v8613_v38  ;;  %vm26084_vm2 = vmmov %vm25923_vm0  ;;  %vm26085_vm7 = vnez %v25637_v14 }
 0x476   : > { %v20235_v63 = vadd.f32 %v14872_v33, %v23849_v59  ;;  %20202 = vmatprep.mubr.msk.f32.mxu0 %vm26072_vm9, %v14269_v39  ;;  %v14400_v33 = vsel %vm26077_vm5, %v14272_v48, 0.0  ;;  %vm26086_vm9 = vmmov %vm25923_vm0 }
 0x477   : > { %v15647_v28 = vadd.f32 %v20234_v24, %v24146_v40  ;;  %v8616_v24 = vld [vmem:[#allocation2 + $0x3a0] sm:$0xff]  ;;  %vm26091_vm5 = vmmov %vm25923_vm0 }
 0x478   : > { %v15646_v25 = vadd.f32 %v20235_v63, %v24146_v40  ;;  %v20045_v59 = vpop.f32.mrb[2].mxu0  ;;  %19427 = vmatmul.mubr.msk.f32.gmra.mrb[108].mxu1 %vm26073_vm4, %v8614_v30  ;;  %v8617_v63 = vld [vmem:[#allocation2 + $0x3a8] sm:$0xff]  ;;  %vm26087_vm4 = vmmov %vm25923_vm0 }
 0x479   : > { %v15775_v13 = vmax.f32 %v15647_v28, 0.0  ;;  %v20236_v17 = vadd.f32 %v20045_v59, %v23855_v9  ;;  %v14882_v18 = vpop.f32.mrb[3].mxu0  ;;  %20203 = vmatmul.mubr.msk.f32.gmra.mrb[108].mxu0 %vm26074_vm10, %v14270_v27  ;;  %19429 = vmatprep.mubr.msk.f32.mxu1 %vm26075_vm1, %v8615_v58  ;;  %v14273_v30 = vld [vmem:[#allocation2 + $0x3c9] sm:$0xff]  ;;  %v14274_v59 = vld [vmem:[#allocation2 + $0x3d1] sm:$0xff]  ;;  %vm26088_vm10 = vmmov %vm25923_vm0 }
 0x47a   : > { %v15774_v38 = vmax.f32 %v15646_v25, 0.0  ;;  %v20237_v39 = vadd.f32 %v14882_v18, %v23857_v4  ;;  %20205 = vmatprep.mubr.msk.f32.mxu0 %vm26076_vm6, %v14271_v21  ;;  %v8618_v25 = vld [vmem:[#allocation2 + $0x3b0] sm:$0xff]  ;;  %v14276_v18 = vld [vmem:[#allocation2 + $0x3e1] sm:$0xff]  ;;  %vm26089_vm1 = vmmov %vm25923_vm0 }
 0x47b   : > { %15904 = vst.msk [vmem:[%s24160_s30 + $0x8] sm:$0xff] %vm15902_vm3, %v15775_v13  ;;  %v15649_v9 = vadd.f32 %v20236_v17, %v24146_v40  ;;  %v8619_v17 = vld [vmem:[#allocation2 + $0x3b8] sm:$0xff]  ;;  %vm26090_vm6 = vmmov %vm25923_vm0 }
 0x47c   : > { %15903 = vst.msk [vmem:[%s24160_s30] sm:$0xff] %vm15902_vm3, %v15774_v38  ;;  %v15648_v27 = vadd.f32 %v20237_v39, %v24146_v40  ;;  %v20048_v4 = vpop.f32.mrb[4].mxu0  ;;  %19430 = vmatmul.mubr.msk.f32.gmra.mrb[110].mxu1 %vm25923_vm0, %v8616_v24 }
 0x47d   : > { %v15777_v28 = vmax.f32 %v15649_v9, 0.0  ;;  %v20238_v21 = vadd.f32 %v20048_v4, %v23867_v37  ;;  %v14892_v2 = vpop.f32.mrb[5].mxu0  ;;  %20206 = vmatmul.mubr.msk.f32.gmra.mrb[110].mxu0 %vm26078_vm8, %v14400_v33  ;;  %19432 = vmatprep.mubr.msk.f32.mxu1 %vm26079_vm12, %v8617_v63  ;;  %v14275_v37 = vld [vmem:[#allocation2 + $0x3d9] sm:$0xff]  ;;  %v8621_v4 = vld [vmem:[#allocation2 + $0x3c8] sm:$0xff]  ;;  %vm26092_vm8 = vmmov %vm25923_vm0  ;;  %vm26093_vm12 = vnez %v25646_v49 }
 0x47e   : > { %v15776_v48 = vmax.f32 %v15648_v27, 0.0  ;;  %v20239_v58 = vadd.f32 %v14892_v2, %v23869_v32  ;;  %20208 = vmatprep.mubr.msk.f32.mxu0 %vm26080_vm14, %v14273_v30  ;;  %v8620_v30 = vld [vmem:[#allocation2 + $0x3c0] sm:$0xff]  ;;  %v14404_v27 = vsel %vm26085_vm7, %v14276_v18, 0.0  ;;  %vm26094_vm14 = vmmov %vm25923_vm0 }
 0x47f   : > { %15906 = vst.msk [vmem:[%s24160_s30 + $0x18] sm:$0xff] %vm15902_vm3, %v15777_v28  ;;  %v15651_v13 = vadd.f32 %v20238_v21, %v24146_v40  ;;  %v14277_v28 = vld [vmem:[#allocation2 + $0x3e9] sm:$0xff]  ;;  %v14280_v18 = vld [vmem:[#allocation2 + $0x401] sm:$0xff]  ;;  %vm26099_vm7 = vmmov %vm25923_vm0 }
 0x480   : > { %15905 = vst.msk [vmem:[%s24160_s30 + $0x10] sm:$0xff] %vm15902_vm3, %v15776_v48  ;;  %v15650_v38 = vadd.f32 %v20239_v58, %v24146_v40  ;;  %v20051_v39 = vpop.f32.mrb[6].mxu0  ;;  %19433 = vmatmul.mubr.msk.f32.gmra.mrb[112].mxu1 %vm26081_vm13, %v8618_v25  ;;  %vm26095_vm13 = vmmov %vm25923_vm0 }
 0x481   : > { %v15779_v32 = vmax.f32 %v15651_v13, 0.0  ;;  %v20240_v24 = vadd.f32 %v20051_v39, %v23875_v35  ;;  %v14902_v33 = vpop.f32.mrb[7].mxu0  ;;  %20209 = vmatmul.mubr.msk.f32.gmra.mrb[112].mxu0 %vm26082_vm15, %v14274_v59  ;;  %19435 = vmatprep.mubr.msk.f32.mxu1 %vm26083_vm11, %v8619_v17  ;;  %v8622_v59 = vld [vmem:[#allocation2 + $0x3d0] sm:$0xff]  ;;  %vm26096_vm15 = vmmov %vm25923_vm0 }
 0x482   : > { %v15778_v9 = vmax.f32 %v15650_v38, 0.0  ;;  %v20241_v63 = vadd.f32 %v14902_v33, %v23877_v53  ;;  %20211 = vmatprep.mubr.msk.f32.mxu0 %vm26084_vm2, %v14275_v37  ;;  %v14278_v13 = vld [vmem:[#allocation2 + $0x3f1] sm:$0xff]  ;;  %vm26097_vm11 = vmmov %vm25923_vm0 }
 0x483   : > { %15908 = vst.msk [vmem:[%s24160_s30 + $0x28] sm:$0xff] %vm15902_vm3, %v15779_v32  ;;  %v15653_v35 = vadd.f32 %v20240_v24, %v24146_v40  ;;  %v8623_v37 = vld [vmem:[#allocation2 + $0x3d8] sm:$0xff]  ;;  %vm26098_vm2 = vmmov %vm25923_vm0 }
 0x484   : > { %15907 = vst.msk [vmem:[%s24160_s30 + $0x20] sm:$0xff] %vm15902_vm3, %v15778_v9  ;;  %v15652_v21 = vadd.f32 %v20241_v63, %v24146_v40  ;;  %v20054_v53 = vpop.f32.mrb[8].mxu0  ;;  %19436 = vmatmul.mubr.msk.f32.gmra.mrb[114].mxu1 %vm26086_vm9, %v8620_v30  ;;  %v8624_v63 = vld [vmem:[#allocation2 + $0x3e0] sm:$0xff]  ;;  %v14408_v30 = vsel %vm26093_vm12, %v14280_v18, 0.0  ;;  %vm26100_vm9 = vmmov %vm25923_vm0 }
 0x485   : > { %v15781_v2 = vmax.f32 %v15653_v35, 0.0  ;;  %v20242_v48 = vadd.f32 %v20054_v53, %v23887_v22  ;;  %v14912_v14 = vpop.f32.mrb[9].mxu0  ;;  %20212 = vmatmul.mubr.msk.f32.gmra.mrb[114].mxu0 %vm26087_vm4, %v14404_v27  ;;  %19438 = vmatprep.mubr.msk.f32.mxu1 %vm26088_vm10, %v8621_v4  ;;  %v14279_v22 = vld [vmem:[#allocation2 + $0x3f9] sm:$0xff]  ;;  %v8625_v27 = vld [vmem:[#allocation2 + $0x3e8] sm:$0xff]  ;;  %vm26101_vm4 = vmmov %vm25923_vm0  ;;  %vm26102_vm10 = vnez %v25655_v20 }
 0x486   : > { %v15780_v58 = vmax.f32 %v15652_v21, 0.0  ;;  %v20243_v25 = vadd.f32 %v14912_v14, %v23889_v0  ;;  %20214 = vmatprep.mubr.msk.f32.mxu0 %vm26089_vm1, %v14277_v28  ;;  %v14281_v35 = vld [vmem:[#allocation2 + $0x409] sm:$0xff]  ;;  %v14282_v14 = vld [vmem:[#allocation2 + $0x411] sm:$0xff]  ;;  %vm26103_vm1 = vmmov %vm25923_vm0 }
 0x487   : > { %15910 = vst.msk [vmem:[%s24160_s30 + $0x38] sm:$0xff] %vm15902_vm3, %v15781_v2  ;;  %v15655_v17 = vadd.f32 %v20242_v48, %v24146_v40  ;;  %v8626_v48 = vld [vmem:[#allocation2 + $0x3f0] sm:$0xff]  ;;  %vm26107_vm12 = vmmov %vm25923_vm0 }
 0x488   : > { %15909 = vst.msk [vmem:[%s24160_s30 + $0x30] sm:$0xff] %vm15902_vm3, %v15780_v58  ;;  %v15654_v38 = vadd.f32 %v20243_v25, %v24146_v40  ;;  %v20057_v39 = vpop.f32.mrb[10].mxu0  ;;  %19439 = vmatmul.mubr.msk.f32.gmra.mrb[116].mxu1 %vm26090_vm6, %v8622_v59  ;;  %v8627_v25 = vld [vmem:[#allocation2 + $0x3f8] sm:$0xff]  ;;  %v14284_v59 = vld [vmem:[#allocation2 + $0x421] sm:$0xff]  ;;  %vm26104_vm6 = vmmov %vm25923_vm0 }
 0x489   : > { %v15783_v0 = vmax.f32 %v15655_v17, 0.0  ;;  %v20244_v32 = vadd.f32 %v20057_v39, %v23895_v52  ;;  %v14922_v24 = vpop.f32.mrb[11].mxu0  ;;  %20215 = vmatmul.mubr.msk.f32.gmra.mrb[116].mxu0 %vm26091_vm5, %v14278_v13  ;;  %19441 = vmatprep.mubr.msk.f32.mxu1 %vm25923_vm0, %v8623_v37  ;;  %v8628_v39 = vld [vmem:[#allocation2 + $0x400] sm:$0xff]  ;;  %vm26105_vm5 = vmmov %vm25923_vm0 }
 0x48a   : > { %v15782_v33 = vmax.f32 %v15654_v38, 0.0  ;;  %v20245_v9 = vadd.f32 %v14922_v24, %v23897_v47  ;;  %20217 = vmatprep.mubr.msk.f32.mxu0 %vm26092_vm8, %v14279_v22  ;;  %v14285_v24 = vld [vmem:[#allocation2 + $0x429] sm:$0xff]  ;;  %vm26106_vm8 = vmmov %vm25923_vm0 }
 0x48b   : > { %15912 = vst.msk [vmem:[%s24160_s30 + $0x48] sm:$0xff] %vm15902_vm3, %v15783_v0  ;;  %v15657_v52 = vadd.f32 %v20244_v32, %v24146_v40  ;;  %v14412_v0 = vsel %vm26102_vm10, %v14284_v59, 0.0  ;;  %v8629_v32 = vld [vmem:[#allocation2 + $0x408] sm:$0xff] }
 0x48c   : > { %15911 = vst.msk [vmem:[%s24160_s30 + $0x40] sm:$0xff] %vm15902_vm3, %v15782_v33  ;;  %v15656_v4 = vadd.f32 %v20245_v9, %v24146_v40  ;;  %v20060_v47 = vpop.f32.mrb[12].mxu0  ;;  %19442 = vmatmul.mubr.msk.f32.gmra.mrb[118].mxu1 %vm26094_vm14, %v8624_v63  ;;  %vm26108_vm14 = vmmov %vm25923_vm0 }
 0x48d   : > { %v15785_v28 = vmax.f32 %v15657_v52, 0.0  ;;  %v20246_v21 = vadd.f32 %v20060_v47, %v23907_v1  ;;  %v14932_v49 = vpop.f32.mrb[13].mxu0  ;;  %20218 = vmatmul.mubr.msk.f32.gmra.mrb[118].mxu0 %vm26095_vm13, %v14408_v30  ;;  %19444 = vmatprep.mubr.msk.f32.mxu1 %vm26096_vm15, %v8625_v27  ;;  %v14283_v1 = vld [vmem:[#allocation2 + $0x419] sm:$0xff]  ;;  %v8630_v27 = vld [vmem:[#allocation2 + $0x410] sm:$0xff]  ;;  %vm26109_vm13 = vmmov %vm25923_vm0  ;;  %vm26110_vm15 = vnez %v25665_v29 }
 0x48e   : > { %v15784_v53 = vmax.f32 %v15656_v4, 0.0  ;;  %v20247_v2 = vadd.f32 %v14932_v49, %v23909_v23  ;;  %20220 = vmatprep.mubr.msk.f32.mxu0 %vm26097_vm11, %v14281_v35  ;;  %v14286_v35 = vld [vmem:[#allocation2 + $0x431] sm:$0xff]  ;;  %vm26111_vm11 = vmmov %vm25923_vm0 }
 0x48f   : > { %15914 = vst.msk [vmem:[%s24160_s30 + $0x58] sm:$0xff] %vm15902_vm3, %v15785_v28  ;;  %v15659_v58 = vadd.f32 %v20246_v21, %v24146_v40  ;;  %v8631_v47 = vld [vmem:[#allocation2 + $0x418] sm:$0xff]  ;;  %v14288_v28 = vld [vmem:[#allocation2 + $0x441] sm:$0xff] }
 0x490   : > { %15913 = vst.msk [vmem:[%s24160_s30 + $0x50] sm:$0xff] %vm15902_vm3, %v15784_v53  ;;  %v15658_v13 = vadd.f32 %v20247_v2, %v24146_v40  ;;  %v20063_v17 = vpop.f32.mrb[14].mxu0  ;;  %19445 = vmatmul.mubr.msk.f32.gmra.mrb[120].mxu1 %vm26098_vm2, %v8626_v48  ;;  %vm26112_vm2 = vmmov %vm25923_vm0 }
 0x491   : > { %v15787_v23 = vmax.f32 %v15659_v58, 0.0  ;;  %v20248_v37 = vadd.f32 %v20063_v17, %v23915_v50  ;;  %v14942_v22 = vpop.f32.mrb[15].mxu0  ;;  %20221 = vmatmul.mubr.msk.f32.gmra.mrb[120].mxu0 %vm26099_vm7, %v14282_v14  ;;  %19447 = vmatprep.mubr.msk.f32.mxu1 %vm26100_vm9, %v8627_v25  ;;  %v8632_v58 = vld [vmem:[#allocation2 + $0x420] sm:$0xff]  ;;  %v14416_v25 = vsel %vm26110_vm15, %v14288_v28, 0.0 }
 0x492   : > { %v15786_v18 = vmax.f32 %v15658_v13, 0.0  ;;  %v20249_v38 = vadd.f32 %v14942_v22, %v23917_v41  ;;  %20223 = vmatprep.mubr.msk.f32.mxu0 %vm26101_vm4, %v14283_v1 }
 0x493   : > { %15916 = vst.msk [vmem:[%s24160_s30 + $0x68] sm:$0xff] %vm15902_vm3, %v15787_v23  ;;  %v15661_v50 = vadd.f32 %v20248_v37, %v24146_v40 }
 0x494   : > { %15915 = vst.msk [vmem:[%s24160_s30 + $0x60] sm:$0xff] %vm15902_vm3, %v15786_v18  ;;  %v15660_v33 = vadd.f32 %v20249_v38, %v24146_v40  ;;  %v20066_v41 = vpop.f32.mrb[16].mxu0  ;;  %19448 = vmatmul.mubr.msk.f32.gmra.mrb[122].mxu1 %vm26103_vm1, %v8628_v39 }
 0x495   : > { %v15789_v9 = vmax.f32 %v15661_v50, 0.0  ;;  %v20250_v63 = vadd.f32 %v20066_v41, %v23927_v10  ;;  %v14952_v20 = vpop.f32.mrb[17].mxu0  ;;  %20224 = vmatmul.mubr.msk.f32.gmra.mrb[122].mxu0 %vm26104_vm6, %v14412_v0  ;;  %19450 = vmatprep.mubr.msk.f32.mxu1 %vm26105_vm5, %v8629_v32  ;;  %v14287_v10 = vld [vmem:[#allocation2 + $0x439] sm:$0xff] }
 0x496   : > { %v15788_v30 = vmax.f32 %v15660_v33, 0.0  ;;  %v20251_v52 = vadd.f32 %v14952_v20, %v23929_v55  ;;  %20226 = vmatprep.mubr.msk.f32.mxu0 %vm25923_vm0, %v14285_v24 }
 0x497   : > { %15918 = vst.msk [vmem:[%s24160_s30 + $0x78] sm:$0xff] %vm15902_vm3, %v15789_v9  ;;  %v15663_v4 = vadd.f32 %v20250_v63, %v24146_v40 }
 0x498   : > { %15917 = vst.msk [vmem:[%s24160_s30 + $0x70] sm:$0xff] %vm15902_vm3, %v15788_v30  ;;  %v15662_v21 = vadd.f32 %v20251_v52, %v24146_v40  ;;  %v20069_v55 = vpop.f32.mrb[18].mxu0  ;;  %19451 = vmatmul.mubr.msk.f32.gmra.mrb[124].mxu1 %vm26106_vm8, %v8630_v27 }
 0x499   : > { %v15791_v49 = vmax.f32 %v15663_v4, 0.0  ;;  %v20252_v53 = vadd.f32 %v20069_v55, %v23935_v6  ;;  %v14962_v2 = vpop.f32.mrb[19].mxu0  ;;  %20227 = vmatmul.mubr.msk.f32.gmra.mrb[124].mxu0 %vm26107_vm12, %v14286_v35  ;;  %19453 = vmatprep.mubr.msk.f32.mxu1 %vm26108_vm14, %v8631_v47 }
 0x49a   : > { %v15790_v48 = vmax.f32 %v15662_v21, 0.0  ;;  %v20253_v14 = vadd.f32 %v14962_v2, %v23937_v16  ;;  %20229 = vmatprep.mubr.msk.f32.mxu0 %vm26109_vm13, %v14287_v10 }
 0x49b   : > { %15920 = vst.msk [vmem:[%s24160_s30 + $0x88] sm:$0xff] %vm15902_vm3, %v15791_v49  ;;  %v15665_v6 = vadd.f32 %v20252_v53, %v24146_v40 }
 0x49c   : > { %15919 = vst.msk [vmem:[%s24160_s30 + $0x80] sm:$0xff] %vm15902_vm3, %v15790_v48  ;;  %v15664_v1 = vadd.f32 %v20253_v14, %v24146_v40  ;;  %v20072_v59 = vpop.f32.mrb[20].mxu0  ;;  %19454 = vmatmul.mubr.msk.f32.gmra.mrb[126].mxu1 %vm26111_vm11, %v8632_v58 }
 0x49d   : > { %v15793_v16 = vmax.f32 %v15665_v6, 0.0  ;;  %v20254_v13 = vadd.f32 %v20072_v59, %v23945_v34  ;;  %v14972_v17 = vpop.f32.mrb[21].mxu0  ;;  %20230 = vmatmul.mubr.msk.f32.gmra.mrb[126].mxu0 %vm26112_vm2, %v14416_v25 }
 0x49e   : > { %v15792_v29 = vmax.f32 %v15664_v1, 0.0  ;;  %v20255_v23 = vadd.f32 %v14972_v17, %v23947_v8 }
 0x49f   : > { %15922 = vst.msk [vmem:[%s24160_s30 + $0x98] sm:$0xff] %vm15902_vm3, %v15793_v16  ;;  %v15667_v37 = vadd.f32 %v20254_v13, %v24146_v40 }
 0x4a0   : > { %15921 = vst.msk [vmem:[%s24160_s30 + $0x90] sm:$0xff] %vm15902_vm3, %v15792_v29  ;;  %v15666_v22 = vadd.f32 %v20255_v23, %v24146_v40  ;;  %v20075_v18 = vpop.f32.mrb[22].mxu0 }
 0x4a1   : > { %v15795_v34 = vmax.f32 %v15667_v37, 0.0  ;;  %v20256_v38 = vadd.f32 %v20075_v18, %v23953_v56  ;;  %v14982_v39 = vpop.f32.mrb[23].mxu0 }
 0x4a2   : > { %v15794_v0 = vmax.f32 %v15666_v22, 0.0  ;;  %v20257_v50 = vadd.f32 %v14982_v39, %v23955_v54 }
 0x4a3   : > { %15924 = vst.msk [vmem:[%s24160_s30 + $0xa8] sm:$0xff] %vm15902_vm3, %v15795_v34  ;;  %v15669_v8 = vadd.f32 %v20256_v38, %v24146_v40 }
 0x4a4   : > { %15923 = vst.msk [vmem:[%s24160_s30 + $0xa0] sm:$0xff] %vm15902_vm3, %v15794_v0  ;;  %v15668_v32 = vadd.f32 %v20257_v50, %v24146_v40  ;;  %v20078_v24 = vpop.f32.mrb[24].mxu0 }
 0x4a5   : > { %v15797_v33 = vmax.f32 %v15669_v8, 0.0  ;;  %v20258_v41 = vadd.f32 %v20078_v24, %v23963_v12  ;;  %v14992_v56 = vpop.f32.mrb[25].mxu0 }
 0x4a6   : > { %v15796_v9 = vmax.f32 %v15668_v32, 0.0  ;;  %v20259_v63 = vadd.f32 %v14992_v56, %v23965_v60 }
 0x4a7   : > { %15926 = vst.msk [vmem:[%s24160_s30 + $0xb8] sm:$0xff] %vm15902_vm3, %v15797_v33  ;;  %v15671_v54 = vadd.f32 %v20258_v41, %v24146_v40 }
 0x4a8   : > { %15925 = vst.msk [vmem:[%s24160_s30 + $0xb0] sm:$0xff] %vm15902_vm3, %v15796_v9  ;;  %v15670_v20 = vadd.f32 %v20259_v63, %v24146_v40  ;;  %v20081_v30 = vpop.f32.mrb[26].mxu0 }
 0x4a9   : > { %v15799_v52 = vmax.f32 %v15671_v54, 0.0  ;;  %v20260_v27 = vadd.f32 %v20081_v30, %v23971_v46  ;;  %v15002_v12 = vpop.f32.mrb[27].mxu0 }
 0x4aa   : > { %v15798_v35 = vmax.f32 %v15670_v20, 0.0  ;;  %v20261_v4 = vadd.f32 %v15002_v12, %v23973_v7 }
 0x4ab   : > { %15928 = vst.msk [vmem:[%s24160_s30 + $0xc8] sm:$0xff] %vm15902_vm3, %v15799_v52  ;;  %v15673_v60 = vadd.f32 %v20260_v27, %v24146_v40  ;;  %v26113_v52 = vld [vmem:[#allocation60_spill] sm:$0xff] }
 0x4ac   : > { %15927 = vst.msk [vmem:[%s24160_s30 + $0xc0] sm:$0xff] %vm15902_vm3, %v15798_v35  ;;  %v15672_v47 = vadd.f32 %v20261_v4, %v24146_v40  ;;  %v20084_v10 = vpop.f32.mrb[28].mxu0  ;;  %v26114_v35 = vld [vmem:[#allocation63_spill] sm:$0xff] }
 0x4ad   : > { %v15801_v28 = vmax.f32 %v15673_v60, 0.0  ;;  %v20262_v21 = vadd.f32 %v20084_v10, %v23981_v45  ;;  %v15012_v46 = vpop.f32.mrb[29].mxu0 }
 0x4ae   : > { %v15800_v55 = vmax.f32 %v15672_v47, 0.0  ;;  %v20263_v49 = vadd.f32 %v15012_v46, %v23983_v36 }
 0x4af   : > { %15930 = vst.msk [vmem:[%s24160_s30 + $0xd8] sm:$0xff] %vm15902_vm3, %v15801_v28  ;;  %v15675_v7 = vadd.f32 %v20262_v21, %v24146_v40 }
 0x4b0   : > { %15929 = vst.msk [vmem:[%s24160_s30 + $0xd0] sm:$0xff] %vm15902_vm3, %v15800_v55  ;;  %v15674_v53 = vadd.f32 %v20263_v49, %v24146_v40  ;;  %v20087_v2 = vpop.f32.mrb[30].mxu0  ;;  %v26115_v55 = vld [vmem:[#allocation64_spill] sm:$0xff] }
 0x4b1   : > { %v15803_v48 = vmax.f32 %v15675_v7, 0.0  ;;  %v20264_v14 = vadd.f32 %v20087_v2, %v23989_v5  ;;  %v15022_v45 = vpop.f32.mrb[31].mxu0 }
 0x4b2   : > { %v15802_v58 = vmax.f32 %v15674_v53, 0.0  ;;  %v20265_v25 = vadd.f32 %v15022_v45, %v23991_v57 }
 0x4b3   : > { %15932 = vst.msk [vmem:[%s24160_s30 + $0xe8] sm:$0xff] %vm15902_vm3, %v15803_v48  ;;  %v15677_v36 = vadd.f32 %v20264_v14, %v24146_v40  ;;  %v26116_v14 = vld [vmem:[#allocation62_spill] sm:$0xff] }
 0x4b4   : > { %15931 = vst.msk [vmem:[%s24160_s30 + $0xe0] sm:$0xff] %vm15902_vm3, %v15802_v58  ;;  %v15676_v6 = vadd.f32 %v20265_v25, %v24146_v40  ;;  %v20090_v1 = vpop.f32.mrb[32].mxu0  ;;  %v26117_v25 = vld [vmem:[#allocation3_spill] sm:$0xff] }
 0x4b5   : > { %v15805_v59 = vmax.f32 %v15677_v36, 0.0  ;;  %v20266_v16 = vadd.f32 %v20090_v1, %v23999_v43  ;;  %v15032_v5 = vpop.f32.mrb[33].mxu0 }
 0x4b6   : > { %v15804_v13 = vmax.f32 %v15676_v6, 0.0  ;;  %v20267_v17 = vadd.f32 %v15032_v5, %v24001_v15 }
 0x4b7   : > { %15934 = vst.msk [vmem:[%s24160_s30 + $0xf8] sm:$0xff] %vm15902_vm3, %v15805_v59  ;;  %v15679_v57 = vadd.f32 %v20266_v16, %v24146_v40 }
 0x4b8   : > { %15933 = vst.msk [vmem:[%s24160_s30 + $0xf0] sm:$0xff] %vm15902_vm3, %v15804_v13  ;;  %v15678_v29 = vadd.f32 %v20267_v17, %v24146_v40  ;;  %v20093_v23 = vpop.f32.mrb[34].mxu0 }
 0x4b9   : > { %v15807_v37 = vmax.f32 %v15679_v57, 0.0  ;;  %v20268_v22 = vadd.f32 %v20093_v23, %v24007_v19  ;;  %v15042_v43 = vpop.f32.mrb[35].mxu0  ;;  %v26118_v57 = vld [vmem:[#allocation4_spill] sm:$0xff] }
 0x4ba   : > { %v15806_v18 = vmax.f32 %v15678_v29, 0.0  ;;  %v20269_v34 = vadd.f32 %v15042_v43, %v24009_v61 }
 0x4bb   : > { %15936 = vst.msk [vmem:[%s24160_s30 + $0x108] sm:$0xff] %vm15902_vm3, %v15807_v37  ;;  %v15681_v15 = vadd.f32 %v20268_v22, %v24146_v40 }
 0x4bc   : > { %15935 = vst.msk [vmem:[%s24160_s30 + $0x100] sm:$0xff] %vm15902_vm3, %v15806_v18  ;;  %v15680_v38 = vadd.f32 %v20269_v34, %v24146_v40  ;;  %v20096_v39 = vpop.f32.mrb[36].mxu0  ;;  %v26119_v18 = vld [vmem:[#allocation5_spill] sm:$0xff] }
 0x4bd   : > { %v15809_v0 = vmax.f32 %v15681_v15, 0.0  ;;  %v20270_v50 = vadd.f32 %v20096_v39, %v24017_v11  ;;  %v15052_v19 = vpop.f32.mrb[37].mxu0 }
 0x4be   : > { %v15808_v8 = vmax.f32 %v15680_v38, 0.0  ;;  %v20271_v32 = vadd.f32 %v15052_v19, %v24019_v62  ;;  %v26120_v38 = vld [vmem:[#allocation6_spill] sm:$0xff] }
 0x4bf   : > { %15938 = vst.msk [vmem:[%s24160_s30 + $0x118] sm:$0xff] %vm15902_vm3, %v15809_v0  ;;  %v15683_v61 = vadd.f32 %v20270_v50, %v24146_v40 }
 0x4c0   : > { %15937 = vst.msk [vmem:[%s24160_s30 + $0x110] sm:$0xff] %vm15902_vm3, %v15808_v8  ;;  %v15682_v24 = vadd.f32 %v20271_v32, %v24146_v40  ;;  %v20099_v33 = vpop.f32.mrb[38].mxu0 }
 0x4c1   : > { %v15811_v41 = vmax.f32 %v15683_v61, 0.0  ;;  %v20272_v56 = vadd.f32 %v20099_v33, %v24025_v44  ;;  %v15062_v11 = vpop.f32.mrb[39].mxu0  ;;  %v26121_v33 = vld [vmem:[#allocation7_spill] sm:$0xff] }
 0x4c2   : > { %v15810_v9 = vmax.f32 %v15682_v24, 0.0  ;;  %v20273_v63 = vadd.f32 %v15062_v11, %v24027_v51 }
 0x4c3   : > { %15940 = vst.msk [vmem:[%s24160_s30 + $0x128] sm:$0xff] %vm15902_vm3, %v15811_v41  ;;  %v15685_v62 = vadd.f32 %v20272_v56, %v24146_v40 }
 0x4c4   : > { %15939 = vst.msk [vmem:[%s24160_s30 + $0x120] sm:$0xff] %vm15902_vm3, %v15810_v9  ;;  %v15684_v54 = vadd.f32 %v20273_v63, %v24146_v40  ;;  %v20102_v20 = vpop.f32.mrb[40].mxu0 }
 0x4c5   : > { %v15813_v30 = vmax.f32 %v15685_v62, 0.0  ;;  %v20274_v27 = vadd.f32 %v20102_v20, %v26113_v52  ;;  %v15072_v44 = vpop.f32.mrb[41].mxu0  ;;  %v26122_v62 = vld [vmem:[#allocation8_spill] sm:$0xff] }
 0x4c6   : > { %v15812_v12 = vmax.f32 %v15684_v54, 0.0  ;;  %v20275_v4 = vadd.f32 %v15072_v44, %v26114_v35 }
 0x4c7   : > { %15942 = vst.msk [vmem:[%s24160_s30 + $0x138] sm:$0xff] %vm15902_vm3, %v15813_v30  ;;  %v15687_v51 = vadd.f32 %v20274_v27, %v24146_v40  ;;  %v26123_v30 = vld [vmem:[#allocation9_spill] sm:$0xff] }
 0x4c8   : > { %15941 = vst.msk [vmem:[%s24160_s30 + $0x130] sm:$0xff] %vm15902_vm3, %v15812_v12  ;;  %v15686_v60 = vadd.f32 %v20275_v4, %v24146_v40  ;;  %v20105_v47 = vpop.f32.mrb[42].mxu0 }
 0x4c9   : > { %v15815_v10 = vmax.f32 %v15687_v51, 0.0  ;;  %v20276_v28 = vadd.f32 %v20105_v47, %v24043_v31  ;;  %v15082_v21 = vpop.f32.mrb[43].mxu0  ;;  %v26124_v47 = vld [vmem:[#allocation42_spill] sm:$0xff] }
 0x4ca   : > { %v15814_v46 = vmax.f32 %v15686_v60, 0.0  ;;  %v20277_v49 = vadd.f32 %v15082_v21, %v26115_v55 }
 0x4cb   : > { %15944 = vst.msk [vmem:[%s24160_s30 + $0x148] sm:$0xff] %vm15902_vm3, %v15815_v10  ;;  %v15689_v7 = vadd.f32 %v20276_v28, %v24146_v40 }
 0x4cc   : > { %15943 = vst.msk [vmem:[%s24160_s30 + $0x140] sm:$0xff] %vm15902_vm3, %v15814_v46  ;;  %v15688_v53 = vadd.f32 %v20277_v49, %v24146_v40  ;;  %v20108_v2 = vpop.f32.mrb[44].mxu0  ;;  %v26125_v49 = vld [vmem:[#allocation68_spill] sm:$0xff] }
 0x4cd   : > { %v15817_v48 = vmax.f32 %v15689_v7, 0.0  ;;  %v20278_v45 = vadd.f32 %v20108_v2, %v26116_v14  ;;  %v15092_v31 = vpop.f32.mrb[45].mxu0  ;;  %v26126_v2 = vld [vmem:[#allocation10_spill] sm:$0xff] }
 0x4ce   : > { %v15816_v58 = vmax.f32 %v15688_v53, 0.0  ;;  %v20279_v36 = vadd.f32 %v15092_v31, %v26117_v25  ;;  %v26127_v25 = vld [vmem:[#allocation70_spill] sm:$0xff] }
 0x4cf   : > { %15946 = vst.msk [vmem:[%s24160_s30 + $0x158] sm:$0xff] %vm15902_vm3, %v15817_v48  ;;  %v15691_v6 = vadd.f32 %v20278_v45, %v24146_v40 }
 0x4d0   : > { %15945 = vst.msk [vmem:[%s24160_s30 + $0x150] sm:$0xff] %vm15902_vm3, %v15816_v58  ;;  %v15690_v1 = vadd.f32 %v20279_v36, %v24146_v40  ;;  %v20111_v59 = vpop.f32.mrb[46].mxu0 }
 0x4d1   : > { %v15819_v16 = vmax.f32 %v15691_v6, 0.0  ;;  %v20280_v5 = vadd.f32 %v20111_v59, %v24061_v3  ;;  %v15102_v13 = vpop.f32.mrb[47].mxu0  ;;  %v26128_v59 = vld [vmem:[#allocation66_spill] sm:$0xff] }
 0x4d2   : > { %v15818_v17 = vmax.f32 %v15690_v1, 0.0  ;;  %v20281_v29 = vadd.f32 %v15102_v13, %v26118_v57 }
 0x4d3   : > { %15948 = vst.msk [vmem:[%s24160_s30 + $0x168] sm:$0xff] %vm15902_vm3, %v15819_v16  ;;  %v15693_v23 = vadd.f32 %v20280_v5, %v24146_v40 }
 0x4d4   : > { %15947 = vst.msk [vmem:[%s24160_s30 + $0x160] sm:$0xff] %vm15902_vm3, %v15818_v17  ;;  %v15692_v37 = vadd.f32 %v20281_v29, %v24146_v40  ;;  %v20114_v22 = vpop.f32.mrb[48].mxu0  ;;  %v26129_v29 = vld [vmem:[#allocation43_spill] sm:$0xff] }
 0x4d5   : > { %v15821_v43 = vmax.f32 %v15693_v23, 0.0  ;;  %v20282_v34 = vadd.f32 %v20114_v22, %v26119_v18  ;;  %v15112_v3 = vpop.f32.mrb[49].mxu0 }
 0x4d6   : > { %v15820_v15 = vmax.f32 %v15692_v37, 0.0  ;;  %v20283_v39 = vadd.f32 %v15112_v3, %v26120_v38 }
 0x4d7   : > { %15950 = vst.msk [vmem:[%s24160_s30 + $0x178] sm:$0xff] %vm15902_vm3, %v15821_v43  ;;  %v15695_v0 = vadd.f32 %v20282_v34, %v24146_v40  ;;  %v26130_v43 = vld [vmem:[#allocation44_spill] sm:$0xff] }
 0x4d8   : > { %15949 = vst.msk [vmem:[%s24160_s30 + $0x170] sm:$0xff] %vm15902_vm3, %v15820_v15  ;;  %v15694_v50 = vadd.f32 %v20283_v39, %v24146_v40  ;;  %v20117_v19 = vpop.f32.mrb[50].mxu0  ;;  %v26131_v39 = vld [vmem:[#allocation47_spill] sm:$0xff] }
 0x4d9   : > { %v15823_v8 = vmax.f32 %v15695_v0, 0.0  ;;  %v20284_v32 = vadd.f32 %v20117_v19, %v24079_v26  ;;  %v15122_v61 = vpop.f32.mrb[51].mxu0 }
 0x4da   : > { %v15822_v24 = vmax.f32 %v15694_v50, 0.0  ;;  %v20285_v41 = vadd.f32 %v15122_v61, %v26121_v33 }
 0x4db   : > { %15952 = vst.msk [vmem:[%s24160_s30 + $0x188] sm:$0xff] %vm15902_vm3, %v15823_v8  ;;  %v15697_v56 = vadd.f32 %v20284_v32, %v24146_v40  ;;  %v26132_v8 = vld [vmem:[#allocation11_spill] sm:$0xff] }
 0x4dc   : > { %15951 = vst.msk [vmem:[%s24160_s30 + $0x180] sm:$0xff] %vm15902_vm3, %v15822_v24  ;;  %v15696_v11 = vadd.f32 %v20285_v41, %v24146_v40  ;;  %v20120_v9 = vpop.f32.mrb[52].mxu0 }
 0x4dd   : > { %v15825_v63 = vmax.f32 %v15697_v56, 0.0  ;;  %v20286_v54 = vadd.f32 %v20120_v9, %v26122_v62  ;;  %v15132_v26 = vpop.f32.mrb[53].mxu0 }
 0x4de   : > { %v15824_v20 = vmax.f32 %v15696_v11, 0.0  ;;  %v20287_v52 = vadd.f32 %v15132_v26, %v26123_v30 }
 0x4df   : > { %15954 = vst.msk [vmem:[%s24160_s30 + $0x198] sm:$0xff] %vm15902_vm3, %v15825_v63  ;;  %v15699_v27 = vadd.f32 %v20286_v54, %v24146_v40 }
 0x4e0   : > { %15953 = vst.msk [vmem:[%s24160_s30 + $0x190] sm:$0xff] %vm15902_vm3, %v15824_v20  ;;  %v15698_v44 = vadd.f32 %v20287_v52, %v24146_v40  ;;  %v20123_v12 = vpop.f32.mrb[54].mxu0 }
 0x4e1   : > { %v15827_v35 = vmax.f32 %v15699_v27, 0.0  ;;  %v20288_v4 = vadd.f32 %v20123_v12, %v24097_v42  ;;  %v15142_v51 = vpop.f32.mrb[55].mxu0 }
 0x4e2   : > { %v15826_v60 = vmax.f32 %v15698_v44, 0.0  ;;  %v20289_v10 = vadd.f32 %v15142_v51, %v26124_v47 }
 0x4e3   : > { %15956 = vst.msk [vmem:[%s24160_s30 + $0x1a8] sm:$0xff] %vm15902_vm3, %v15827_v35  ;;  %v15701_v28 = vadd.f32 %v20288_v4, %v24146_v40 }
 0x4e4   : > { %15955 = vst.msk [vmem:[%s24160_s30 + $0x1a0] sm:$0xff] %vm15902_vm3, %v15826_v60  ;;  %v15700_v21 = vadd.f32 %v20289_v10, %v24146_v40  ;;  %v20126_v46 = vpop.f32.mrb[56].mxu0 }
 0x4e5   : > { %v15829_v55 = vmax.f32 %v15701_v28, 0.0  ;;  %v20290_v7 = vadd.f32 %v20126_v46, %v26125_v49  ;;  %v15152_v42 = vpop.f32.mrb[57].mxu0 }
 0x4e6   : > { %v15828_v53 = vmax.f32 %v15700_v21, 0.0  ;;  %v20291_v48 = vadd.f32 %v15152_v42, %v26126_v2 }
 0x4e7   : > { %15958 = vst.msk [vmem:[%s24160_s30 + $0x1b8] sm:$0xff] %vm15902_vm3, %v15829_v55  ;;  %v15703_v14 = vadd.f32 %v20290_v7, %v24146_v40 }
 0x4e8   : > { %15957 = vst.msk [vmem:[%s24160_s30 + $0x1b0] sm:$0xff] %vm15902_vm3, %v15828_v53  ;;  %v15702_v45 = vadd.f32 %v20291_v48, %v24146_v40  ;;  %v20129_v31 = vpop.f32.mrb[58].mxu0 }
 0x4e9   : > { %v15831_v58 = vmax.f32 %v15703_v14, 0.0  ;;  %v20292_v36 = vadd.f32 %v20129_v31, %v26127_v25  ;;  %v15162_v6 = vpop.f32.mrb[59].mxu0 }
 0x4ea   : > { %v15830_v1 = vmax.f32 %v15702_v45, 0.0  ;;  %v20293_v16 = vadd.f32 %v15162_v6, %v26128_v59 }
 0x4eb   : > { %15960 = vst.msk [vmem:[%s24160_s30 + $0x1c8] sm:$0xff] %vm15902_vm3, %v15831_v58  ;;  %v15705_v5 = vadd.f32 %v20292_v36, %v24146_v40 }
 0x4ec   : > { %15959 = vst.msk [vmem:[%s24160_s30 + $0x1c0] sm:$0xff] %vm15902_vm3, %v15830_v1  ;;  %v15704_v13 = vadd.f32 %v20293_v16, %v24146_v40  ;;  %v20132_v17 = vpop.f32.mrb[60].mxu0 }
 0x4ed   : > { %v15833_v57 = vmax.f32 %v15705_v5, 0.0  ;;  %v20294_v23 = vadd.f32 %v20132_v17, %v26129_v29  ;;  %v15172_v37 = vpop.f32.mrb[61].mxu0 }
 0x4ee   : > { %v15832_v22 = vmax.f32 %v15704_v13, 0.0  ;;  %v20295_v18 = vadd.f32 %v15172_v37, %v26130_v43 }
 0x4ef   : > { %15962 = vst.msk [vmem:[%s24160_s30 + $0x1d8] sm:$0xff] %vm15902_vm3, %v15833_v57  ;;  %v15707_v34 = vadd.f32 %v20294_v23, %v24146_v40 }
 0x4f0   : > { %15961 = vst.msk [vmem:[%s24160_s30 + $0x1d0] sm:$0xff] %vm15902_vm3, %v15832_v22  ;;  %v15706_v3 = vadd.f32 %v20295_v18, %v24146_v40  ;;  %v20135_v15 = vpop.f32.mrb[62].mxu0 }
 0x4f1   : > { %v15835_v38 = vmax.f32 %v15707_v34, 0.0  ;;  %v20296_v0 = vadd.f32 %v20135_v15, %v26131_v39  ;;  %v15182_v50 = vpop.f32.mrb[63].mxu0 }
 0x4f2   : > { %v15834_v19 = vmax.f32 %v15706_v3, 0.0  ;;  %v20297_v32 = vadd.f32 %v15182_v50, %v26132_v8 }
 0x4f3   : > { %15964 = vst.msk [vmem:[%s24160_s30 + $0x1e8] sm:$0xff] %vm15902_vm3, %v15835_v38  ;;  %v15709_v61 = vadd.f32 %v20296_v0, %v24146_v40  ;;  %v19362_v33 = vpop.f32.mrb[64].mxu1 }
 0x4f4   : > { %15963 = vst.msk [vmem:[%s24160_s30 + $0x1e0] sm:$0xff] %vm15902_vm3, %v15834_v19  ;;  %v15708_v24 = vadd.f32 %v20297_v32, %v24146_v40  ;;  %v20138_v41 = vpop.f32.mrb[64].mxu0  ;;  %v9408_v9 = vpop.f32.mrb[65].mxu1 }
 0x4f5   : > { %v15837_v56 = vmax.f32 %v15709_v61, 0.0  ;;  %v20298_v11 = vadd.f32 %v20138_v41, %v19362_v33  ;;  %v15192_v63 = vpop.f32.mrb[65].mxu0 }
 0x4f6   : > { %v15836_v62 = vmax.f32 %v15708_v24, 0.0  ;;  %v20299_v54 = vadd.f32 %v15192_v63, %v9408_v9 }
 0x4f7   : > { %15966 = vst.msk [vmem:[%s24160_s30 + $0x1f8] sm:$0xff] %vm15902_vm3, %v15837_v56  ;;  %v15711_v26 = vadd.f32 %v20298_v11, %v24146_v40  ;;  %v19365_v30 = vpop.f32.mrb[66].mxu1 }
 0x4f8   : > { %15965 = vst.msk [vmem:[%s24160_s30 + $0x1f0] sm:$0xff] %vm15902_vm3, %v15836_v62  ;;  %v15710_v20 = vadd.f32 %v20299_v54, %v24146_v40  ;;  %v20141_v52 = vpop.f32.mrb[66].mxu0  ;;  %v9418_v12 = vpop.f32.mrb[67].mxu1 }
 0x4f9   : > { %v15839_v27 = vmax.f32 %v15711_v26, 0.0  ;;  %v20300_v44 = vadd.f32 %v20141_v52, %v19365_v30  ;;  %v15202_v35 = vpop.f32.mrb[67].mxu0 }
 0x4fa   : > { %v15838_v4 = vmax.f32 %v15710_v20, 0.0  ;;  %v20301_v51 = vadd.f32 %v15202_v35, %v9418_v12 }
 0x4fb   : > { %15968 = vst.msk [vmem:[%s24160_s30 + $0x208] sm:$0xff] %vm15902_vm3, %v15839_v27  ;;  %v15713_v60 = vadd.f32 %v20300_v44, %v24146_v40  ;;  %v19368_v10 = vpop.f32.mrb[68].mxu1 }
 0x4fc   : > { %15967 = vst.msk [vmem:[%s24160_s30 + $0x200] sm:$0xff] %vm15902_vm3, %v15838_v4  ;;  %v15712_v47 = vadd.f32 %v20301_v51, %v24146_v40  ;;  %v20144_v28 = vpop.f32.mrb[68].mxu0  ;;  %v9428_v55 = vpop.f32.mrb[69].mxu1 }
 0x4fd   : > { %v15841_v21 = vmax.f32 %v15713_v60, 0.0  ;;  %v20302_v46 = vadd.f32 %v20144_v28, %v19368_v10  ;;  %v15212_v49 = vpop.f32.mrb[69].mxu0 }
 0x4fe   : > { %v15840_v7 = vmax.f32 %v15712_v47, 0.0  ;;  %v20303_v42 = vadd.f32 %v15212_v49, %v9428_v55 }
 0x4ff   : > { %15970 = vst.msk [vmem:[%s24160_s30 + $0x218] sm:$0xff] %vm15902_vm3, %v15841_v21  ;;  %v15715_v53 = vadd.f32 %v20302_v46, %v24146_v40  ;;  %v19371_v48 = vpop.f32.mrb[70].mxu1 }
 0x500   : > { %15969 = vst.msk [vmem:[%s24160_s30 + $0x210] sm:$0xff] %vm15902_vm3, %v15840_v7  ;;  %v15714_v2 = vadd.f32 %v20303_v42, %v24146_v40  ;;  %v20147_v14 = vpop.f32.mrb[70].mxu0  ;;  %v9438_v58 = vpop.f32.mrb[71].mxu1 }
 0x501   : > { %v15843_v45 = vmax.f32 %v15715_v53, 0.0  ;;  %v20304_v31 = vadd.f32 %v20147_v14, %v19371_v48  ;;  %v15222_v25 = vpop.f32.mrb[71].mxu0 }
 0x502   : > { %v15842_v36 = vmax.f32 %v15714_v2, 0.0  ;;  %v20305_v6 = vadd.f32 %v15222_v25, %v9438_v58  ;;  %v24518_v25 = vld [vmem:[%s24672_s3] ss:$0 sm:$0xff] }
 0x503   : > { %15972 = vst.msk [vmem:[%s24160_s30 + $0x228] sm:$0xff] %vm15902_vm3, %v15843_v45  ;;  %v15717_v1 = vadd.f32 %v20304_v31, %v24146_v40  ;;  %v19374_v16 = vpop.f32.mrb[72].mxu1 }
 0x504   : > { %15971 = vst.msk [vmem:[%s24160_s30 + $0x220] sm:$0xff] %vm15902_vm3, %v15842_v36  ;;  %v15716_v59 = vadd.f32 %v20305_v6, %v24146_v40  ;;  %v20150_v5 = vpop.f32.mrb[72].mxu0  ;;  %v9448_v57 = vpop.f32.mrb[73].mxu1 }
 0x505   : > { %v15845_v13 = vmax.f32 %v15717_v1, 0.0  ;;  %v20306_v17 = vadd.f32 %v20150_v5, %v19374_v16  ;;  %v15232_v29 = vpop.f32.mrb[73].mxu0 }
 0x506   : > { %v15844_v23 = vmax.f32 %v15716_v59, 0.0  ;;  %v20307_v37 = vadd.f32 %v15232_v29, %v9448_v57 }
 0x507   : > { %15974 = vst.msk [vmem:[%s24160_s30 + $0x238] sm:$0xff] %vm15902_vm3, %v15845_v13  ;;  %v15719_v22 = vadd.f32 %v20306_v17, %v24146_v40  ;;  %v19377_v18 = vpop.f32.mrb[74].mxu1 }
 0x508   : > { %15973 = vst.msk [vmem:[%s24160_s30 + $0x230] sm:$0xff] %vm15902_vm3, %v15844_v23  ;;  %v15718_v43 = vadd.f32 %v20307_v37, %v24146_v40  ;;  %v20153_v34 = vpop.f32.mrb[74].mxu0  ;;  %v9458_v38 = vpop.f32.mrb[75].mxu1 }
 0x509   : > { %v15847_v3 = vmax.f32 %v15719_v22, 0.0  ;;  %v20308_v15 = vadd.f32 %v20153_v34, %v19377_v18  ;;  %v15242_v39 = vpop.f32.mrb[75].mxu0 }
 0x50a   : > { %v15846_v0 = vmax.f32 %v15718_v43, 0.0  ;;  %v20309_v50 = vadd.f32 %v15242_v39, %v9458_v38 }
 0x50b   : > { %15976 = vst.msk [vmem:[%s24160_s30 + $0x248] sm:$0xff] %vm15902_vm3, %v15847_v3  ;;  %v15721_v19 = vadd.f32 %v20308_v15, %v24146_v40  ;;  %v19380_v32 = vpop.f32.mrb[76].mxu1 }
 0x50c   : > { %15975 = vst.msk [vmem:[%s24160_s30 + $0x240] sm:$0xff] %vm15902_vm3, %v15846_v0  ;;  %v15720_v8 = vadd.f32 %v20309_v50, %v24146_v40  ;;  %v20156_v61 = vpop.f32.mrb[76].mxu0  ;;  %v9468_v41 = vpop.f32.mrb[77].mxu1 }
 0x50d   : > { %v15849_v24 = vmax.f32 %v15721_v19, 0.0  ;;  %v20310_v33 = vadd.f32 %v20156_v61, %v19380_v32  ;;  %v15252_v56 = vpop.f32.mrb[77].mxu0 }
 0x50e   : > { %v15848_v11 = vmax.f32 %v15720_v8, 0.0  ;;  %v20311_v9 = vadd.f32 %v15252_v56, %v9468_v41 }
 0x50f   : > { %15978 = vst.msk [vmem:[%s24160_s30 + $0x258] sm:$0xff] %vm15902_vm3, %v15849_v24  ;;  %v15723_v63 = vadd.f32 %v20310_v33, %v24146_v40  ;;  %v19383_v54 = vpop.f32.mrb[78].mxu1 }
 0x510   : > { %15977 = vst.msk [vmem:[%s24160_s30 + $0x250] sm:$0xff] %vm15902_vm3, %v15848_v11  ;;  %v15722_v62 = vadd.f32 %v20311_v9, %v24146_v40  ;;  %v20159_v26 = vpop.f32.mrb[78].mxu0  ;;  %v9478_v52 = vpop.f32.mrb[79].mxu1 }
 0x511   : > { %v15851_v20 = vmax.f32 %v15723_v63, 0.0  ;;  %v20312_v30 = vadd.f32 %v20159_v26, %v19383_v54  ;;  %v15262_v27 = vpop.f32.mrb[79].mxu0 }
 0x512   : > { %v15850_v44 = vmax.f32 %v15722_v62, 0.0  ;;  %v20313_v12 = vadd.f32 %v15262_v27, %v9478_v52 }
 0x513   : > { %15980 = vst.msk [vmem:[%s24160_s30 + $0x268] sm:$0xff] %vm15902_vm3, %v15851_v20  ;;  %v15725_v35 = vadd.f32 %v20312_v30, %v24146_v40  ;;  %v19386_v51 = vpop.f32.mrb[80].mxu1 }
 0x514   : > { %15979 = vst.msk [vmem:[%s24160_s30 + $0x260] sm:$0xff] %vm15902_vm3, %v15850_v44  ;;  %v15724_v4 = vadd.f32 %v20313_v12, %v24146_v40  ;;  %v20162_v60 = vpop.f32.mrb[80].mxu0  ;;  %v9488_v28 = vpop.f32.mrb[81].mxu1 }
 0x515   : > { %v15853_v47 = vmax.f32 %v15725_v35, 0.0  ;;  %v20314_v10 = vadd.f32 %v20162_v60, %v19386_v51  ;;  %v15272_v21 = vpop.f32.mrb[81].mxu0 }
 0x516   : > { %v15852_v46 = vmax.f32 %v15724_v4, 0.0  ;;  %v20315_v55 = vadd.f32 %v15272_v21, %v9488_v28 }
 0x517   : > { %15982 = vst.msk [vmem:[%s24160_s30 + $0x278] sm:$0xff] %vm15902_vm3, %v15853_v47  ;;  %v15727_v49 = vadd.f32 %v20314_v10, %v24146_v40  ;;  %v19389_v42 = vpop.f32.mrb[82].mxu1 }
 0x518   : > { %15981 = vst.msk [vmem:[%s24160_s30 + $0x270] sm:$0xff] %vm15902_vm3, %v15852_v46  ;;  %v15726_v7 = vadd.f32 %v20315_v55, %v24146_v40  ;;  %v20165_v53 = vpop.f32.mrb[82].mxu0  ;;  %v9498_v14 = vpop.f32.mrb[83].mxu1 }
 0x519   : > { %v15855_v2 = vmax.f32 %v15727_v49, 0.0  ;;  %v20316_v48 = vadd.f32 %v20165_v53, %v19389_v42  ;;  %v15282_v45 = vpop.f32.mrb[83].mxu0 }
 0x51a   : > { %v15854_v31 = vmax.f32 %v15726_v7, 0.0  ;;  %v20317_v58 = vadd.f32 %v15282_v45, %v9498_v14 }
 0x51b   : > { %15984 = vst.msk [vmem:[%s24160_s30 + $0x288] sm:$0xff] %vm15902_vm3, %v15855_v2  ;;  %v15729_v36 = vadd.f32 %v24518_v25, %v20316_v48  ;;  %v19392_v6 = vpop.f32.mrb[84].mxu1 }
 0x51c   : > { %15983 = vst.msk [vmem:[%s24160_s30 + $0x280] sm:$0xff] %vm15902_vm3, %v15854_v31  ;;  %v15728_v40 = vadd.f32 %v24518_v25, %v20317_v58  ;;  %v20168_v1 = vpop.f32.mrb[84].mxu0  ;;  %v9508_v5 = vpop.f32.mrb[85].mxu1 }
 0x51d   : > { %v15857_v59 = vmax.f32 %v15729_v36, 0.0  ;;  %v20318_v16 = vadd.f32 %v20168_v1, %v19392_v6  ;;  %v15292_v13 = vpop.f32.mrb[85].mxu0 }
 0x51e   : > { %v15856_v17 = vmax.f32 %v15728_v40, 0.0  ;;  %v20319_v57 = vadd.f32 %v15292_v13, %v9508_v5 }
 0x51f   : > { %15986 = vst.msk [vmem:[%s24160_s30 + $0x298] sm:$0xff] %vm15902_vm3, %v15857_v59  ;;  %v15731_v29 = vadd.f32 %v24518_v25, %v20318_v16  ;;  %v19395_v37 = vpop.f32.mrb[86].mxu1 }
 0x520   : > { %15985 = vst.msk [vmem:[%s24160_s30 + $0x290] sm:$0xff] %vm15902_vm3, %v15856_v17  ;;  %v15730_v23 = vadd.f32 %v24518_v25, %v20319_v57  ;;  %v20171_v22 = vpop.f32.mrb[86].mxu0  ;;  %v9518_v34 = vpop.f32.mrb[87].mxu1 }
 0x521   : > { %v15859_v43 = vmax.f32 %v15731_v29, 0.0  ;;  %v20320_v18 = vadd.f32 %v20171_v22, %v19395_v37  ;;  %v15302_v3 = vpop.f32.mrb[87].mxu0 }
 0x522   : > { %v15858_v15 = vmax.f32 %v15730_v23, 0.0  ;;  %v20321_v38 = vadd.f32 %v15302_v3, %v9518_v34 }
 0x523   : > { %15988 = vst.msk [vmem:[%s24160_s30 + $0x2a8] sm:$0xff] %vm15902_vm3, %v15859_v43  ;;  %v15733_v39 = vadd.f32 %v24518_v25, %v20320_v18  ;;  %v19398_v50 = vpop.f32.mrb[88].mxu1 }
 0x524   : > { %15987 = vst.msk [vmem:[%s24160_s30 + $0x2a0] sm:$0xff] %vm15902_vm3, %v15858_v15  ;;  %v15732_v0 = vadd.f32 %v24518_v25, %v20321_v38  ;;  %v20174_v19 = vpop.f32.mrb[88].mxu0  ;;  %v9528_v61 = vpop.f32.mrb[89].mxu1 }
 0x525   : > { %v15861_v8 = vmax.f32 %v15733_v39, 0.0  ;;  %v20322_v32 = vadd.f32 %v20174_v19, %v19398_v50  ;;  %v15312_v24 = vpop.f32.mrb[89].mxu0 }
 0x526   : > { %v15860_v33 = vmax.f32 %v15732_v0, 0.0  ;;  %v20323_v41 = vadd.f32 %v15312_v24, %v9528_v61 }
 0x527   : > { %15990 = vst.msk [vmem:[%s24160_s30 + $0x2b8] sm:$0xff] %vm15902_vm3, %v15861_v8  ;;  %v15735_v56 = vadd.f32 %v24518_v25, %v20322_v32  ;;  %v19401_v9 = vpop.f32.mrb[90].mxu1 }
 0x528   : > { %15989 = vst.msk [vmem:[%s24160_s30 + $0x2b0] sm:$0xff] %vm15902_vm3, %v15860_v33  ;;  %v15734_v11 = vadd.f32 %v24518_v25, %v20323_v41  ;;  %v20177_v63 = vpop.f32.mrb[90].mxu0  ;;  %v9538_v26 = vpop.f32.mrb[91].mxu1 }
 0x529   : > { %v15863_v62 = vmax.f32 %v15735_v56, 0.0  ;;  %v20324_v54 = vadd.f32 %v20177_v63, %v19401_v9  ;;  %v15322_v20 = vpop.f32.mrb[91].mxu0 }
 0x52a   : > { %v15862_v30 = vmax.f32 %v15734_v11, 0.0  ;;  %v20325_v52 = vadd.f32 %v15322_v20, %v9538_v26 }
 0x52b   : > { %15992 = vst.msk [vmem:[%s24160_s30 + $0x2c8] sm:$0xff] %vm15902_vm3, %v15863_v62  ;;  %v15737_v27 = vadd.f32 %v24518_v25, %v20324_v54  ;;  %v19404_v12 = vpop.f32.mrb[92].mxu1 }
 0x52c   : > { %15991 = vst.msk [vmem:[%s24160_s30 + $0x2c0] sm:$0xff] %vm15902_vm3, %v15862_v30  ;;  %v15736_v44 = vadd.f32 %v24518_v25, %v20325_v52  ;;  %v20180_v35 = vpop.f32.mrb[92].mxu0  ;;  %v9548_v60 = vpop.f32.mrb[93].mxu1 }
 0x52d   : > { %v15865_v4 = vmax.f32 %v15737_v27, 0.0  ;;  %v20326_v51 = vadd.f32 %v20180_v35, %v19404_v12  ;;  %v15332_v47 = vpop.f32.mrb[93].mxu0 }
 0x52e   : > { %v15864_v10 = vmax.f32 %v15736_v44, 0.0  ;;  %v20327_v28 = vadd.f32 %v15332_v47, %v9548_v60 }
 0x52f   : > { %15994 = vst.msk [vmem:[%s24160_s30 + $0x2d8] sm:$0xff] %vm15902_vm3, %v15865_v4  ;;  %v15739_v21 = vadd.f32 %v24518_v25, %v20326_v51  ;;  %v19407_v55 = vpop.f32.mrb[94].mxu1 }
 0x530   : > { %15993 = vst.msk [vmem:[%s24160_s30 + $0x2d0] sm:$0xff] %vm15902_vm3, %v15864_v10  ;;  %v15738_v46 = vadd.f32 %v24518_v25, %v20327_v28  ;;  %v20183_v49 = vpop.f32.mrb[94].mxu0  ;;  %v9558_v53 = vpop.f32.mrb[95].mxu1 }
 0x531   : > { %v15867_v7 = vmax.f32 %v15739_v21, 0.0  ;;  %v20328_v42 = vadd.f32 %v20183_v49, %v19407_v55  ;;  %v15342_v2 = vpop.f32.mrb[95].mxu0 }
 0x532   : > { %v15866_v48 = vmax.f32 %v15738_v46, 0.0  ;;  %v20329_v14 = vadd.f32 %v15342_v2, %v9558_v53 }
 0x533   : > { %15996 = vst.msk [vmem:[%s24160_s30 + $0x2e8] sm:$0xff] %vm15902_vm3, %v15867_v7  ;;  %v15741_v45 = vadd.f32 %v24518_v25, %v20328_v42  ;;  %v19410_v58 = vpop.f32.mrb[96].mxu1 }
 0x534   : > { %15995 = vst.msk [vmem:[%s24160_s30 + $0x2e0] sm:$0xff] %vm15902_vm3, %v15866_v48  ;;  %v15740_v31 = vadd.f32 %v24518_v25, %v20329_v14  ;;  %v20186_v36 = vpop.f32.mrb[96].mxu0  ;;  %v9568_v1 = vpop.f32.mrb[97].mxu1 }
 0x535   : > { %v15869_v40 = vmax.f32 %v15741_v45, 0.0  ;;  %v20330_v6 = vadd.f32 %v20186_v36, %v19410_v58  ;;  %v15352_v59 = vpop.f32.mrb[97].mxu0 }
 0x536   : > { %v15868_v16 = vmax.f32 %v15740_v31, 0.0  ;;  %v20331_v5 = vadd.f32 %v15352_v59, %v9568_v1 }
 0x537   : > { %15998 = vst.msk [vmem:[%s24160_s30 + $0x2f8] sm:$0xff] %vm15902_vm3, %v15869_v40  ;;  %v15743_v13 = vadd.f32 %v24518_v25, %v20330_v6  ;;  %v19413_v57 = vpop.f32.mrb[98].mxu1 }
 0x538   : > { %15997 = vst.msk [vmem:[%s24160_s30 + $0x2f0] sm:$0xff] %vm15902_vm3, %v15868_v16  ;;  %v15742_v17 = vadd.f32 %v24518_v25, %v20331_v5  ;;  %v20189_v29 = vpop.f32.mrb[98].mxu0  ;;  %v9578_v22 = vpop.f32.mrb[99].mxu1 }
 0x539   : > { %v15871_v23 = vmax.f32 %v15743_v13, 0.0  ;;  %v20332_v37 = vadd.f32 %v20189_v29, %v19413_v57  ;;  %v15362_v43 = vpop.f32.mrb[99].mxu0 }
 0x53a   : > { %v15870_v18 = vmax.f32 %v15742_v17, 0.0  ;;  %v20333_v34 = vadd.f32 %v15362_v43, %v9578_v22 }
 0x53b   : > { %16000 = vst.msk [vmem:[%s24160_s30 + $0x308] sm:$0xff] %vm15902_vm3, %v15871_v23  ;;  %v15745_v3 = vadd.f32 %v24518_v25, %v20332_v37  ;;  %v19416_v38 = vpop.f32.mrb[100].mxu1 }
 0x53c   : > { %15999 = vst.msk [vmem:[%s24160_s30 + $0x300] sm:$0xff] %vm15902_vm3, %v15870_v18  ;;  %v15744_v15 = vadd.f32 %v24518_v25, %v20333_v34  ;;  %v20192_v39 = vpop.f32.mrb[100].mxu0  ;;  %v9588_v19 = vpop.f32.mrb[101].mxu1 }
 0x53d   : > { %v15873_v0 = vmax.f32 %v15745_v3, 0.0  ;;  %v20334_v50 = vadd.f32 %v20192_v39, %v19416_v38  ;;  %v15372_v8 = vpop.f32.mrb[101].mxu0 }
 0x53e   : > { %v15872_v32 = vmax.f32 %v15744_v15, 0.0  ;;  %v20335_v61 = vadd.f32 %v15372_v8, %v9588_v19 }
 0x53f   : > { %16002 = vst.msk [vmem:[%s24160_s30 + $0x318] sm:$0xff] %vm15902_vm3, %v15873_v0  ;;  %v15747_v24 = vadd.f32 %v24518_v25, %v20334_v50  ;;  %v19419_v41 = vpop.f32.mrb[102].mxu1 }
 0x540   : > { %16001 = vst.msk [vmem:[%s24160_s30 + $0x310] sm:$0xff] %vm15902_vm3, %v15872_v32  ;;  %v15746_v33 = vadd.f32 %v24518_v25, %v20335_v61  ;;  %v20195_v56 = vpop.f32.mrb[102].mxu0  ;;  %v9598_v63 = vpop.f32.mrb[103].mxu1 }
 0x541   : > { %v15875_v11 = vmax.f32 %v15747_v24, 0.0  ;;  %v20336_v9 = vadd.f32 %v20195_v56, %v19419_v41  ;;  %v15382_v62 = vpop.f32.mrb[103].mxu0 }
 0x542   : > { %v15874_v54 = vmax.f32 %v15746_v33, 0.0  ;;  %v20337_v26 = vadd.f32 %v15382_v62, %v9598_v63 }
 0x543   : > { %16004 = vst.msk [vmem:[%s24160_s30 + $0x328] sm:$0xff] %vm15902_vm3, %v15875_v11  ;;  %v15749_v20 = vadd.f32 %v24518_v25, %v20336_v9  ;;  %v19422_v52 = vpop.f32.mrb[104].mxu1 }
 0x544   : > { %16003 = vst.msk [vmem:[%s24160_s30 + $0x320] sm:$0xff] %vm15902_vm3, %v15874_v54  ;;  %v15748_v30 = vadd.f32 %v24518_v25, %v20337_v26  ;;  %v20198_v27 = vpop.f32.mrb[104].mxu0  ;;  %v9608_v35 = vpop.f32.mrb[105].mxu1 }
 0x545   : > { %v15877_v44 = vmax.f32 %v15749_v20, 0.0  ;;  %v20338_v12 = vadd.f32 %v20198_v27, %v19422_v52  ;;  %v15392_v4 = vpop.f32.mrb[105].mxu0 }
 0x546   : > { %v15876_v51 = vmax.f32 %v15748_v30, 0.0  ;;  %v20339_v60 = vadd.f32 %v15392_v4, %v9608_v35 }
 0x547   : > { %16006 = vst.msk [vmem:[%s24160_s30 + $0x338] sm:$0xff] %vm15902_vm3, %v15877_v44  ;;  %v15751_v47 = vadd.f32 %v24518_v25, %v20338_v12  ;;  %v19425_v28 = vpop.f32.mrb[106].mxu1 }
 0x548   : > { %16005 = vst.msk [vmem:[%s24160_s30 + $0x330] sm:$0xff] %vm15902_vm3, %v15876_v51  ;;  %v15750_v10 = vadd.f32 %v24518_v25, %v20339_v60  ;;  %v20201_v21 = vpop.f32.mrb[106].mxu0  ;;  %v9618_v49 = vpop.f32.mrb[107].mxu1 }
 0x549   : > { %v15879_v46 = vmax.f32 %v15751_v47, 0.0  ;;  %v20340_v55 = vadd.f32 %v20201_v21, %v19425_v28  ;;  %v15402_v7 = vpop.f32.mrb[107].mxu0 }
 0x54a   : > { %v15878_v42 = vmax.f32 %v15750_v10, 0.0  ;;  %v20341_v53 = vadd.f32 %v15402_v7, %v9618_v49 }
 0x54b   : > { %16008 = vst.msk [vmem:[%s24160_s30 + $0x348] sm:$0xff] %vm15902_vm3, %v15879_v46  ;;  %v15753_v2 = vadd.f32 %v24518_v25, %v20340_v55  ;;  %v19428_v14 = vpop.f32.mrb[108].mxu1 }
 0x54c   : > { %16007 = vst.msk [vmem:[%s24160_s30 + $0x340] sm:$0xff] %vm15902_vm3, %v15878_v42  ;;  %v15752_v48 = vadd.f32 %v24518_v25, %v20341_v53  ;;  %v20204_v45 = vpop.f32.mrb[108].mxu0  ;;  %v9628_v36 = vpop.f32.mrb[109].mxu1 }
 0x54d   : > { %v15881_v31 = vmax.f32 %v15753_v2, 0.0  ;;  %v20342_v58 = vadd.f32 %v20204_v45, %v19428_v14  ;;  %v15412_v40 = vpop.f32.mrb[109].mxu0 }
 0x54e   : > { %v15880_v6 = vmax.f32 %v15752_v48, 0.0  ;;  %v20343_v1 = vadd.f32 %v15412_v40, %v9628_v36 }
 0x54f   : > { %16010 = vst.msk [vmem:[%s24160_s30 + $0x358] sm:$0xff] %vm15902_vm3, %v15881_v31  ;;  %v15755_v59 = vadd.f32 %v24518_v25, %v20342_v58  ;;  %v19431_v5 = vpop.f32.mrb[110].mxu1 }
 0x550   : > { %16009 = vst.msk [vmem:[%s24160_s30 + $0x350] sm:$0xff] %vm15902_vm3, %v15880_v6  ;;  %v15754_v16 = vadd.f32 %v24518_v25, %v20343_v1  ;;  %v20207_v13 = vpop.f32.mrb[110].mxu0  ;;  %v9638_v29 = vpop.f32.mrb[111].mxu1 }
 0x551   : > { %v15883_v17 = vmax.f32 %v15755_v59, 0.0  ;;  %v20344_v57 = vadd.f32 %v20207_v13, %v19431_v5  ;;  %v15422_v23 = vpop.f32.mrb[111].mxu0 }
 0x552   : > { %v15882_v37 = vmax.f32 %v15754_v16, 0.0  ;;  %v20345_v22 = vadd.f32 %v15422_v23, %v9638_v29 }
 0x553   : > { %16012 = vst.msk [vmem:[%s24160_s30 + $0x368] sm:$0xff] %vm15902_vm3, %v15883_v17  ;;  %v15757_v43 = vadd.f32 %v24518_v25, %v20344_v57  ;;  %v19434_v34 = vpop.f32.mrb[112].mxu1 }
 0x554   : > { %16011 = vst.msk [vmem:[%s24160_s30 + $0x360] sm:$0xff] %vm15902_vm3, %v15882_v37  ;;  %v15756_v18 = vadd.f32 %v24518_v25, %v20345_v22  ;;  %v20210_v3 = vpop.f32.mrb[112].mxu0  ;;  %v9648_v39 = vpop.f32.mrb[113].mxu1 }
 0x555   : > { %v15885_v15 = vmax.f32 %v15757_v43, 0.0  ;;  %v20346_v38 = vadd.f32 %v20210_v3, %v19434_v34  ;;  %v15432_v0 = vpop.f32.mrb[113].mxu0 }
 0x556   : > { %v15884_v50 = vmax.f32 %v15756_v18, 0.0  ;;  %v20347_v19 = vadd.f32 %v15432_v0, %v9648_v39 }
 0x557   : > { %16014 = vst.msk [vmem:[%s24160_s30 + $0x378] sm:$0xff] %vm15902_vm3, %v15885_v15  ;;  %v15759_v8 = vadd.f32 %v24518_v25, %v20346_v38  ;;  %v19437_v61 = vpop.f32.mrb[114].mxu1 }
 0x558   : > { %16013 = vst.msk [vmem:[%s24160_s30 + $0x370] sm:$0xff] %vm15902_vm3, %v15884_v50  ;;  %v15758_v32 = vadd.f32 %v24518_v25, %v20347_v19  ;;  %v20213_v24 = vpop.f32.mrb[114].mxu0  ;;  %v9658_v56 = vpop.f32.mrb[115].mxu1 }
 0x559   : > { %v15887_v33 = vmax.f32 %v15759_v8, 0.0  ;;  %v20348_v41 = vadd.f32 %v20213_v24, %v19437_v61  ;;  %v15442_v11 = vpop.f32.mrb[115].mxu0 }
 0x55a   : > { %v15886_v9 = vmax.f32 %v15758_v32, 0.0  ;;  %v20349_v63 = vadd.f32 %v15442_v11, %v9658_v56 }
 0x55b   : > { %16016 = vst.msk [vmem:[%s24160_s30 + $0x388] sm:$0xff] %vm15902_vm3, %v15887_v33  ;;  %v15761_v62 = vadd.f32 %v24518_v25, %v20348_v41  ;;  %v19440_v26 = vpop.f32.mrb[116].mxu1 }
 0x55c   : > { %16015 = vst.msk [vmem:[%s24160_s30 + $0x380] sm:$0xff] %vm15902_vm3, %v15886_v9  ;;  %v15760_v54 = vadd.f32 %v24518_v25, %v20349_v63  ;;  %v20216_v20 = vpop.f32.mrb[116].mxu0  ;;  %v9668_v27 = vpop.f32.mrb[117].mxu1 }
 0x55d   : > { %v15889_v30 = vmax.f32 %v15761_v62, 0.0  ;;  %v20350_v52 = vadd.f32 %v20216_v20, %v19440_v26  ;;  %v15452_v44 = vpop.f32.mrb[117].mxu0 }
 0x55e   : > { %v15888_v12 = vmax.f32 %v15760_v54, 0.0  ;;  %v20351_v35 = vadd.f32 %v15452_v44, %v9668_v27 }
 0x55f   : > { %16018 = vst.msk [vmem:[%s24160_s30 + $0x398] sm:$0xff] %vm15902_vm3, %v15889_v30  ;;  %v15763_v4 = vadd.f32 %v24518_v25, %v20350_v52  ;;  %v19443_v60 = vpop.f32.mrb[118].mxu1 }
 0x560   : > { %16017 = vst.msk [vmem:[%s24160_s30 + $0x390] sm:$0xff] %vm15902_vm3, %v15888_v12  ;;  %v15762_v51 = vadd.f32 %v24518_v25, %v20351_v35  ;;  %v20219_v47 = vpop.f32.mrb[118].mxu0  ;;  %v9678_v21 = vpop.f32.mrb[119].mxu1 }
 0x561   : > { %v15891_v10 = vmax.f32 %v15763_v4, 0.0  ;;  %v20352_v28 = vadd.f32 %v20219_v47, %v19443_v60  ;;  %v15462_v46 = vpop.f32.mrb[119].mxu0 }
 0x562   : > { %v15890_v55 = vmax.f32 %v15762_v51, 0.0  ;;  %v20353_v49 = vadd.f32 %v15462_v46, %v9678_v21 }
 0x563   : > { %16020 = vst.msk [vmem:[%s24160_s30 + $0x3a8] sm:$0xff] %vm15902_vm3, %v15891_v10  ;;  %v15765_v7 = vadd.f32 %v24518_v25, %v20352_v28  ;;  %v19446_v53 = vpop.f32.mrb[120].mxu1 }
 0x564   : > { %16019 = vst.msk [vmem:[%s24160_s30 + $0x3a0] sm:$0xff] %vm15902_vm3, %v15890_v55  ;;  %v15764_v42 = vadd.f32 %v24518_v25, %v20353_v49  ;;  %v20222_v2 = vpop.f32.mrb[120].mxu0  ;;  %v9688_v45 = vpop.f32.mrb[121].mxu1 }
 0x565   : > { %v15893_v48 = vmax.f32 %v15765_v7, 0.0  ;;  %v20354_v14 = vadd.f32 %v20222_v2, %v19446_v53  ;;  %v15472_v31 = vpop.f32.mrb[121].mxu0 }
 0x566   : > { %v15892_v58 = vmax.f32 %v15764_v42, 0.0  ;;  %v20355_v36 = vadd.f32 %v15472_v31, %v9688_v45 }
 0x567   : > { %16022 = vst.msk [vmem:[%s24160_s30 + $0x3b8] sm:$0xff] %vm15902_vm3, %v15893_v48  ;;  %v15767_v40 = vadd.f32 %v24518_v25, %v20354_v14  ;;  %v19449_v1 = vpop.f32.mrb[122].mxu1 }
 0x568   : > { %16021 = vst.msk [vmem:[%s24160_s30 + $0x3b0] sm:$0xff] %vm15902_vm3, %v15892_v58  ;;  %v15766_v6 = vadd.f32 %v24518_v25, %v20355_v36  ;;  %v20225_v59 = vpop.f32.mrb[122].mxu0  ;;  %v9698_v13 = vpop.f32.mrb[123].mxu1 }
 0x569   : > { %v15895_v16 = vmax.f32 %v15767_v40, 0.0  ;;  %v20356_v5 = vadd.f32 %v20225_v59, %v19449_v1  ;;  %v15482_v17 = vpop.f32.mrb[123].mxu0 }
 0x56a   : > { %v15894_v57 = vmax.f32 %v15766_v6, 0.0  ;;  %v20357_v29 = vadd.f32 %v15482_v17, %v9698_v13 }
 0x56b   : > { %16024 = vst.msk [vmem:[%s24160_s30 + $0x3c8] sm:$0xff] %vm15902_vm3, %v15895_v16  ;;  %v15769_v23 = vadd.f32 %v24518_v25, %v20356_v5  ;;  %v19452_v22 = vpop.f32.mrb[124].mxu1 }
 0x56c   : > { %16023 = vst.msk [vmem:[%s24160_s30 + $0x3c0] sm:$0xff] %vm15902_vm3, %v15894_v57  ;;  %v15768_v37 = vadd.f32 %v24518_v25, %v20357_v29  ;;  %v20228_v43 = vpop.f32.mrb[124].mxu0  ;;  %v9708_v3 = vpop.f32.mrb[125].mxu1 }
 0x56d   : > { %v15897_v18 = vmax.f32 %v15769_v23, 0.0  ;;  %v20358_v34 = vadd.f32 %v20228_v43, %v19452_v22  ;;  %v15492_v15 = vpop.f32.mrb[125].mxu0 }
 0x56e   : > { %v15896_v38 = vmax.f32 %v15768_v37, 0.0  ;;  %v20359_v39 = vadd.f32 %v15492_v15, %v9708_v3 }
 0x56f   : > { %16026 = vst.msk [vmem:[%s24160_s30 + $0x3d8] sm:$0xff] %vm15902_vm3, %v15897_v18  ;;  %v15771_v0 = vadd.f32 %v24518_v25, %v20358_v34  ;;  %v19455_v19 = vpop.f32.mrb[126].mxu1 }
 0x570   : > { %16025 = vst.msk [vmem:[%s24160_s30 + $0x3d0] sm:$0xff] %vm15902_vm3, %v15896_v38  ;;  %v15770_v50 = vadd.f32 %v24518_v25, %v20359_v39  ;;  %v20231_v8 = vpop.f32.mrb[126].mxu0  ;;  %v9718_v24 = vpop.f32.mrb[127].mxu1 }
 0x571   : > { %v15899_v32 = vmax.f32 %v15771_v0, 0.0  ;;  %v20360_v61 = vadd.f32 %v20231_v8, %v19455_v19  ;;  %v15502_v33 = vpop.f32.mrb[127].mxu0 }
 0x572   : > { %v15898_v41 = vmax.f32 %v15770_v50, 0.0  ;;  %v20361_v56 = vadd.f32 %v15502_v33, %v9718_v24 }
 0x573   : > { %16028 = vst.msk [vmem:[%s24160_s30 + $0x3e8] sm:$0xff] %vm15902_vm3, %v15899_v32  ;;  %v15773_v11 = vadd.f32 %v24518_v25, %v20360_v61 }
 0x574   : > { %16027 = vst.msk [vmem:[%s24160_s30 + $0x3e0] sm:$0xff] %vm15902_vm3, %v15898_v41  ;;  %v15772_v9 = vadd.f32 %v24518_v25, %v20361_v56 }
 0x575   : > { %v15901_v63 = vmax.f32 %v15773_v11, 0.0 }
 0x576   : > { %v15900_v62 = vmax.f32 %v15772_v9, 0.0 }
 0x577   : > { %16030 = vst.msk [vmem:[%s24160_s30 + $0x3f8] sm:$0xff] %vm15902_vm3, %v15901_v63 }
 0x578   : > { %16029 = vst.msk [vmem:[%s24160_s30 + $0x3f0] sm:$0xff] %vm15902_vm3, %v15900_v62 }
 0x579 PF: > { %s14_s17 = sadd.s32 1, %s21306_s17   ;;  %s26133_s15 = smov %s21302_s16 }
 0x57a   : > { %p11_p5 = scmp.ge.s32.totalorder %s14_s17, 4   ;;  %s26134_s16 = smov %s26136_s18 }
 0x57c   :  { %13 = sbr.rel (!%p11_p5) target bundleno = 2 (0x2), region = 77 }

</bundles_post_ra>
